<compile_context>
chip_gen: v5e
topology: v5e:2x2
jax: 0.10.0
libtpu: 0.0.40
codegen_flags: <defaults>
</compile_context>

<pallas_src>
import math

import jax
import jax.numpy as jnp
from jax.experimental import pallas as pl
from jax.experimental.pallas import tpu as pltpu

# ---------------------------------------------------------------------------
# Model hyper-parameters (synthetic, deterministic init — no checkpoint load).
# ---------------------------------------------------------------------------
N_POINTS = 32        # number of sketch points fed to the renderer MLP
IN_DIM = 2           # (x, y) point coordinates
PE_FREQS = 6         # positional-encoding frequency bands
PE_DIM = IN_DIM + 2 * IN_DIM * PE_FREQS   # 2 + 24 = 26
PE_PAD = 32          # padded encoded width (multiple of 8 sublanes)
HIDDEN = 128         # MLP hidden width (lane-friendly)
OUT_DIM = 2          # predicted control-point (dx, dy)
TILE_M = 256         # rows per grid step (fills MXU rows on v6e/v7x)
WEIGHT_DTYPE = jnp.bfloat16

# TODO(synk): checkpoint loading/saving, logging and CUDA/CPU device fallback
# from the original module are host-side I/O with no Pallas equivalent.


# ---------------------------------------------------------------------------
# Fused kernel: positional encoding + 3x(Linear+ReLU) + Linear+tanh head.
# ---------------------------------------------------------------------------
def painter_mlp_kernel(x_ref, w1_ref, wh_ref, b_ref, wo_ref, out_ref):
    x = x_ref[...]                                   # [TM, 2] f32
    tm = x.shape[0]

    # ---- NeRF positional encoding built lane-wise (no concat) --------------
    # Column layout (matches the torch reference concat order):
    #   0,1          -> x, y
    #   2+4b..3+4b   -> sin(2^b * pi * [x, y])
    #   4+4b..5+4b   -> cos(2^b * pi * [x, y])
    #   26..31       -> zero padding
    col = jax.lax.broadcasted_iota(jnp.int32, (tm, PE_PAD), 1)
    v = jnp.where((col & 1) == 0, x[:, 0:1], x[:, 1:2])      # pick x or y
    band = jnp.right_shift(jnp.maximum(col - 2, 0), 2)       # frequency band
    freq = jnp.float32(math.pi) * jnp.left_shift(1, band).astype(jnp.float32)
    arg = freq * v
    phase = (col - 2) & 3                                    # 0,1: sin  2,3: cos
    pe = jnp.where(col < 2, v,
                   jnp.where(phase < 2, jnp.sin(arg), jnp.cos(arg)))
    pe = jnp.where(col < PE_DIM, pe, 0.0).astype(w1_ref.dtype)   # [TM, 32] bf16

    # ---- MLP: bf16 matmuls, f32 accumulation --------------------------------
    h = jnp.dot(pe, w1_ref[...], preferred_element_type=jnp.float32) + b_ref[0:1, :]
    h = jnp.maximum(h, 0.0).astype(w1_ref.dtype)
    h = jnp.dot(h, wh_ref[0], preferred_element_type=jnp.float32) + b_ref[1:2, :]
    h = jnp.maximum(h, 0.0).astype(w1_ref.dtype)
    h = jnp.dot(h, wh_ref[1], preferred_element_type=jnp.float32) + b_ref[2:3, :]
    h = jnp.maximum(h, 0.0).astype(w1_ref.dtype)
    o = jnp.dot(h, wo_ref[...], preferred_element_type=jnp.float32) + b_ref[3:4, :]
    out_ref[...] = jnp.tanh(o)                               # [TM, 128] f32, lane-dense


def sketch_model_forward(x, params):
    """Forward pass of SketchModel: renderer(x) == PainterNerf MLP(PE(x))."""
    n = x.shape[0]
    m_pad = pl.cdiv(max(n, 1), TILE_M) * TILE_M
    x_pad = jnp.zeros((m_pad, IN_DIM), jnp.float32).at[:n, :].set(
        x.astype(jnp.float32))
    grid_m = m_pad // TILE_M

    flops = 2 * m_pad * (PE_PAD * HIDDEN + 3 * HIDDEN * HIDDEN)
    transcendentals = m_pad * (2 * PE_PAD + HIDDEN)          # sin/cos + tanh
    bytes_accessed = (
        x_pad.size * 4
        + params["w1"].size * 2 + params["wh"].size * 2 + params["wo"].size * 2
        + params["b"].size * 4
        + m_pad * HIDDEN * 4)

    out = pl.pallas_call(
        painter_mlp_kernel,
        out_shape=jax.ShapeDtypeStruct((m_pad, HIDDEN), jnp.float32),
        grid_spec=pltpu.PrefetchScalarGridSpec(
            num_scalar_prefetch=0,
            grid=(grid_m,),
            in_specs=[
                pl.BlockSpec((TILE_M, IN_DIM), lambda i: (i, 0)),          # x rows
                pl.BlockSpec((PE_PAD, HIDDEN), lambda i: (0, 0)),          # w1 (resident)
                pl.BlockSpec((2, HIDDEN, HIDDEN), lambda i: (0, 0, 0)),    # w2,w3 stacked
                pl.BlockSpec((4, HIDDEN), lambda i: (0, 0)),               # biases stacked
                pl.BlockSpec((HIDDEN, HIDDEN), lambda i: (0, 0)),          # wo (padded)
            ],
            out_specs=pl.BlockSpec((TILE_M, HIDDEN), lambda i: (i, 0)),
        ),
        compiler_params=pltpu.CompilerParams(
            dimension_semantics=("parallel",)),
        cost_estimate=pl.CostEstimate(
            flops=flops,
            transcendentals=transcendentals,
            bytes_accessed=bytes_accessed),
    )(x_pad, params["w1"], params["wh"], params["b"], params["wo"])

    return out[:n, :OUT_DIM]


# ---------------------------------------------------------------------------
# Parameter init (synthetic, deterministic) and pure-JAX reference.
# ---------------------------------------------------------------------------
def init_params(key):
    ks = jax.random.split(key, 4)

    def lin(kw, fan_in, fan_out):
        scale = 1.0 / jnp.sqrt(jnp.float32(fan_in))
        return jax.random.normal(kw, (fan_in, fan_out), jnp.float32) * scale

    w1 = lin(ks[0], PE_DIM, HIDDEN)                       # [26, 128]
    w1 = jnp.pad(w1, ((0, PE_PAD - PE_DIM), (0, 0)))      # zero rows -> [32, 128]
    w2 = lin(ks[1], HIDDEN, HIDDEN)
    w3 = lin(ks[2], HIDDEN, HIDDEN)
    wo = lin(ks[3], HIDDEN, OUT_DIM)                      # [128, 2]
    wo = jnp.pad(wo, ((0, 0), (0, HIDDEN - OUT_DIM)))     # zero cols -> [128, 128]

    return {
        "w1": w1.astype(WEIGHT_DTYPE),
        "wh": jnp.stack([w2, w3]).astype(WEIGHT_DTYPE),   # [2, 128, 128]
        "b": jnp.zeros((4, HIDDEN), jnp.float32),         # b1,b2,b3,bo (padded)
        "wo": wo.astype(WEIGHT_DTYPE),
    }


def _reference_forward(x, params):
    """Pure-JAX reference with identical numerics (bf16 weights, f32 accum)."""
    feats = [x.astype(jnp.float32)]
    for k in range(PE_FREQS):
        f = (2.0 ** k) * jnp.pi
        feats.append(jnp.sin(f * x))
        feats.append(jnp.cos(f * x))
    pe = jnp.concatenate(feats, axis=-1)                           # [N, 26]
    pe = jnp.pad(pe, ((0, 0), (0, PE_PAD - PE_DIM)))
    pe = pe.astype(params["w1"].dtype)
    h = jnp.dot(pe, params["w1"], preferred_element_type=jnp.float32) + params["b"][0]
    h = jnp.maximum(h, 0.0).astype(params["w1"].dtype)
    h = jnp.dot(h, params["wh"][0], preferred_element_type=jnp.float32) + params["b"][1]
    h = jnp.maximum(h, 0.0).astype(params["w1"].dtype)
    h = jnp.dot(h, params["wh"][1], preferred_element_type=jnp.float32) + params["b"][2]
    h = jnp.maximum(h, 0.0).astype(params["w1"].dtype)
    o = jnp.dot(h, params["wo"], preferred_element_type=jnp.float32) + params["b"][3]
    return jnp.tanh(o)[:, :OUT_DIM]


if __name__ == "__main__":
    key = jax.random.PRNGKey(0)
    k_x, k_p = jax.random.split(key)

    # Sketch point coordinates in [-1, 1], shape [N_POINTS, 2].
    x = jax.random.uniform(k_x, (N_POINTS, IN_DIM), jnp.float32,
                           minval=-1.0, maxval=1.0)
    params = init_params(k_p)

    out = jax.block_until_ready(sketch_model_forward(x, params))
    ref = jax.block_until_ready(_reference_forward(x, params))

    assert out.shape == (N_POINTS, OUT_DIM)
    assert out.dtype == jnp.float32
    assert bool(jnp.all(jnp.isfinite(out)))
    assert bool(jnp.max(jnp.abs(out - ref)) < 5e-2), "mismatch vs pure-JAX reference"
    print("KERNEL_OK")
</pallas_src>

<mosaic_0001>
module attributes {stable_mosaic.version = 11 : i64} {
  func.func @painter_mlp_kernel(%arg0: i32, %arg1: memref<256x2xf32, #tpu.memory_space<vmem>>, %arg2: memref<32x128xbf16, #tpu.memory_space<vmem>>, %arg3: memref<2x128x128xbf16, #tpu.memory_space<vmem>>, %arg4: memref<4x128xf32, #tpu.memory_space<vmem>>, %arg5: memref<128x128xbf16, #tpu.memory_space<vmem>>, %arg6: memref<256x128xf32, #tpu.memory_space<vmem>>) attributes {dimension_semantics = [#tpu.dimension_semantics<parallel>], iteration_bounds = array<i64: 1>, scalar_prefetch = 0 : i64, scratch_operands = 0 : i64, tpu.core_type = #tpu.core_type<tc>, window_params = [{transform_indices = @transform_0, window_bounds = array<i64: 256, 2>}, {pipeline_mode = #tpu.pipeline_mode<synchronous>, transform_indices = @transform_1, window_bounds = array<i64: 32, 128>}, {pipeline_mode = #tpu.pipeline_mode<synchronous>, transform_indices = @transform_2, window_bounds = array<i64: 2, 128, 128>}, {pipeline_mode = #tpu.pipeline_mode<synchronous>, transform_indices = @transform_3, window_bounds = array<i64: 4, 128>}, {pipeline_mode = #tpu.pipeline_mode<synchronous>, transform_indices = @transform_4, window_bounds = array<i64: 128, 128>}, {transform_indices = @transform_5, window_bounds = array<i64: 256, 128>}]} {
    %c0 = arith.constant 0 : index
    %c0_0 = arith.constant 0 : index
    %0 = vector.load %arg1[%c0, %c0_0] : memref<256x2xf32, #tpu.memory_space<vmem>>, vector<256x2xf32>
    %1 = tpu.iota {dimensions = array<i32: 1>} : vector<256x32xi32>
    %c1_i32 = arith.constant 1 : i32
    %2 = vector.broadcast %c1_i32 : i32 to vector<256x32xi32>
    %3 = arith.andi %1, %2 : vector<256x32xi32>
    %c0_i32 = arith.constant 0 : i32
    %4 = vector.broadcast %c0_i32 : i32 to vector<256x32xi32>
    %5 = arith.cmpi eq, %3, %4 : vector<256x32xi32>
    %6 = vector.extract_strided_slice %0 {offsets = [0, 0], sizes = [256, 1], strides = [1, 1]} : vector<256x2xf32> to vector<256x1xf32>
    %7 = vector.extract_strided_slice %0 {offsets = [0, 1], sizes = [256, 1], strides = [1, 1]} : vector<256x2xf32> to vector<256x1xf32>
    %8 = vector.shape_cast %6 : vector<256x1xf32> to vector<256x1xf32>
    %9 = vector.broadcast %8 : vector<256x1xf32> to vector<256x32xf32>
    %10 = vector.shape_cast %7 : vector<256x1xf32> to vector<256x1xf32>
    %11 = vector.broadcast %10 : vector<256x1xf32> to vector<256x32xf32>
    %12 = arith.select %5, %9, %11 : vector<256x32xi1>, vector<256x32xf32>
    %c2_i32 = arith.constant 2 : i32
    %13 = vector.broadcast %c2_i32 : i32 to vector<256x32xi32>
    %14 = arith.subi %1, %13 : vector<256x32xi32>
    %c0_i32_1 = arith.constant 0 : i32
    %15 = vector.broadcast %c0_i32_1 : i32 to vector<256x32xi32>
    %16 = arith.maxsi %14, %15 : vector<256x32xi32>
    %c2_i32_2 = arith.constant 2 : i32
    %17 = vector.broadcast %c2_i32_2 : i32 to vector<256x32xi32>
    %18 = arith.shrsi %16, %17 : vector<256x32xi32>
    %c1_i32_3 = arith.constant 1 : i32
    %19 = vector.broadcast %c1_i32_3 : i32 to vector<256x32xi32>
    %20 = arith.shli %19, %18 : vector<256x32xi32>
    %21 = arith.sitofp %20 : vector<256x32xi32> to vector<256x32xf32>
    %cst = arith.constant 3.14159274 : f32
    %22 = vector.broadcast %cst : f32 to vector<256x32xf32>
    %23 = arith.mulf %22, %21 : vector<256x32xf32>
    %24 = arith.mulf %23, %12 : vector<256x32xf32>
    %c2_i32_4 = arith.constant 2 : i32
    %25 = vector.broadcast %c2_i32_4 : i32 to vector<256x32xi32>
    %26 = arith.subi %1, %25 : vector<256x32xi32>
    %c3_i32 = arith.constant 3 : i32
    %27 = vector.broadcast %c3_i32 : i32 to vector<256x32xi32>
    %28 = arith.andi %26, %27 : vector<256x32xi32>
    %c2_i32_5 = arith.constant 2 : i32
    %29 = vector.broadcast %c2_i32_5 : i32 to vector<256x32xi32>
    %30 = arith.cmpi slt, %1, %29 : vector<256x32xi32>
    %c2_i32_6 = arith.constant 2 : i32
    %31 = vector.broadcast %c2_i32_6 : i32 to vector<256x32xi32>
    %32 = arith.cmpi slt, %28, %31 : vector<256x32xi32>
    %33 = math.sin %24 : vector<256x32xf32>
    %34 = math.cos %24 : vector<256x32xf32>
    %35 = arith.select %32, %33, %34 : vector<256x32xi1>, vector<256x32xf32>
    %36 = arith.select %30, %12, %35 : vector<256x32xi1>, vector<256x32xf32>
    %c26_i32 = arith.constant 26 : i32
    %37 = vector.broadcast %c26_i32 : i32 to vector<256x32xi32>
    %38 = arith.cmpi slt, %1, %37 : vector<256x32xi32>
    %cst_7 = arith.constant 0.000000e+00 : f32
    %39 = vector.broadcast %cst_7 : f32 to vector<256x32xf32>
    %40 = arith.select %38, %36, %39 : vector<256x32xi1>, vector<256x32xf32>
    %41 = arith.truncf %40 : vector<256x32xf32> to vector<256x32xbf16>
    %c0_8 = arith.constant 0 : index
    %c0_9 = arith.constant 0 : index
    %42 = vector.load %arg2[%c0_8, %c0_9] : memref<32x128xbf16, #tpu.memory_space<vmem>>, vector<32x128xbf16>
    %cst_10 = arith.constant dense<0.000000e+00> : vector<256x128xf32>
    %43 = tpu.matmul %41, %42, %cst_10 {dimension_numbers = #tpu.dot_dimension_numbers<[1], [0], [0], [1], [0, 0, 1, 1], [], []>} : vector<256x32xbf16>, vector<32x128xbf16>, vector<256x128xf32> -> vector<256x128xf32>
    %c0_11 = arith.constant 0 : index
    %c0_12 = arith.constant 0 : index
    %44 = vector.load %arg4[%c0_11, %c0_12] : memref<4x128xf32, #tpu.memory_space<vmem>>, vector<1x128xf32>
    %45 = vector.broadcast %44 : vector<1x128xf32> to vector<256x128xf32>
    %46 = arith.addf %43, %45 : vector<256x128xf32>
    %cst_13 = arith.constant 0.000000e+00 : f32
    %47 = vector.broadcast %cst_13 : f32 to vector<256x128xf32>
    %48 = arith.maximumf %46, %47 : vector<256x128xf32>
    %49 = arith.truncf %48 : vector<256x128xf32> to vector<256x128xbf16>
    %c0_14 = arith.constant 0 : index
    %c0_15 = arith.constant 0 : index
    %c0_16 = arith.constant 0 : index
    %50 = vector.load %arg3[%c0_14, %c0_15, %c0_16] : memref<2x128x128xbf16, #tpu.memory_space<vmem>>, vector<1x128x128xbf16>
    %51 = vector.shape_cast %50 : vector<1x128x128xbf16> to vector<128x128xbf16>
    %cst_17 = arith.constant dense<0.000000e+00> : vector<256x128xf32>
    %52 = tpu.matmul %49, %51, %cst_17 {dimension_numbers = #tpu.dot_dimension_numbers<[1], [0], [0], [1], [0, 0, 1, 1], [], []>} : vector<256x128xbf16>, vector<128x128xbf16>, vector<256x128xf32> -> vector<256x128xf32>
    %c1 = arith.constant 1 : index
    %c0_18 = arith.constant 0 : index
    %53 = vector.load %arg4[%c1, %c0_18] : memref<4x128xf32, #tpu.memory_space<vmem>>, vector<1x128xf32>
    %54 = vector.broadcast %53 : vector<1x128xf32> to vector<256x128xf32>
    %55 = arith.addf %52, %54 : vector<256x128xf32>
    %cst_19 = arith.constant 0.000000e+00 : f32
    %56 = vector.broadcast %cst_19 : f32 to vector<256x128xf32>
    %57 = arith.maximumf %55, %56 : vector<256x128xf32>
    %58 = arith.truncf %57 : vector<256x128xf32> to vector<256x128xbf16>
    %c1_20 = arith.constant 1 : index
    %c0_21 = arith.constant 0 : index
    %c0_22 = arith.constant 0 : index
    %59 = vector.load %arg3[%c1_20, %c0_21, %c0_22] : memref<2x128x128xbf16, #tpu.memory_space<vmem>>, vector<1x128x128xbf16>
    %60 = vector.shape_cast %59 : vector<1x128x128xbf16> to vector<128x128xbf16>
    %cst_23 = arith.constant dense<0.000000e+00> : vector<256x128xf32>
    %61 = tpu.matmul %58, %60, %cst_23 {dimension_numbers = #tpu.dot_dimension_numbers<[1], [0], [0], [1], [0, 0, 1, 1], [], []>} : vector<256x128xbf16>, vector<128x128xbf16>, vector<256x128xf32> -> vector<256x128xf32>
    %c2 = arith.constant 2 : index
    %c0_24 = arith.constant 0 : index
    %62 = vector.load %arg4[%c2, %c0_24] : memref<4x128xf32, #tpu.memory_space<vmem>>, vector<1x128xf32>
    %63 = vector.broadcast %62 : vector<1x128xf32> to vector<256x128xf32>
    %64 = arith.addf %61, %63 : vector<256x128xf32>
    %cst_25 = arith.constant 0.000000e+00 : f32
    %65 = vector.broadcast %cst_25 : f32 to vector<256x128xf32>
    %66 = arith.maximumf %64, %65 : vector<256x128xf32>
    %67 = arith.truncf %66 : vector<256x128xf32> to vector<256x128xbf16>
    %c0_26 = arith.constant 0 : index
    %c0_27 = arith.constant 0 : index
    %68 = vector.load %arg5[%c0_26, %c0_27] : memref<128x128xbf16, #tpu.memory_space<vmem>>, vector<128x128xbf16>
    %cst_28 = arith.constant dense<0.000000e+00> : vector<256x128xf32>
    %69 = tpu.matmul %67, %68, %cst_28 {dimension_numbers = #tpu.dot_dimension_numbers<[1], [0], [0], [1], [0, 0, 1, 1], [], []>} : vector<256x128xbf16>, vector<128x128xbf16>, vector<256x128xf32> -> vector<256x128xf32>
    %c3 = arith.constant 3 : index
    %c0_29 = arith.constant 0 : index
    %70 = vector.load %arg4[%c3, %c0_29] : memref<4x128xf32, #tpu.memory_space<vmem>>, vector<1x128xf32>
    %71 = vector.broadcast %70 : vector<1x128xf32> to vector<256x128xf32>
    %72 = arith.addf %69, %71 : vector<256x128xf32>
    %73 = math.tanh %72 : vector<256x128xf32>
    %c0_30 = arith.constant 0 : index
    %c0_31 = arith.constant 0 : index
    %74 = vector.load %arg6[%c0_30, %c0_31] : memref<256x128xf32, #tpu.memory_space<vmem>>, vector<256x128xf32>
    tpu.vector_store %arg6[%c0_30, %c0_31], %73 {strides = array<i32>} : memref<256x128xf32, #tpu.memory_space<vmem>>, vector<256x128xf32>,
    return
  }
  func.func @transform_0(%arg0: i32) -> (i32, i32) {
    %c0_i32 = arith.constant 0 : i32
    %c0_i32_0 = arith.constant 0 : i32
    return %arg0, %c0_i32 : i32, i32
  }
  func.func @transform_1(%arg0: i32) -> (i32, i32) {
    %c0_i32 = arith.constant 0 : i32
    %c0_i32_0 = arith.constant 0 : i32
    %c0_i32_1 = arith.constant 0 : i32
    return %c0_i32, %c0_i32_0 : i32, i32
  }
  func.func @transform_2(%arg0: i32) -> (i32, i32, i32) {
    %c0_i32 = arith.constant 0 : i32
    %c0_i32_0 = arith.constant 0 : i32
    %c0_i32_1 = arith.constant 0 : i32
    %c0_i32_2 = arith.constant 0 : i32
    return %c0_i32, %c0_i32_0, %c0_i32_1 : i32, i32, i32
  }
  func.func @transform_3(%arg0: i32) -> (i32, i32) {
    %c0_i32 = arith.constant 0 : i32
    %c0_i32_0 = arith.constant 0 : i32
    %c0_i32_1 = arith.constant 0 : i32
    return %c0_i32, %c0_i32_0 : i32, i32
  }
  func.func @transform_4(%arg0: i32) -> (i32, i32) {
    %c0_i32 = arith.constant 0 : i32
    %c0_i32_0 = arith.constant 0 : i32
    %c0_i32_1 = arith.constant 0 : i32
    return %c0_i32, %c0_i32_0 : i32, i32
  }
  func.func @transform_5(%arg0: i32) -> (i32, i32) {
    %c0_i32 = arith.constant 0 : i32
    %c0_i32_0 = arith.constant 0 : i32
    return %arg0, %c0_i32 : i32, i32
  }
}

</mosaic_0001>

<bundles_post_ra>
// kernel: tpu_custom_call.1
= control target key start
LH: loop header
LB: loop body
LE: loop exit
PB: predicated region body
PF: predicated region fallthrough
CT: control target
= control target key end

     0   :  { %v19480_v2 = vmov 1   ;;  %v19490_v3 = vmov 0   ;;  %s19469_s0 = inlined_call_operand.vmem [shape: f32[256,2], index: 0, kind: input, shape index: {}]   ;;  %s19470_s1 = inlined_call_operand.vmem [shape: bf16[32,128], index: 1, kind: input, shape index: {}]   ;;  %s19471_s2 = inlined_call_operand.vmem [shape: bf16[2,128,128], index: 2, kind: input, shape index: {}]   ;;  %s19472_s3 = inlined_call_operand.vmem [shape: f32[4,128], index: 3, kind: input, shape index: {}]   ;;  %s19473_s4 = inlined_call_operand.vmem [shape: bf16[128,128], index: 4, kind: input, shape index: {}]   ;;  %s19474_s5 = inlined_call_operand.hbm [shape: f32[256,128], index: 5, kind: output, shape index: {}]  }
   0x1   :  { %v24_v0 = vld [vmem:[%s19469_s0 + $0x10] sm:$0xff]  ;;  %v22_v1 = vld [vmem:[%s19469_s0] sm:$0xff]  ;;  %11636 = vset.pattern.permute.xlu1 %v19480_v2  ;;  %11637 = vset.pattern.permute.xlu2 %v19490_v3 }
   0x2   :  { %11635 = vset.pattern.permute.xlu0 %v19490_v3  ;;  %70 = vperm.xlu2 %11637, %v24_v0  }
   0x3   :  { %219 = vperm.xlu1 %11636, %v22_v1   ;;  %60 = vperm.xlu0 %11635, %v22_v1  }
   0x4   :  { %10 = vsyncpa [#allocation3], 0  ;;  %v25_v4 = vld [vmem:[%s19469_s0 + $0x18] sm:$0xff]  ;;  %v23_v5 = vld [vmem:[%s19469_s0 + $0x8] sm:$0xff]  ;;  %v54_v25 = vlaneseq  ;;  %v19791_v33 = vmov 0  ;;  %s11257_s14 = sshll.u32 %s19474_s5, 4  ;;  %s11258_s14 = int_to_ptr.hbm [resolvable:$true] %s11257_s14 }
   0x5   :  { %v26_v6 = vld [vmem:[%s19469_s0 + $0x20] sm:$0xff]  ;;  %v27_v7 = vld [vmem:[%s19469_s0 + $0x28] sm:$0xff]  ;;  %v28_v8 = vld [vmem:[%s19469_s0 + $0x30] sm:$0xff]  ;;  %v19494_v51 = vmov 920167782   ;;  %s11777_s15 = smov 128  }
   0x6   :  { %v29_v9 = vld [vmem:[%s19469_s0 + $0x38] sm:$0xff]  ;;  %v30_v10 = vld [vmem:[%s19469_s0 + $0x40] sm:$0xff]  ;;  %v31_v11 = vld [vmem:[%s19469_s0 + $0x48] sm:$0xff]  ;;  %v11903_v26 = vand.u32 127, %v54_v25  ;;  %v19477_v53 = vmov 1326507024  }
   0x7   :  { %v32_v12 = vld [vmem:[%s19469_s0 + $0x50] sm:$0xff]  ;;  %v33_v13 = vld [vmem:[%s19469_s0 + $0x58] sm:$0xff]  ;;  %v35_v14 = vld [vmem:[%s19469_s0 + $0x68] sm:$0xff]  ;;  %v19492_v57 = vmov 2102212464   ;;  %s11778_s16 = smov 8  }
   0x8   :  { %v34_v15 = vld [vmem:[%s19469_s0 + $0x60] sm:$0xff]  ;;  %v36_v16 = vld [vmem:[%s19469_s0 + $0x70] sm:$0xff]  ;;  %v39_v17 = vld [vmem:[%s19469_s0 + $0x88] sm:$0xff]  ;;  %19790 = vst [vmem:[#allocation5_spill] sm:$0xff] %v11903_v26  ;;  %v11906_v27 = vadd.s32 4294967294, %v11903_v26  ;;  %v56_v31 = vand.u32 1, %v11903_v26 }
   0x9   :  { %v37_v18 = vld [vmem:[%s19469_s0 + $0x78] sm:$0xff]  ;;  %v40_v19 = vld [vmem:[%s19469_s0 + $0x90] sm:$0xff]  ;;  %v38_v20 = vld [vmem:[%s19469_s0 + $0x80] sm:$0xff]  ;;  %v19488_v60 = vmov 2475754826  }
   0xa   :  { %75 = vperm.xlu2 %11637, %v25_v4   ;;  %v43_v21 = vld [vmem:[%s19469_s0 + $0xa8] sm:$0xff]  ;;  %v41_v22 = vld [vmem:[%s19469_s0 + $0x98] sm:$0xff]  ;;  %v44_v23 = vld [vmem:[%s19469_s0 + $0xb0] sm:$0xff]  ;;  %vm379_vm0 = vcmp.gt.s32.totalorder %v11906_v27, 0  ;;  %vm11916_vm1 = vcmp.eq.s32.totalorder %v56_v31, 0 }
   0xb   :  { %223 = vperm.xlu1 %11636, %v23_v5   ;;  %65 = vperm.xlu0 %11635, %v23_v5   ;;  %v42_v24 = vld [vmem:[%s19469_s0 + $0xa0] sm:$0xff]  ;;  %v380_v28 = vsel %vm379_vm0, %v11906_v27, 0  ;;  %v19792_v33 = vsel %vm11916_vm1, 4294967295, %v19791_v33  ;;  %v19485_v62 = vmov 2131351028  }
   0xc   :  { %v381_v29 = vshra.s32 %v380_v28, 2  ;;  %19793 = vst [vmem:[#allocation6_spill] sm:$0xff] %v19792_v33  ;;  %v19483_v5 = vmov 683565275  }
   0xe   :  { %v382_v30 = vshll.u32 %v19480_v2, %v381_v29 }
  0x10   :  { %v383_v32 = vcvt.s32.f32 %v382_v30 }
  0x12   :  { %80 = vperm.xlu2 %11637, %v26_v6   ;;  %v11920_v36 = vmul.f32 3.1415927, %v383_v32 }
  0x13   :  { %231 = vperm.xlu1 %11636, %v25_v4   ;;  %11638 = vset.pattern.permute.xlu0 %v19480_v2 }
  0x14   :  { %227 = vperm.xlu0 %11638, %v24_v0   ;;  %19794 = vst [vmem:[#allocation7_spill] sm:$0xff] %v11920_v36 }
  0x1a   :  { %11640 = vset.pattern.permute.xlu2 %v19480_v2 }
  0x1b   :  { %11639 = vset.pattern.permute.xlu1 %v19490_v3  ;;  %235 = vperm.xlu2 %11640, %v26_v6  }
  0x1c   :  { %85 = vperm.xlu1 %11639, %v27_v7   ;;  %239 = vperm.xlu0 %11638, %v27_v7  }
  0x23   :  { %11641 = vset.pattern.permute.xlu2 %v19490_v3 }
  0x24   :  { %90 = vperm.xlu1 %11639, %v28_v8   ;;  %243 = vperm.xlu0 %11638, %v28_v8  }
  0x25   :  { %95 = vperm.xlu2 %11641, %v29_v9  }
  0x2c   :  { %11642 = vset.pattern.permute.xlu1 %v19480_v2  ;;  %11643 = vset.pattern.permute.xlu0 %v19490_v3 }
  0x2d   :  { %100 = vperm.xlu2 %11641, %v30_v10   ;;  %247 = vperm.xlu1 %11642, %v29_v9  }
  0x2e   :  { %105 = vperm.xlu0 %11643, %v31_v11  }
  0x35   :  { %11644 = vset.pattern.permute.xlu2 %v19480_v2  ;;  %251 = vperm.xlu1 %11642, %v30_v10   ;;  %v11966_v10 = vld [vmem:[%s19469_s0 + $0xc8] sm:$0xff] }
  0x36   :  { %255 = vperm.xlu2 %11644, %v31_v11   ;;  %11647 = vset.pattern.permute.xlu0 %v19480_v2 }
  0x37   :  { %259 = vperm.xlu0 %11647, %v32_v12  }
  0x3d   :  { %11645 = vset.pattern.permute.xlu1 %v19490_v3 }
  0x3e   :  { %11646 = vset.pattern.permute.xlu2 %v19490_v3  ;;  %110 = vperm.xlu1 %11645, %v32_v12  }
  0x3f   :  { %115 = vperm.xlu2 %11646, %v33_v13   ;;  %271 = vperm.xlu0 %11647, %v35_v14  }
  0x46   :  { %11648 = vset.pattern.permute.xlu1 %v19480_v2 }
  0x47   :  { %120 = vperm.xlu2 %11646, %v34_v15   ;;  %263 = vperm.xlu1 %11648, %v33_v13  }
  0x48   :  { %275 = vperm.xlu0 %11647, %v36_v16  }
  0x4f   :  { %11650 = vset.pattern.permute.xlu2 %v19480_v2  ;;  %11649 = vset.pattern.permute.xlu1 %v19490_v3 }
  0x50   :  { %267 = vperm.xlu2 %11650, %v34_v15   ;;  %125 = vperm.xlu1 %11649, %v35_v14  }
  0x51   :  { %11653 = vset.pattern.permute.xlu0 %v19490_v3 }
  0x52   :  { %145 = vperm.xlu0 %11653, %v39_v17  }
  0x58   :  { %11651 = vset.pattern.permute.xlu2 %v19490_v3  ;;  %130 = vperm.xlu1 %11649, %v36_v16  }
  0x59   :  { %135 = vperm.xlu2 %11651, %v37_v18  }
  0x5a   :  { %11657 = vset.pattern.permute.xlu0 %v19480_v2 }
  0x5b   :  { %291 = vperm.xlu0 %11657, %v40_v19  }
  0x5c   :  { %v11926_v38 = vpop.permute.xlu2 %70 }
  0x60   :  { %11652 = vset.pattern.permute.xlu1 %v19480_v2 }
  0x61   :  { %140 = vperm.xlu2 %11651, %v38_v20   ;;  %279 = vperm.xlu1 %11652, %v37_v18  }
  0x63   :  { %303 = vperm.xlu0 %11657, %v43_v21  }
  0x64   :  { %v11933_v42 = vpop.permute.xlu2 %75 }
  0x69   :  { %11654 = vset.pattern.permute.xlu2 %v19480_v2  ;;  %283 = vperm.xlu1 %11652, %v38_v20  }
  0x6a   :  { %287 = vperm.xlu2 %11654, %v39_v17  }
  0x6b   :  { %307 = vperm.xlu0 %11657, %v44_v23  }
  0x6c   :  { %v81_v45 = vpop.permute.xlu2 %80 }
  0x71   :  { %11655 = vset.pattern.permute.xlu1 %v19490_v3 }
  0x72   :  { %11656 = vset.pattern.permute.xlu2 %v19490_v3  ;;  %150 = vperm.xlu1 %11655, %v40_v19  }
  0x73   :  { %155 = vperm.xlu2 %11656, %v41_v22   ;;  %11663 = vset.pattern.permute.xlu0 %v19490_v3 }
  0x74   :  { %185 = vperm.xlu0 %11663, %v11966_v10  }
  0x75   :  { %v220_v34 = vpop.permute.xlu1 %219  ;;  %v61_v35 = vpop.permute.xlu0 %60 }
  0x76   :  { %v11924_v37 = vsel %vm11916_vm1, %v61_v35, %v220_v34  ;;  %v236_v49 = vpop.permute.xlu2 %235 }
  0x77   :  { %v11930_v39 = vmul.f32 %v11920_v36, %v11924_v37  ;;  %v11939_v50 = vsel %vm11916_vm1, %v81_v45, %v236_v49 }
  0x78   :  { %19795 = vst [vmem:[#allocation8_spill] sm:$0xff] %v11939_v50  ;;  %v11951_v59 = vmul.f32 %v11920_v36, %v11939_v50 }
  0x79   :  { %v423_v40 = vand.u32 2139095040, %v11930_v39  ;;  %v19476_v55 = vand.u32 2147483647, %v11930_v39 }
  0x7a   :  { %11658 = vset.pattern.permute.xlu1 %v19480_v2  ;;  %19796 = vst [vmem:[#allocation9_spill] sm:$0xff] %v11951_v59  ;;  %v1043_v12 = vand.u32 2139095040, %v11951_v59 }
  0x7b   :  { %160 = vperm.xlu2 %11656, %v42_v24   ;;  %295 = vperm.xlu1 %11658, %v41_v22   ;;  %v424_v41 = vshrl.u32 %v423_v40, 23  ;;  %v427_v11 = vand.u32 8388607, %v19476_v55 }
  0x7c   :  { %v1044_v18 = vshrl.u32 %v1043_v12, 23  ;;  %11667 = vset.pattern.permute.xlu0 %v19480_v2 }
  0x7d   :  { %v11270_v43 = vadd.s32 4294967169, %v424_v41  ;;  %v428_v19 = vor.u32 8388608, %v427_v11 }
  0x7e   :  { %v11282_v25 = vadd.s32 4294967169, %v1044_v18 }
  0x7f   :  { %v430_v44 = vadd.s32 1, %v11270_v43  ;;  %v12004_v29 = vshll.u32 %v428_v19, 8 }
  0x80   :  { %v1050_v32 = vadd.s32 1, %v11282_v25  ;;  %v19475_v25 = vand.u32 2147483647, %v11951_v59 }
  0x81   :  { %vm431_vm2 = vcmp.gt.s32.totalorder %v430_v44, 0  ;;  %v469_v34 = vand.u32 65535, %v12004_v29 }
  0x82   :  { %v432_v46 = vsel %vm431_vm2, %v430_v44, 0  ;;  %vm1051_vm7 = vcmp.gt.s32.totalorder %v1050_v32, 0  ;;  %v470_v44 = vshrl.u32 %v12004_v29, 16 }
  0x83   :  { %11660 = vset.pattern.permute.xlu2 %v19480_v2  ;;  %11659 = vset.pattern.permute.xlu1 %v19490_v3  ;;  %v434_v47 = vand.u32 31, %v432_v46  ;;  %v11946_v56 = vshrl.u32 %v432_v46, 5  ;;  %v1052_v46 = vsel %vm1051_vm7, %v1050_v32, 0 }
  0x84   :  { %299 = vperm.xlu2 %11660, %v42_v24   ;;  %165 = vperm.xlu1 %11659, %v43_v21  }
  0x85   :  { %v11935_v48 = vsub.s32 32, %v434_v47  ;;  %v446_v58 = vshll.u32 %v19492_v57, %v434_v47  ;;  %v449_v1 = vshll.u32 %v19494_v51, %v434_v47  ;;  %v437_v6 = vshll.u32 %v19483_v5, %v434_v47 }
  0x86   :  { %v440_v7 = vshll.u32 %v19488_v60, %v434_v47  ;;  %v443_v8 = vshll.u32 %v19485_v62, %v434_v47  ;;  %vm455_vm3 = vcmp.lt.s32.totalorder %v11946_v56, 4  ;;  %vm452_vm4 = vcmp.lt.s32.totalorder %v11946_v56, 1 }
  0x87   :  { %v447_v52 = vshrl.u32 %v19494_v51, %v11935_v48  ;;  %v450_v54 = vshrl.u32 %v19477_v53, %v11935_v48  ;;  %v438_v61 = vshrl.u32 %v19488_v60, %v11935_v48  ;;  %v441_v63 = vshrl.u32 %v19485_v62, %v11935_v48 }
  0x88   :  { %v444_v0 = vshrl.u32 %v19492_v57, %v11935_v48  ;;  %vm454_vm5 = vcmp.lt.s32.totalorder %v11946_v56, 3  ;;  %vm453_vm6 = vcmp.lt.s32.totalorder %v11946_v56, 2 }
  0x89   :  { %v448_v4 = vor.u32 %v447_v52, %v446_v58  ;;  %v451_v9 = vor.u32 %v450_v54, %v449_v1  ;;  %v11972_v13 = vor.u32 %v438_v61, %v437_v6  ;;  %v11974_v14 = vor.u32 %v441_v63, %v440_v7  ;;  %v66_v1 = vpop.permute.xlu0 %65 }
  0x8a   :  { %v11976_v15 = vor.u32 %v444_v0, %v443_v8  ;;  %v1054_v61 = vand.u32 31, %v1052_v46  ;;  %v224_v0 = vpop.permute.xlu1 %223 }
  0x8b   :  { %v461_v16 = vsel %vm455_vm3, %v448_v4, 920167782  ;;  %v465_v17 = vsel %vm455_vm3, %v451_v9, 1326507024  ;;  %v460_v20 = vsel %vm452_vm4, %v11972_v13, %v11974_v14  ;;  %v12021_v11 = vsel %vm11916_vm1, %v66_v1, %v224_v0 }
  0x8c   :  { %11661 = vset.pattern.permute.xlu2 %v19490_v3  ;;  %170 = vperm.xlu1 %11659, %v44_v23   ;;  %v462_v21 = vsel %vm454_vm5, %v11976_v15, %v461_v16  ;;  %v464_v22 = vsel %vm452_vm4, %v11974_v14, %v11976_v15  ;;  %v466_v23 = vsel %vm454_vm5, %v448_v4, %v465_v17  ;;  %v12017_v9 = vsub.s32 32, %v1054_v61 }
  0x8d   :  { %v463_v24 = vsel %vm453_vm6, %v460_v20, %v462_v21  ;;  %v467_v28 = vsel %vm453_vm6, %v464_v22, %v466_v23  ;;  %19797 = vst [vmem:[#allocation10_spill] sm:$0xff] %v12021_v11  ;;  %v12029_v19 = vmul.f32 %v11920_v36, %v12021_v11  ;;  %v1066_v22 = vshll.u32 %v19492_v57, %v1054_v61 }
  0x8e   :  { %v494_v30 = vshrl.u32 %v463_v24, 16  ;;  %v472_v31 = vshrl.u32 %v467_v28, 16  ;;  %v493_v41 = vand.u32 65535, %v463_v24  ;;  %v471_v43 = vand.u32 65535, %v467_v28 }
  0x8f   :  { %v1067_v23 = vshrl.u32 %v19494_v51, %v12017_v9  ;;  %v12037_v28 = vshrl.u32 %v1052_v46, 5  ;;  %v1060_v32 = vshll.u32 %v19488_v60, %v1054_v61  ;;  %v1064_v46 = vshrl.u32 %v19492_v57, %v12017_v9 }
  0x90   :  { %v496_v35 = vmul.u32 %v494_v30, %v469_v34  ;;  %v474_v40 = vmul.u32 %v472_v31, %v469_v34  ;;  %v495_v49 = vmul.u32 %v493_v41, %v469_v34  ;;  %v12008_v52 = vmul.u32 %v493_v41, %v470_v44 }
  0x91   :  { %v473_v54 = vmul.u32 %v471_v43, %v469_v34  ;;  %v12010_v58 = vmul.u32 %v471_v43, %v470_v44  ;;  %v498_v16 = vmul.u32 %v494_v30, %v470_v44  ;;  %v476_v17 = vmul.u32 %v472_v31, %v470_v44 }
  0x92   :  { %v499_v45 = vshll.u32 %v496_v35, 16  ;;  %v477_v47 = vshll.u32 %v474_v40, 16  ;;  %v501_v6 = vshll.u32 %v12008_v52, 16  ;;  %v1057_v30 = vshll.u32 %v19483_v5, %v1054_v61  ;;  %v232_v55 = vpop.permute.xlu1 %231 }
  0x93   :  { %v479_v7 = vshll.u32 %v12010_v58, 16  ;;  %v1058_v31 = vshrl.u32 %v19488_v60, %v12017_v9  ;;  %v1069_v34 = vshll.u32 %v19494_v51, %v1054_v61  ;;  %v1070_v41 = vshrl.u32 %v19477_v53, %v12017_v9 }
  0x94   :  { %11662 = vset.pattern.permute.xlu1 %v19480_v2  ;;  %vm503_vm8 = vc.u32 %v495_v49, %v499_v45  ;;  %v12012_v63 = vadd.s32 %v499_v45, %v495_v49  ;;  %vm481_vm9 = vc.u32 %v473_v54, %v477_v47  ;;  %v483_v4 = vadd.s32 %v477_v47, %v473_v54 }
  0x95   :  { %v504_v8 = vsel %vm503_vm8, 1, %v19490_v3  ;;  %v482_v12 = vsel %vm481_vm9, 1, %v19490_v3  ;;  %v1061_v44 = vshrl.u32 %v19485_v62, %v12017_v9  ;;  %v1063_v45 = vshll.u32 %v19485_v62, %v1054_v61 }
  0x96   :  { %vm507_vm10 = vc.u32 %v12012_v63, %v501_v6  ;;  %vm485_vm11 = vc.u32 %v483_v4, %v479_v7  ;;  %v506_v18 = vadd.s32 %v504_v8, %v498_v16  ;;  %v484_v20 = vadd.s32 %v482_v12, %v476_v17 }
  0x97   :  { %v508_v21 = vsel %vm507_vm10, 1, %v19490_v3  ;;  %v486_v24 = vsel %vm485_vm11, 1, %v19490_v3  ;;  %v1068_v49 = vor.u32 %v1067_v23, %v1066_v22  ;;  %v578_v54 = vand.u32 2139095040, %v12029_v19 }
  0x98   :  { %v510_v43 = vadd.s32 %v508_v21, %v506_v18  ;;  %v488_v47 = vadd.s32 %v486_v24, %v484_v20  ;;  %v500_v0 = vshrl.u32 %v496_v35, 16  ;;  %v1047_v1 = vand.u32 8388607, %v19475_v25 }
  0x99   :  { %vm1075_vm12 = vcmp.lt.s32.totalorder %v12037_v28, 4  ;;  %v478_v4 = vshrl.u32 %v474_v40, 16  ;;  %v12055_v7 = vor.u32 %v1058_v31, %v1057_v30  ;;  %v1071_v8 = vor.u32 %v1070_v41, %v1069_v34 }
  0x9a   :  { %v511_v12 = vadd.s32 %v510_v43, %v500_v0  ;;  %v12057_v16 = vor.u32 %v1061_v44, %v1060_v32  ;;  %v12059_v61 = vor.u32 %v1064_v46, %v1063_v45  ;;  %vm1072_vm13 = vcmp.lt.s32.totalorder %v12037_v28, 1 }
  0x9b   :  { %v489_v17 = vadd.s32 %v488_v47, %v478_v4  ;;  %vm1074_vm14 = vcmp.lt.s32.totalorder %v12037_v28, 3  ;;  %v1081_v35 = vsel %vm1075_vm12, %v1068_v49, 920167782  ;;  %v579_v18 = vshrl.u32 %v578_v54, 23 }
  0x9c   :  { %v502_v20 = vshrl.u32 %v12008_v52, 16  ;;  %v1048_v40 = vor.u32 8388608, %v1047_v1  ;;  %v457_v21 = vsel %vm455_vm3, %v11976_v15, 2102212464  ;;  %v480_v22 = vshrl.u32 %v12010_v58, 16 }
  0x9d   :  { %v1085_v23 = vsel %vm1075_vm12, %v1071_v8, 1326507024  ;;  %vm1073_vm15 = vcmp.lt.s32.totalorder %v12037_v28, 2  ;;  %v1080_v30 = vsel %vm1072_vm13, %v12055_v7, %v12057_v16  ;;  %v1082_v31 = vsel %vm1074_vm14, %v12059_v61, %v1081_v35 }
  0x9e   :  { %v512_v24 = vadd.s32 %v511_v12, %v502_v20  ;;  %v436_v15 = vshrl.u32 %v19483_v5, %v11935_v48  ;;  %v12082_v32 = vadd.s32 %v489_v17, %v480_v22  ;;  %v11273_v58 = vadd.s32 4294967169, %v579_v18 }
  0x9f   :  { %v1084_v34 = vsel %vm1072_vm13, %v12057_v16, %v12059_v61  ;;  %v1086_v41 = vsel %vm1074_vm14, %v1068_v49, %v1085_v23  ;;  %v12090_v43 = vshll.u32 %v1048_v40, 8  ;;  %v458_v48 = vsel %vm454_vm5, %v11974_v14, %v457_v21 }
  0xa0   :  { %v456_v44 = vsel %vm452_vm4, %v436_v15, %v11972_v13  ;;  %v12101_v45 = vadd.s32 %v12012_v63, %v501_v6  ;;  %v1083_v46 = vsel %vm1073_vm15, %v1080_v30, %v1082_v31  ;;  %v516_v47 = vadd.s32 1, %v512_v24  ;;  %v45_v63 = vld [vmem:[%s19469_s0 + $0xb8] sm:$0xff] }
  0xa1   :  { %v1087_v49 = vsel %vm1073_vm15, %v1084_v34, %v1086_v41  ;;  %v585_v13 = vadd.s32 1, %v11273_v58  ;;  %v459_v54 = vsel %vm453_vm6, %v456_v44, %v458_v48  ;;  %v1089_v14 = vand.u32 65535, %v12090_v43  ;;  %175 = vperm.xlu2 %11661, %v45_v63   ;;  %311 = vperm.xlu1 %11662, %v45_v63  }
  0xa2   :  { %vm515_vm0 = vc.u32 %v12082_v32, %v12101_v45  ;;  %v1114_v52 = vshrl.u32 %v1083_v46, 16  ;;  %v1092_v0 = vshrl.u32 %v1087_v49, 16  ;;  %v513_v1 = vmul.u32 %v12004_v29, %v459_v54 }
  0xa3   :  { %v517_v6 = vsel %vm515_vm0, %v516_v47, %v512_v24  ;;  %vm586_vm2 = vcmp.gt.s32.totalorder %v585_v13, 0  ;;  %v1090_v4 = vshrl.u32 %v12090_v43, 16  ;;  %v1113_v8 = vand.u32 65535, %v1083_v46 }
  0xa4   :  { %v12117_v12 = vmul.u32 %v1114_v52, %v1089_v14  ;;  %v518_v56 = vadd.s32 %v517_v6, %v513_v1  ;;  %v1091_v17 = vand.u32 65535, %v1087_v49  ;;  %v12119_v35 = vmul.u32 %v1092_v0, %v1089_v14 }
  0xa5   :  { %v587_v18 = vsel %vm586_vm2, %v585_v13, 0  ;;  %v1115_v20 = vmul.u32 %v1113_v8, %v1089_v14  ;;  %v12121_v40 = vmul.u32 %v1113_v8, %v1090_v4  ;;  %v1118_v47 = vmul.u32 %v1114_v52, %v1090_v4 }
  0xa6   :  { %v1119_v21 = vshll.u32 %v12117_v12, 16  ;;  %v519_v22 = vadd.s32 536870912, %v518_v56  ;;  %v589_v23 = vand.u32 31, %v587_v18  ;;  %v1093_v24 = vmul.u32 %v1091_v17, %v1089_v14 }
  0xa7   :  { %v12124_v29 = vmul.u32 %v1091_v17, %v1090_v4  ;;  %v1097_v30 = vshll.u32 %v12119_v35, 16  ;;  %v1121_v31 = vshll.u32 %v12121_v40, 16  ;;  %v19482_v49 = vand.u32 2147483647, %v12029_v19 }
  0xa8   :  { %v12128_v15 = vadd.s32 %v1119_v21, %v1115_v20  ;;  %v12130_v58 = vshrl.u32 %v519_v22, 30  ;;  %vm1123_vm3 = vc.u32 %v1115_v20, %v1119_v21  ;;  %v12132_v34 = vsub.s32 32, %v589_v23 }
  0xa9   :  { %v1099_v41 = vshll.u32 %v12124_v29, 16  ;;  %v1103_v44 = vadd.s32 %v1097_v30, %v1093_v24  ;;  %vm1101_vm4 = vc.u32 %v1093_v24, %v1097_v30  ;;  %v1124_v48 = vsel %vm1123_vm3, 1, %v19490_v3 }
  0xaa   :  { %vm1127_vm5 = vc.u32 %v12128_v15, %v1121_v31  ;;  %v521_v46 = vshll.u32 %v12130_v58, 30  ;;  %v602_v13 = vshrl.u32 %v19494_v51, %v12132_v34  ;;  %v1096_v54 = vmul.u32 %v1092_v0, %v1090_v4 }
  0xab   :  { %v1102_v14 = vsel %vm1101_vm4, 1, %v19490_v3  ;;  %vm1105_vm6 = vc.u32 %v1103_v44, %v1099_v41  ;;  %v605_v63 = vshrl.u32 %v19477_v53, %v12132_v34  ;;  %v1126_v6 = vadd.s32 %v1124_v48, %v1118_v47 }
  0xac   :  { %v1128_v1 = vsel %vm1127_vm5, 1, %v19490_v3  ;;  %v12147_v8 = vshrl.u32 %v587_v18, 5  ;;  %v601_v17 = vshll.u32 %v19492_v57, %v589_v23  ;;  %v593_v52 = vshrl.u32 %v19488_v60, %v12132_v34 }
  0xad   :  { %v596_v20 = vshrl.u32 %v19485_v62, %v12132_v34  ;;  %v599_v0 = vshrl.u32 %v19492_v57, %v12132_v34  ;;  %v604_v4 = vshll.u32 %v19494_v51, %v589_v23  ;;  %v12157_v21 = vsub.s32 %v518_v56, %v521_v46 }
  0xae   :  { %v1104_v22 = vadd.s32 %v1102_v14, %v1096_v54  ;;  %v1106_v24 = vsel %vm1105_vm6, 1, %v19490_v3  ;;  %v603_v18 = vor.u32 %v602_v13, %v601_v17  ;;  %v592_v30 = vshll.u32 %v19483_v5, %v589_v23 }
  0xaf   :  { %v595_v41 = vshll.u32 %v19488_v60, %v589_v23  ;;  %v598_v44 = vshll.u32 %v19485_v62, %v589_v23  ;;  %v606_v48 = vor.u32 %v605_v63, %v604_v4  ;;  %v1130_v47 = vadd.s32 %v1128_v1, %v1126_v6 }
  0xb0   :  { %v582_v25 = vand.u32 8388607, %v19482_v49  ;;  %v12165_v53 = vor.u32 %v593_v52, %v592_v30  ;;  %vm610_vm7 = vcmp.lt.s32.totalorder %v12147_v8, 4  ;;  %v1108_v13 = vadd.s32 %v1106_v24, %v1104_v22 }
  0xb1   :  { %v12167_v56 = vor.u32 %v596_v20, %v595_v41  ;;  %v12169_v46 = vor.u32 %v599_v0, %v598_v44  ;;  %v616_v54 = vsel %vm610_vm7, %v603_v18, 920167782  ;;  %v524_v23 = vsub.s32 0, %v12157_v21 }
  0xb2   :  { %v1120_v14 = vshrl.u32 %v12117_v12, 16  ;;  %v620_v63 = vsel %vm610_vm7, %v606_v48, 1326507024  ;;  %v12181_v6 = vsel %vm11916_vm1, %v11933_v42, %v232_v55  ;;  %vm523_vm8 = vcmp.lt.s32.totalorder %v12157_v21, 0 }
  0xb3   :  { %19798 = vst [vmem:[#allocation11_spill] sm:$0xff] %v12181_v6  ;;  %v1098_v1 = vshrl.u32 %v12119_v35, 16  ;;  %vm607_vm9 = vcmp.lt.s32.totalorder %v12147_v8, 1  ;;  %vm609_vm10 = vcmp.lt.s32.totalorder %v12147_v8, 3  ;;  %v583_v52 = vor.u32 8388608, %v582_v25 }
  0xb4   :  { %v1131_v17 = vadd.s32 %v1130_v47, %v1120_v14  ;;  %v615_v12 = vsel %vm607_vm9, %v12165_v53, %v12167_v56  ;;  %v617_v42 = vsel %vm609_vm10, %v12169_v46, %v616_v54  ;;  %v619_v35 = vsel %vm607_vm9, %v12167_v56, %v12169_v46 }
  0xb5   :  { %v1109_v55 = vadd.s32 %v1108_v13, %v1098_v1  ;;  %v621_v20 = vsel %vm609_vm10, %v603_v18, %v620_v63  ;;  %v12202_v25 = vmul.f32 %v11920_v36, %v12181_v6  ;;  %v525_v0 = vsel %vm523_vm8, %v524_v23, %v12157_v21 }
  0xb6   :  { %v1122_v4 = vshrl.u32 %v12121_v40, 16  ;;  %vm608_vm11 = vcmp.lt.s32.totalorder %v12147_v8, 2  ;;  %v1056_v22 = vshrl.u32 %v19483_v5, %v12017_v9  ;;  %v1100_v24 = vshrl.u32 %v12124_v29, 16 }
  0xb7   :  { %19799 = vst [vmem:[#allocation12_spill] sm:$0xff] %v12202_v25  ;;  %v618_v30 = vsel %vm608_vm11, %v615_v12, %v617_v42  ;;  %v1077_v18 = vsel %vm1075_vm12, %v12059_v61, 2102212464  ;;  %v622_v44 = vsel %vm608_vm11, %v619_v35, %v621_v20  ;;  %v12217_v48 = vshll.u32 %v583_v52, 8 }
  0xb8   :  { %v1132_v41 = vadd.s32 %v1131_v17, %v1122_v4  ;;  %v526_v47 = vclz %v525_v0  ;;  %v12219_v13 = vadd.s32 %v1109_v55, %v1100_v24  ;;  %v888_v9 = vand.u32 2139095040, %v12202_v25  ;;  %v46_v0 = vld [vmem:[%s19469_s0 + $0xc0] sm:$0xff] }
  0xb9   :  { %v649_v54 = vshrl.u32 %v618_v30, 16  ;;  %v1076_v29 = vsel %vm1072_vm13, %v1056_v22, %v12055_v7  ;;  %v1078_v61 = vsel %vm1074_vm14, %v12057_v16, %v1077_v18  ;;  %v12231_v23 = vadd.s32 %v12128_v15, %v1121_v31  ;;  %180 = vperm.xlu2 %11661, %v46_v0   ;;  %315 = vperm.xlu1 %11662, %v46_v0  }
  0xba   :  { %v627_v14 = vshrl.u32 %v622_v44, 16  ;;  %v1136_v63 = vadd.s32 1, %v1132_v41  ;;  %v624_v1 = vand.u32 65535, %v12217_v48  ;;  %v11271_v17 = vadd.s32 4294967294, %v526_v47 }
  0xbb   :  { %vm1135_vm12 = vc.u32 %v12219_v13, %v12231_v23  ;;  %v889_v52 = vshrl.u32 %v888_v9, 23  ;;  %v1079_v7 = vsel %vm1073_vm15, %v1076_v29, %v1078_v61  ;;  %v648_v40 = vand.u32 65535, %v618_v30 }
  0xbc   :  { %v651_v12 = vmul.u32 %v649_v54, %v624_v1  ;;  %v12238_v42 = vmul.u32 %v627_v14, %v624_v1  ;;  %v1137_v16 = vsel %vm1135_vm12, %v1136_v63, %v1132_v41  ;;  %vm11272_vm13 = vcmp.lt.s32.totalorder %v11271_v17, 0 }
  0xbd   :  { %v1133_v31 = vmul.u32 %v12090_v43, %v1079_v7  ;;  %v626_v15 = vand.u32 65535, %v622_v44  ;;  %v11279_v55 = vadd.s32 4294967169, %v889_v52  ;;  %v625_v35 = vshrl.u32 %v12217_v48, 16 }
  0xbe   :  { %v654_v20 = vshll.u32 %v651_v12, 16  ;;  %v632_v28 = vshll.u32 %v12238_v42, 16  ;;  %v529_v22 = vsel %vm11272_vm13, 0, %v11271_v17  ;;  %v650_v24 = vmul.u32 %v648_v40, %v624_v1 }
  0xbf   :  { %v1138_v4 = vadd.s32 %v1137_v16, %v1133_v31  ;;  %v12246_v30 = vmul.u32 %v648_v40, %v625_v35  ;;  %v628_v18 = vmul.u32 %v626_v15, %v624_v1  ;;  %v630_v43 = vmul.u32 %v626_v15, %v625_v35 }
  0xc0   :  { %v895_v41 = vadd.s32 1, %v11279_v55  ;;  %vm658_vm14 = vc.u32 %v650_v24, %v654_v20  ;;  %v12248_v44 = vadd.s32 %v654_v20, %v650_v24  ;;  %v534_v47 = vsub.s32 4294967266, %v529_v22 }
  0xc1   :  { %v1139_v9 = vadd.s32 536870912, %v1138_v4  ;;  %vm636_vm15 = vc.u32 %v628_v18, %v632_v28  ;;  %v638_v29 = vadd.s32 %v632_v28, %v628_v18  ;;  %v656_v61 = vshll.u32 %v12246_v30, 16  ;;  %11664 = vset.pattern.permute.xlu2 %v19480_v2  ;;  %11665 = vset.pattern.permute.xlu1 %v19490_v3 }
  0xc2   :  { %v634_v63 = vshll.u32 %v630_v43, 16  ;;  %v659_v52 = vsel %vm658_vm14, 1, %v19490_v3  ;;  %vm896_vm0 = vcmp.gt.s32.totalorder %v895_v41, 0  ;;  %v530_v17 = vsub.s32 32, %v529_v22  ;;  %319 = vperm.xlu2 %11664, %v11966_v10  }
  0xc3   :  { %v637_v7 = vsel %vm636_vm15, 1, %v19490_v3  ;;  %v653_v16 = vmul.u32 %v649_v54, %v625_v35  ;;  %vm662_vm2 = vc.u32 %v12248_v44, %v656_v61  ;;  %v535_v1 = vadd.s32 127, %v534_v47 }
  0xc4   :  { %v12254_v40 = vshrl.u32 %v1139_v9, 30  ;;  %v631_v31 = vmul.u32 %v627_v14, %v625_v35  ;;  %vm640_vm3 = vc.u32 %v638_v29, %v634_v63  ;;  %v514_v15 = vadd.s32 %v12101_v45, %v12082_v32 }
  0xc5   :  { %v661_v55 = vadd.s32 %v659_v52, %v653_v16  ;;  %v897_v20 = vsel %vm896_vm0, %v895_v41, 0  ;;  %v663_v54 = vsel %vm662_vm2, 1, %v19490_v3  ;;  %v641_v24 = vsel %vm640_vm3, 1, %v19490_v3 }
  0xc6   :  { %v639_v0 = vadd.s32 %v637_v7, %v631_v31  ;;  %v532_v28 = vshrl.u32 %v514_v15, %v530_v17  ;;  %v536_v18 = vshll.u32 %v535_v1, 23  ;;  %v1141_v14 = vshll.u32 %v12254_v40, 30 }
  0xc7   :  { %v899_v35 = vand.u32 31, %v897_v20  ;;  %v531_v47 = vshll.u32 %v12157_v21, %v529_v22  ;;  %v665_v9 = vadd.s32 %v663_v54, %v661_v55  ;;  %v655_v41 = vshrl.u32 %v651_v12, 16 }
  0xc8   :  { %v643_v32 = vadd.s32 %v641_v24, %v639_v0  ;;  %v537_v29 = vor.u32 4788187, %v536_v18  ;;  %v12265_v10 = vsub.s32 %v1138_v4, %v1141_v14  ;;  %v633_v63 = vshrl.u32 %v12238_v42, 16  ;;  %v228_v18 = vpop.permute.xlu0 %227 }
  0xc9   :  { %v533_v45 = vor.u32 %v532_v28, %v531_v47  ;;  %v12268_v52 = vsub.s32 32, %v899_v35  ;;  %v666_v17 = vadd.s32 %v665_v9, %v655_v41  ;;  %v612_v7 = vsel %vm610_vm7, %v12169_v46, 2102212464 }
  0xca   :  { %11666 = vset.pattern.permute.xlu2 %v19490_v3  ;;  %v644_v16 = vadd.s32 %v643_v32, %v633_v63  ;;  %v591_v22 = vshrl.u32 %v19483_v5, %v12132_v34  ;;  %v657_v12 = vshrl.u32 %v12246_v30, 16  ;;  %v538_v4 = vand.u32 2147483647, %v537_v29 }
  0xcb   :  { %v540_v21 = vcvt.s32.f32 %v533_v45  ;;  %vm1143_vm4 = vcmp.lt.s32.totalorder %v12265_v10, 0  ;;  %v635_v42 = vshrl.u32 %v630_v43, 16  ;;  %v912_v1 = vshrl.u32 %v19494_v51, %v12268_v52 }
  0xcc   :  { %v1144_v31 = vsub.s32 0, %v12265_v10  ;;  %v611_v46 = vsel %vm607_vm9, %v591_v22, %v12165_v53  ;;  %v613_v15 = vsel %vm609_vm10, %v12167_v56, %v612_v7  ;;  %v667_v34 = vadd.s32 %v666_v17, %v657_v12 }
  0xcd   :  { %v12287_v55 = vadd.s32 %v644_v16, %v635_v42  ;;  %v19479_v30 = vand.u32 2147483647, %v12202_v25  ;;  %v911_v43 = vshll.u32 %v19492_v57, %v899_v35  ;;  %v19800_v0 = vmov 1326507024  }
  0xce   :  { %v915_v54 = vshrl.u32 %v19800_v0, %v12268_v52  ;;  %v12293_v28 = vshrl.u32 %v897_v20, 5  ;;  %v903_v24 = vshrl.u32 %v19488_v60, %v12268_v52  ;;  %v906_v53 = vshrl.u32 %v19485_v62, %v12268_v52 }
  0xcf   :  { %v909_v56 = vshrl.u32 %v19492_v57, %v12268_v52  ;;  %v614_v14 = vsel %vm608_vm11, %v611_v46, %v613_v15  ;;  %v12304_v47 = vadd.s32 %v12248_v44, %v656_v61  ;;  %v913_v9 = vor.u32 %v912_v1, %v911_v43 }
  0xd0   :  { %v914_v20 = vshll.u32 %v19494_v51, %v899_v35  ;;  %v671_v32 = vadd.s32 1, %v667_v34  ;;  %v902_v45 = vshll.u32 %v19483_v5, %v899_v35  ;;  %v905_v41 = vshll.u32 %v19488_v60, %v899_v35 }
  0xd1   :  { %v908_v29 = vshll.u32 %v19485_v62, %v899_v35  ;;  %vm670_vm5 = vc.u32 %v12287_v55, %v12304_v47  ;;  %v892_v8 = vand.u32 8388607, %v19479_v30  ;;  %v12317_v44 = vsel %vm11916_vm1, %v11926_v38, %v228_v18 }
  0xd2   :  { %v916_v63 = vor.u32 %v915_v54, %v914_v20  ;;  %19801 = vst [vmem:[#allocation13_spill] sm:$0xff] %v12317_v44  ;;  %v12319_v61 = vor.u32 %v903_v24, %v902_v45  ;;  %v12321_v17 = vor.u32 %v906_v53, %v905_v41  ;;  %vm920_vm6 = vcmp.lt.s32.totalorder %v12293_v28, 4 }
  0xd3   :  { %v12323_v7 = vor.u32 %v909_v56, %v908_v29  ;;  %v926_v35 = vsel %vm920_vm6, %v913_v9, 920167782  ;;  %v541_v16 = vmul.f32 %v540_v21, %v538_v4  ;;  %v1145_v22 = vsel %vm1143_vm4, %v1144_v31, %v12265_v10 }
  0xd4   :  { %v672_v12 = vsel %vm670_vm5, %v671_v32, %v667_v34  ;;  %v12333_v38 = vmul.f32 %v11920_v36, %v12317_v44  ;;  %v668_v42 = vmul.u32 %v12217_v48, %v614_v14  ;;  %vm917_vm7 = vcmp.lt.s32.totalorder %v12293_v28, 1 }
  0xd5   :  { %vm919_vm8 = vcmp.lt.s32.totalorder %v12293_v28, 3  ;;  %v930_v1 = vsel %vm920_vm6, %v916_v63, 1326507024  ;;  %v893_v46 = vor.u32 8388608, %v892_v8  ;;  %v925_v21 = vsel %vm917_vm7, %v12319_v61, %v12321_v17 }
  0xd6   :  { %19802 = vst [vmem:[#allocation14_spill] sm:$0xff] %v12333_v38  ;;  %v927_v4 = vsel %vm919_vm8, %v12323_v7, %v926_v35  ;;  %v1146_v31 = vclz %v1145_v22  ;;  %v673_v15 = vadd.s32 %v672_v12, %v668_v42  ;;  %vm918_vm9 = vcmp.lt.s32.totalorder %v12293_v28, 2 }
  0xd7   :  { %v929_v48 = vsel %vm917_vm7, %v12321_v17, %v12323_v7  ;;  %v931_v34 = vsel %vm919_vm8, %v913_v9, %v930_v1  ;;  %v733_v43 = vand.u32 2139095040, %v12333_v38  ;;  %v542_v54 = vxor.u32 2147483648, %v541_v16 }
  0xd8   :  { %v928_v24 = vsel %vm918_vm9, %v925_v21, %v927_v4  ;;  %v12357_v53 = vshll.u32 %v893_v46, 8  ;;  %v11283_v56 = vadd.s32 4294967294, %v1146_v31  ;;  %v674_v18 = vadd.s32 536870912, %v673_v15 }
  0xd9   :  { %v932_v14 = vsel %vm918_vm9, %v929_v48, %v931_v34  ;;  %vm422_vm10 = vcmp.lt.s32.totalorder %v11930_v39, 0  ;;  %v959_v20 = vshrl.u32 %v928_v24, 16  ;;  %v734_v32 = vshrl.u32 %v733_v43, 23 }
  0xda   :  { %v543_v9 = vsel %vm422_vm10, %v542_v54, %v541_v16  ;;  %v934_v45 = vand.u32 65535, %v12357_v53  ;;  %v937_v41 = vshrl.u32 %v932_v14, 16  ;;  %v19803_v29 = vand.u32 2147483647, %v11930_v39 }
  0xdb   :  { %vm11284_vm12 = vcmp.lt.s32.totalorder %v11283_v56, 0  ;;  %v12371_v63 = vshrl.u32 %v674_v18, 30  ;;  %v11276_v16 = vadd.s32 4294967169, %v734_v32  ;;  %v958_v1 = vand.u32 65535, %v928_v24 }
  0xdc   :  { %vm12367_vm11 = vcmp.le.f32.partialorder %v19803_v29, 0.7853982  ;;  %v12378_v22 = vmul.u32 %v959_v20, %v934_v45  ;;  %v1149_v12 = vsel %vm11284_vm12, 0, %v11283_v56  ;;  %v12380_v42 = vmul.u32 %v937_v41, %v934_v45 }
  0xdd   :  { %v12376_v35 = vsel %vm12367_vm11, %v11930_v39, %v543_v9  ;;  %v676_v21 = vshll.u32 %v12371_v63, 30  ;;  %v936_v4 = vand.u32 65535, %v932_v14  ;;  %v935_v31 = vshrl.u32 %v12357_v53, 16 }
  0xde   :  { %v12384_v46 = vmul.f32 %v12376_v35, %v12376_v35  ;;  %v964_v48 = vshll.u32 %v12378_v22, 16  ;;  %v740_v34 = vadd.s32 1, %v11276_v16  ;;  %v1154_v43 = vsub.s32 4294967266, %v1149_v12 }
  0xdf   :  { %v942_v54 = vshll.u32 %v12380_v42, 16  ;;  %v960_v18 = vmul.u32 %v958_v1, %v934_v45  ;;  %v12390_v56 = vmul.u32 %v958_v1, %v935_v31  ;;  %v12393_v32 = vsub.s32 %v673_v15, %v676_v21 }
  0xe0   :  { %v556_v24 = vmul.f32 -0.00019511016, %v12384_v46  ;;  %v938_v9 = vmul.u32 %v936_v4, %v934_v45  ;;  %v12395_v29 = vmul.u32 %v936_v4, %v935_v31  ;;  %vm741_vm14 = vcmp.gt.s32.totalorder %v740_v34, 0 }
  0xe1   :  { %vm968_vm13 = vc.u32 %v960_v18, %v964_v48  ;;  %v12397_v14 = vadd.s32 %v964_v48, %v960_v18  ;;  %v1150_v30 = vsub.s32 32, %v1149_v12  ;;  %v1155_v2 = vadd.s32 127, %v1154_v43 }
  0xe2   :  { %v544_v16 = vsub.s32 4, %v12130_v58  ;;  %vm946_vm15 = vc.u32 %v938_v9, %v942_v54  ;;  %v948_v49 = vadd.s32 %v942_v54, %v938_v9  ;;  %v19487_v1 = vshll.u32 %v12390_v56, 16 }
  0xe3   :  { %v557_v5 = vadd.f32 0.008332121, %v556_v24  ;;  %v1134_v15 = vadd.s32 %v12231_v23, %v12219_v13  ;;  %v969_v45 = vsel %vm968_vm13, 1, %v19490_v3  ;;  %v742_v21 = vsel %vm741_vm14, %v740_v34, 0 }
  0xe4   :  { %v679_v4 = vsub.s32 0, %v12393_v32  ;;  %v944_v48 = vshll.u32 %v12395_v29, 16  ;;  %v963_v18 = vmul.u32 %v959_v20, %v935_v31  ;;  %vm972_vm0 = vc.u32 %v12397_v14, %v19487_v1 }
  0xe5   :  { %v1152_v43 = vshrl.u32 %v1134_v15, %v1150_v30  ;;  %v1156_v54 = vshll.u32 %v1155_v2, 23  ;;  %vm678_vm2 = vcmp.lt.s32.totalorder %v12393_v32, 0  ;;  %v947_v24 = vsel %vm946_vm15, 1, %v19490_v3 }
  0xe6   :  { %v941_v9 = vmul.u32 %v937_v41, %v935_v31  ;;  %vm950_vm3 = vc.u32 %v948_v49, %v944_v48  ;;  %v971_v13 = vadd.s32 %v969_v45, %v963_v18  ;;  %v744_v23 = vand.u32 31, %v742_v21 }
  0xe7   :  { %v1151_v34 = vshll.u32 %v12265_v10, %v1149_v12  ;;  %v973_v62 = vsel %vm972_vm0, 1, %v19490_v3  ;;  %v545_v20 = vsel %vm422_vm10, %v544_v16, %v12130_v58  ;;  %v549_v1 = vmul.f32 -0.001358992, %v12384_v46 }
  0xe8   :  { %v680_v2 = vsel %vm678_vm2, %v679_v4, %v12393_v32  ;;  %v949_v30 = vadd.s32 %v947_v24, %v941_v9  ;;  %v558_v15 = vmul.f32 %v557_v5, %v12384_v46  ;;  %v1157_v41 = vor.u32 4788187, %v1156_v54  ;;  %v86_v5 = vpop.permute.xlu1 %85 }
  0xe9   :  { %v1153_v60 = vor.u32 %v1152_v43, %v1151_v34  ;;  %v951_v49 = vsel %vm950_vm3, 1, %v19490_v3  ;;  %v975_v31 = vadd.s32 %v973_v62, %v971_v13  ;;  %v12420_v45 = vsub.s32 32, %v744_v23  ;;  %v240_v43 = vpop.permute.xlu0 %239 }
  0xea   :  { %v681_v10 = vclz %v680_v2  ;;  %v12424_v12 = vsel %vm12367_vm11, 0, %v545_v20  ;;  %v953_v58 = vadd.s32 %v951_v49, %v949_v30  ;;  %v965_v16 = vshrl.u32 %v12378_v22, 16 }
  0xeb   :  { %v550_v48 = vadd.f32 0.041655596, %v549_v1  ;;  %v559_v4 = vadd.f32 -0.16666654, %v558_v15  ;;  %v1158_v18 = vand.u32 2147483647, %v1157_v41  ;;  %v1160_v24 = vcvt.s32.f32 %v1153_v60 }
  0xec   :  { %v943_v54 = vshrl.u32 %v12380_v42, 16  ;;  %v976_v9 = vadd.s32 %v975_v31, %v965_v16  ;;  %v757_v13 = vshrl.u32 %v19494_v51, %v12420_v45  ;;  %v11274_v8 = vadd.s32 4294967294, %v681_v10 }
  0xed   :  { %v922_v34 = vsel %vm920_vm6, %v12323_v7, 2102212464  ;;  %v967_v22 = vshrl.u32 %v12390_v56, 16  ;;  %v760_v60 = vshrl.u32 %v19800_v0, %v12420_v45  ;;  %v12437_v20 = vshrl.u32 %v742_v21, 5 }
  0xee   :  { %v954_v1 = vadd.s32 %v953_v58, %v943_v54  ;;  %v756_v42 = vshll.u32 %v19492_v57, %v744_v23  ;;  %v12442_v2 = vsel %vm11916_vm1, %v86_v5, %v240_v43  ;;  %v19807_v30 = vmov 2475754826  }
  0xef   :  { %19806 = vst [vmem:[#allocation15_spill] sm:$0xff] %v12442_v2  ;;  %v748_v15 = vshrl.u32 %v19807_v30, %v12420_v45  ;;  %v19808_v41 = vmov 2131351028   ;;  %v754_v49 = vshrl.u32 %v19492_v57, %v12420_v45  ;;  %v759_v31 = vshll.u32 %v19494_v51, %v744_v23 }
  0xf0   :  { %v751_v7 = vshrl.u32 %v19808_v41, %v12420_v45  ;;  %v945_v21 = vshrl.u32 %v12395_v29, 16  ;;  %v977_v10 = vadd.s32 %v976_v9, %v967_v22  ;;  %v19809_v58 = vmov 683565275  }
  0xf1   :  { %v747_v16 = vshll.u32 %v19809_v58, %v744_v23  ;;  %v758_v54 = vor.u32 %v757_v13, %v756_v42  ;;  %vm1042_vm4 = vcmp.lt.s32.totalorder %v11951_v59, 0  ;;  %v750_v5 = vshll.u32 %v19807_v30, %v744_v23 }
  0xf2   :  { %v753_v43 = vshll.u32 %v19808_v41, %v744_v23  ;;  %v761_v3 = vor.u32 %v760_v60, %v759_v31  ;;  %v12458_v62 = vmul.f32 %v11920_v36, %v12442_v2  ;;  %v1161_v57 = vmul.f32 %v1160_v24, %v1158_v18 }
  0xf3   :  { %v901_v51 = vshrl.u32 %v19809_v58, %v12268_v52  ;;  %v12462_v29 = vadd.s32 %v954_v1, %v945_v21  ;;  %v19811_v9 = vand.u32 2147483647, %v12333_v38  ;;  %v12466_v22 = vor.u32 %v748_v15, %v747_v16 }
  0xf4   :  { %19810 = vst [vmem:[#allocation16_spill] sm:$0xff] %v12458_v62  ;;  %v12468_v42 = vor.u32 %v751_v7, %v750_v5  ;;  %v12470_v44 = vor.u32 %v754_v49, %v753_v43  ;;  %vm765_vm5 = vcmp.lt.s32.totalorder %v12437_v20, 4  ;;  %v923_v52 = vsel %vm919_vm8, %v12321_v17, %v922_v34 }
  0xf5   :  { %v737_v13 = vand.u32 8388607, %v19811_v9  ;;  %v921_v23 = vsel %vm917_vm7, %v901_v51, %v12319_v61  ;;  %v19812_v18 = vshll.u32 %v12390_v56, 16  ;;  %v771_v60 = vsel %vm765_vm5, %v758_v54, 920167782 }
  0xf6   :  { %vm11275_vm6 = vcmp.lt.s32.totalorder %v11274_v8, 0  ;;  %v981_v1 = vadd.s32 1, %v977_v10  ;;  %v775_v15 = vsel %vm765_vm5, %v761_v3, 1326507024  ;;  %v1198_v7 = vand.u32 2139095040, %v12458_v62 }
  0xf7   :  { %v12482_v24 = vadd.s32 %v12397_v14, %v19812_v18  ;;  %v1162_v51 = vxor.u32 2147483648, %v1161_v57  ;;  %vm762_vm8 = vcmp.lt.s32.totalorder %v12437_v20, 1  ;;  %vm764_vm10 = vcmp.lt.s32.totalorder %v12437_v20, 3 }
  0xf8   :  { %v924_v61 = vsel %vm918_vm9, %v921_v23, %v923_v52  ;;  %v738_v17 = vor.u32 8388608, %v737_v13  ;;  %v770_v56 = vsel %vm762_vm8, %v12466_v22, %v12468_v42  ;;  %v772_v3 = vsel %vm764_vm10, %v12470_v44, %v771_v60 }
  0xf9   :  { %vm980_vm7 = vc.u32 %v12462_v29, %v12482_v24  ;;  %v551_v14 = vmul.f32 %v550_v48, %v12384_v46  ;;  %v684_v34 = vsel %vm11275_vm6, 0, %v11274_v8  ;;  %v774_v49 = vsel %vm762_vm8, %v12468_v42, %v12470_v44 }
  0xfa   :  { %v776_v28 = vsel %vm764_vm10, %v758_v54, %v775_v15  ;;  %v564_v31 = vadd.s32 3, %v12424_v12  ;;  %v982_v21 = vsel %vm980_vm7, %v981_v1, %v977_v10  ;;  %vm763_vm9 = vcmp.lt.s32.totalorder %v12437_v20, 2 }
  0xfb   :  { %v1199_v16 = vshrl.u32 %v1198_v7, 23  ;;  %v560_v5 = vmul.f32 %v559_v4, %v12384_v46  ;;  %v1163_v48 = vsel %vm1042_vm4, %v1162_v51, %v1161_v57  ;;  %v978_v8 = vmul.u32 %v12357_v53, %v924_v61 }
  0xfc   :  { %v12517_v43 = vsel %vm763_vm9, %v770_v56, %v772_v3  ;;  %v689_v9 = vsub.s32 4294967266, %v684_v34  ;;  %v12521_v54 = vsel %vm763_vm9, %v774_v49, %v776_v28  ;;  %v12523_v10 = vshll.u32 %v738_v17, 8 }
  0xfd   :  { %v552_v13 = vadd.f32 -0.4999988, %v551_v14  ;;  %v19813_v23 = vand.u32 2147483647, %v11951_v59  ;;  %v1164_v57 = vsub.s32 4, %v12254_v40  ;;  %v12532_v53 = vadd.s32 %v982_v21, %v978_v8 }
  0xfe   :  { %v19498_v18 = vshrl.u32 %v12517_v43, 16  ;;  %v11285_v60 = vadd.s32 4294967169, %v1199_v16  ;;  %v561_v1 = vadd.f32 1.0, %v560_v5  ;;  %v12540_v15 = vand.u32 3, %v564_v31 }
  0xff   :  { %vm12527_vm11 = vcmp.le.f32.partialorder %v19813_v23, 0.7853982  ;;  %v19497_v7 = vshrl.u32 %v12521_v54, 16  ;;  %v685_v51 = vsub.s32 32, %v684_v34  ;;  %v690_v61 = vadd.s32 127, %v689_v9 }
 0x100   :  { %v12537_v52 = vsel %vm12527_vm11, %v11951_v59, %v1163_v48  ;;  %v779_v17 = vand.u32 65535, %v12523_v10  ;;  %v553_v56 = vmul.f32 %v552_v13, %v12384_v46  ;;  %v1165_v3 = vsel %vm1042_vm4, %v1164_v57, %v12254_v40 }
 0x101   :  { %v12550_v14 = vmul.f32 %v12537_v52, %v12537_v52  ;;  %v984_v49 = vadd.s32 536870912, %v12532_v53  ;;  %v669_v31 = vadd.s32 %v12304_v47, %v12287_v55  ;;  %v1205_v46 = vadd.s32 1, %v11285_v60 }
 0x102   :  { %v12558_v21 = vmul.u32 %v19498_v18, %v779_v17  ;;  %v12561_v16 = vmul.f32 %v561_v1, %v12376_v35  ;;  %vm567_vm12 = vcmp.eq.s32.totalorder %v12540_v15, 0  ;;  %v12565_v40 = vand.u32 3, %v12424_v12 }
 0x103   :  { %v12569_v5 = vmul.u32 %v19497_v7, %v779_v17  ;;  %v12573_v55 = vsel %vm12527_vm11, 0, %v1165_v3  ;;  %v687_v47 = vshrl.u32 %v669_v31, %v685_v51  ;;  %v691_v48 = vshll.u32 %v690_v61, 23  ;;  %v244_v31 = vpop.permute.xlu0 %243 }
 0x104   :  { %v803_v8 = vand.u32 65535, %v12517_v43  ;;  %v554_v9 = vadd.f32 1.0, %v553_v56  ;;  %v1169_v35 = vmul.f32 -0.001358992, %v12550_v14  ;;  %v12577_v13 = vshrl.u32 %v984_v49, 30  ;;  %v91_v49 = vpop.permute.xlu1 %90 }
 0x105   :  { %v781_v12 = vand.u32 65535, %v12521_v54  ;;  %v686_v23 = vshll.u32 %v12393_v32, %v684_v34  ;;  %v780_v57 = vshrl.u32 %v12523_v10, 16  ;;  %v809_v60 = vshll.u32 %v12558_v21, 16 }
 0x106   :  { %19816 = vst [vmem:[#allocation17_spill] sm:$0xff] %v12577_v13  ;;  %vm1206_vm13 = vcmp.gt.s32.totalorder %v1205_v46, 0  ;;  %v568_v4 = vxor.u32 2147483648, %v12561_v16  ;;  %vm5526_vm14 = vcmp.eq.s32.totalorder %v12565_v40, 0  ;;  %v1176_v1 = vmul.f32 -0.00019511016, %v12550_v14 }
 0x107   :  { %v12587_v51 = vadd.s32 3, %v12573_v55  ;;  %v787_v61 = vshll.u32 %v12569_v5, 16  ;;  %vm570_vm15 = vcmp.eq.s32.totalorder %v12540_v15, 2  ;;  %v688_v56 = vor.u32 %v687_v47, %v686_v23 }
 0x108   :  { %v692_v32 = vor.u32 4788187, %v691_v48  ;;  %v805_v34 = vmul.u32 %v803_v8, %v779_v17  ;;  %v12591_v3 = vmul.u32 %v803_v8, %v780_v57  ;;  %vm5529_vm0 = vcmp.eq.s32.totalorder %v12565_v40, 2 }
 0x109   :  { %v986_v28 = vshll.u32 %v12577_v13, 30  ;;  %v783_v7 = vmul.u32 %v781_v12, %v779_v17  ;;  %v12595_v18 = vmul.u32 %v781_v12, %v780_v57  ;;  %v1207_v2 = vsel %vm1206_vm13, %v1205_v46, 0 }
 0x10a   :  { %vm566_vm2 = vcmp.lt.s32.totalorder %v12540_v15, 2  ;;  %v571_v6 = vxor.u32 2147483648, %v554_v9  ;;  %vm5525_vm3 = vcmp.lt.s32.totalorder %v12565_v40, 2  ;;  %v1170_v47 = vadd.f32 0.041655596, %v1169_v35 }
 0x10b   :  { %vm813_vm4 = vc.u32 %v805_v34, %v809_v60  ;;  %v12600_v48 = vadd.s32 %v809_v60, %v805_v34  ;;  %v1177_v8 = vadd.f32 0.008332121, %v1176_v1  ;;  %vm791_vm6 = vc.u32 %v783_v7, %v787_v61 }
 0x10c   :  { %v793_v23 = vadd.s32 %v787_v61, %v783_v7  ;;  %v12604_v11 = vsel %vm11916_vm1, %v91_v49, %v244_v31  ;;  %v569_v17 = vsel %vm567_vm12, %v554_v9, %v568_v4  ;;  %v693_v46 = vand.u32 2147483647, %v692_v32 }
 0x10d   :  { %19817 = vst [vmem:[#allocation18_spill] sm:$0xff] %v12604_v11  ;;  %v19509_v12 = vshll.u32 %v12591_v3, 16  ;;  %v1209_v50 = vand.u32 31, %v1207_v2  ;;  %v695_v38 = vcvt.s32.f32 %v688_v56  ;;  %v12610_v35 = vsub.s32 %v12532_v53, %v986_v28 }
 0x10e   :  { %v789_v60 = vshll.u32 %v12595_v18, 16  ;;  %v19819_v1 = vmov 0   ;;  %v19820_v61 = vshrl.u32 %v12517_v43, 16  ;;  %v12622_v32 = vmul.f32 %v11920_v36, %v12604_v11 }
 0x10f   :  { %19818 = vst [vmem:[#allocation19_spill] sm:$0xff] %v12610_v35  ;;  %v814_v34 = vsel %vm813_vm4, 1, %v19819_v1  ;;  %v792_v7 = vsel %vm791_vm6, 1, %v19819_v1  ;;  %vm817_vm7 = vc.u32 %v12600_v48, %v19509_v12  ;;  %v1171_v53 = vmul.f32 %v1170_v47, %v12550_v14 }
 0x110   :  { %v808_v49 = vmul.u32 %v19820_v61, %v780_v57  ;;  %19821 = vst [vmem:[#allocation20_spill] sm:$0xff] %v12622_v32  ;;  %v1178_v28 = vmul.f32 %v1177_v8, %v12550_v14  ;;  %v19822_v56 = vshrl.u32 %v12521_v54, 16  ;;  %vm795_vm11 = vc.u32 %v793_v23, %v789_v60 }
 0x111   :  { %v5528_v43 = vsel %vm5526_vm14, %v554_v9, %v568_v4  ;;  %v696_v61 = vmul.f32 %v695_v38, %v693_v46  ;;  %v12630_v25 = vsub.s32 32, %v1209_v50  ;;  %v572_v12 = vsel %vm570_vm15, %v571_v6, %v12561_v16 }
 0x112   :  { %v786_v31 = vmul.u32 %v19822_v56, %v780_v57  ;;  %v816_v13 = vadd.s32 %v814_v34, %v808_v49  ;;  %v989_v11 = vsub.s32 0, %v12610_v35  ;;  %v818_v8 = vsel %vm817_vm7, 1, %v19819_v1 }
 0x113   :  { %19823 = vst [vmem:[#allocation21_spill] sm:$0xff] %v12630_v25  ;;  %v5531_v54 = vsel %vm5529_vm0, %v571_v6, %v12561_v16  ;;  %vm988_vm12 = vcmp.lt.s32.totalorder %v12610_v35, 0  ;;  %v796_v38 = vsel %vm795_vm11, 1, %v19819_v1  ;;  %v1353_v9 = vand.u32 2139095040, %v12622_v32 }
 0x114   :  { %v794_v47 = vadd.s32 %v792_v7, %v786_v31  ;;  %v12645_v57 = vsel %vm566_vm2, %v569_v17, %v572_v12  ;;  %v12649_v4 = vsel %vm5525_vm3, %v5528_v43, %v5531_v54  ;;  %v1172_v23 = vadd.f32 -0.4999988, %v1171_v53 }
 0x115   :  { %v1179_v46 = vadd.f32 -0.16666654, %v1178_v28  ;;  %vm577_vm13 = vcmp.lt.s32.totalorder %v12029_v19, 0  ;;  %v697_v60 = vxor.u32 2147483648, %v696_v61  ;;  %v746_v6 = vshrl.u32 %v19809_v58, %v12420_v45 }
 0x116   :  { %v820_v16 = vadd.s32 %v818_v8, %v816_v13  ;;  %v19824_v34 = vmov 920167782   ;;  %v990_v15 = vsel %vm988_vm12, %v989_v11, %v12610_v35  ;;  %v798_v17 = vadd.s32 %v796_v38, %v794_v47 }
 0x117   :  { %v1222_v7 = vshrl.u32 %v19824_v34, %v12630_v25  ;;  %v810_v12 = vshrl.u32 %v12558_v21, 16  ;;  %v1225_v40 = vshrl.u32 %v19800_v0, %v12630_v25  ;;  %v12661_v53 = vshrl.u32 %v1207_v2, 5 }
 0x118   :  { %v19825_v28 = vmov 2102212464   ;;  %v1354_v31 = vshrl.u32 %v1353_v9, 23  ;;  %v1213_v45 = vshrl.u32 %v19807_v30, %v12630_v25  ;;  %v1216_v13 = vshrl.u32 %v19808_v41, %v12630_v25 }
 0x119   :  { %v1221_v56 = vshll.u32 %v19825_v28, %v1209_v50  ;;  %v1219_v11 = vshrl.u32 %v19825_v28, %v12630_v25  ;;  %v1224_v21 = vshll.u32 %v19824_v34, %v1209_v50  ;;  %v991_v43 = vclz %v990_v15 }
 0x11a   :  { %v788_v47 = vshrl.u32 %v12569_v5, 16  ;;  %v821_v8 = vadd.s32 %v820_v16, %v810_v12  ;;  %v19826_v54 = vand.u32 2147483647, %v12029_v19  ;;  %v1212_v9 = vshll.u32 %v19809_v58, %v1209_v50 }
 0x11b   :  { %v1223_v2 = vor.u32 %v1222_v7, %v1221_v56  ;;  %v1215_v49 = vshll.u32 %v19807_v30, %v1209_v50  ;;  %v1218_v59 = vshll.u32 %v19808_v41, %v1209_v50  ;;  %v1226_v25 = vor.u32 %v1225_v40, %v1224_v21 }
 0x11c   :  { %vm12674_vm14 = vcmp.le.f32.partialorder %v19826_v54, 0.7853982  ;;  %v799_v35 = vadd.s32 %v798_v17, %v788_v47  ;;  %v812_v15 = vshrl.u32 %v12591_v3, 16  ;;  %v19829_v5 = vand.u32 2147483647, %v12458_v62 }
 0x11d   :  { %v11288_v7 = vadd.s32 4294967169, %v1354_v31  ;;  %vm563_vm15 = vweird.f32 %v11930_v39  ;;  %v12685_v12 = vor.u32 %v1213_v45, %v1212_v9  ;;  %v12687_v56 = vor.u32 %v1216_v13, %v1215_v49 }
 0x11e   :  { %v1202_v16 = vand.u32 8388607, %v19829_v5  ;;  %v12689_v54 = vor.u32 %v1219_v11, %v1218_v59  ;;  %vm1230_vm0 = vcmp.lt.s32.totalorder %v12661_v53, 4  ;;  %v1180_v50 = vmul.f32 %v1179_v46, %v12550_v14 }
 0x11f   :  { %v698_v17 = vsel %vm577_vm13, %v697_v60, %v696_v61  ;;  %v790_v40 = vshrl.u32 %v12595_v18, 16  ;;  %v1236_v31 = vsel %vm1230_vm0, %v1223_v2, 920167782  ;;  %v19830_v21 = vand.u32 3, %v11906_v27 }
 0x120   :  { %v19831_v45 = vmov 0  ;;  %v766_v59 = vsel %vm762_vm8, %v746_v6, %v12466_v22  ;;  %v767_v46 = vsel %vm765_vm5, %v12470_v44, 2102212464  ;;  %v822_v61 = vadd.s32 %v821_v8, %v812_v15 }
 0x121   :  { %vm12700_vm2 = vcmp.lt.s32.totalorder %v19830_v21, 2  ;;  %v1240_v18 = vsel %vm1230_vm0, %v1226_v25, 1326507024  ;;  %v11280_v60 = vadd.s32 4294967294, %v991_v43  ;;  %v12712_v49 = vadd.s32 %v799_v35, %v790_v40 }
 0x122   :  { %v19832_v45 = vsel %vm12700_vm2, 4294967295, %v19831_v45  ;;  %vm1227_vm3 = vcmp.lt.s32.totalorder %v12661_v53, 1  ;;  %vm1229_vm4 = vcmp.lt.s32.totalorder %v12661_v53, 3  ;;  %v1203_v27 = vor.u32 8388608, %v1202_v16 }
 0x123   :  { %19833 = vst [vmem:[#allocation22_spill] sm:$0xff] %v19832_v45  ;;  %v1235_v22 = vsel %vm1227_vm3, %v12685_v12, %v12687_v56  ;;  %v1237_v44 = vsel %vm1229_vm4, %v12689_v54, %v1236_v31  ;;  %v1360_v6 = vadd.s32 1, %v11288_v7  ;;  %v768_v25 = vsel %vm764_vm10, %v12468_v42, %v767_v46  ;;  %v48_v42 = vld [vmem:[%s19469_s0 + $0xd0] sm:$0xff] }
 0x124   :  { %19834 = vst [vmem:[#allocation23_spill] sm:$0xff] %v12712_v49  ;;  %v19835_v35 = vshll.u32 %v12591_v3, 16  ;;  %v1239_v11 = vsel %vm1227_vm3, %v12687_v56, %v12689_v54  ;;  %v1241_v43 = vsel %vm1229_vm4, %v1223_v2, %v1240_v18  ;;  %v1173_v47 = vmul.f32 %v1172_v23, %v12550_v14  ;;  %190 = vperm.xlu1 %11665, %v48_v42  }
 0x125   :  { %v1181_v8 = vadd.f32 1.0, %v1180_v50  ;;  %v826_v9 = vadd.s32 1, %v822_v61  ;;  %vm1228_vm5 = vcmp.lt.s32.totalorder %v12661_v53, 2  ;;  %v12745_v3 = vsel %vm12674_vm14, %v12029_v19, %v698_v17  ;;  %323 = vperm.xlu0 %11667, %v48_v42  }
 0x126   :  { %v12729_v13 = vadd.s32 %v12600_v48, %v19835_v35  ;;  %vm11281_vm8 = vcmp.lt.s32.totalorder %v11280_v60, 0  ;;  %v12751_v14 = vsel %vm1228_vm5, %v1235_v22, %v1237_v44  ;;  %v49_v48 = vld [vmem:[%s19469_s0 + $0xd8] sm:$0xff]  ;;  %v769_v23 = vsel %vm763_vm9, %v766_v59, %v768_v25 }
 0x127   :  { %v12760_v2 = vsel %vm1228_vm5, %v1239_v11, %v1241_v43  ;;  %v12762_v15 = vshll.u32 %v1203_v27, 8  ;;  %vm1361_vm6 = vcmp.gt.s32.totalorder %v1360_v6, 0  ;;  %195 = vperm.xlu2 %11666, %v49_v48   ;;  %v574_v5 = vsel %vm563_vm15, nan, %v12645_v57 }
 0x128   :  { %19836 = vst [vmem:[#allocation24_spill] sm:$0xff] %v12729_v13  ;;  %vm825_vm10 = vc.u32 %v12712_v49, %v12729_v13  ;;  %v5533_v16 = vsel %vm563_vm15, nan, %v12649_v4  ;;  %v12771_v7 = vand.u32 3, %v12587_v51  ;;  %v12774_v20 = vand.u32 3, %v12573_v55 }
 0x129   :  { %v12776_v50 = vadd.f32 1.0, %v1173_v47  ;;  %v12779_v17 = vsel %vm11281_vm8, 0, %v11280_v60  ;;  %v827_v40 = vsel %vm825_vm10, %v826_v9, %v822_v61  ;;  %v1269_v57 = vshrl.u32 %v12751_v14, 16 }
 0x12a   :  { %v12787_v39 = vmul.f32 %v12745_v3, %v12745_v3  ;;  %v823_v51 = vmul.u32 %v12523_v10, %v769_v23  ;;  %v19515_v55 = vshrl.u32 %v12760_v2, 16  ;;  %v1362_v4 = vsel %vm1361_vm6, %v1360_v6, 0 }
 0x12b   :  { %vm19532_vm9 = vcmp.lt.s32.totalorder %v11903_v26, 2  ;;  %v12793_v31 = vmul.f32 %v1181_v8, %v12537_v52  ;;  %v1244_v21 = vand.u32 65535, %v12762_v15  ;;  %v10308_v59 = vsel %vm12700_vm2, %v574_v5, %v5533_v16 }
 0x12c   :  { %vm6145_vm7 = vcmp.eq.s32.totalorder %v12774_v20, 2  ;;  %v999_v46 = vsub.s32 4294967266, %v12779_v17  ;;  %v12800_v61 = vadd.s32 %v827_v40, %v823_v51  ;;  %vm1190_vm11 = vcmp.eq.s32.totalorder %v12771_v7, 2 }
 0x12d   :  { %v1191_v10 = vxor.u32 2147483648, %v12776_v50  ;;  %v12804_v18 = vmul.u32 %v1269_v57, %v1244_v21  ;;  %v1364_v60 = vand.u32 31, %v1362_v4  ;;  %v704_v52 = vmul.f32 -0.001358992, %v12787_v39 }
 0x12e   :  { %v711_v27 = vmul.f32 -0.00019511016, %v12787_v39  ;;  %v12810_v22 = vmul.u32 %v19515_v55, %v1244_v21  ;;  %v1268_v44 = vand.u32 65535, %v12751_v14  ;;  %v19837_v6 = vmov 1  }
 0x12f   :  { %11668 = vset.pattern.permute.xlu1 %v19837_v6  ;;  %v12817_v25 = vsel %vm19532_vm9, %v11924_v37, %v10308_v59  ;;  %v1246_v43 = vand.u32 65535, %v12760_v2  ;;  %v12822_v47 = vadd.s32 127, %v999_v46  ;;  %v829_v8 = vadd.s32 536870912, %v12800_v61 }
 0x130   :  { %19838 = vst [vmem:[#allocation25_spill] sm:$0xff] %v12817_v25  ;;  %327 = vperm.xlu1 %11668, %v49_v48   ;;  %v1245_v9 = vshrl.u32 %v12762_v15, 16  ;;  %v12830_v37 = vsel %vm1190_vm11, %v1191_v10, %v12793_v31  ;;  %v12835_v14 = vsel %vm6145_vm7, %v1191_v10, %v12793_v31  ;;  %v1274_v48 = vshll.u32 %v12804_v18, 16  ;;  %v248_v25 = vpop.permute.xlu1 %247 }
 0x131   :  { %v12838_v23 = vsub.s32 32, %v1364_v60  ;;  %v12840_v5 = vadd.f32 0.041655596, %v704_v52  ;;  %v712_v16 = vadd.f32 0.008332121, %v711_v27  ;;  %v1252_v40 = vshll.u32 %v12810_v22, 16 }
 0x132   :  { %v12843_v51 = vmul.u32 %v1268_v44, %v1245_v9  ;;  %v979_v59 = vadd.s32 %v12482_v24, %v12462_v29  ;;  %v995_v46 = vsub.s32 32, %v12779_v17  ;;  %v12848_v35 = vmul.u32 %v1246_v43, %v1245_v9  ;;  %v96_v24 = vpop.permute.xlu2 %95 }
 0x133   :  { %19839 = vst [vmem:[#allocation26_spill] sm:$0xff] %v12838_v23  ;;  %v1270_v10 = vmul.u32 %v1268_v44, %v1244_v21  ;;  %v1001_v11 = vshll.u32 %v12822_v47, 23  ;;  %v12851_v55 = vshrl.u32 %v829_v8, 30  ;;  %v1248_v42 = vmul.u32 %v1246_v43, %v1244_v21 }
 0x134   :  { %v19841_v52 = vand.u32 2147483647, %v12622_v32  ;;  %v1273_v62 = vmul.u32 %v1269_v57, %v1245_v9  ;;  %v1380_v29 = vshrl.u32 %v19800_v0, %v12838_v23  ;;  %v12862_v47 = vshrl.u32 %v1362_v4, 5 }
 0x135   :  { %19840 = vst [vmem:[#allocation27_spill] sm:$0xff] %v12851_v55  ;;  %vm1278_vm12 = vc.u32 %v1270_v10, %v1274_v48  ;;  %v12857_v6 = vadd.s32 %v1274_v48, %v1270_v10  ;;  %vm1256_vm15 = vc.u32 %v1248_v42, %v1252_v40  ;;  %v1377_v21 = vshrl.u32 %v19824_v34, %v12838_v23 }
 0x136   :  { %v12855_v27 = vand.u32 8388607, %v19841_v52  ;;  %v1254_v43 = vshll.u32 %v12848_v35, 16  ;;  %v1258_v8 = vadd.s32 %v1252_v40, %v1248_v42  ;;  %v1379_v57 = vshll.u32 %v19824_v34, %v1364_v60 }
 0x137   :  { %v12870_v48 = vsel %vm11916_vm1, %v96_v24, %v248_v25  ;;  %v1279_v10 = vsel %vm1278_vm12, 1, %v19819_v1  ;;  %v1371_v4 = vshrl.u32 %v19808_v41, %v12838_v23  ;;  %v1374_v52 = vshrl.u32 %v19825_v28, %v12838_v23 }
 0x138   :  { %19842 = vst [vmem:[#allocation28_spill] sm:$0xff] %v12870_v48  ;;  %11669 = vset.pattern.permute.xlu1 %v19819_v1  ;;  %v1376_v44 = vshll.u32 %v19825_v28, %v1364_v60  ;;  %v1257_v42 = vsel %vm1256_vm15, 1, %v19819_v1  ;;  %v19843_v40 = vshll.u32 %v12843_v51, 16  ;;  %v1368_v24 = vshrl.u32 %v19807_v30, %v12838_v23 }
 0x139   :  { %v1381_v32 = vor.u32 %v1380_v29, %v1379_v57  ;;  %v1370_v26 = vshll.u32 %v19807_v30, %v1364_v60  ;;  %v1373_v0 = vshll.u32 %v19808_v41, %v1364_v60  ;;  %v12893_v28 = vmul.f32 %v11920_v36, %v12870_v48 }
 0x13a   :  { %vm12883_vm8 = vc.u32 %v12857_v6, %v19843_v40  ;;  %v1378_v34 = vor.u32 %v1377_v21, %v1376_v44  ;;  %v831_v13 = vshll.u32 %v12851_v55, 30  ;;  %v19847_v40 = vshrl.u32 %v12760_v2, 16 }
 0x13b   :  { %19846 = vst [vmem:[#allocation29_spill] sm:$0xff] %v12893_v28  ;;  %vm1260_vm10 = vc.u32 %v1258_v8, %v1254_v43  ;;  %v1367_v45 = vshll.u32 %v19809_v58, %v1364_v60  ;;  %v1281_v33 = vadd.s32 %v1279_v10, %v1273_v62  ;;  %v12899_v23 = vor.u32 %v1371_v4, %v1370_v26 }
 0x13c   :  { %v1251_v49 = vmul.u32 %v19847_v40, %v1245_v9  ;;  %v12901_v29 = vor.u32 %v1374_v52, %v1373_v0  ;;  %vm1385_vm6 = vcmp.lt.s32.totalorder %v12862_v47, 4  ;;  %v1283_v21 = vsel %vm12883_vm8, 1, %v19819_v1 }
 0x13d   :  { %v12907_v57 = vor.u32 %v1368_v24, %v1367_v45  ;;  %v1395_v2 = vsel %vm1385_vm6, %v1381_v32, 1326507024  ;;  %vm1187_vm7 = vcmp.eq.s32.totalorder %v12771_v7, 0  ;;  %vm6142_vm11 = vcmp.eq.s32.totalorder %v12774_v20, 0 }
 0x13e   :  { %v1259_v44 = vadd.s32 %v1257_v42, %v1251_v49  ;;  %v713_v26 = vmul.f32 %v712_v16, %v12787_v39  ;;  %v1261_v0 = vsel %vm1260_vm10, 1, %v19819_v1  ;;  %v1391_v62 = vsel %vm1385_vm6, %v1378_v34, 920167782 }
 0x13f   :  { %v1508_v49 = vand.u32 2139095040, %v12893_v28  ;;  %v997_v60 = vshrl.u32 %v979_v59, %v995_v46  ;;  %v1002_v9 = vor.u32 4788187, %v1001_v11  ;;  %vm1382_vm12 = vcmp.lt.s32.totalorder %v12862_v47, 1  ;;  %v19848_v46 = vld [vmem:[#allocation19_spill] sm:$0xff] }
 0x140   :  { %vm1384_vm15 = vcmp.lt.s32.totalorder %v12862_v47, 3  ;;  %v1285_v32 = vadd.s32 %v1283_v21, %v1281_v33  ;;  %v1358_v45 = vor.u32 8388608, %v12855_v27  ;;  %v1394_v16 = vsel %vm1382_vm12, %v12899_v23, %v12901_v29 }
 0x141   :  { %v1396_v43 = vsel %vm1384_vm15, %v1378_v34, %v1395_v2  ;;  %v12928_v8 = vsub.s32 %v12800_v61, %v831_v13  ;;  %v1263_v59 = vadd.s32 %v1261_v0, %v1259_v44  ;;  %v1390_v11 = vsel %vm1382_vm12, %v12907_v57, %v12899_v23 }
 0x142   :  { %v1392_v33 = vsel %vm1384_vm15, %v12901_v29, %v1391_v62  ;;  %v996_v27 = vshll.u32 %v19848_v46, %v12779_v17  ;;  %v1275_v10 = vshrl.u32 %v12804_v18, 16  ;;  %vm1383_vm8 = vcmp.lt.s32.totalorder %v12862_v47, 2 }
 0x143   :  { %v1509_v34 = vshrl.u32 %v1508_v49, 23  ;;  %v19849_v13 = vsub.s32 4, %v12371_v63  ;;  %v706_v4 = vmul.f32 %v12840_v5, %v12787_v39  ;;  %v1253_v52 = vshrl.u32 %v12810_v22, 16 }
 0x144   :  { %v12951_v42 = vsel %vm1383_vm8, %v1394_v16, %v1396_v43  ;;  %vm1186_vm10 = vcmp.lt.s32.totalorder %v12771_v7, 2  ;;  %vm6141_vm9 = vcmp.lt.s32.totalorder %v12774_v20, 2  ;;  %v998_v17 = vor.u32 %v997_v60, %v996_v27 }
 0x145   :  { %v700_v61 = vsel %vm577_vm13, %v19849_v13, %v12371_v63  ;;  %v1286_v18 = vadd.s32 %v1285_v32, %v1275_v10  ;;  %v12957_v25 = vsel %vm1383_vm8, %v1390_v11, %v1392_v33  ;;  %v12959_v63 = vshll.u32 %v1358_v45, 8  ;;  %v19853_v33 = vld [vmem:[#allocation21_spill] sm:$0xff] }
 0x146   :  { %v714_v24 = vadd.f32 -0.16666654, %v713_v26  ;;  %v1003_v5 = vand.u32 2147483647, %v1002_v9  ;;  %v834_v22 = vsub.s32 0, %v12928_v8  ;;  %v1264_v40 = vadd.s32 %v1263_v59, %v1253_v52  ;;  %v19852_v59 = vld [vmem:[#allocation9_spill] sm:$0xff] }
 0x147   :  { %vm833_vm13 = vcmp.lt.s32.totalorder %v12928_v8, 0  ;;  %v1277_v44 = vshrl.u32 %v12843_v51, 16  ;;  %v1402_v21 = vshrl.u32 %v12951_v42, 16  ;;  %v11291_v2 = vadd.s32 4294967169, %v1509_v34  ;;  %v12992_v34 = vpop.permute.xlu2 %100 }
 0x148   :  { %v19850_v0 = vxor.u32 2147483648, %v12793_v31  ;;  %v1255_v60 = vshrl.u32 %v12848_v35, 16  ;;  %v1424_v9 = vshrl.u32 %v12957_v25, 16  ;;  %v1005_v32 = vcvt.s32.f32 %v998_v17  ;;  %19855 = vst [vmem:[#allocation9_spill] sm:$0xff] %v12992_v34 }
 0x149   :  { %v1232_v45 = vsel %vm1230_vm0, %v12689_v54, 2102212464  ;;  %v1287_v16 = vadd.s32 %v1286_v18, %v1277_v44  ;;  %v1399_v43 = vand.u32 65535, %v12959_v63  ;;  %v707_v11 = vadd.f32 -0.4999988, %v706_v4 }
 0x14a   :  { %v1189_v62 = vsel %vm1187_vm7, %v12776_v50, %v19850_v0  ;;  %v19851_v49 = vmov %v19850_v0  ;;  %vm1183_vm7 = vweird.f32 %v19852_v59  ;;  %v835_v31 = vsel %vm833_vm13, %v834_v22, %v12928_v8 }
 0x14b   :  { %v6144_v26 = vsel %vm6142_vm11, %v12776_v50, %v19851_v49  ;;  %v1211_v50 = vshrl.u32 %v19809_v58, %v19853_v33  ;;  %v12985_v46 = vadd.s32 %v1264_v40, %v1255_v60  ;;  %v715_v35 = vmul.f32 %v714_v24, %v12787_v39 }
 0x14c   :  { %v1006_v27 = vmul.f32 %v1005_v32, %v1003_v5  ;;  %v12990_v10 = vmul.u32 %v1402_v21, %v1399_v43  ;;  %v1515_v54 = vadd.s32 1, %v11291_v2  ;;  %v1233_v4 = vsel %vm1229_vm4, %v12687_v56, %v1232_v45  ;;  %v19858_v5 = vld [vmem:[#allocation12_spill] sm:$0xff] }
 0x14d   :  { %19854 = vst [vmem:[#allocation19_spill] sm:$0xff] %v12985_v46  ;;  %v1231_v13 = vsel %vm1227_vm3, %v1211_v50, %v12685_v12  ;;  %v19856_v52 = vshll.u32 %v12843_v51, 16  ;;  %v13007_v18 = vmul.u32 %v1424_v9, %v1399_v43  ;;  %v702_v24 = vsel %vm12674_vm14, 0, %v700_v61 }
 0x14e   :  { %vm887_vm0 = vcmp.lt.s32.totalorder %v19858_v5, 0  ;;  %v836_v22 = vclz %v835_v31  ;;  %v1291_v12 = vadd.s32 1, %v1287_v16  ;;  %v1401_v40 = vand.u32 65535, %v12951_v42 }
 0x14f   :  { %v13003_v17 = vadd.s32 %v12857_v6, %v19856_v52  ;;  %v1193_v56 = vsel %vm1186_vm10, %v1189_v62, %v12830_v37  ;;  %v6148_v6 = vsel %vm6141_vm9, %v6144_v26, %v12835_v14  ;;  %v1423_v38 = vand.u32 65535, %v12957_v25  ;;  %v256_v52 = vpop.permute.xlu2 %255 }
 0x150   :  { %v1234_v51 = vsel %vm1228_vm5, %v1231_v13, %v1233_v4  ;;  %v1400_v61 = vshrl.u32 %v12959_v63, 16  ;;  %v1407_v44 = vshll.u32 %v12990_v10, 16  ;;  %vm1516_vm14 = vcmp.gt.s32.totalorder %v1515_v54, 0 }
 0x151   :  { %19857 = vst [vmem:[#allocation21_spill] sm:$0xff] %v13003_v17  ;;  %vm1290_vm3 = vc.u32 %v12985_v46, %v13003_v17  ;;  %v708_v7 = vmul.f32 %v707_v11, %v12787_v39  ;;  %v716_v37 = vadd.f32 1.0, %v715_v35  ;;  %v19859_v2 = vand.u32 2147483647, %v19858_v5 }
 0x152   :  { %v1007_v14 = vxor.u32 2147483648, %v1006_v27  ;;  %v1429_v0 = vshll.u32 %v13007_v18, 16  ;;  %v11277_v62 = vadd.s32 4294967294, %v836_v22  ;;  %v1292_v53 = vsel %vm1290_vm3, %v1291_v12, %v1287_v16 }
 0x153   :  { %vm13029_vm4 = vcmp.le.f32.partialorder %v19859_v2, 0.7853982  ;;  %v1403_v49 = vmul.u32 %v1401_v40, %v1399_v43  ;;  %v13034_v26 = vmul.u32 %v1401_v40, %v1400_v61  ;;  %v1288_v60 = vmul.u32 %v12762_v15, %v1234_v51  ;;  %v106_v15 = vpop.permute.xlu0 %105 }
 0x154   :  { %v1425_v32 = vmul.u32 %v1423_v38, %v1399_v43  ;;  %v13037_v45 = vmul.u32 %v1423_v38, %v1400_v61  ;;  %v1517_v39 = vsel %vm1516_vm14, %v1515_v54, 0  ;;  %v13041_v11 = vsel %vm1183_vm7, nan, %v1193_v56 }
 0x155   :  { %v13045_v31 = vsel %vm1183_vm7, nan, %v6148_v6  ;;  %vm1411_vm5 = vc.u32 %v1403_v49, %v1407_v44  ;;  %v1413_v33 = vadd.s32 %v1407_v44, %v1403_v49  ;;  %v719_v16 = vadd.s32 3, %v702_v24  ;;  %v19868_v49 = vld [vmem:[#allocation23_spill] sm:$0xff] }
 0x156   :  { %v13047_v50 = vadd.s32 %v1292_v53, %v1288_v60  ;;  %vm1433_vm9 = vc.u32 %v1425_v32, %v1429_v0  ;;  %v13049_v35 = vadd.s32 %v1429_v0, %v1425_v32  ;;  %v13051_v43 = vadd.f32 1.0, %v708_v7  ;;  %v19869_v60 = vld [vmem:[#allocation24_spill] sm:$0xff] }
 0x157   :  { %v13054_v54 = vmul.f32 %v716_v37, %v12745_v3  ;;  %v1409_v13 = vshll.u32 %v13034_v26, 16  ;;  %v1519_v4 = vand.u32 31, %v1517_v39  ;;  %v1008_v59 = vsel %vm887_vm0, %v1007_v14, %v1006_v27 }
 0x158   :  { %vm11278_vm11 = vcmp.lt.s32.totalorder %v11277_v62, 0  ;;  %v1412_v22 = vsel %vm1411_vm5, 1, %v19819_v1  ;;  %v19533_v12 = vshll.u32 %v13037_v45, 16  ;;  %v1406_v40 = vmul.u32 %v1402_v21, %v1400_v61 }
 0x159   :  { %vm1415_vm10 = vc.u32 %v1413_v33, %v1409_v13  ;;  %v1434_v56 = vsel %vm1433_vm9, 1, %v19819_v1  ;;  %v13066_v6 = vsel %vm11916_vm1, %v106_v15, %v256_v52  ;;  %v13068_v38 = vand.u32 3, %v702_v24 }
 0x15a   :  { %19863 = vst [vmem:[#allocation12_spill] sm:$0xff] %v13066_v6  ;;  %v1294_v27 = vadd.s32 536870912, %v13047_v50  ;;  %v1428_v51 = vmul.u32 %v1424_v9, %v1400_v61  ;;  %vm1437_vm13 = vc.u32 %v13049_v35, %v19533_v12  ;;  %v13079_v42 = vsel %vm13029_vm4, %v19858_v5, %v1008_v59 }
 0x15b   :  { %19864 = vst [vmem:[#allocation30_spill] sm:$0xff] %v13079_v42  ;;  %v13081_v21 = vsel %vm11278_vm11, 0, %v11277_v62  ;;  %v1414_v44 = vadd.s32 %v1412_v22, %v1406_v40  ;;  %v13083_v7 = vsub.s32 32, %v1519_v4  ;;  %v1416_v9 = vsel %vm1415_vm10, 1, %v19819_v1 }
 0x15c   :  { %v1436_v61 = vadd.s32 %v1434_v56, %v1428_v51  ;;  %v13092_v37 = vmul.f32 %v11920_v36, %v13066_v6  ;;  %v13094_v2 = vand.u32 3, %v719_v16  ;;  %v1438_v62 = vsel %vm1437_vm13, 1, %v19819_v1 }
 0x15d   :  { %19865 = vst [vmem:[#allocation31_spill] sm:$0xff] %v13083_v7  ;;  %v13101_v53 = vmul.f32 %v13079_v42, %v13079_v42  ;;  %v824_v32 = vadd.s32 %v19869_v60, %v19868_v49  ;;  %v844_v33 = vsub.s32 4294967266, %v13081_v21  ;;  %v13106_v15 = vshrl.u32 %v1294_v27, 30 }
 0x15e   :  { %19867 = vst [vmem:[#allocation32_spill] sm:$0xff] %v13092_v37  ;;  %v1418_v13 = vadd.s32 %v1416_v9, %v1414_v44  ;;  %v1430_v16 = vshrl.u32 %v13007_v18, 16  ;;  %v19870_v59 = vmov 2102212464   ;;  %v19871_v22 = vmov 920167782  }
 0x15f   :  { %v1531_v52 = vshll.u32 %v19870_v59, %v1519_v4  ;;  %v1532_v40 = vshrl.u32 %v19871_v22, %v13083_v7  ;;  %v1440_v56 = vadd.s32 %v1438_v62, %v1436_v61  ;;  %v13113_v25 = vshrl.u32 %v1517_v39, 5 }
 0x160   :  { %v1818_v0 = vand.u32 2139095040, %v13092_v37  ;;  %v1522_v49 = vshll.u32 %v19809_v58, %v1519_v4  ;;  %v1525_v27 = vshll.u32 %v19807_v30, %v1519_v4  ;;  %v1534_v44 = vshll.u32 %v19871_v22, %v1519_v4 }
 0x161   :  { %v19872_v18 = vmov 1326507024   ;;  %v1523_v60 = vshrl.u32 %v19807_v30, %v13083_v7  ;;  %v1526_v61 = vshrl.u32 %v19808_v41, %v13083_v7  ;;  %v1528_v39 = vshll.u32 %v19808_v41, %v1519_v4 }
 0x162   :  { %v1535_v9 = vshrl.u32 %v19872_v18, %v13083_v7  ;;  %v1529_v62 = vshrl.u32 %v19870_v59, %v13083_v7  ;;  %v13129_v14 = vmul.f32 -0.001358992, %v13101_v53  ;;  %v840_v12 = vsub.s32 32, %v13081_v21 }
 0x163   :  { %v1408_v51 = vshrl.u32 %v12990_v10, 16  ;;  %v1533_v6 = vor.u32 %v1532_v40, %v1531_v52  ;;  %v845_v48 = vadd.s32 127, %v844_v33  ;;  %v1441_v42 = vadd.s32 %v1440_v56, %v1430_v16 }
 0x164   :  { %v19873_v17 = vand.u32 2147483647, %v12893_v28  ;;  %vm19544_vm7 = vcmp.lt.s32.totalorder %v13113_v25, 4  ;;  %v1296_v4 = vshll.u32 %v13106_v15, 30  ;;  %v1432_v3 = vshrl.u32 %v13037_v45, 16 }
 0x165   :  { %v1419_v36 = vadd.s32 %v1418_v13, %v1408_v51  ;;  %v1536_v34 = vor.u32 %v1535_v9, %v1534_v44  ;;  %vm722_vm3 = vcmp.eq.s32.totalorder %v13094_v2, 0  ;;  %v13139_v7 = vor.u32 %v1523_v60, %v1522_v49 }
 0x166   :  { %v1512_v46 = vand.u32 8388607, %v19873_v17  ;;  %v13141_v55 = vor.u32 %v1526_v61, %v1525_v27  ;;  %v13143_v10 = vor.u32 %v1529_v62, %v1528_v39  ;;  %v1819_v33 = vshrl.u32 %v1818_v0, 23  ;;  %v19874_v0 = vld [vmem:[#allocation26_spill] sm:$0xff] }
 0x167   :  { %v1410_v16 = vshrl.u32 %v13034_v26, 16  ;;  %vm1537_vm14 = vcmp.lt.s32.totalorder %v13113_v25, 1  ;;  %vm19545_vm5 = vcmp.lt.s32.totalorder %v13113_v25, 3  ;;  %v1546_v17 = vsel %vm19544_vm7, %v1533_v6, 920167782 }
 0x168   :  { %vm5680_vm9 = vcmp.eq.s32.totalorder %v13068_v38, 0  ;;  %v842_v13 = vshrl.u32 %v824_v32, %v840_v12  ;;  %v1387_v52 = vsel %vm1385_vm6, %v12901_v29, 2102212464  ;;  %v1442_v40 = vadd.s32 %v1441_v42, %v1432_v3 }
 0x169   :  { %v1513_v56 = vor.u32 8388608, %v1512_v46  ;;  %v846_v51 = vshll.u32 %v845_v48, 23  ;;  %v1366_v26 = vshrl.u32 %v19809_v58, %v19874_v0  ;;  %v13156_v49 = vadd.s32 %v1419_v36, %v1410_v16 }
 0x16a   :  { %v1550_v27 = vsel %vm19544_vm7, %v1536_v34, 1326507024  ;;  %vm725_vm11 = vcmp.eq.s32.totalorder %v13094_v2, 2  ;;  %vm5683_vm10 = vcmp.eq.s32.totalorder %v13068_v38, 2  ;;  %vm1538_vm13 = vcmp.lt.s32.totalorder %v13113_v25, 2 }
 0x16b   :  { %v1545_v29 = vsel %vm1537_vm14, %v13139_v7, %v13141_v55  ;;  %v1547_v48 = vsel %vm19545_vm5, %v13143_v10, %v1546_v17  ;;  %v11297_v36 = vadd.s32 4294967169, %v1819_v33  ;;  %vm721_vm6 = vcmp.lt.s32.totalorder %v13094_v2, 2 }
 0x16c   :  { %vm5679_vm7 = vcmp.lt.s32.totalorder %v13068_v38, 2  ;;  %v13173_v46 = vsub.s32 %v13047_v50, %v1296_v4  ;;  %v1386_v34 = vsel %vm1382_vm12, %v1366_v26, %v12907_v57  ;;  %v1388_v12 = vsel %vm1384_vm15, %v12899_v23, %v1387_v52 }
 0x16d   :  { %v19875_v3 = vshll.u32 %v13037_v45, 16  ;;  %v1446_v32 = vadd.s32 1, %v1442_v40  ;;  %v1549_v50 = vsel %vm1537_vm14, %v13141_v55, %v13143_v10  ;;  %v1551_v44 = vsel %vm19545_vm5, %v1533_v6, %v1550_v27 }
 0x16e   :  { %v13192_v9 = vshll.u32 %v1513_v56, 8  ;;  %v1021_v57 = vmul.f32 -0.00019511016, %v13101_v53  ;;  %v841_v23 = vshll.u32 %v12928_v8, %v13081_v21  ;;  %v13201_v45 = vsel %vm1538_vm13, %v1545_v29, %v1547_v48 }
 0x16f   :  { %v13184_v42 = vadd.s32 %v13049_v35, %v19875_v3  ;;  %vm718_vm15 = vweird.f32 %v12029_v19  ;;  %v19876_v35 = vld [vmem:[#allocation17_spill] sm:$0xff]  ;;  %v847_v61 = vor.u32 4788187, %v846_v51  ;;  %v1389_v6 = vsel %vm1383_vm8, %v1386_v34, %v1388_v12 }
 0x170   :  { %v1009_v60 = vsub.s32 4, %v19876_v35  ;;  %v1825_v39 = vadd.s32 1, %v11297_v36  ;;  %v19877_v62 = vxor.u32 2147483648, %v13054_v54  ;;  %v843_v21 = vor.u32 %v842_v13, %v841_v23 }
 0x171   :  { %vm1445_vm12 = vc.u32 %v13156_v49, %v13184_v42  ;;  %v1299_v4 = vsub.s32 0, %v13173_v46  ;;  %v13215_v33 = vsel %vm1538_vm13, %v1549_v50, %v1551_v44  ;;  %vm1298_vm5 = vcmp.lt.s32.totalorder %v13173_v46, 0 }
 0x172   :  { %v724_v8 = vsel %vm722_vm3, %v13051_v43, %v19877_v62  ;;  %v1447_v16 = vsel %vm1445_vm12, %v1446_v32, %v1442_v40  ;;  %v1554_v47 = vand.u32 65535, %v13192_v9  ;;  %v1579_v17 = vshrl.u32 %v13201_v45, 16 }
 0x173   :  { %v19878_v52 = vmov %v19877_v62  ;;  %v1015_v13 = vadd.f32 0.041655596, %v13129_v14  ;;  %v1022_v51 = vadd.f32 0.008332121, %v1021_v57  ;;  %v1443_v0 = vmul.u32 %v12959_v63, %v1389_v6 }
 0x174   :  { %v5682_v56 = vsel %vm5680_vm9, %v13051_v43, %v19878_v52  ;;  %v1010_v26 = vsel %vm887_vm0, %v1009_v60, %v19876_v35  ;;  %v848_v40 = vand.u32 2147483647, %v847_v61  ;;  %v1557_v27 = vshrl.u32 %v13215_v33, 16  ;;  %v19882_v61 = vld [vmem:[#allocation14_spill] sm:$0xff]  ;;  %v19886_v52 = vld [vmem:[#allocation5_spill] sm:$0xff] }
 0x175   :  { %vm1826_vm8 = vcmp.gt.s32.totalorder %v1825_v39, 0  ;;  %v19879_v29 = vxor.u32 2147483648, %v13051_v43  ;;  %v1300_v36 = vsel %vm1298_vm5, %v1299_v4, %v13173_v46  ;;  %v13242_v34 = vadd.s32 %v1447_v16, %v1443_v0  ;;  %v19885_v16 = vld [vmem:[#allocation8_spill] sm:$0xff] }
 0x176   :  { %v850_v32 = vcvt.s32.f32 %v843_v21  ;;  %v13250_v50 = vmul.u32 %v1579_v17, %v1554_v47  ;;  %v1012_v43 = vsel %vm13029_vm4, 0, %v1010_v26  ;;  %v1023_v44 = vmul.f32 %v1022_v51, %v13101_v53 }
 0x177   :  { %v727_v48 = vsel %vm725_vm11, %v19879_v29, %v13054_v54  ;;  %v19880_v14 = vmov %v19879_v29  ;;  %v1827_v57 = vsel %vm1826_vm8, %v1825_v39, 0  ;;  %v1301_v35 = vclz %v1300_v36 }
 0x178   :  { %v5685_v63 = vsel %vm5683_vm10, %v19880_v14, %v13054_v54  ;;  %v728_v12 = vsel %vm721_vm6, %v724_v8, %v727_v48  ;;  %v1016_v54 = vmul.f32 %v1015_v13, %v13101_v53  ;;  %v851_v23 = vmul.f32 %v850_v32, %v848_v40 }
 0x179   :  { %v5686_v3 = vsel %vm5679_vm7, %v5682_v56, %v5685_v63  ;;  %v13256_v2 = vmul.u32 %v1557_v27, %v1554_v47  ;;  %v1578_v38 = vand.u32 65535, %v13201_v45  ;;  %v13261_v60 = vsel %vm718_vm15, nan, %v728_v12 }
 0x17a   :  { %19881 = vst [vmem:[#allocation23_spill] sm:$0xff] %v13261_v60  ;;  %vm732_vm0 = vcmp.lt.s32.totalorder %v19882_v61, 0  ;;  %v1449_v20 = vadd.s32 536870912, %v13242_v34  ;;  %v1555_v6 = vshrl.u32 %v13192_v9, 16  ;;  %v13268_v62 = vsel %vm718_vm15, nan, %v5686_v3 }
 0x17b   :  { %19883 = vst [vmem:[#allocation24_spill] sm:$0xff] %v13268_v62  ;;  %v1556_v39 = vand.u32 65535, %v13215_v33  ;;  %v1584_v8 = vshll.u32 %v13250_v50, 16  ;;  %v1829_v21 = vand.u32 31, %v1827_v57  ;;  %v19884_v4 = vsel %vm12700_vm2, %v13041_v11, %v13045_v31  ;;  %v50_v33 = vld [vmem:[%s19469_s0 + $0xe0] sm:$0xff] }
 0x17c   :  { %vm19887_vm4 = vcmp.lt.s32.totalorder %v19886_v52, 2  ;;  %v1017_v13 = vadd.f32 -0.4999988, %v1016_v54  ;;  %v1024_v51 = vadd.f32 -0.16666654, %v1023_v44  ;;  %v1029_v19 = vadd.s32 3, %v1012_v43  ;;  %200 = vperm.xlu2 %11666, %v50_v33  }
 0x17d   :  { %v13280_v56 = vsel %vm19887_vm4, %v19885_v16, %v19884_v4  ;;  %v852_v0 = vxor.u32 2147483648, %v851_v23  ;;  %v11286_v26 = vadd.s32 4294967294, %v1301_v35  ;;  %v1562_v40 = vshll.u32 %v13256_v2, 16 }
 0x17e   :  { %19888 = vst [vmem:[#allocation26_spill] sm:$0xff] %v13280_v56  ;;  %v1580_v29 = vmul.u32 %v1578_v38, %v1554_v47  ;;  %v13290_v31 = vand.u32 3, %v1012_v43  ;;  %v13292_v48 = vshrl.u32 %v1449_v20, 30  ;;  %v13294_v14 = vmul.u32 %v1578_v38, %v1555_v6  ;;  %v19894_v56 = vld [vmem:[#allocation27_spill] sm:$0xff] }
 0x17f   :  { %v1558_v63 = vmul.u32 %v1556_v39, %v1554_v47  ;;  %v13296_v36 = vmul.u32 %v1556_v39, %v1555_v6  ;;  %v13298_v12 = vsub.s32 32, %v1829_v21  ;;  %v13301_v3 = vmul.f32 %v1017_v13, %v13101_v53 }
 0x180   :  { %19889 = vst [vmem:[#allocation17_spill] sm:$0xff] %v13292_v48  ;;  %vm1588_vm7 = vc.u32 %v1580_v29, %v1584_v8  ;;  %v13304_v32 = vmul.f32 %v1024_v51, %v13101_v53  ;;  %v13306_v54 = vand.u32 3, %v1029_v19  ;;  %v19890_v43 = vand.u32 2147483647, %v19882_v61 }
 0x181   :  { %v13314_v47 = vadd.s32 %v1584_v8, %v1580_v29  ;;  %v853_v35 = vsel %vm732_vm0, %v852_v0, %v851_v23  ;;  %vm11287_vm5 = vcmp.lt.s32.totalorder %v11286_v26, 0  ;;  %vm1566_vm9 = vc.u32 %v1558_v63, %v1562_v40 }
 0x182   :  { %vm13310_vm3 = vcmp.le.f32.partialorder %v19890_v43, 0.7853982  ;;  %v1568_v38 = vadd.s32 %v1562_v40, %v1558_v63  ;;  %v1451_v20 = vshll.u32 %v13292_v48, 30  ;;  %v19546_v53 = vshll.u32 %v13294_v14, 16 }
 0x183   :  { %v1589_v39 = vsel %vm1588_vm7, 1, %v19819_v1  ;;  %v19549_v4 = vand.u32 2147483647, %v13092_v37  ;;  %v1564_v16 = vshll.u32 %v13296_v36, 16  ;;  %v1583_v8 = vmul.u32 %v1579_v17, %v1555_v6  ;;  %v252_v37 = vpop.permute.xlu1 %251 }
 0x184   :  { %v1844_v13 = vshll.u32 %v19871_v22, %v1829_v21  ;;  %v1845_v23 = vshrl.u32 %v19872_v18, %v13298_v12  ;;  %v1561_v51 = vmul.u32 %v1557_v27, %v1555_v6  ;;  %v1567_v19 = vsel %vm1566_vm9, 1, %v19819_v1 }
 0x185   :  { %vm1592_vm11 = vc.u32 %v13314_v47, %v19546_v53  ;;  %v13332_v0 = vshrl.u32 %v1827_v57, 5  ;;  %vm1570_vm10 = vc.u32 %v1568_v38, %v1564_v16  ;;  %v1591_v40 = vadd.s32 %v1589_v39, %v1583_v8 }
 0x186   :  { %v1841_v29 = vshll.u32 %v19870_v59, %v1829_v21  ;;  %v1842_v45 = vshrl.u32 %v19871_v22, %v13298_v12  ;;  %v19893_v17 = vmov 1   ;;  %v1835_v63 = vshll.u32 %v19807_v30, %v1829_v21 }
 0x187   :  { %11670 = vset.pattern.permute.xlu2 %v19893_v17  ;;  %v1836_v27 = vshrl.u32 %v19808_v41, %v13298_v12  ;;  %v1838_v6 = vshll.u32 %v19808_v41, %v1829_v21  ;;  %v1839_v57 = vshrl.u32 %v19870_v59, %v13298_v12  ;;  %v1569_v43 = vadd.s32 %v1567_v19, %v1561_v51 }
 0x188   :  { %331 = vperm.xlu2 %11670, %v50_v33   ;;  %v1593_v38 = vsel %vm1592_vm11, 1, %v19819_v1  ;;  %v1822_v39 = vand.u32 8388607, %v19549_v4  ;;  %v1846_v16 = vor.u32 %v1845_v23, %v1844_v13  ;;  %v1571_v8 = vsel %vm1570_vm10, 1, %v19819_v1 }
 0x189   :  { %v1832_v11 = vshll.u32 %v19809_v58, %v1829_v21  ;;  %v1833_v53 = vshrl.u32 %v19807_v30, %v13298_v12  ;;  %vm1850_vm6 = vcmp.lt.s32.totalorder %v13332_v0, 4  ;;  %v854_v28 = vsub.s32 4, %v19894_v56 }
 0x18a   :  { %v13356_v33 = vsel %vm13310_vm3, %v19882_v61, %v853_v35  ;;  %v13359_v51 = vsel %vm11287_vm5, 0, %v11286_v26  ;;  %v1843_v13 = vor.u32 %v1842_v45, %v1841_v29  ;;  %v13362_v23 = vsub.s32 %v13242_v34, %v1451_v20 }
 0x18b   :  { %v1595_v21 = vadd.s32 %v1593_v38, %v1591_v40  ;;  %v13364_v19 = vor.u32 %v1836_v27, %v1835_v63  ;;  %v13366_v4 = vor.u32 %v1839_v57, %v1838_v6  ;;  %v1573_v17 = vadd.s32 %v1571_v8, %v1569_v43  ;;  %v19895_v40 = vld [vmem:[#allocation31_spill] sm:$0xff]  ;;  %v19896_v6 = vld [vmem:[#allocation9_spill] sm:$0xff] }
 0x18c   :  { %vm1847_vm12 = vcmp.lt.s32.totalorder %v13332_v0, 1  ;;  %vm19561_vm15 = vcmp.lt.s32.totalorder %v13332_v0, 3  ;;  %v1860_v35 = vsel %vm1850_vm6, %v1846_v16, 1326507024  ;;  %v1309_v26 = vsub.s32 4294967266, %v13359_v51 }
 0x18d   :  { %v1585_v29 = vshrl.u32 %v13250_v50, 16  ;;  %v1823_v34 = vor.u32 8388608, %v1822_v39  ;;  %v13374_v20 = vor.u32 %v1833_v53, %v1832_v11  ;;  %v1521_v45 = vshrl.u32 %v19809_v58, %v19895_v40 }
 0x18e   :  { %v1563_v63 = vshrl.u32 %v13256_v2, 16  ;;  %v1856_v27 = vsel %vm1850_vm6, %v1843_v13, 920167782  ;;  %v13384_v43 = vsel %vm11916_vm1, %v19896_v6, %v252_v37  ;;  %vm19560_vm8 = vcmp.lt.s32.totalorder %v13332_v0, 2 }
 0x18f   :  { %19898 = vst [vmem:[#allocation14_spill] sm:$0xff] %v13384_v43  ;;  %v1596_v38 = vadd.s32 %v1595_v21, %v1585_v29  ;;  %v1859_v50 = vsel %vm1847_vm12, %v13364_v19, %v13366_v4  ;;  %v1861_v11 = vsel %vm19561_vm15, %v1843_v13, %v1860_v35  ;;  %vm1453_vm4 = vcmp.lt.s32.totalorder %v13362_v23, 0  ;;  %v19899_v13 = vld [vmem:[#allocation7_spill] sm:$0xff] }
 0x190   :  { %11671 = vset.pattern.permute.xlu2 %v19819_v1  ;;  %v1454_v2 = vsub.s32 0, %v13362_v23  ;;  %v1574_v53 = vadd.s32 %v1573_v17, %v1563_v63  ;;  %v1587_v37 = vshrl.u32 %v13294_v14, 16  ;;  %v1855_v39 = vsel %vm1847_vm12, %v13374_v20, %v13364_v19 }
 0x191   :  { %v1857_v16 = vsel %vm19561_vm15, %v13366_v4, %v1856_v27  ;;  %v13404_v8 = vshll.u32 %v1823_v34, 8  ;;  %v13408_v21 = vmul.f32 %v19899_v13, %v13384_v43  ;;  %v13412_v17 = vmul.f32 %v13356_v33, %v13356_v33 }
 0x192   :  { %vm19901_vm7 = vcmp.lt.s32.totalorder %v13113_v25, 4  ;;  %v1565_v29 = vshrl.u32 %v13296_v36, 16  ;;  %v13420_v40 = vsel %vm19560_vm8, %v1859_v50, %v1861_v11  ;;  %v13423_v34 = vadd.f32 1.0, %v13301_v3 }
 0x193   :  { %19900 = vst [vmem:[#allocation8_spill] sm:$0xff] %v13408_v21  ;;  %v1542_v35 = vsel %vm19901_vm7, %v13143_v10, 2102212464  ;;  %v1026_v63 = vadd.f32 1.0, %v13304_v32  ;;  %v1310_v27 = vadd.s32 127, %v1309_v26  ;;  %v1597_v6 = vadd.s32 %v1596_v38, %v1587_v37 }
 0x194   :  { %v1455_v43 = vsel %vm1453_vm4, %v1454_v2, %v13362_v23  ;;  %v1541_v10 = vsel %vm1537_vm14, %v1521_v45, %v13139_v7  ;;  %v13432_v36 = vadd.s32 %v1574_v53, %v1565_v29  ;;  %v13436_v50 = vsel %vm19560_vm8, %v1855_v39, %v1857_v16  ;;  %v19907_v29 = vld [vmem:[#allocation21_spill] sm:$0xff] }
 0x195   :  { %vm19903_vm5 = vcmp.lt.s32.totalorder %v13113_v25, 3  ;;  %v1864_v32 = vand.u32 65535, %v13404_v8  ;;  %v1867_v26 = vshrl.u32 %v13420_v40, 16  ;;  %v1663_v38 = vand.u32 2139095040, %v13408_v21 }
 0x196   :  { %19902 = vst [vmem:[#allocation27_spill] sm:$0xff] %v13432_v36  ;;  %v1543_v3 = vsel %vm19903_vm5, %v13141_v55, %v1542_v35  ;;  %v855_v7 = vsel %vm732_vm0, %v854_v28, %v19894_v56  ;;  %v859_v45 = vmul.f32 -0.001358992, %v13412_v17  ;;  %v1305_v11 = vsub.s32 32, %v13359_v51  ;;  %v19906_v35 = vld [vmem:[#allocation19_spill] sm:$0xff] }
 0x197   :  { %v19904_v2 = vshll.u32 %v13294_v14, 16  ;;  %v866_v55 = vmul.f32 -0.00019511016, %v13412_v17  ;;  %v1456_v37 = vclz %v1455_v43  ;;  %v1601_v39 = vadd.s32 1, %v1597_v6 }
 0x198   :  { %v19558_v16 = vshrl.u32 %v13436_v50, 16  ;;  %v1289_v48 = vadd.s32 %v19907_v29, %v19906_v35  ;;  %v1311_v52 = vshll.u32 %v1310_v27, 23  ;;  %v1544_v28 = vsel %vm1538_vm13, %v1541_v10, %v1543_v3 }
 0x199   :  { %v13452_v53 = vadd.s32 %v13314_v47, %v19904_v2  ;;  %v1865_v56 = vshrl.u32 %v13404_v8, 16  ;;  %v1866_v14 = vand.u32 65535, %v13420_v40  ;;  %v13464_v47 = vmul.u32 %v1867_v26, %v1864_v32  ;;  %v19908_v2 = vld [vmem:[#allocation30_spill] sm:$0xff] }
 0x19a   :  { %v1664_v43 = vshrl.u32 %v1663_v38, 23  ;;  %v13467_v62 = vmul.f32 %v1026_v63, %v19908_v2  ;;  %v857_v35 = vsel %vm13310_vm3, 0, %v855_v7  ;;  %v860_v27 = vadd.f32 0.041655596, %v859_v45 }
 0x19b   :  { %19905 = vst [vmem:[#allocation31_spill] sm:$0xff] %v13452_v53  ;;  %vm1600_vm14 = vc.u32 %v13432_v36, %v13452_v53  ;;  %v1307_v29 = vshrl.u32 %v1289_v48, %v1305_v11  ;;  %v11289_v25 = vadd.s32 4294967294, %v1456_v37  ;;  %v1888_v3 = vand.u32 65535, %v13436_v50  ;;  %v13481_v48 = vpop.permute.xlu2 %115 }
 0x19c   :  { %v1602_v10 = vsel %vm1600_vm14, %v1601_v39, %v1597_v6  ;;  %v13474_v53 = vmul.u32 %v19558_v16, %v1864_v32  ;;  %v867_v40 = vadd.f32 0.008332121, %v866_v55  ;;  %v1306_v38 = vshll.u32 %v13173_v46, %v13359_v51  ;;  %19909 = vst [vmem:[#allocation9_spill] sm:$0xff] %v13481_v48 }
 0x19d   :  { %v1312_v36 = vor.u32 4788187, %v1311_v52  ;;  %v1598_v63 = vmul.u32 %v13192_v9, %v1544_v28  ;;  %vm1035_vm13 = vcmp.eq.s32.totalorder %v13306_v54, 2  ;;  %vm5991_vm0 = vcmp.eq.s32.totalorder %v13290_v31, 2 }
 0x19e   :  { %v1868_v44 = vmul.u32 %v1866_v14, %v1864_v32  ;;  %v13483_v6 = vmul.u32 %v1866_v14, %v1865_v56  ;;  %v1872_v7 = vshll.u32 %v13464_v47, 16  ;;  %v11294_v45 = vadd.s32 4294967169, %v1664_v43 }
 0x19f   :  { %vm1032_vm3 = vcmp.eq.s32.totalorder %v13306_v54, 0  ;;  %v1036_v11 = vxor.u32 2147483648, %v13423_v34  ;;  %v861_v46 = vmul.f32 %v860_v27, %v13412_v17  ;;  %v1308_v52 = vor.u32 %v1307_v29, %v1306_v38 }
 0x1a0   :  { %v13489_v9 = vadd.s32 %v1602_v10, %v1598_v63  ;;  %vm11290_vm9 = vcmp.lt.s32.totalorder %v11289_v25, 0  ;;  %v1890_v51 = vmul.u32 %v1888_v3, %v1864_v32  ;;  %v13491_v55 = vmul.u32 %v1888_v3, %v1865_v56 }
 0x1a1   :  { %v1894_v37 = vshll.u32 %v13474_v53, 16  ;;  %v1033_v39 = vxor.u32 2147483648, %v13467_v62  ;;  %vm5988_vm11 = vcmp.eq.s32.totalorder %v13290_v31, 0  ;;  %v868_v28 = vmul.f32 %v867_v40, %v13412_v17 }
 0x1a2   :  { %v874_v14 = vadd.s32 3, %v857_v35  ;;  %v1313_v43 = vand.u32 2147483647, %v1312_v36  ;;  %vm1031_vm10 = vcmp.lt.s32.totalorder %v13306_v54, 2  ;;  %v1874_v2 = vshll.u32 %v13483_v6, 16  ;;  %v19912_v36 = vld [vmem:[#allocation16_spill] sm:$0xff] }
 0x1a3   :  { %vm13499_vm4 = vc.u32 %v1868_v44, %v1872_v7  ;;  %v1878_v32 = vadd.s32 %v1872_v7, %v1868_v44  ;;  %v1670_v29 = vadd.s32 1, %v11294_v45  ;;  %v862_v10 = vadd.f32 -0.4999988, %v861_v46 }
 0x1a4   :  { %v1315_v3 = vcvt.s32.f32 %v1308_v52  ;;  %v13504_v38 = vsel %vm11290_vm9, 0, %v11289_v25  ;;  %v1604_v63 = vadd.s32 536870912, %v13489_v9  ;;  %vm5987_vm7 = vcmp.lt.s32.totalorder %v13290_v31, 2 }
 0x1a5   :  { %vm1197_vm5 = vcmp.lt.s32.totalorder %v19912_v36, 0  ;;  %v1871_v40 = vmul.u32 %v1867_v26, %v1865_v56  ;;  %v19562_v16 = vshll.u32 %v13491_v55, 16  ;;  %vm1898_vm14 = vc.u32 %v1890_v51, %v1894_v37 }
 0x1a6   :  { %v13510_v48 = vadd.s32 %v1894_v37, %v1890_v51  ;;  %v869_v60 = vadd.f32 -0.16666654, %v868_v28  ;;  %v13512_v44 = vand.u32 3, %v857_v35  ;;  %v1316_v7 = vmul.f32 %v1315_v3, %v1313_v43 }
 0x1a7   :  { %v1877_v25 = vsel %vm13499_vm4, 1, %v19819_v1  ;;  %vm1028_vm9 = vweird.f32 %v19858_v5  ;;  %v1464_v45 = vsub.s32 4294967266, %v13504_v38  ;;  %vm1880_vm8 = vc.u32 %v1878_v32, %v1874_v2 }
 0x1a8   :  { %v19913_v26 = vshrl.u32 %v13436_v50, 16  ;;  %vm1671_vm15 = vcmp.gt.s32.totalorder %v1670_v29, 0  ;;  %v1037_v52 = vsel %vm1035_vm13, %v1036_v11, %v13467_v62  ;;  %v5993_v35 = vsel %vm5991_vm0, %v1036_v11, %v13467_v62  ;;  %v121_v62 = vpop.permute.xlu2 %120 }
 0x1a9   :  { %v13527_v51 = vshrl.u32 %v1604_v63, 30  ;;  %v1899_v37 = vsel %vm1898_vm14, 1, %v19819_v1  ;;  %v1034_v28 = vsel %vm1032_vm3, %v13423_v34, %v1033_v39  ;;  %v863_v50 = vmul.f32 %v862_v10, %v13412_v17 }
 0x1aa   :  { %v1893_v46 = vmul.u32 %v19913_v26, %v1865_v56  ;;  %v19915_v56 = vand.u32 2147483647, %v19912_v36  ;;  %v1879_v2 = vadd.s32 %v1877_v25, %v1871_v40  ;;  %vm1902_vm13 = vc.u32 %v13510_v48, %v19562_v16 }
 0x1ab   :  { %19914 = vst [vmem:[#allocation19_spill] sm:$0xff] %v13527_v51  ;;  %v870_v11 = vmul.f32 %v869_v60, %v13412_v17  ;;  %v1317_v27 = vxor.u32 2147483648, %v1316_v7  ;;  %v1881_v32 = vsel %vm1880_vm8, 1, %v19819_v1  ;;  %v1672_v3 = vsel %vm1671_vm15, %v1670_v29, 0 }
 0x1ac   :  { %vm13536_vm4 = vcmp.le.f32.partialorder %v19915_v56, 0.7853982  ;;  %v5990_v10 = vsel %vm5988_vm11, %v13423_v34, %v1033_v39  ;;  %v1460_v63 = vsub.s32 32, %v13504_v38  ;;  %v1465_v26 = vadd.s32 127, %v1464_v45 }
 0x1ad   :  { %v1901_v56 = vadd.s32 %v1899_v37, %v1893_v46  ;;  %v1038_v40 = vsel %vm1031_vm10, %v1034_v28, %v1037_v52  ;;  %v13551_v25 = vand.u32 3, %v874_v14  ;;  %v1606_v16 = vshll.u32 %v13527_v51, 30 }
 0x1ae   :  { %v1903_v60 = vsel %vm1902_vm13, 1, %v19819_v1  ;;  %v1444_v17 = vadd.s32 %v13184_v42, %v13156_v49  ;;  %v1873_v29 = vshrl.u32 %v13464_v47, 16  ;;  %v1883_v24 = vadd.s32 %v1881_v32, %v1879_v2  ;;  %v51_v49 = vld [vmem:[%s19469_s0 + $0xe8] sm:$0xff] }
 0x1af   :  { %v1674_v34 = vand.u32 31, %v1672_v3  ;;  %v5994_v39 = vsel %vm5987_vm7, %v5990_v10, %v5993_v35  ;;  %v13560_v45 = vadd.f32 1.0, %v863_v50  ;;  %v871_v54 = vadd.f32 1.0, %v870_v11  ;;  %205 = vperm.xlu1 %11669, %v51_v49   ;;  %335 = vperm.xlu0 %11667, %v51_v49  }
 0x1b0   :  { %v1318_v14 = vsel %vm1197_vm5, %v1317_v27, %v1316_v7  ;;  %v1462_v46 = vshrl.u32 %v1444_v17, %v1460_v63  ;;  %v1466_v52 = vshll.u32 %v1465_v26, 23  ;;  %v1895_v37 = vshrl.u32 %v13474_v53, 16  ;;  %v268_v11 = vpop.permute.xlu2 %267 }
 0x1b1   :  { %v1905_v28 = vadd.s32 %v1903_v60, %v1901_v56  ;;  %v13570_v42 = vsel %vm1028_vm9, nan, %v1038_v40  ;;  %v1461_v31 = vshll.u32 %v13362_v23, %v13504_v38  ;;  %v13575_v47 = vsub.s32 %v13489_v9, %v1606_v16 }
 0x1b2   :  { %v1831_v7 = vshrl.u32 %v19809_v58, %v13298_v12  ;;  %v1852_v53 = vsel %vm1850_vm6, %v13366_v4, 2102212464  ;;  %v1875_v35 = vshrl.u32 %v13483_v6, 16  ;;  %v1884_v50 = vadd.s32 %v1883_v24, %v1873_v29 }
 0x1b3   :  { %v13583_v2 = vsub.s32 32, %v1674_v34  ;;  %v13587_v23 = vsel %vm1028_vm9, nan, %v5994_v39  ;;  %v13590_v16 = vmul.f32 %v871_v54, %v13356_v33  ;;  %v881_v12 = vxor.u32 2147483648, %v13560_v45 }
 0x1b4   :  { %v13596_v9 = vsel %vm13536_vm4, %v19912_v36, %v1318_v14  ;;  %v1463_v4 = vor.u32 %v1462_v46, %v1461_v31  ;;  %v1467_v38 = vor.u32 4788187, %v1466_v52  ;;  %v1897_v24 = vshrl.u32 %v13491_v55, 16 }
 0x1b5   :  { %v1906_v6 = vadd.s32 %v1905_v28, %v1895_v37  ;;  %vm1608_vm6 = vcmp.lt.s32.totalorder %v13575_v47, 0  ;;  %v1609_v5 = vsub.s32 0, %v13575_v47  ;;  %v1851_v33 = vsel %vm1847_vm12, %v1831_v7, %v13374_v20 }
 0x1b6   :  { %vm19918_vm15 = vcmp.lt.s32.totalorder %v13332_v0, 3  ;;  %v13607_v32 = vadd.s32 %v1884_v50, %v1875_v35  ;;  %v19919_v10 = vshll.u32 %v13491_v55, 16  ;;  %v1686_v26 = vshll.u32 %v19870_v59, %v1674_v34 }
 0x1b7   :  { %v1853_v27 = vsel %vm19918_vm15, %v13364_v19, %v1852_v53  ;;  %v1687_v56 = vshrl.u32 %v19871_v22, %v13583_v2  ;;  %v13617_v40 = vshrl.u32 %v1672_v3, 5  ;;  %v1689_v20 = vshll.u32 %v19871_v22, %v1674_v34 }
 0x1b8   :  { %v13612_v63 = vadd.s32 %v13510_v48, %v19919_v10  ;;  %v1690_v60 = vshrl.u32 %v19872_v18, %v13583_v2  ;;  %v13624_v19 = vsel %vm11916_vm1, %v121_v62, %v268_v11  ;;  %vm877_vm12 = vcmp.eq.s32.totalorder %v13551_v25, 0 }
 0x1b9   :  { %19920 = vst [vmem:[#allocation21_spill] sm:$0xff] %v13624_v19  ;;  %v1907_v48 = vadd.s32 %v1906_v6, %v1897_v24  ;;  %v19564_v55 = vand.u32 2147483647, %v13408_v21  ;;  %v1677_v17 = vshll.u32 %v19809_v58, %v1674_v34  ;;  %v1680_v29 = vshll.u32 %v19807_v30, %v1674_v34  ;;  %v19923_v24 = vld [vmem:[#allocation20_spill] sm:$0xff] }
 0x1ba   :  { %vm5834_vm8 = vcmp.eq.s32.totalorder %v13512_v44, 0  ;;  %v1678_v3 = vshrl.u32 %v19807_v30, %v13583_v2  ;;  %v1681_v39 = vshrl.u32 %v19808_v41, %v13583_v2  ;;  %v1683_v62 = vshll.u32 %v19808_v41, %v1674_v34 }
 0x1bb   :  { %v1684_v54 = vshrl.u32 %v19870_v59, %v13583_v2  ;;  %v878_v14 = vxor.u32 2147483648, %v13590_v16  ;;  %v13641_v46 = vmul.f32 %v13596_v9, %v13596_v9  ;;  %v1688_v52 = vor.u32 %v1687_v56, %v1686_v26 }
 0x1bc   :  { %v13645_v37 = vmul.f32 %v19899_v13, %v13624_v19  ;;  %v1468_v28 = vand.u32 2147483647, %v1467_v38  ;;  %v1470_v49 = vcvt.s32.f32 %v1463_v4  ;;  %v1691_v31 = vor.u32 %v1690_v60, %v1689_v20 }
 0x1bd   :  { %vm1695_vm0 = vcmp.lt.s32.totalorder %v13617_v40, 4  ;;  %vm5837_vm3 = vcmp.eq.s32.totalorder %v13512_v44, 2  ;;  %v1610_v34 = vsel %vm1608_vm6, %v1609_v5, %v13575_v47  ;;  %vm19922_vm11 = vcmp.lt.s32.totalorder %v13332_v0, 2 }
 0x1be   :  { %19921 = vst [vmem:[#allocation30_spill] sm:$0xff] %v13645_v37  ;;  %v1854_v7 = vsel %vm19922_vm11, %v1851_v33, %v1853_v27  ;;  %vm1910_vm10 = vc.u32 %v13607_v32, %v13612_v63  ;;  %v1911_v53 = vadd.s32 1, %v1907_v48  ;;  %vm876_vm7 = vcmp.lt.s32.totalorder %v13551_v25, 2 }
 0x1bf   :  { %vm5833_vm14 = vcmp.lt.s32.totalorder %v13512_v44, 2  ;;  %v1667_v35 = vand.u32 8388607, %v19564_v55  ;;  %v13660_v50 = vor.u32 %v1678_v3, %v1677_v17  ;;  %v13662_v4 = vor.u32 %v1681_v39, %v1680_v29 }
 0x1c0   :  { %v13664_v38 = vor.u32 %v1684_v54, %v1683_v62  ;;  %v1319_v0 = vsub.s32 4, %v13106_v15  ;;  %vm1352_vm9 = vcmp.lt.s32.totalorder %v19923_v24, 0  ;;  %vm1692_vm13 = vcmp.lt.s32.totalorder %v13617_v40, 1 }
 0x1c1   :  { %v1701_v6 = vsel %vm1695_vm0, %v1688_v52, 920167782  ;;  %v2283_v11 = vand.u32 2139095040, %v13645_v37  ;;  %v1331_v5 = vmul.f32 -0.00019511016, %v13641_v46  ;;  %v1471_v33 = vmul.f32 %v1470_v49, %v1468_v28 }
 0x1c2   :  { %v1908_v27 = vmul.u32 %v13404_v8, %v1854_v7  ;;  %v1705_v10 = vsel %vm1695_vm0, %v1691_v31, 1326507024  ;;  %v1324_v26 = vmul.f32 -0.001358992, %v13641_v46  ;;  %v1611_v56 = vclz %v1610_v34 }
 0x1c3   :  { %v1912_v20 = vsel %vm1910_vm10, %v1911_v53, %v1907_v48  ;;  %vm1694_vm6 = vcmp.lt.s32.totalorder %v13617_v40, 3  ;;  %vm873_vm15 = vweird.f32 %v19882_v61  ;;  %v879_v60 = vsel %vm877_vm12, %v13560_v45, %v878_v14 }
 0x1c4   :  { %v1668_v17 = vor.u32 8388608, %v1667_v35  ;;  %v1700_v8 = vsel %vm1692_vm13, %v13660_v50, %v13662_v4  ;;  %v1702_v29 = vsel %vm1694_vm6, %v13664_v38, %v1701_v6  ;;  %v5836_v48 = vsel %vm5834_vm8, %v13560_v45, %v878_v14 }
 0x1c5   :  { %v1704_v3 = vsel %vm1692_vm13, %v13662_v4, %v13664_v38  ;;  %v1706_v39 = vsel %vm1694_vm6, %v1688_v52, %v1705_v10  ;;  %v2284_v62 = vshrl.u32 %v2283_v11, 23  ;;  %v1332_v54 = vadd.f32 0.008332121, %v1331_v5 }
 0x1c6   :  { %v1472_v28 = vxor.u32 2147483648, %v1471_v33  ;;  %v13701_v49 = vadd.s32 %v1912_v20, %v1908_v27  ;;  %vm1693_vm12 = vcmp.lt.s32.totalorder %v13617_v40, 2  ;;  %vm880_vm11 = vcmp.eq.s32.totalorder %v13551_v25, 2  ;;  %v19925_v25 = vld [vmem:[#allocation23_spill] sm:$0xff]  ;;  %v19928_v20 = vld [vmem:[#allocation10_spill] sm:$0xff] }
 0x1c7   :  { %v1325_v31 = vadd.f32 0.041655596, %v1324_v26  ;;  %v11292_v34 = vadd.s32 4294967294, %v1611_v56  ;;  %v13707_v14 = vsel %vm1693_vm12, %v1700_v8, %v1702_v29  ;;  %v882_v7 = vsel %vm880_vm11, %v881_v12, %v13590_v16  ;;  %v19926_v56 = vld [vmem:[#allocation24_spill] sm:$0xff] }
 0x1c8   :  { %v5839_v52 = vsel %vm5837_vm3, %v881_v12, %v13590_v16  ;;  %v13719_v53 = vsel %vm1693_vm12, %v1704_v3, %v1706_v39  ;;  %v13721_v35 = vshll.u32 %v1668_v17, 8  ;;  %v883_v6 = vsel %vm876_vm7, %v879_v60, %v882_v7  ;;  %v19929_v60 = vld [vmem:[#allocation5_spill] sm:$0xff] }
 0x1c9   :  { %v5840_v11 = vsel %vm5833_vm14, %v5836_v48, %v5839_v52  ;;  %v1320_v5 = vsel %vm1197_vm5, %v1319_v0, %v13106_v15  ;;  %v11306_v45 = vadd.s32 4294967169, %v2284_v62  ;;  %v1333_v27 = vmul.f32 %v1332_v54, %v13641_v46 }
 0x1ca   :  { %v1473_v16 = vsel %vm1352_vm9, %v1472_v28, %v1471_v33  ;;  %v1914_v12 = vadd.s32 536870912, %v13701_v49  ;;  %v19565_v10 = vshrl.u32 %v13707_v14, 16  ;;  %v19927_v44 = vsel %vm12700_vm2, %v19925_v25, %v19926_v56 }
 0x1cb   :  { %vm19930_vm8 = vcmp.lt.s32.totalorder %v19929_v60, 2  ;;  %v1326_v15 = vmul.f32 %v1325_v31, %v13641_v46  ;;  %vm11293_vm5 = vcmp.lt.s32.totalorder %v11292_v34, 0  ;;  %v1712_v0 = vshrl.u32 %v13719_v53, 16 }
 0x1cc   :  { %v13743_v17 = vsel %vm19930_vm8, %v19928_v20, %v19927_v44  ;;  %v10311_v33 = vsel %vm12700_vm2, %v13570_v42, %v13587_v23  ;;  %v1322_v8 = vsel %vm13536_vm4, 0, %v1320_v5  ;;  %v19932_v29 = vand.u32 2147483647, %v19923_v24  ;;  %v19939_v5 = vld [vmem:[#allocation11_spill] sm:$0xff]  ;;  %vm19940_vm4 = vmmov %vm19930_vm8 }
 0x1cd   :  { %19931 = vst [vmem:[#allocation16_spill] sm:$0xff] %v13743_v17  ;;  %v1709_v3 = vand.u32 65535, %v13721_v35  ;;  %v13762_v39 = vsel %vm873_vm15, nan, %v883_v6  ;;  %v13766_v62 = vsel %vm873_vm15, nan, %v5840_v11  ;;  %v2290_v42 = vadd.s32 1, %v11306_v45  ;;  %v19938_v6 = vld [vmem:[#allocation17_spill] sm:$0xff] }
 0x1ce   :  { %vm13755_vm3 = vcmp.le.f32.partialorder %v19932_v29, 0.7853982  ;;  %19935 = vst [vmem:[#allocation23_spill] sm:$0xff] %v13762_v39  ;;  %v1334_v23 = vadd.f32 -0.16666654, %v1333_v27  ;;  %v1614_v54 = vsel %vm11293_vm5, 0, %v11292_v34  ;;  %v1676_v57 = vshrl.u32 %v19809_v58, %v13583_v2 }
 0x1cf   :  { %19936 = vst [vmem:[#allocation24_spill] sm:$0xff] %v13766_v62  ;;  %v13771_v43 = vsel %vm13755_vm3, %v19923_v24, %v1473_v16  ;;  %v13773_v28 = vshrl.u32 %v1914_v12, 30  ;;  %v13777_v31 = vmul.u32 %v19565_v10, %v1709_v3  ;;  %v1327_v7 = vadd.f32 -0.4999988, %v1326_v15 }
 0x1d0   :  { %v1339_v52 = vadd.s32 3, %v1322_v8  ;;  %v1474_v61 = vsub.s32 4, %v19938_v6  ;;  %v13780_v11 = vmul.u32 %v1712_v0, %v1709_v3  ;;  %v13785_v16 = vsel %vm19940_vm4, %v19939_v5, %v10311_v33 }
 0x1d1   :  { %19937 = vst [vmem:[#allocation10_spill] sm:$0xff] %v13773_v28  ;;  %v13787_v45 = vand.u32 3, %v1322_v8  ;;  %v13791_v34 = vmul.f32 %v13771_v43, %v13771_v43  ;;  %v1733_v27 = vand.u32 65535, %v13707_v14  ;;  %v1619_v25 = vsub.s32 4294967266, %v1614_v54 }
 0x1d2   :  { %19941 = vst [vmem:[#allocation17_spill] sm:$0xff] %v13785_v16  ;;  %v1711_v56 = vand.u32 65535, %v13719_v53  ;;  %vm2291_vm10 = vcmp.gt.s32.totalorder %v2290_v42, 0  ;;  %v1335_v44 = vmul.f32 %v1334_v23, %v13641_v46  ;;  %v1916_v20 = vshll.u32 %v13773_v28, 30 }
 0x1d3   :  { %v1710_v15 = vshrl.u32 %v13721_v35, 16  ;;  %v1739_v33 = vshll.u32 %v13777_v31, 16  ;;  %v1328_v8 = vmul.f32 %v1327_v7, %v13641_v46  ;;  %v13804_v29 = vand.u32 3, %v1339_v52 }
 0x1d4   :  { %v13809_v5 = vsel %vm1352_vm9, %v1474_v61, %v19938_v6  ;;  %v1717_v53 = vshll.u32 %v13780_v11, 16  ;;  %v1486_v55 = vmul.f32 -0.00019511016, %v13791_v34  ;;  %v1735_v23 = vmul.u32 %v1733_v27, %v1709_v3  ;;  %v19942_v6 = vld [vmem:[#allocation27_spill] sm:$0xff] }
 0x1d5   :  { %v13813_v12 = vmul.u32 %v1733_v27, %v1710_v15  ;;  %v2292_v10 = vsel %vm2291_vm10, %v2290_v42, 0  ;;  %v1615_v16 = vsub.s32 32, %v1614_v54  ;;  %v1620_v17 = vadd.s32 127, %v1619_v25  ;;  %v19943_v61 = vld [vmem:[#allocation31_spill] sm:$0xff] }
 0x1d6   :  { %v1713_v19 = vmul.u32 %v1711_v56, %v1709_v3  ;;  %v13815_v21 = vmul.u32 %v1711_v56, %v1710_v15  ;;  %v1336_v46 = vadd.f32 1.0, %v1335_v44  ;;  %v13818_v7 = vsub.s32 %v13701_v49, %v1916_v20 }
 0x1d7   :  { %vm1743_vm7 = vc.u32 %v1735_v23, %v1739_v33  ;;  %v13820_v52 = vadd.s32 %v1739_v33, %v1735_v23  ;;  %v1599_v28 = vadd.s32 %v19943_v61, %v19942_v6  ;;  %v2294_v27 = vand.u32 31, %v2292_v10 }
 0x1d8   :  { %vm1721_vm14 = vc.u32 %v1713_v19, %v1717_v53  ;;  %v1723_v60 = vadd.s32 %v1717_v53, %v1713_v19  ;;  %v1479_v42 = vmul.f32 -0.001358992, %v13791_v34  ;;  %v1487_v62 = vadd.f32 0.008332121, %v1486_v55 }
 0x1d9   :  { %v1616_v3 = vshll.u32 %v13575_v47, %v1614_v54  ;;  %v19573_v25 = vshll.u32 %v13813_v12, 16  ;;  %v1617_v56 = vshrl.u32 %v1599_v28, %v1615_v16  ;;  %v1621_v44 = vshll.u32 %v1620_v17, 23 }
 0x1da   :  { %v1719_v49 = vshll.u32 %v13815_v21, 16  ;;  %v1744_v20 = vsel %vm1743_vm7, 1, %v19819_v1  ;;  %v1919_v33 = vsub.s32 0, %v13818_v7  ;;  %v1722_v23 = vsel %vm1721_vm14, 1, %v19819_v1 }
 0x1db   :  { %v19944_v19 = vshrl.u32 %v13707_v14, 16  ;;  %vm1747_vm9 = vc.u32 %v13820_v52, %v19573_v25  ;;  %vm1918_vm15 = vcmp.lt.s32.totalorder %v13818_v7, 0  ;;  %v1716_v47 = vmul.u32 %v1712_v0, %v1710_v15  ;;  %v111_v14 = vpop.permute.xlu1 %110 }
 0x1dc   :  { %vm1725_vm11 = vc.u32 %v1723_v60, %v1719_v49  ;;  %v13837_v55 = vsub.s32 32, %v2294_v27  ;;  %v13839_v17 = vadd.f32 1.0, %v1328_v8  ;;  %v13842_v54 = vmul.f32 %v1336_v46, %v13596_v9  ;;  %v52_v60 = vld [vmem:[%s19469_s0 + $0xf0] sm:$0xff]  ;;  %v260_v46 = vpop.permute.xlu0 %259 }
 0x1dd   :  { %v1738_v53 = vmul.u32 %v19944_v19, %v1710_v15  ;;  %v13844_v28 = vadd.f32 0.041655596, %v1479_v42  ;;  %v13847_v6 = vmul.f32 %v1487_v62, %v13791_v34  ;;  %v1618_v61 = vor.u32 %v1617_v56, %v1616_v3  ;;  %210 = vperm.xlu1 %11669, %v52_v60   ;;  %339 = vperm.xlu0 %11667, %v52_v60  }
 0x1de   :  { %19945 = vst [vmem:[#allocation11_spill] sm:$0xff] %v13837_v55  ;;  %v1724_v19 = vadd.s32 %v1722_v23, %v1716_v47  ;;  %v1748_v25 = vsel %vm1747_vm9, 1, %v19819_v1  ;;  %v1622_v0 = vor.u32 4788187, %v1621_v44  ;;  %v1920_v15 = vsel %vm1918_vm15, %v1919_v33, %v13818_v7 }
 0x1df   :  { %v1746_v16 = vadd.s32 %v1744_v20, %v1738_v53  ;;  %v1726_v9 = vsel %vm1725_vm11, 1, %v19819_v1  ;;  %v1740_v62 = vshrl.u32 %v13777_v31, 16  ;;  %v2306_v42 = vshll.u32 %v19870_v59, %v2294_v27 }
 0x1e0   :  { %v2307_v3 = vshrl.u32 %v19871_v22, %v13837_v55  ;;  %v13862_v56 = vsel %vm11916_vm1, %v111_v14, %v260_v46  ;;  %v13864_v49 = vshrl.u32 %v2292_v10, 5  ;;  %v2309_v20 = vshll.u32 %v19871_v22, %v2294_v27 }
 0x1e1   :  { %19946 = vst [vmem:[#allocation27_spill] sm:$0xff] %v13862_v56  ;;  %v1750_v44 = vadd.s32 %v1748_v25, %v1746_v16  ;;  %v2310_v33 = vshrl.u32 %v19872_v18, %v13837_v55  ;;  %v1728_v23 = vadd.s32 %v1726_v9, %v1724_v19  ;;  %v2297_v31 = vshll.u32 %v19809_v58, %v2294_v27 }
 0x1e2   :  { %v2300_v53 = vshll.u32 %v19807_v30, %v2294_v27  ;;  %v2303_v47 = vshll.u32 %v19808_v41, %v2294_v27  ;;  %v2298_v60 = vshrl.u32 %v19807_v30, %v13837_v55  ;;  %v2301_v25 = vshrl.u32 %v19808_v41, %v13837_v55 }
 0x1e3   :  { %v2304_v10 = vshrl.u32 %v19870_v59, %v13837_v55  ;;  %v13880_v16 = vmul.f32 %v19899_v13, %v13862_v56  ;;  %v1623_v14 = vand.u32 2147483647, %v1622_v0  ;;  %v1625_v19 = vcvt.s32.f32 %v1618_v61 }
 0x1e4   :  { %v1718_v9 = vshrl.u32 %v13780_v11, 16  ;;  %v2308_v46 = vor.u32 %v2307_v3, %v2306_v42  ;;  %v1751_v8 = vadd.s32 %v1750_v44, %v1740_v62  ;;  %v19948_v27 = vand.u32 2147483647, %v13645_v37 }
 0x1e5   :  { %19947 = vst [vmem:[#allocation31_spill] sm:$0xff] %v13880_v16  ;;  %v2311_v51 = vor.u32 %v2310_v33, %v2309_v20  ;;  %vm2315_vm8 = vcmp.lt.s32.totalorder %v13864_v49, 4  ;;  %v1921_v24 = vclz %v1920_v15  ;;  %v1742_v56 = vshrl.u32 %v13813_v12, 16 }
 0x1e6   :  { %v2287_v39 = vand.u32 8388607, %v19948_v27  ;;  %v1729_v55 = vadd.s32 %v1728_v23, %v1718_v9  ;;  %v13889_v13 = vor.u32 %v2298_v60, %v2297_v31  ;;  %v13891_v61 = vor.u32 %v2301_v25, %v2300_v53 }
 0x1e7   :  { %v13893_v11 = vor.u32 %v2304_v10, %v2303_v47  ;;  %v1973_v0 = vand.u32 2139095040, %v13880_v16  ;;  %v19949_v62 = vmov 1   ;;  %v1720_v42 = vshrl.u32 %v13815_v21, 16  ;;  %v19951_v10 = vld [vmem:[#allocation29_spill] sm:$0xff] }
 0x1e8   :  { %11672 = vset.pattern.permute.xlu1 %v19949_v62  ;;  %vm2312_vm5 = vcmp.lt.s32.totalorder %v13864_v49, 1  ;;  %vm19582_vm4 = vcmp.lt.s32.totalorder %v13864_v49, 3  ;;  %v2321_v2 = vsel %vm2315_vm8, %v2308_v46, 920167782  ;;  %v1697_v15 = vsel %vm1695_vm0, %v13664_v38, 2102212464 }
 0x1e9   :  { %v1752_v3 = vadd.s32 %v1751_v8, %v1742_v56  ;;  %v2288_v44 = vor.u32 8388608, %v2287_v39  ;;  %v2325_v20 = vsel %vm2315_vm8, %v2311_v51, 1326507024  ;;  %vm1342_vm10 = vcmp.eq.s32.totalorder %v13804_v29, 0 }
 0x1ea   :  { %v1626_v33 = vmul.f32 %v1625_v19, %v1623_v14  ;;  %v11298_v21 = vadd.s32 4294967294, %v1921_v24  ;;  %v1696_v23 = vsel %vm1692_vm13, %v1676_v57, %v13660_v50  ;;  %v13911_v31 = vadd.s32 %v1729_v55, %v1720_v42  ;;  %v19974_v19 = vld [vmem:[#allocation23_spill] sm:$0xff] }
 0x1eb   :  { %vm1345_vm7 = vcmp.eq.s32.totalorder %v13804_v29, 2  ;;  %vm6296_vm14 = vcmp.eq.s32.totalorder %v13787_v45, 0  ;;  %vm2313_vm0 = vcmp.lt.s32.totalorder %v13864_v49, 2  ;;  %v2320_v51 = vsel %vm2312_vm5, %v13889_v13, %v13891_v61 }
 0x1ec   :  { %v2322_v38 = vsel %vm19582_vm4, %v13893_v11, %v2321_v2  ;;  %v1974_v24 = vshrl.u32 %v1973_v0, 23  ;;  %v1698_v57 = vsel %vm1694_vm6, %v13662_v4, %v1697_v15  ;;  %v19950_v50 = vshll.u32 %v13813_v12, 16 }
 0x1ed   :  { %v2324_v55 = vsel %vm2312_vm5, %v13891_v61, %v13893_v11  ;;  %v2326_v8 = vsel %vm19582_vm4, %v2308_v46, %v2325_v20  ;;  %vm1341_vm13 = vcmp.lt.s32.totalorder %v13804_v29, 2  ;;  %v1343_v56 = vxor.u32 2147483648, %v13842_v54 }
 0x1ee   :  { %v13929_v39 = vadd.s32 %v13820_v52, %v19950_v50  ;;  %vm6299_vm9 = vcmp.eq.s32.totalorder %v13787_v45, 2  ;;  %v1477_v4 = vsel %vm13755_vm3, 0, %v13809_v5  ;;  %v1756_v12 = vadd.s32 1, %v1752_v3 }
 0x1ef   :  { %v13943_v52 = vshll.u32 %v2288_v44, 8  ;;  %vm6295_vm6 = vcmp.lt.s32.totalorder %v13787_v45, 2  ;;  %v1481_v53 = vmul.f32 %v13844_v28, %v13791_v34  ;;  %vm11299_vm15 = vcmp.lt.s32.totalorder %v11298_v21, 0 }
 0x1f0   :  { %vm1755_vm11 = vc.u32 %v13911_v31, %v13929_v39  ;;  %v13952_v47 = vsel %vm2313_vm0, %v2320_v51, %v2322_v38  ;;  %v1489_v60 = vadd.f32 -0.16666654, %v13847_v6  ;;  %v1699_v48 = vsel %vm1693_vm12, %v1696_v23, %v1698_v57 }
 0x1f1   :  { %v13959_v5 = vsel %vm2313_vm0, %v2324_v55, %v2326_v8  ;;  %v11300_v25 = vadd.s32 4294967169, %v1974_v24  ;;  %v1346_v28 = vxor.u32 2147483648, %v13839_v17  ;;  %v19952_v14 = vand.u32 2147483647, %v19951_v10 }
 0x1f2   :  { %vm19587_vm4 = vcmp.lt.s32.totalorder %v19951_v10, 0  ;;  %v1627_v9 = vxor.u32 2147483648, %v1626_v33  ;;  %v1924_v6 = vsel %vm11299_vm15, 0, %v11298_v21  ;;  %v1757_v46 = vsel %vm1755_vm11, %v1756_v12, %v1752_v3 }
 0x1f3   :  { %vm13964_vm3 = vcmp.le.f32.partialorder %v19952_v14, 0.7853982  ;;  %v2329_v40 = vand.u32 65535, %v13943_v52  ;;  %v2354_v27 = vshrl.u32 %v13952_v47, 16  ;;  %vm1338_vm12 = vweird.f32 %v19912_v36 }
 0x1f4   :  { %v1494_v0 = vadd.s32 3, %v1477_v4  ;;  %v13972_v62 = vand.u32 3, %v1477_v4  ;;  %v1753_v42 = vmul.u32 %v13721_v35, %v1699_v48  ;;  %v2332_v2 = vshrl.u32 %v13959_v5, 16 }
 0x1f5   :  { %v1344_v15 = vsel %vm1342_vm10, %v13839_v17, %v1343_v56  ;;  %v1482_v44 = vadd.f32 -0.4999988, %v1481_v53  ;;  %v1490_v3 = vmul.f32 %v1489_v60, %v13791_v34  ;;  %v1980_v20 = vadd.s32 1, %v11300_v25 }
 0x1f6   :  { %v1347_v21 = vsel %vm1345_vm7, %v1346_v28, %v13842_v54  ;;  %v6298_v23 = vsel %vm6296_vm14, %v13839_v17, %v1343_v56  ;;  %v1929_v51 = vsub.s32 4294967266, %v1924_v6  ;;  %v13986_v35 = vadd.s32 %v1757_v46, %v1753_v42 }
 0x1f7   :  { %v1628_v38 = vsel %vm19587_vm4, %v1627_v9, %v1626_v33  ;;  %v2330_v24 = vshrl.u32 %v13943_v52, 16  ;;  %v2353_v57 = vand.u32 65535, %v13952_v47  ;;  %v13992_v50 = vmul.u32 %v2354_v27, %v2329_v40 }
 0x1f8   :  { %v1348_v55 = vsel %vm1341_vm13, %v1344_v15, %v1347_v21  ;;  %v6301_v8 = vsel %vm6299_vm9, %v1346_v28, %v13842_v54  ;;  %v2331_v17 = vand.u32 65535, %v13959_v5  ;;  %v14000_v56 = vmul.u32 %v2332_v2, %v2329_v40 }
 0x1f9   :  { %v6302_v33 = vsel %vm6295_vm6, %v6298_v23, %v6301_v8  ;;  %v1483_v4 = vmul.f32 %v1482_v44, %v13791_v34  ;;  %v1491_v12 = vadd.f32 1.0, %v1490_v3  ;;  %vm1981_vm10 = vcmp.gt.s32.totalorder %v1980_v20, 0 }
 0x1fa   :  { %v14008_v29 = vsel %vm13964_vm3, %v19951_v10, %v1628_v38  ;;  %v1925_v53 = vsub.s32 32, %v1924_v6  ;;  %v1930_v47 = vadd.s32 127, %v1929_v51  ;;  %v1759_v54 = vadd.s32 536870912, %v13986_v35 }
 0x1fb   :  { %v1909_v60 = vadd.s32 %v13612_v63, %v13607_v32  ;;  %v2355_v48 = vmul.u32 %v2353_v57, %v2329_v40  ;;  %v14013_v5 = vmul.u32 %v2353_v57, %v2330_v24  ;;  %v2359_v45 = vshll.u32 %v13992_v50, 16 }
 0x1fc   :  { %v2333_v34 = vmul.u32 %v2331_v17, %v2329_v40  ;;  %v14016_v25 = vmul.u32 %v2331_v17, %v2330_v24  ;;  %v2337_v28 = vshll.u32 %v14000_v56, 16  ;;  %v1982_v14 = vsel %vm1981_vm10, %v1980_v20, 0 }
 0x1fd   :  { %v14021_v9 = vsel %vm1338_vm12, nan, %v1348_v55  ;;  %v14023_v46 = vadd.f32 1.0, %v1483_v4  ;;  %v14025_v42 = vand.u32 3, %v1494_v0  ;;  %v14029_v32 = vmul.f32 %v14008_v29, %v14008_v29 }
 0x1fe   :  { %v14033_v63 = vsel %vm1338_vm12, nan, %v6302_v33  ;;  %v1927_v40 = vshrl.u32 %v1909_v60, %v1925_v53  ;;  %v1931_v15 = vshll.u32 %v1930_v47, 23  ;;  %v14035_v44 = vshrl.u32 %v1759_v54, 30 }
 0x1ff   :  { %v19584_v3 = vshll.u32 %v14013_v5, 16  ;;  %vm2363_vm7 = vc.u32 %v2355_v48, %v2359_v45  ;;  %v14038_v20 = vadd.s32 %v2359_v45, %v2355_v48  ;;  %v1984_v21 = vand.u32 31, %v1982_v14 }
 0x200   :  { %v14041_v0 = vmul.f32 %v1491_v12, %v13771_v43  ;;  %v1926_v23 = vshll.u32 %v13818_v7, %v1924_v6  ;;  %v2339_v51 = vshll.u32 %v14016_v25, 16  ;;  %v2343_v36 = vadd.s32 %v2337_v28, %v2333_v34 }
 0x201   :  { %v19583_v38 = vxor.u32 2147483648, %v14023_v46  ;;  %v1641_v57 = vmul.f32 -0.00019511016, %v14029_v32  ;;  %vm2341_vm14 = vc.u32 %v2333_v34, %v2337_v28  ;;  %v2358_v55 = vmul.u32 %v2354_v27, %v2330_v24 }
 0x202   :  { %v14047_v8 = vor.u32 %v1927_v40, %v1926_v23  ;;  %v14049_v17 = vor.u32 4788187, %v1931_v15  ;;  %v1761_v33 = vshll.u32 %v14035_v44, 30  ;;  %v2364_v43 = vsel %vm2363_vm7, 1, %v19819_v1 }
 0x203   :  { %vm1500_vm13 = vcmp.eq.s32.totalorder %v14025_v42, 2  ;;  %v2336_v7 = vmul.u32 %v2332_v2, %v2330_v24  ;;  %vm2367_vm9 = vc.u32 %v14038_v20, %v19584_v3  ;;  %v14057_v6 = vsub.s32 32, %v1984_v21 }
 0x204   :  { %v2342_v12 = vsel %vm2341_vm14, 1, %v19819_v1  ;;  %vm2345_vm6 = vc.u32 %v2343_v36, %v2339_v51  ;;  %v14068_v2 = vsel %vm1500_vm13, %v19583_v38, %v14041_v0  ;;  %v14071_v24 = vmul.f32 -0.001358992, %v14029_v32 }
 0x205   :  { %v14073_v53 = vadd.f32 0.008332121, %v1641_v57  ;;  %v2366_v47 = vadd.s32 %v2364_v43, %v2358_v55  ;;  %v1933_v54 = vand.u32 2147483647, %v14049_v17  ;;  %v1935_v60 = vcvt.s32.f32 %v14047_v8 }
 0x206   :  { %v14078_v48 = vsub.s32 %v13986_v35, %v1761_v33  ;;  %v2368_v45 = vsel %vm2367_vm9, 1, %v19819_v1  ;;  %v2344_v34 = vadd.s32 %v2342_v12, %v2336_v7  ;;  %v2346_v28 = vsel %vm2345_vm6, 1, %v19819_v1 }
 0x207   :  { %v1996_v40 = vshll.u32 %v19870_v59, %v1984_v21  ;;  %v1997_v15 = vshrl.u32 %v19871_v22, %v14057_v6  ;;  %v19585_v23 = vand.u32 2147483647, %v13880_v16  ;;  %v14086_v51 = vshrl.u32 %v1982_v14, 5 }
 0x208   :  { %v1999_v36 = vshll.u32 %v19871_v22, %v1984_v21  ;;  %v2000_v35 = vshrl.u32 %v19872_v18, %v14057_v6  ;;  %v2360_v57 = vshrl.u32 %v13992_v50, 16  ;;  %v2370_v55 = vadd.s32 %v2368_v45, %v2366_v47  ;;  %v19955_v50 = vld [vmem:[#allocation11_spill] sm:$0xff] }
 0x209   :  { %v1987_v8 = vshll.u32 %v19809_v58, %v1984_v21  ;;  %v1990_v17 = vshll.u32 %v19807_v30, %v1984_v21  ;;  %v1988_v33 = vshrl.u32 %v19807_v30, %v14057_v6  ;;  %v1991_v43 = vshrl.u32 %v19808_v41, %v14057_v6 }
 0x20a   :  { %v1993_v14 = vshll.u32 %v19808_v41, %v1984_v21  ;;  %v1994_v7 = vshrl.u32 %v19870_v59, %v14057_v6  ;;  %vm1497_vm15 = vcmp.eq.s32.totalorder %v14025_v42, 0  ;;  %vm6450_vm11 = vcmp.eq.s32.totalorder %v13972_v62, 0 }
 0x20b   :  { %v2296_v12 = vshrl.u32 %v19809_v58, %v19955_v50  ;;  %v2338_v47 = vshrl.u32 %v14000_v56, 16  ;;  %v2348_v45 = vadd.s32 %v2346_v28, %v2344_v34  ;;  %v1998_v27 = vor.u32 %v1997_v15, %v1996_v40  ;;  %v264_v34 = vpop.permute.xlu1 %263 }
 0x20c   :  { %v2317_v38 = vsel %vm2315_vm8, %v13893_v11, 2102212464  ;;  %v1977_v21 = vand.u32 8388607, %v19585_v23  ;;  %v2001_v4 = vor.u32 %v2000_v35, %v1999_v36  ;;  %vm19586_vm12 = vcmp.lt.s32.totalorder %v14086_v51, 4  ;;  %v19956_v35 = vld [vmem:[#allocation32_spill] sm:$0xff] }
 0x20d   :  { %vm1763_vm10 = vcmp.lt.s32.totalorder %v14078_v48, 0  ;;  %v1764_v3 = vsub.s32 0, %v14078_v48  ;;  %v2340_v50 = vshrl.u32 %v14016_v25, 16  ;;  %v2362_v56 = vshrl.u32 %v14013_v5, 16 }
 0x20e   :  { %vm1496_vm7 = vcmp.lt.s32.totalorder %v14025_v42, 2  ;;  %vm6453_vm14 = vcmp.eq.s32.totalorder %v13972_v62, 2  ;;  %v2371_v11 = vadd.s32 %v2370_v55, %v2360_v57  ;;  %v14118_v28 = vor.u32 %v1988_v33, %v1987_v8  ;;  %v19957_v8 = vld [vmem:[#allocation9_spill] sm:$0xff] }
 0x20f   :  { %v14120_v40 = vor.u32 %v1991_v43, %v1990_v17  ;;  %v14122_v15 = vor.u32 %v1994_v7, %v1993_v14  ;;  %vm6449_vm8 = vcmp.lt.s32.totalorder %v13972_v62, 2  ;;  %v2349_v36 = vadd.s32 %v2348_v45, %v2338_v47  ;;  %v19962_v7 = vld [vmem:[#allocation20_spill] sm:$0xff] }
 0x210   :  { %vm2002_vm13 = vcmp.lt.s32.totalorder %v14086_v51, 1  ;;  %vm2004_vm9 = vcmp.lt.s32.totalorder %v14086_v51, 3  ;;  %v2011_v25 = vsel %vm19586_vm12, %v1998_v27, 920167782  ;;  %v1936_v23 = vmul.f32 %v1935_v60, %v1933_v54 }
 0x211   :  { %v1978_v57 = vor.u32 8388608, %v1977_v21  ;;  %v2015_v55 = vsel %vm19586_vm12, %v2001_v4, 1326507024  ;;  %v14135_v33 = vsel %vm11916_vm1, %v19957_v8, %v264_v34  ;;  %v1765_v43 = vsel %vm1763_vm10, %v1764_v3, %v14078_v48  ;;  %v19967_v34 = vld [vmem:[#allocation19_spill] sm:$0xff] }
 0x212   :  { %19959 = vst [vmem:[#allocation29_spill] sm:$0xff] %v14135_v33  ;;  %v2316_v14 = vsel %vm2312_vm5, %v2296_v12, %v13889_v13  ;;  %vm19960_vm6 = vcmp.lt.s32.totalorder %v13864_v49, 3  ;;  %v19961_v60 = vshll.u32 %v14013_v5, 16  ;;  %vm1493_vm12 = vweird.f32 %v19962_v7 }
 0x213   :  { %v2318_v54 = vsel %vm19960_vm6, %v13891_v61, %v2317_v38  ;;  %v2372_v47 = vadd.s32 %v2371_v11, %v2362_v56  ;;  %vm2003_vm4 = vcmp.lt.s32.totalorder %v14086_v51, 2  ;;  %v2010_v3 = vsel %vm2002_vm13, %v14118_v28, %v14120_v40  ;;  %v19963_v38 = vld [vmem:[#allocation7_spill] sm:$0xff] }
 0x214   :  { %v14149_v4 = vadd.s32 %v14038_v20, %v19961_v60  ;;  %v2012_v13 = vsel %vm2004_vm9, %v14122_v15, %v2011_v25  ;;  %v14160_v61 = vadd.s32 %v2349_v36, %v2340_v50  ;;  %v2014_v5 = vsel %vm2002_vm13, %v14120_v40, %v14122_v15 }
 0x215   :  { %v2016_v20 = vsel %vm2004_vm9, %v1998_v27, %v2015_v55  ;;  %v14170_v12 = vmul.f32 %v19963_v38, %v14135_v33  ;;  %v19965_v45 = vxor.u32 2147483648, %v14041_v0  ;;  %v1629_v11 = vsub.s32 4, %v19967_v34 }
 0x216   :  { %v14183_v36 = vshll.u32 %v1978_v57, 8  ;;  %v1635_v27 = vadd.f32 0.041655596, %v14071_v24  ;;  %v1937_v25 = vxor.u32 2147483648, %v1936_v23  ;;  %v1766_v55 = vclz %v1765_v43 }
 0x217   :  { %19964 = vst [vmem:[#allocation11_spill] sm:$0xff] %v14170_v12  ;;  %v1499_v21 = vsel %vm1497_vm15, %v14023_v46, %v19965_v45  ;;  %v19966_v50 = vmov %v19965_v45  ;;  %v14188_v8 = vsel %vm2003_vm4, %v2010_v3, %v2012_v13  ;;  %v1643_v60 = vmul.f32 %v14073_v53, %v14029_v32 }
 0x218   :  { %v6452_v56 = vsel %vm6450_vm11, %v14023_v46, %v19966_v50  ;;  %v2319_v45 = vsel %vm2313_vm0, %v2316_v14, %v2318_v54  ;;  %v2376_v33 = vadd.s32 1, %v2372_v47  ;;  %v14196_v50 = vsel %vm2003_vm4, %v2014_v5, %v2016_v20 }
 0x219   :  { %v1503_v24 = vsel %vm1496_vm7, %v1499_v21, %v14068_v2  ;;  %v19968_v57 = vxor.u32 2147483648, %v14023_v46  ;;  %vm2375_vm5 = vc.u32 %v14160_v61, %v14149_v4  ;;  %v2128_v49 = vand.u32 2139095040, %v14170_v12 }
 0x21a   :  { %vm19969_vm0 = vcmp.lt.s32.totalorder %v19951_v10, 0  ;;  %v2019_v42 = vand.u32 65535, %v14183_v36  ;;  %v2044_v2 = vshrl.u32 %v14188_v8, 16  ;;  %vm19970_vm15 = vcmp.lt.s32.totalorder %v19956_v35, 0 }
 0x21b   :  { %v6455_v43 = vsel %vm6453_vm14, %v19968_v57, %v14041_v0  ;;  %v1630_v14 = vsel %vm19969_vm0, %v1629_v11, %v19967_v34  ;;  %v1938_v46 = vsel %vm19970_vm15, %v1937_v25, %v1936_v23  ;;  %v11295_v0 = vadd.s32 4294967294, %v1766_v55  ;;  %v19978_v57 = vld [vmem:[#allocation5_spill] sm:$0xff]  ;;  %vm19989_vm6 = vmmov %vm19970_vm15 }
 0x21c   :  { %v6456_v53 = vsel %vm6449_vm8, %v6452_v56, %v6455_v43  ;;  %v2373_v54 = vmul.u32 %v13943_v52, %v2319_v45  ;;  %v2022_v3 = vshrl.u32 %v14196_v50, 16  ;;  %v1636_v13 = vmul.f32 %v1635_v27, %v14029_v32 }
 0x21d   :  { %v1644_v62 = vadd.f32 -0.16666654, %v1643_v60  ;;  %v19971_v5 = vand.u32 2147483647, %v19956_v35  ;;  %v2377_v21 = vsel %vm2375_vm5, %v2376_v33, %v2372_v47  ;;  %v1504_v56 = vsel %vm1493_vm12, nan, %v1503_v24  ;;  %v19975_v60 = vld [vmem:[#allocation24_spill] sm:$0xff] }
 0x21e   :  { %v6457_v23 = vsel %vm1493_vm12, nan, %v6456_v53  ;;  %v1632_v52 = vsel %vm13964_vm3, 0, %v1630_v14  ;;  %v2129_v34 = vshrl.u32 %v2128_v49, 23  ;;  %v2020_v27 = vshrl.u32 %v14183_v36, 16  ;;  %v19977_v24 = vld [vmem:[#allocation13_spill] sm:$0xff]  ;;  %v19982_v49 = vld [vmem:[#allocation15_spill] sm:$0xff] }
 0x21f   :  { %vm14223_vm11 = vcmp.le.f32.partialorder %v19971_v5, 0.7853982  ;;  %v2043_v25 = vand.u32 65535, %v14188_v8  ;;  %v14240_v33 = vmul.u32 %v2044_v2, %v2019_v42  ;;  %vm11296_vm10 = vcmp.lt.s32.totalorder %v11295_v0, 0 }
 0x220   :  { %v14236_v11 = vsel %vm14223_vm11, %v19956_v35, %v1938_v46  ;;  %v14242_v47 = vadd.s32 %v2377_v21, %v2373_v54  ;;  %v2021_v7 = vand.u32 65535, %v14196_v50  ;;  %v14245_v55 = vmul.u32 %v2022_v3, %v2019_v42 }
 0x221   :  { %v19976_v45 = vsel %vm12700_vm2, %v19974_v19, %v19975_v60  ;;  %vm19979_vm3 = vcmp.lt.s32.totalorder %v19978_v57, 2  ;;  %v19981_v8 = vsel %vm12700_vm2, %v14021_v9, %v14033_v63  ;;  %v1637_v53 = vadd.f32 -0.4999988, %v1636_v13 }
 0x222   :  { %v14255_v43 = vsel %vm19979_vm3, %v19977_v24, %v19976_v45  ;;  %vm19983_vm12 = vmmov %vm19979_vm3  ;;  %v1645_v14 = vmul.f32 %v1644_v62, %v14029_v32  ;;  %v10314_v46 = vsel %vm12700_vm2, %v1504_v56, %v6457_v23  ;;  %v1649_v54 = vadd.s32 3, %v1632_v52  ;;  %v19985_v23 = vld [vmem:[#allocation18_spill] sm:$0xff] }
 0x223   :  { %19980 = vst [vmem:[#allocation32_spill] sm:$0xff] %v14255_v43  ;;  %v14265_v50 = vsel %vm19983_vm12, %v19982_v49, %v19981_v8  ;;  %v14272_v5 = vmul.f32 %v14236_v11, %v14236_v11  ;;  %v11303_v21 = vadd.s32 4294967169, %v2129_v34  ;;  %v14274_v19 = vsel %vm11296_vm10, 0, %v11295_v0  ;;  %vm19986_vm7 = vmmov %vm19979_vm3  ;;  %v19988_v8 = vld [vmem:[#allocation10_spill] sm:$0xff] }
 0x224   :  { %19984 = vst [vmem:[#allocation9_spill] sm:$0xff] %v14265_v50  ;;  %v2045_v9 = vmul.u32 %v2043_v25, %v2019_v42  ;;  %v14276_v63 = vmul.u32 %v2043_v25, %v2020_v27  ;;  %v2049_v60 = vshll.u32 %v14240_v33, 16  ;;  %v2379_v13 = vadd.s32 536870912, %v14242_v47 }
 0x225   :  { %v2023_v45 = vmul.u32 %v2021_v7, %v2019_v42  ;;  %v14280_v62 = vmul.u32 %v2021_v7, %v2020_v27  ;;  %v2027_v56 = vshll.u32 %v14245_v55, 16  ;;  %v14286_v24 = vsel %vm19986_vm7, %v19985_v23, %v10314_v46 }
 0x226   :  { %19987 = vst [vmem:[#allocation20_spill] sm:$0xff] %v14286_v24  ;;  %v1638_v0 = vmul.f32 %v1637_v53, %v14029_v32  ;;  %v1646_v34 = vadd.f32 1.0, %v1645_v14  ;;  %v1939_v25 = vsub.s32 4, %v19988_v8  ;;  %v14290_v49 = vand.u32 3, %v1649_v54 }
 0x227   :  { %v14292_v50 = vand.u32 3, %v1632_v52  ;;  %v1944_v42 = vmul.f32 -0.001358992, %v14272_v5  ;;  %v2135_v7 = vadd.s32 1, %v11303_v21  ;;  %v1774_v43 = vsub.s32 4294967266, %v14274_v19 }
 0x228   :  { %v19593_v16 = vshll.u32 %v14276_v63, 16  ;;  %vm2053_vm14 = vc.u32 %v2045_v9, %v2049_v60  ;;  %v14297_v37 = vadd.s32 %v2049_v60, %v2045_v9  ;;  %v14299_v46 = vshrl.u32 %v2379_v13, 30 }
 0x229   :  { %v2029_v32 = vshll.u32 %v14280_v62, 16  ;;  %vm2031_vm8 = vc.u32 %v2023_v45, %v2027_v56  ;;  %v2033_v53 = vadd.s32 %v2027_v56, %v2023_v45  ;;  %v1639_v14 = vadd.f32 1.0, %v1638_v0 }
 0x22a   :  { %v1647_v52 = vmul.f32 %v1646_v34, %v14008_v29  ;;  %v1940_v54 = vsel %vm19989_vm6, %v1939_v25, %v19988_v8  ;;  %v2048_v21 = vmul.u32 %v2044_v2, %v2020_v27  ;;  %vm6604_vm5 = vcmp.eq.s32.totalorder %v14292_v50, 0 }
 0x22b   :  { %vm6607_vm0 = vcmp.eq.s32.totalorder %v14292_v50, 2  ;;  %v1951_v9 = vmul.f32 -0.00019511016, %v14272_v5  ;;  %v2026_v60 = vmul.u32 %v2022_v3, %v2020_v27  ;;  %v2054_v13 = vsel %vm2053_vm14, 1, %v19819_v1  ;;  %v53_v27 = vld [vmem:[%s19469_s0 + $0xf8] sm:$0xff] }
 0x22c   :  { %vm2136_vm15 = vcmp.gt.s32.totalorder %v2135_v7, 0  ;;  %vm1651_vm10 = vcmp.lt.s32.totalorder %v14290_v49, 2  ;;  %vm1652_vm3 = vcmp.eq.s32.totalorder %v14290_v49, 0  ;;  %v1775_v29 = vadd.s32 127, %v1774_v43  ;;  %343 = vperm.xlu1 %11672, %v53_v27   ;;  %215 = vperm.xlu2 %11671, %v53_v27  }
 0x22d   :  { %v2032_v45 = vsel %vm2031_vm8, 1, %v19819_v1  ;;  %vm2057_vm12 = vc.u32 %v14297_v37, %v19593_v16  ;;  %v1942_v2 = vsel %vm14223_vm11, 0, %v1940_v54  ;;  %v1945_v56 = vadd.f32 0.041655596, %v1944_v42 }
 0x22e   :  { %v2381_v3 = vshll.u32 %v14299_v46, 30  ;;  %vm2035_vm7 = vc.u32 %v2033_v53, %v2029_v32  ;;  %v1653_v23 = vxor.u32 2147483648, %v1647_v52  ;;  %vm1655_vm14 = vcmp.eq.s32.totalorder %v14290_v49, 2 }
 0x22f   :  { %v2056_v43 = vadd.s32 %v2054_v13, %v2048_v21  ;;  %v2137_v0 = vsel %vm2136_vm15, %v2135_v7, 0  ;;  %v1656_v34 = vxor.u32 2147483648, %v1639_v14  ;;  %v1952_v8 = vadd.f32 0.008332121, %v1951_v9 }
 0x230   :  { %v2034_v25 = vadd.s32 %v2032_v45, %v2026_v60  ;;  %v2058_v20 = vsel %vm2057_vm12, 1, %v19819_v1  ;;  %v14324_v42 = vadd.s32 3, %v1942_v2  ;;  %v1770_v32 = vsub.s32 32, %v14274_v19 }
 0x231   :  { %v1776_v53 = vshll.u32 %v1775_v29, 23  ;;  %v2036_v54 = vsel %vm2035_vm7, 1, %v19819_v1  ;;  %v1946_v16 = vmul.f32 %v1945_v56, %v14272_v5  ;;  %v14329_v24 = vand.u32 3, %v1942_v2 }
 0x232   :  { %v14332_v7 = vsub.s32 %v14242_v47, %v2381_v3  ;;  %v2139_v21 = vand.u32 31, %v2137_v0  ;;  %v1654_v9 = vsel %vm1652_vm3, %v1639_v14, %v1653_v23  ;;  %v1754_v60 = vadd.s32 %v13929_v39, %v13911_v31 }
 0x233   :  { %v2050_v13 = vshrl.u32 %v14240_v33, 16  ;;  %v2060_v45 = vadd.s32 %v2058_v20, %v2056_v43  ;;  %v1657_v29 = vsel %vm1655_vm14, %v1656_v34, %v1647_v52  ;;  %v1953_v56 = vmul.f32 %v1952_v8, %v14272_v5 }
 0x234   :  { %v2028_v2 = vshrl.u32 %v14245_v55, 16  ;;  %v2038_v27 = vadd.s32 %v2036_v54, %v2034_v25  ;;  %v14345_v47 = vsel %vm6604_vm5, %v1639_v14, %v1653_v23  ;;  %v14349_v3 = vsel %vm6607_vm0, %v1656_v34, %v1647_v52  ;;  %v14364_v34 = vpop.permute.xlu2 %135 }
 0x235   :  { %v1772_v31 = vshrl.u32 %v1754_v60, %v1770_v32  ;;  %v1777_v39 = vor.u32 4788187, %v1776_v53  ;;  %v14353_v33 = vsel %vm1651_vm10, %v1654_v9, %v1657_v29  ;;  %v14355_v43 = vadd.f32 -0.4999988, %v1946_v16  ;;  %19990 = vst [vmem:[#allocation19_spill] sm:$0xff] %v14364_v34  ;;  %v272_v32 = vpop.permute.xlu0 %271  ;;  %v126_v53 = vpop.permute.xlu1 %125 }
 0x236   :  { %v2384_v8 = vsub.s32 0, %v14332_v7  ;;  %v14358_v55 = vsub.s32 32, %v2139_v21  ;;  %v1771_v14 = vshll.u32 %v14078_v48, %v14274_v19  ;;  %vm2383_vm11 = vcmp.lt.s32.totalorder %v14332_v7, 0 }
 0x237   :  { %v2052_v52 = vshrl.u32 %v14276_v63, 16  ;;  %v2061_v23 = vadd.s32 %v2060_v45, %v2050_v13  ;;  %v1954_v25 = vadd.f32 -0.16666654, %v1953_v56  ;;  %v1986_v49 = vshrl.u32 %v19809_v58, %v14057_v6 }
 0x238   :  { %v2030_v16 = vshrl.u32 %v14280_v62, 16  ;;  %v2039_v20 = vadd.s32 %v2038_v27, %v2028_v2  ;;  %v1773_v54 = vor.u32 %v1772_v31, %v1771_v14  ;;  %v1778_v9 = vand.u32 2147483647, %v1777_v39 }
 0x239   :  { %vm19991_vm8 = vcmp.lt.s32.totalorder %v14086_v51, 4  ;;  %v19594_v19 = vand.u32 2147483647, %v14170_v12  ;;  %v2385_v60 = vsel %vm2383_vm11, %v2384_v8, %v14332_v7  ;;  %v14374_v13 = vshrl.u32 %v2137_v0, 5 }
 0x23a   :  { %v2007_v48 = vsel %vm19991_vm8, %v14122_v15, 2102212464  ;;  %v2154_v45 = vshll.u32 %v19871_v22, %v2139_v21  ;;  %v2155_v6 = vshrl.u32 %v19872_v18, %v14358_v55  ;;  %vm6603_vm6 = vcmp.lt.s32.totalorder %v14292_v50, 2 }
 0x23b   :  { %v2062_v62 = vadd.s32 %v2061_v23, %v2052_v52  ;;  %v2151_v29 = vshll.u32 %v19870_v59, %v2139_v21  ;;  %v2152_v56 = vshrl.u32 %v19871_v22, %v14358_v55  ;;  %v14385_v15 = vsel %vm11916_vm1, %v126_v53, %v272_v32 }
 0x23c   :  { %19992 = vst [vmem:[#allocation23_spill] sm:$0xff] %v14385_v15  ;;  %v2006_v0 = vsel %vm2002_vm13, %v1986_v49, %v14118_v28  ;;  %v2008_v2 = vsel %vm2004_vm9, %v14120_v40, %v2007_v48  ;;  %v14393_v27 = vadd.s32 %v2039_v20, %v2030_v16  ;;  %v19993_v31 = vshll.u32 %v14276_v63, 16 }
 0x23d   :  { %v2145_v8 = vshll.u32 %v19807_v30, %v2139_v21  ;;  %v2146_v14 = vshrl.u32 %v19808_v41, %v14358_v55  ;;  %v2148_v52 = vshll.u32 %v19808_v41, %v2139_v21  ;;  %v2149_v28 = vshrl.u32 %v19870_v59, %v14358_v55 }
 0x23e   :  { %v14398_v39 = vadd.s32 %v14297_v37, %v19993_v31  ;;  %vm1648_vm13 = vweird.f32 %v19951_v10  ;;  %v2142_v40 = vshll.u32 %v19809_v58, %v2139_v21  ;;  %v2143_v63 = vshrl.u32 %v19807_v30, %v14358_v55 }
 0x23f   :  { %v2156_v23 = vor.u32 %v2155_v6, %v2154_v45  ;;  %v14412_v37 = vmul.f32 %v19963_v38, %v14385_v15  ;;  %v2066_v49 = vadd.s32 1, %v2062_v62  ;;  %v2132_v16 = vand.u32 8388607, %v19594_v19 }
 0x240   :  { %19994 = vst [vmem:[#allocation24_spill] sm:$0xff] %v14398_v39  ;;  %v2153_v20 = vor.u32 %v2152_v56, %v2151_v29  ;;  %vm2160_vm9 = vcmp.lt.s32.totalorder %v14374_v13, 4  ;;  %v1955_v32 = vmul.f32 %v1954_v25, %v14272_v5  ;;  %v1780_v53 = vcvt.s32.f32 %v1773_v54  ;;  %v14432_v54 = vpop.permute.xlu2 %140 }
 0x241   :  { %19995 = vst [vmem:[#allocation13_spill] sm:$0xff] %v14412_v37  ;;  %v2386_v48 = vclz %v2385_v60  ;;  %vm2065_vm5 = vc.u32 %v14393_v27, %v14398_v39  ;;  %v2009_v21 = vsel %vm2003_vm4, %v2006_v0, %v2008_v2  ;;  %v14422_v45 = vor.u32 %v2146_v14, %v2145_v8  ;;  %v14434_v60 = vpop.permute.xlu0 %275 }
 0x242   :  { %v14424_v6 = vor.u32 %v2149_v28, %v2148_v52  ;;  %vm2157_vm0 = vcmp.lt.s32.totalorder %v14374_v13, 1  ;;  %v14427_v31 = vor.u32 %v2143_v63, %v2142_v40  ;;  %vm2159_vm15 = vcmp.lt.s32.totalorder %v14374_v13, 3  ;;  %19996 = vst [vmem:[#allocation15_spill] sm:$0xff] %v14432_v54 }
 0x243   :  { %v2170_v25 = vsel %vm2160_vm9, %v2156_v23, 1326507024  ;;  %v2438_v51 = vand.u32 2139095040, %v14412_v37  ;;  %v1781_v29 = vmul.f32 %v1780_v53, %v1778_v9  ;;  %v2067_v56 = vsel %vm2065_vm5, %v2066_v49, %v2062_v62  ;;  %v19997_v53 = vld [vmem:[#allocation8_spill] sm:$0xff] }
 0x244   :  { %v2133_v0 = vor.u32 8388608, %v2132_v16  ;;  %v2166_v2 = vsel %vm2160_vm9, %v2153_v20, 920167782  ;;  %v6610_v8 = vsel %vm6603_vm6, %v14345_v47, %v14349_v3  ;;  %v1948_v14 = vmul.f32 %v14355_v43, %v14272_v5 }
 0x245   :  { %v11307_v52 = vadd.s32 4294967294, %v2386_v48  ;;  %v2063_v28 = vmul.u32 %v14183_v36, %v2009_v21  ;;  %v1956_v40 = vadd.f32 1.0, %v1955_v32  ;;  %vm2158_vm4 = vcmp.lt.s32.totalorder %v14374_v13, 2 }
 0x246   :  { %v2169_v9 = vsel %vm2157_vm0, %v14422_v45, %v14424_v6  ;;  %v2171_v62 = vsel %vm2159_vm15, %v2153_v20, %v2170_v25  ;;  %v2165_v50 = vsel %vm2157_vm0, %v14427_v31, %v14422_v45  ;;  %v2167_v36 = vsel %vm2159_vm15, %v14424_v6, %v2166_v2 }
 0x247   :  { %v14453_v63 = vadd.s32 %v2067_v56, %v2063_v28  ;;  %v2439_v5 = vshrl.u32 %v2438_v51, 23  ;;  %v1659_v47 = vsel %vm1648_vm13, nan, %v14353_v33  ;;  %v6611_v3 = vsel %vm1648_vm13, nan, %v6610_v8 }
 0x248   :  { %v1782_v43 = vxor.u32 2147483648, %v1781_v29  ;;  %v14467_v23 = vshll.u32 %v2133_v0, 8  ;;  %v1949_v49 = vadd.f32 1.0, %v1948_v14  ;;  %v1960_v16 = vand.u32 3, %v14324_v42  ;;  %v288_v14 = vpop.permute.xlu2 %287 }
 0x249   :  { %vm11308_vm10 = vcmp.lt.s32.totalorder %v11307_v52, 0  ;;  %v14472_v20 = vsel %vm2158_vm4, %v2169_v9, %v2171_v62  ;;  %v1957_v32 = vmul.f32 %v1956_v40, %v14236_v11  ;;  %v19998_v48 = vand.u32 2147483647, %v19997_v53  ;;  %v146_v28 = vpop.permute.xlu0 %145  ;;  %v20001_v40 = vld [vmem:[#allocation28_spill] sm:$0xff] }
 0x24a   :  { %vm1662_vm12 = vcmp.lt.s32.totalorder %v19997_v53, 0  ;;  %v14484_v10 = vsel %vm2158_vm4, %v2165_v50, %v2167_v36  ;;  %v10315_v42 = vsel %vm12700_vm2, %v1659_v47, %v6611_v3  ;;  %vm6912_vm7 = vcmp.eq.s32.totalorder %v14329_v24, 0 }
 0x24b   :  { %vm14477_vm3 = vcmp.le.f32.partialorder %v19998_v48, 0.7853982  ;;  %v2069_v21 = vadd.s32 536870912, %v14453_v63  ;;  %v11309_v11 = vadd.s32 4294967169, %v2439_v5  ;;  %v1783_v25 = vsel %vm1662_vm12, %v1782_v43, %v1781_v29 }
 0x24c   :  { %v14492_v51 = vsel %vm11308_vm10, 0, %v11307_v52  ;;  %v2174_v56 = vand.u32 65535, %v14467_v23  ;;  %v2177_v0 = vshrl.u32 %v14472_v20, 16  ;;  %vm1961_vm14 = vcmp.lt.s32.totalorder %v1960_v16, 2 }
 0x24d   :  { %v1966_v2 = vxor.u32 2147483648, %v1949_v49  ;;  %vm6911_vm11 = vcmp.lt.s32.totalorder %v14329_v24, 2  ;;  %vm6915_vm8 = vcmp.eq.s32.totalorder %v14329_v24, 2  ;;  %v2199_v8 = vshrl.u32 %v14484_v10, 16 }
 0x24e   :  { %vm20002_vm6 = vcmp.lt.s32.totalorder %v19978_v57, 2  ;;  %vm1962_vm13 = vcmp.eq.s32.totalorder %v1960_v16, 0  ;;  %v1963_v52 = vxor.u32 2147483648, %v1957_v32  ;;  %vm1965_vm5 = vcmp.eq.s32.totalorder %v1960_v16, 2 }
 0x24f   :  { %v14502_v29 = vsel %vm20002_vm6, %v20001_v40, %v10315_v42  ;;  %v14507_v9 = vsel %vm14477_vm3, %v19997_v53, %v1783_v25  ;;  %v2394_v62 = vsub.s32 4294967266, %v14492_v51  ;;  %v14510_v50 = vshrl.u32 %v2069_v21, 30 }
 0x250   :  { %20003 = vst [vmem:[#allocation18_spill] sm:$0xff] %v14502_v29  ;;  %v2445_v36 = vadd.s32 1, %v11309_v11  ;;  %v2175_v5 = vshrl.u32 %v14467_v23, 16  ;;  %v2176_v47 = vand.u32 65535, %v14472_v20  ;;  %v14514_v3 = vmul.u32 %v2177_v0, %v2174_v56 }
 0x251   :  { %20004 = vst [vmem:[#allocation10_spill] sm:$0xff] %v14510_v50  ;;  %v14518_v43 = vsel %vm11916_vm1, %v146_v28, %v288_v14  ;;  %v1967_v48 = vsel %vm1965_vm5, %v1966_v2, %v1957_v32  ;;  %v6917_v42 = vsel %vm6915_vm8, %v1966_v2, %v1957_v32  ;;  %v2198_v25 = vand.u32 65535, %v14484_v10 }
 0x252   :  { %20005 = vst [vmem:[#allocation28_spill] sm:$0xff] %v14518_v43  ;;  %v14523_v40 = vmul.u32 %v2199_v8, %v2174_v56  ;;  %v1964_v21 = vsel %vm1962_vm13, %v1949_v49, %v1963_v52  ;;  %v6914_v11 = vsel %vm6912_vm7, %v1949_v49, %v1963_v52  ;;  %v1784_v20 = vsub.s32 4, %v14035_v44 }
 0x253   :  { %v14530_v19 = vmul.f32 %v14507_v9, %v14507_v9  ;;  %v2390_v14 = vsub.s32 32, %v14492_v51  ;;  %v2395_v28 = vadd.s32 127, %v2394_v62  ;;  %vm2446_vm10 = vcmp.gt.s32.totalorder %v2445_v36, 0 }
 0x254   :  { %v14535_v32 = vmul.f32 %v19963_v38, %v14518_v43  ;;  %vm1958_vm8 = vweird.f32 %v19956_v35  ;;  %v2071_v10 = vshll.u32 %v14510_v50, 30  ;;  %v2178_v2 = vmul.u32 %v2176_v47, %v2174_v56 }
 0x255   :  { %v14539_v49 = vmul.u32 %v2176_v47, %v2175_v5  ;;  %v2182_v52 = vshll.u32 %v14514_v3, 16  ;;  %v2374_v29 = vadd.s32 %v14149_v4, %v14160_v61  ;;  %v2200_v15 = vmul.u32 %v2198_v25, %v2174_v56 }
 0x256   :  { %20006 = vst [vmem:[#allocation33_spill] sm:$0xff] %v14535_v32  ;;  %v14544_v54 = vmul.u32 %v2198_v25, %v2175_v5  ;;  %v2204_v62 = vshll.u32 %v14523_v40, 16  ;;  %v1968_v43 = vsel %vm1961_vm14, %v1964_v21, %v1967_v48  ;;  %v6918_v12 = vsel %vm6911_vm11, %v6914_v11, %v6917_v42 }
 0x257   :  { %v1785_v47 = vsel %vm1662_vm12, %v1784_v20, %v14035_v44  ;;  %v2447_v57 = vsel %vm2446_vm10, %v2445_v36, 0  ;;  %v1796_v50 = vmul.f32 -0.00019511016, %v14530_v19  ;;  %v2392_v34 = vshrl.u32 %v2374_v29, %v2390_v14 }
 0x258   :  { %v2396_v39 = vshll.u32 %v2395_v28, 23  ;;  %v3058_v4 = vand.u32 2139095040, %v14535_v32  ;;  %v14556_v61 = vsub.s32 %v14453_v63, %v2071_v10  ;;  %v2184_v16 = vshll.u32 %v14539_v49, 16 }
 0x259   :  { %vm2186_vm7 = vc.u32 %v2178_v2, %v2182_v52  ;;  %v2188_v56 = vadd.s32 %v2182_v52, %v2178_v2  ;;  %v19603_v24 = vshll.u32 %v14544_v54, 16  ;;  %vm2208_vm14 = vc.u32 %v2200_v15, %v2204_v62 }
 0x25a   :  { %v14560_v48 = vadd.s32 %v2204_v62, %v2200_v15  ;;  %v2449_v44 = vand.u32 31, %v2447_v57  ;;  %v14564_v36 = vsel %vm14477_vm3, 0, %v1785_v47  ;;  %v1789_v29 = vmul.f32 -0.001358992, %v14530_v19 }
 0x25b   :  { %v2391_v63 = vshll.u32 %v14332_v7, %v14492_v51  ;;  %v2181_v42 = vmul.u32 %v2177_v0, %v2175_v5  ;;  %v1797_v25 = vadd.f32 0.008332121, %v1796_v50  ;;  %v2187_v21 = vsel %vm2186_vm7, 1, %v19819_v1 }
 0x25c   :  { %v2203_v11 = vmul.u32 %v2199_v8, %v2175_v5  ;;  %v3059_v20 = vshrl.u32 %v3058_v4, 23  ;;  %v2397_v28 = vor.u32 4788187, %v2396_v39  ;;  %vm2190_vm12 = vc.u32 %v2188_v56, %v2184_v16 }
 0x25d   :  { %v2393_v14 = vor.u32 %v2392_v34, %v2391_v63  ;;  %v2209_v15 = vsel %vm2208_vm14, 1, %v19819_v1  ;;  %v14573_v33 = vsel %vm1958_vm8, nan, %v1968_v43  ;;  %v2074_v10 = vsub.s32 0, %v14556_v61 }
 0x25e   :  { %20007 = vst [vmem:[#allocation34_spill] sm:$0xff] %v14573_v33  ;;  %vm2212_vm3 = vc.u32 %v14560_v48, %v19603_v24  ;;  %v14579_v7 = vsub.s32 32, %v2449_v44  ;;  %v14583_v51 = vsel %vm1958_vm8, nan, %v6918_v12  ;;  %v14586_v34 = vadd.s32 3, %v14564_v36 }
 0x25f   :  { %20009 = vst [vmem:[#allocation36_spill] sm:$0xff] %v14583_v51  ;;  %vm2073_vm11 = vcmp.lt.s32.totalorder %v14556_v61, 0  ;;  %v2189_v39 = vadd.s32 %v2187_v21, %v2181_v42  ;;  %v1790_v0 = vadd.f32 0.041655596, %v1789_v29  ;;  %v2191_v8 = vsel %vm2190_vm12, 1, %v19819_v1 }
 0x260   :  { %20008 = vst [vmem:[#allocation35_spill] sm:$0xff] %v14579_v7  ;;  %v2211_v50 = vadd.s32 %v2209_v15, %v2203_v11  ;;  %v11321_v5 = vadd.s32 4294967169, %v3059_v20  ;;  %v1798_v43 = vmul.f32 %v1797_v25, %v14530_v19  ;;  %v2398_v2 = vand.u32 2147483647, %v2397_v28  ;;  %v20010_v15 = vld [vmem:[#allocation30_spill] sm:$0xff] }
 0x261   :  { %v2400_v52 = vcvt.s32.f32 %v2393_v14  ;;  %v2213_v62 = vsel %vm2212_vm3, 1, %v19819_v1  ;;  %v2075_v35 = vsel %vm2073_vm11, %v2074_v10, %v14556_v61  ;;  %v2183_v12 = vshrl.u32 %v14514_v3, 16 }
 0x262   :  { %v2464_v47 = vshll.u32 %v19871_v22, %v2449_v44  ;;  %v2465_v4 = vshrl.u32 %v19872_v18, %v14579_v7  ;;  %v2193_v16 = vadd.s32 %v2191_v8, %v2189_v39  ;;  %v14597_v56 = vshrl.u32 %v2447_v57, 5 }
 0x263   :  { %v2461_v29 = vshll.u32 %v19870_v59, %v2449_v44  ;;  %v2462_v63 = vshrl.u32 %v19871_v22, %v14579_v7  ;;  %v2205_v42 = vshrl.u32 %v14523_v40, 16  ;;  %v2215_v25 = vadd.s32 %v2213_v62, %v2211_v50 }
 0x264   :  { %v3065_v11 = vadd.s32 1, %v11321_v5  ;;  %v2455_v3 = vshll.u32 %v19807_v30, %v2449_v44  ;;  %v2456_v20 = vshrl.u32 %v19808_v41, %v14579_v7  ;;  %v2458_v14 = vshll.u32 %v19808_v41, %v2449_v44 }
 0x265   :  { %v2459_v57 = vshrl.u32 %v19870_v59, %v14579_v7  ;;  %v1791_v28 = vmul.f32 %v1790_v0, %v14530_v19  ;;  %vm2282_vm6 = vcmp.lt.s32.totalorder %v20010_v15, 0  ;;  %v2452_v40 = vshll.u32 %v19809_v58, %v2449_v44 }
 0x266   :  { %v2453_v10 = vshrl.u32 %v19807_v30, %v14579_v7  ;;  %v2466_v39 = vor.u32 %v2465_v4, %v2464_v47  ;;  %v1799_v8 = vadd.f32 -0.16666654, %v1798_v43  ;;  %v2401_v50 = vmul.f32 %v2400_v52, %v2398_v2 }
 0x267   :  { %v2463_v5 = vor.u32 %v2462_v63, %v2461_v29  ;;  %vm2470_vm13 = vcmp.lt.s32.totalorder %v14597_v56, 4  ;;  %v2076_v62 = vclz %v2075_v35  ;;  %v2207_v24 = vshrl.u32 %v14544_v54, 16 }
 0x268   :  { %v2216_v21 = vadd.s32 %v2215_v25, %v2205_v42  ;;  %vm3066_vm5 = vcmp.gt.s32.totalorder %v3065_v11, 0  ;;  %v20011_v0 = vand.u32 2147483647, %v20010_v15  ;;  %v2194_v44 = vadd.s32 %v2193_v16, %v2183_v12 }
 0x269   :  { %v20014_v7 = vand.u32 2147483647, %v14412_v37  ;;  %v14625_v43 = vor.u32 %v2456_v20, %v2455_v3  ;;  %v14627_v2 = vor.u32 %v2459_v57, %v2458_v14  ;;  %v14629_v52 = vor.u32 %v2453_v10, %v2452_v40 }
 0x26a   :  { %vm14619_vm10 = vcmp.le.f32.partialorder %v20011_v0, 0.7853982  ;;  %vm2467_vm8 = vcmp.lt.s32.totalorder %v14597_v56, 1  ;;  %vm2469_vm7 = vcmp.lt.s32.totalorder %v14597_v56, 3  ;;  %v2480_v35 = vsel %vm2470_vm13, %v2466_v39, 1326507024 }
 0x26b   :  { %v2442_v47 = vand.u32 8388607, %v20014_v7  ;;  %v2402_v4 = vxor.u32 2147483648, %v2401_v50  ;;  %v2141_v12 = vshrl.u32 %v19809_v58, %v14358_v55  ;;  %v2476_v7 = vsel %vm2470_vm13, %v2463_v5, 920167782 }
 0x26c   :  { %v3067_v16 = vsel %vm3066_vm5, %v3065_v11, 0  ;;  %v11301_v29 = vadd.s32 4294967294, %v2076_v62  ;;  %v2162_v63 = vsel %vm2160_vm9, %v14424_v6, 2102212464  ;;  %v2185_v42 = vshrl.u32 %v14539_v49, 16 }
 0x26d   :  { %v2217_v25 = vadd.s32 %v2216_v21, %v2207_v24  ;;  %v2443_v3 = vor.u32 8388608, %v2442_v47  ;;  %vm2468_vm14 = vcmp.lt.s32.totalorder %v14597_v56, 2  ;;  %v2479_v55 = vsel %vm2467_vm8, %v14625_v43, %v14627_v2 }
 0x26e   :  { %v2481_v20 = vsel %vm2469_vm7, %v2463_v5, %v2480_v35  ;;  %v14650_v11 = vadd.s32 %v2194_v44, %v2185_v42  ;;  %v2475_v6 = vsel %vm2467_vm8, %v14629_v52, %v14625_v43  ;;  %v2477_v49 = vsel %vm2469_vm7, %v14627_v2, %v2476_v7 }
 0x26f   :  { %v3069_v24 = vand.u32 31, %v3067_v16  ;;  %v1792_v21 = vadd.f32 -0.4999988, %v1791_v28  ;;  %v1800_v14 = vmul.f32 %v1799_v8, %v14530_v19  ;;  %v2403_v57 = vsel %vm2282_vm6, %v2402_v4, %v2401_v50 }
 0x270   :  { %v2404_v40 = vsub.s32 4, %v14299_v46  ;;  %v2161_v10 = vsel %vm2157_vm0, %v2141_v12, %v14427_v31  ;;  %v2163_v39 = vsel %vm2159_vm15, %v14422_v45, %v2162_v63  ;;  %v20015_v5 = vshll.u32 %v14544_v54, 16 }
 0x271   :  { %v14676_v28 = vsel %vm2468_vm14, %v2479_v55, %v2481_v20  ;;  %v2221_v50 = vadd.s32 1, %v2217_v25  ;;  %v14684_v31 = vsel %vm2468_vm14, %v2475_v6, %v2477_v49  ;;  %v14686_v45 = vshll.u32 %v2443_v3, 8 }
 0x272   :  { %v14672_v62 = vadd.s32 %v14560_v48, %v20015_v5  ;;  %v14691_v54 = vsel %vm14619_vm10, %v20010_v15, %v2403_v57  ;;  %vm11302_vm9 = vcmp.lt.s32.totalorder %v11301_v29, 0  ;;  %v14695_v48 = vsub.s32 32, %v3069_v24 }
 0x273   :  { %v14698_v0 = vand.u32 3, %v14586_v34  ;;  %v14701_v44 = vand.u32 3, %v14564_v36  ;;  %v2164_v47 = vsel %vm2158_vm4, %v2161_v10, %v2163_v39  ;;  %v2487_v35 = vshrl.u32 %v14676_v28, 16 }
 0x274   :  { %vm2220_vm0 = vc.u32 %v14650_v11, %v14672_v62  ;;  %v14707_v4 = vmul.f32 %v1792_v21, %v14530_v19  ;;  %v14709_v12 = vadd.f32 1.0, %v1800_v14  ;;  %v14714_v7 = vsel %vm2282_vm6, %v2404_v40, %v14299_v46 }
 0x275   :  { %v2509_v34 = vshrl.u32 %v14684_v31, 16  ;;  %v14719_v36 = vmul.f32 %v14691_v54, %v14691_v54  ;;  %v14721_v13 = vsel %vm11302_vm9, 0, %v11301_v29  ;;  %v2222_v63 = vsel %vm2220_vm0, %v2221_v50, %v2217_v25 }
 0x276   :  { %v2484_v42 = vand.u32 65535, %v14686_v45  ;;  %v2218_v19 = vmul.u32 %v14467_v23, %v2164_v47  ;;  %v19611_v3 = vand.u32 2147483647, %v14535_v32  ;;  %v3084_v55 = vshll.u32 %v19871_v22, %v3069_v24 }
 0x277   :  { %v3085_v46 = vshrl.u32 %v19872_v18, %v14695_v48  ;;  %v14731_v6 = vshrl.u32 %v3067_v16, 5  ;;  %v3081_v49 = vshll.u32 %v19870_v59, %v3069_v24  ;;  %v3082_v29 = vshrl.u32 %v19871_v22, %v14695_v48 }
 0x278   :  { %v14729_v20 = vmul.u32 %v2487_v35, %v2484_v42  ;;  %v14736_v25 = vadd.s32 %v2222_v63, %v2218_v19  ;;  %v2486_v23 = vand.u32 65535, %v14676_v28  ;;  %v2508_v21 = vand.u32 65535, %v14684_v31 }
 0x279   :  { %v14740_v14 = vmul.u32 %v2509_v34, %v2484_v42  ;;  %v3075_v57 = vshll.u32 %v19807_v30, %v3069_v24  ;;  %v3076_v40 = vshrl.u32 %v19808_v41, %v14695_v48  ;;  %v3078_v16 = vshll.u32 %v19808_v41, %v3069_v24 }
 0x27a   :  { %v3079_v10 = vshrl.u32 %v19870_v59, %v14695_v48  ;;  %v2485_v39 = vshrl.u32 %v14686_v45, 16  ;;  %v3072_v5 = vshll.u32 %v19809_v58, %v3069_v24  ;;  %v3073_v28 = vshrl.u32 %v19807_v30, %v14695_v48 }
 0x27b   :  { %v3086_v50 = vor.u32 %v3085_v46, %v3084_v55  ;;  %v2492_v31 = vshll.u32 %v14729_v20, 16  ;;  %v3062_v47 = vand.u32 8388607, %v19611_v3  ;;  %v3083_v63 = vor.u32 %v3082_v29, %v3081_v49 }
 0x27c   :  { %vm3090_vm15 = vcmp.lt.s32.totalorder %v14731_v6, 4  ;;  %v2224_v19 = vadd.s32 536870912, %v14736_v25  ;;  %v2510_v8 = vmul.u32 %v2508_v21, %v2484_v42  ;;  %v14757_v37 = vmul.u32 %v2508_v21, %v2485_v39 }
 0x27d   :  { %v2514_v15 = vshll.u32 %v14740_v14, 16  ;;  %v2488_v24 = vmul.u32 %v2486_v23, %v2484_v42  ;;  %v14760_v51 = vmul.u32 %v2486_v23, %v2485_v39  ;;  %v14762_v33 = vor.u32 %v3076_v40, %v3075_v57 }
 0x27e   :  { %v14764_v55 = vor.u32 %v3079_v10, %v3078_v16  ;;  %v14766_v46 = vor.u32 %v3073_v28, %v3072_v5  ;;  %vm19624_vm4 = vcmp.lt.s32.totalorder %v14731_v6, 1  ;;  %vm19623_vm12 = vcmp.lt.s32.totalorder %v14731_v6, 3  ;;  %v131_v5 = vpop.permute.xlu1 %130 }
 0x27f   :  { %v3100_v49 = vsel %vm3090_vm15, %v3086_v50, 1326507024  ;;  %v2084_v29 = vsub.s32 4294967266, %v14721_v13  ;;  %v2498_v21 = vadd.s32 %v2492_v31, %v2488_v24  ;;  %v3063_v3 = vor.u32 8388608, %v3062_v47 }
 0x280   :  { %v3096_v42 = vsel %vm3090_vm15, %v3083_v63, 920167782  ;;  %v14775_v23 = vshrl.u32 %v2224_v19, 30  ;;  %vm2496_vm3 = vc.u32 %v2488_v24, %v2492_v31  ;;  %vm2518_vm11 = vc.u32 %v2510_v8, %v2514_v15 }
 0x281   :  { %v14777_v57 = vadd.s32 %v2514_v15, %v2510_v8  ;;  %v2494_v40 = vshll.u32 %v14760_v51, 16  ;;  %vm19622_vm6 = vcmp.lt.s32.totalorder %v14731_v6, 2  ;;  %v3099_v16 = vsel %vm19624_vm4, %v14762_v33, %v14764_v55 }
 0x282   :  { %20016 = vst [vmem:[#allocation37_spill] sm:$0xff] %v14775_v23  ;;  %v3101_v10 = vsel %vm19623_vm12, %v3083_v63, %v3100_v49  ;;  %v2491_v28 = vmul.u32 %v2487_v35, %v2485_v39  ;;  %v19612_v50 = vshll.u32 %v14757_v37, 16  ;;  %v3095_v15 = vsel %vm19624_vm4, %v14766_v46, %v14762_v33 }
 0x283   :  { %v3097_v8 = vsel %vm19623_vm12, %v14764_v55, %v3096_v42  ;;  %v2497_v31 = vsel %vm2496_vm3, 1, %v19819_v1  ;;  %vm2500_vm5 = vc.u32 %v2498_v21, %v2494_v40  ;;  %v2519_v47 = vsel %vm2518_vm11, 1, %v19819_v1 }
 0x284   :  { %v14797_v19 = vshll.u32 %v3063_v3, 8  ;;  %v2513_v63 = vmul.u32 %v2509_v34, %v2485_v39  ;;  %vm2522_vm9 = vc.u32 %v14777_v57, %v19612_v50  ;;  %v14804_v35 = vsel %vm19622_vm6, %v3099_v16, %v3101_v10 }
 0x285   :  { %v14809_v24 = vsel %vm11916_vm1, %v131_v5, %v14434_v60  ;;  %v2409_v49 = vmul.f32 -0.001358992, %v14719_v36  ;;  %v2416_v21 = vmul.f32 -0.00019511016, %v14719_v36  ;;  %v2085_v3 = vadd.s32 127, %v2084_v29 }
 0x286   :  { %20017 = vst [vmem:[#allocation38_spill] sm:$0xff] %v14797_v19  ;;  %v14815_v34 = vsel %vm19622_vm6, %v3095_v15, %v3097_v8  ;;  %v2226_v39 = vshll.u32 %v14775_v23, 30  ;;  %v2499_v42 = vadd.s32 %v2497_v31, %v2491_v28  ;;  %v2501_v40 = vsel %vm2500_vm5, 1, %v19819_v1 }
 0x287   :  { %20018 = vst [vmem:[#allocation39_spill] sm:$0xff] %v14809_v24  ;;  %v2521_v16 = vadd.s32 %v2519_v47, %v2513_v63  ;;  %v2523_v10 = vsel %vm2522_vm9, 1, %v19819_v1  ;;  %v3104_v60 = vand.u32 65535, %v14797_v19  ;;  %v14824_v50 = vmul.f32 %v19963_v38, %v14809_v24  ;;  %v20020_v24 = vld [vmem:[#allocation24_spill] sm:$0xff] }
 0x288   :  { %v14827_v29 = vadd.f32 1.0, %v14707_v4  ;;  %v14831_v15 = vmul.f32 %v14709_v12, %v14507_v9  ;;  %v14836_v28 = vsel %vm14619_vm10, 0, %v14714_v7  ;;  %v3129_v8 = vshrl.u32 %v14815_v34, 16 }
 0x289   :  { %20019 = vst [vmem:[#allocation40_spill] sm:$0xff] %v14824_v50  ;;  %v2410_v31 = vadd.f32 0.041655596, %v2409_v49  ;;  %v2417_v47 = vadd.f32 0.008332121, %v2416_v21  ;;  %v2080_v63 = vsub.s32 32, %v14721_v13  ;;  %v2064_v4 = vadd.s32 %v20020_v24, %v14393_v27 }
 0x28a   :  { %v2086_v5 = vshll.u32 %v2085_v3, 23  ;;  %v14843_v32 = vsub.s32 %v14736_v25, %v2226_v39  ;;  %v2503_v9 = vadd.s32 %v2501_v40, %v2499_v42  ;;  %v2525_v12 = vadd.s32 %v2523_v10, %v2521_v16 }
 0x28b   :  { %v3105_v23 = vshrl.u32 %v14797_v19, 16  ;;  %v3106_v53 = vand.u32 65535, %v14804_v35  ;;  %v20021_v7 = vshrl.u32 %v14804_v35, 16  ;;  %v2593_v49 = vand.u32 2139095040, %v14824_v50 }
 0x28c   :  { %v2493_v21 = vshrl.u32 %v14729_v20, 16  ;;  %v2515_v3 = vshrl.u32 %v14740_v14, 16  ;;  %v3128_v27 = vand.u32 65535, %v14815_v34  ;;  %v14855_v25 = vmul.u32 %v3129_v8, %v3104_v60 }
 0x28d   :  { %v14849_v26 = vmul.u32 %v20021_v7, %v3104_v60  ;;  %v2411_v24 = vmul.f32 %v2410_v31, %v14719_v36  ;;  %v2081_v39 = vshll.u32 %v14556_v61, %v14721_v13  ;;  %v2082_v42 = vshrl.u32 %v2064_v4, %v2080_v63  ;;  %v20022_v63 = vld [vmem:[#allocation35_spill] sm:$0xff] }
 0x28e   :  { %v2087_v40 = vor.u32 4788187, %v2086_v5  ;;  %vm2228_vm10 = vcmp.lt.s32.totalorder %v14843_v32, 0  ;;  %v2229_v16 = vsub.s32 0, %v14843_v32  ;;  %v2504_v10 = vadd.s32 %v2503_v9, %v2493_v21 }
 0x28f   :  { %v2526_v7 = vadd.s32 %v2525_v12, %v2515_v3  ;;  %v3108_v20 = vmul.u32 %v3106_v53, %v3104_v60  ;;  %v14862_v19 = vmul.u32 %v3106_v53, %v3105_v23  ;;  %v3112_v14 = vshll.u32 %v14849_v26, 16 }
 0x290   :  { %v2594_v34 = vshrl.u32 %v2593_v49, 23  ;;  %v2517_v41 = vshrl.u32 %v14757_v37, 16  ;;  %v3130_v31 = vmul.u32 %v3128_v27, %v3104_v60  ;;  %v14866_v18 = vmul.u32 %v3128_v27, %v3105_v23 }
 0x291   :  { %v3134_v61 = vshll.u32 %v14855_v25, 16  ;;  %v2418_v13 = vmul.f32 %v2417_v47, %v14719_v36  ;;  %v2083_v5 = vor.u32 %v2082_v42, %v2081_v39  ;;  %v2451_v4 = vshrl.u32 %v19809_v58, %v20022_v63 }
 0x292   :  { %v2495_v9 = vshrl.u32 %v14760_v51, 16  ;;  %v2088_v12 = vand.u32 2147483647, %v2087_v40  ;;  %v2230_v53 = vsel %vm2228_vm10, %v2229_v16, %v14843_v32  ;;  %v2472_v60 = vsel %vm2470_vm13, %v14627_v2, 2102212464 }
 0x293   :  { %v2527_v49 = vadd.s32 %v2526_v7, %v2517_v41  ;;  %v3114_v47 = vshll.u32 %v14862_v19, 16  ;;  %vm14882_vm0 = vc.u32 %v3108_v20, %v3112_v14  ;;  %v11312_v27 = vadd.s32 4294967169, %v2594_v34 }
 0x294   :  { %v14879_v21 = vadd.s32 %v2504_v10, %v2495_v9  ;;  %vm1807_vm3 = vcmp.eq.s32.totalorder %v14698_v0, 0  ;;  %v3118_v51 = vadd.s32 %v3112_v14, %v3108_v20  ;;  %v3136_v39 = vshll.u32 %v14866_v18, 16 }
 0x295   :  { %vm14888_vm11 = vc.u32 %v3130_v31, %v3134_v61  ;;  %v14892_v2 = vadd.s32 %v3134_v61, %v3130_v31  ;;  %v2231_v41 = vclz %v2230_v53  ;;  %v2471_v40 = vsel %vm2467_vm8, %v2451_v4, %v14629_v52 }
 0x296   :  { %v2473_v16 = vsel %vm2469_vm7, %v14625_v43, %v2472_v60  ;;  %v20027_v10 = vshll.u32 %v14757_v37, 16  ;;  %vm1810_vm13 = vcmp.eq.s32.totalorder %v14698_v0, 2  ;;  %vm6761_vm5 = vcmp.eq.s32.totalorder %v14701_v44, 2  ;;  %v20029_v60 = vld [vmem:[#allocation8_spill] sm:$0xff] }
 0x297   :  { %v2090_v20 = vcvt.s32.f32 %v2083_v5  ;;  %v2531_v14 = vadd.s32 1, %v2527_v49  ;;  %v20028_v34 = vshrl.u32 %v14804_v35, 16  ;;  %v3133_v61 = vmul.u32 %v3129_v8, %v3105_v23 }
 0x298   :  { %v14903_v7 = vadd.s32 %v14777_v57, %v20027_v10  ;;  %vm1806_vm8 = vcmp.lt.s32.totalorder %v14698_v0, 2  ;;  %vm6758_vm9 = vcmp.eq.s32.totalorder %v14701_v44, 0  ;;  %v3117_v37 = vsel %vm14882_vm0, 1, %v19819_v1 }
 0x299   :  { %v3111_v31 = vmul.u32 %v20028_v34, %v3105_v23  ;;  %v3139_v43 = vsel %vm14888_vm11, 1, %v19819_v1  ;;  %v2600_v52 = vadd.s32 1, %v11312_v27  ;;  %v2091_v57 = vmul.f32 %v2090_v20, %v2088_v12 }
 0x29a   :  { %vm2530_vm7 = vc.u32 %v14879_v21, %v14903_v7  ;;  %v2474_v23 = vsel %vm2468_vm14, %v2471_v40, %v2473_v16  ;;  %vm3120_vm10 = vc.u32 %v3118_v51, %v3114_v47  ;;  %vm3142_vm6 = vc.u32 %v14892_v2, %v3136_v39  ;;  %v20030_v51 = vld [vmem:[#allocation31_spill] sm:$0xff] }
 0x29b   :  { %v1808_v35 = vxor.u32 2147483648, %v14831_v15  ;;  %v1811_v8 = vxor.u32 2147483648, %v14827_v29  ;;  %v2412_v5 = vadd.f32 -0.4999988, %v2411_v24  ;;  %v11304_v63 = vadd.s32 4294967294, %v2231_v41 }
 0x29c   :  { %vm6757_vm0 = vcmp.lt.s32.totalorder %v14701_v44, 2  ;;  %v2419_v4 = vadd.f32 -0.16666654, %v2418_v13  ;;  %v2532_v9 = vsel %vm2530_vm7, %v2531_v14, %v2527_v49  ;;  %v3119_v53 = vadd.s32 %v3117_v37, %v3111_v31 }
 0x29d   :  { %v3141_v12 = vadd.s32 %v3139_v43, %v3133_v61  ;;  %vm1803_vm11 = vweird.f32 %v20029_v60  ;;  %v2528_v56 = vmul.u32 %v14686_v45, %v2474_v23  ;;  %v3121_v47 = vsel %vm3120_vm10, 1, %v19819_v1 }
 0x29e   :  { %v3143_v3 = vsel %vm3142_vm6, 1, %v19819_v1  ;;  %vm2601_vm14 = vcmp.gt.s32.totalorder %v2600_v52, 0  ;;  %v2424_v27 = vadd.s32 3, %v14836_v28  ;;  %v20031_v24 = vand.u32 2147483647, %v20030_v51 }
 0x29f   :  { %vm1972_vm7 = vcmp.lt.s32.totalorder %v20030_v51, 0  ;;  %v2092_v13 = vxor.u32 2147483648, %v2091_v57  ;;  %v1809_v45 = vsel %vm1807_vm3, %v14827_v29, %v1808_v35  ;;  %vm11305_vm4 = vcmp.lt.s32.totalorder %v11304_v63, 0 }
 0x2a0   :  { %vm14934_vm12 = vcmp.le.f32.partialorder %v20031_v24, 0.7853982  ;;  %v14942_v49 = vadd.s32 %v2532_v9, %v2528_v56  ;;  %v3113_v41 = vshrl.u32 %v14849_v26, 16  ;;  %v3123_v40 = vadd.s32 %v3121_v47, %v3119_v53  ;;  %v280_v9 = vpop.permute.xlu1 %279 }
 0x2a1   :  { %v3135_v16 = vshrl.u32 %v14855_v25, 16  ;;  %v3145_v10 = vadd.s32 %v3143_v3, %v3141_v12  ;;  %v2602_v20 = vsel %vm2601_vm14, %v2600_v52, 0  ;;  %v1812_v14 = vsel %vm1810_vm13, %v1811_v8, %v14831_v15 }
 0x2a2   :  { %v6763_v34 = vsel %vm6761_vm5, %v1811_v8, %v14831_v15  ;;  %v2413_v31 = vmul.f32 %v2412_v5, %v14719_v36  ;;  %v2420_v61 = vmul.f32 %v2419_v4, %v14719_v36  ;;  %v1813_v26 = vsel %vm1806_vm8, %v1809_v45, %v1812_v14  ;;  %v20037_v45 = vld [vmem:[#allocation19_spill] sm:$0xff] }
 0x2a3   :  { %v6760_v25 = vsel %vm6758_vm9, %v14827_v29, %v1808_v35  ;;  %v2093_v37 = vsel %vm1972_vm7, %v2092_v13, %v2091_v57  ;;  %v14961_v43 = vsel %vm11305_vm4, 0, %v11304_v63  ;;  %v2534_v52 = vadd.s32 536870912, %v14942_v49 }
 0x2a4   :  { %v3071_v15 = vshrl.u32 %v19809_v58, %v14695_v48  ;;  %v3092_v36 = vsel %vm3090_vm15, %v14764_v55, 2102212464  ;;  %v2604_v0 = vand.u32 31, %v2602_v20  ;;  %v3115_v23 = vshrl.u32 %v14862_v19, 16 }
 0x2a5   :  { %v3124_v8 = vadd.s32 %v3123_v40, %v3113_v41  ;;  %v3137_v29 = vshrl.u32 %v14866_v18, 16  ;;  %v3146_v35 = vadd.s32 %v3145_v10, %v3135_v16  ;;  %v6764_v57 = vsel %vm6757_vm0, %v6760_v25, %v6763_v34 }
 0x2a6   :  { %v14973_v5 = vadd.f32 1.0, %v2413_v31  ;;  %v2421_v63 = vadd.f32 1.0, %v2420_v61  ;;  %v14976_v4 = vand.u32 3, %v14836_v28  ;;  %v14980_v48 = vsel %vm1803_vm11, nan, %v1813_v26 }
 0x2a7   :  { %v14982_v55 = vand.u32 3, %v2424_v27  ;;  %v14987_v19 = vsel %vm14934_vm12, %v20030_v51, %v2093_v37  ;;  %v2239_v44 = vsub.s32 4294967266, %v14961_v43  ;;  %v14990_v53 = vshrl.u32 %v2534_v52, 30 }
 0x2a8   :  { %vm20035_vm15 = vcmp.lt.s32.totalorder %v14731_v6, 1  ;;  %vm20036_vm4 = vcmp.lt.s32.totalorder %v14731_v6, 3  ;;  %v14998_v56 = vsub.s32 32, %v2604_v0  ;;  %v15002_v47 = vsel %vm1803_vm11, nan, %v6764_v57 }
 0x2a9   :  { %20034 = vst [vmem:[#allocation24_spill] sm:$0xff] %v14990_v53  ;;  %v3091_v28 = vsel %vm20035_vm15, %v3071_v15, %v14766_v46  ;;  %v3093_v12 = vsel %vm20036_vm4, %v14762_v33, %v3092_v36  ;;  %v15004_v3 = vadd.s32 %v3124_v8, %v3115_v23  ;;  %v15009_v27 = vadd.s32 %v14892_v2, %v3136_v39 }
 0x2aa   :  { %v3147_v24 = vadd.s32 %v3146_v35, %v3137_v29  ;;  %v15012_v46 = vmul.f32 %v2421_v63, %v14691_v54  ;;  %v2431_v13 = vxor.u32 2147483648, %v14973_v5  ;;  %v2219_v33 = vadd.s32 %v14672_v62, %v14650_v11  ;;  %v20043_v35 = vld [vmem:[#allocation10_spill] sm:$0xff] }
 0x2ab   :  { %v15020_v60 = vsel %vm11916_vm1, %v20037_v45, %v280_v9  ;;  %vm2427_vm6 = vcmp.eq.s32.totalorder %v14982_v55, 0  ;;  %v15025_v18 = vmul.f32 %v14987_v19, %v14987_v19  ;;  %v2235_v39 = vsub.s32 32, %v14961_v43 }
 0x2ac   :  { %20038 = vst [vmem:[#allocation35_spill] sm:$0xff] %v15020_v60  ;;  %v2240_v54 = vadd.s32 127, %v2239_v44  ;;  %vm20039_vm3 = vcmp.lt.s32.totalorder %v14731_v6, 2  ;;  %v2536_v41 = vshll.u32 %v14990_v53, 30  ;;  %v19625_v11 = vand.u32 2147483647, %v14824_v50 }
 0x2ad   :  { %v3094_v2 = vsel %vm20039_vm3, %v3091_v28, %v3093_v12  ;;  %v2616_v62 = vshll.u32 %v19870_v59, %v2604_v0  ;;  %v2617_v40 = vshrl.u32 %v19871_v22, %v14998_v56  ;;  %vm3150_vm13 = vc.u32 %v15004_v3, %v15009_v27 }
 0x2ae   :  { %v3151_v16 = vadd.s32 1, %v3147_v24  ;;  %v15037_v10 = vshrl.u32 %v2602_v20, 5  ;;  %v15041_v14 = vmul.f32 %v19963_v38, %v15020_v60  ;;  %v2607_v6 = vshll.u32 %v19809_v58, %v2604_v0 }
 0x2af   :  { %v2610_v34 = vshll.u32 %v19807_v30, %v2604_v0  ;;  %v2619_v31 = vshll.u32 %v19871_v22, %v2604_v0  ;;  %v20041_v61 = vmov 1326507024   ;;  %vm7374_vm5 = vcmp.eq.s32.totalorder %v14976_v4, 0 }
 0x2b0   :  { %20040 = vst [vmem:[#allocation8_spill] sm:$0xff] %v15041_v14  ;;  %v2620_v26 = vshrl.u32 %v20041_v61, %v14998_v56  ;;  %v2608_v25 = vshrl.u32 %v19807_v30, %v14998_v56  ;;  %v20042_v20 = vmov 2131351028   ;;  %v2614_v15 = vshrl.u32 %v19870_v59, %v14998_v56 }
 0x2b1   :  { %v2611_v37 = vshrl.u32 %v20042_v20, %v14998_v56  ;;  %v2613_v52 = vshll.u32 %v20042_v20, %v2604_v0  ;;  %v2428_v36 = vxor.u32 2147483648, %v15012_v46  ;;  %v2241_v23 = vshll.u32 %v2240_v54, 23  ;;  %v20044_v0 = vld [vmem:[#allocation38_spill] sm:$0xff] }
 0x2b2   :  { %v15058_v8 = vsub.s32 %v14942_v49, %v2536_v41  ;;  %v2618_v29 = vor.u32 %v2617_v40, %v2616_v62  ;;  %vm2430_vm8 = vcmp.eq.s32.totalorder %v14982_v55, 2  ;;  %v2094_v57 = vsub.s32 4, %v20043_v35 }
 0x2b3   :  { %v2099_v63 = vmul.f32 -0.001358992, %v15025_v18  ;;  %v2237_v44 = vshrl.u32 %v2219_v33, %v2235_v39  ;;  %v2748_v9 = vand.u32 2139095040, %v15041_v14  ;;  %vm7377_vm9 = vcmp.eq.s32.totalorder %v14976_v4, 2 }
 0x2b4   :  { %v3148_v28 = vmul.u32 %v20044_v0, %v3094_v2  ;;  %v3152_v12 = vsel %vm3150_vm13, %v3151_v16, %v3147_v24  ;;  %v2597_v49 = vand.u32 8388607, %v19625_v11  ;;  %v2621_v45 = vor.u32 %v2620_v26, %v2619_v31 }
 0x2b5   :  { %vm2426_vm10 = vcmp.lt.s32.totalorder %v14982_v55, 2  ;;  %vm7373_vm0 = vcmp.lt.s32.totalorder %v14976_v4, 2  ;;  %v15073_v54 = vor.u32 %v2608_v25, %v2607_v6  ;;  %v15075_v33 = vor.u32 %v2611_v37, %v2610_v34  ;;  %v20046_v55 = vld [vmem:[#allocation34_spill] sm:$0xff] }
 0x2b6   :  { %v15077_v39 = vor.u32 %v2614_v15, %v2613_v52  ;;  %vm2625_vm11 = vcmp.lt.s32.totalorder %v15037_v10, 4  ;;  %v2429_v24 = vsel %vm2427_vm6, %v14973_v5, %v2428_v36  ;;  %v2242_v2 = vor.u32 4788187, %v2241_v23 }
 0x2b7   :  { %v2539_v41 = vsub.s32 0, %v15058_v8  ;;  %v2631_v62 = vsel %vm2625_vm11, %v2618_v29, 920167782  ;;  %v2106_v40 = vmul.f32 -0.00019511016, %v15025_v18  ;;  %v2236_v16 = vshll.u32 %v14843_v32, %v14961_v43 }
 0x2b8   :  { %vm2538_vm14 = vcmp.lt.s32.totalorder %v15058_v8, 0  ;;  %v2749_v6 = vshrl.u32 %v2748_v9, 23  ;;  %v15090_v34 = vadd.s32 %v3152_v12, %v3148_v28  ;;  %vm2622_vm15 = vcmp.lt.s32.totalorder %v15037_v10, 1 }
 0x2b9   :  { %vm2624_vm4 = vcmp.lt.s32.totalorder %v15037_v10, 3  ;;  %v2635_v31 = vsel %vm2625_vm11, %v2621_v45, 1326507024  ;;  %v2238_v26 = vor.u32 %v2237_v44, %v2236_v16  ;;  %v2598_v25 = vor.u32 8388608, %v2597_v49 }
 0x2ba   :  { %v2630_v37 = vsel %vm2622_vm15, %v15073_v54, %v15075_v33  ;;  %v2632_v32 = vsel %vm2624_vm4, %v15077_v39, %v2631_v62  ;;  %v7376_v43 = vsel %vm7374_vm5, %v14973_v5, %v2428_v36  ;;  %v2100_v52 = vadd.f32 0.041655596, %v2099_v63 }
 0x2bb   :  { %v2243_v15 = vand.u32 2147483647, %v2242_v2  ;;  %v2540_v23 = vsel %vm2538_vm14, %v2539_v41, %v15058_v8  ;;  %vm2623_vm6 = vcmp.lt.s32.totalorder %v15037_v10, 2  ;;  %v2634_v44 = vsel %vm2622_vm15, %v15075_v33, %v15077_v39 }
 0x2bc   :  { %v2636_v9 = vsel %vm2624_vm4, %v2618_v29, %v2635_v31  ;;  %v11315_v0 = vadd.s32 4294967169, %v2749_v6  ;;  %v2432_v36 = vsel %vm2430_vm8, %v2431_v13, %v15012_v46  ;;  %v2107_v63 = vadd.f32 0.008332121, %v2106_v40 }
 0x2bd   :  { %v3154_v28 = vadd.s32 536870912, %v15090_v34  ;;  %v15122_v12 = vsel %vm2623_vm6, %v2630_v37, %v2632_v32  ;;  %v7379_v29 = vsel %vm7377_vm9, %v2431_v13, %v15012_v46  ;;  %v2245_v49 = vcvt.s32.f32 %v2238_v26  ;;  %v20049_v26 = vld [vmem:[#allocation12_spill] sm:$0xff]  ;;  %v20053_v32 = vld [vmem:[#allocation30_spill] sm:$0xff] }
 0x2be   :  { %v2541_v45 = vclz %v2540_v23  ;;  %v15129_v2 = vshll.u32 %v2598_v25, 8  ;;  %v2433_v41 = vsel %vm2426_vm10, %v2429_v24, %v2432_v36  ;;  %v7380_v62 = vsel %vm7373_vm0, %v7376_v43, %v7379_v29  ;;  %v20047_v24 = vld [vmem:[#allocation36_spill] sm:$0xff]  ;;  %v20050_v25 = vld [vmem:[#allocation5_spill] sm:$0xff] }
 0x2bf   :  { %v2101_v40 = vmul.f32 %v2100_v52, %v15025_v18  ;;  %v15138_v16 = vsel %vm2623_vm6, %v2634_v44, %v2636_v9  ;;  %v2095_v5 = vsel %vm1972_vm7, %v2094_v57, %v20043_v35  ;;  %v2246_v46 = vmul.f32 %v2245_v49, %v2243_v15 }
 0x2c0   :  { %v19626_v13 = vshrl.u32 %v15122_v12, 16  ;;  %v2755_v6 = vadd.s32 1, %v11315_v0  ;;  %v20048_v4 = vsel %vm12700_vm2, %v20046_v55, %v20047_v24  ;;  %vm20051_vm3 = vcmp.lt.s32.totalorder %v20050_v25, 2 }
 0x2c1   :  { %v15152_v37 = vsel %vm20051_vm3, %v20049_v26, %v20048_v4  ;;  %vm2423_vm13 = vweird.f32 %v20053_v32  ;;  %v2108_v43 = vmul.f32 %v2107_v63, %v15025_v18  ;;  %v15156_v52 = vshrl.u32 %v3154_v28, 30  ;;  %v20055_v28 = vld [vmem:[#allocation37_spill] sm:$0xff]  ;;  %vm20057_vm5 = vmmov %vm20051_vm3 }
 0x2c2   :  { %20052 = vst [vmem:[#allocation31_spill] sm:$0xff] %v15152_v37  ;;  %v10316_v35 = vsel %vm12700_vm2, %v14980_v48, %v15002_v47  ;;  %v11310_v57 = vadd.s32 4294967294, %v2541_v45  ;;  %v2639_v15 = vand.u32 65535, %v15129_v2  ;;  %v2642_v23 = vshrl.u32 %v15138_v16, 16  ;;  %v20056_v48 = vld [vmem:[#allocation14_spill] sm:$0xff] }
 0x2c3   :  { %20054 = vst [vmem:[#allocation19_spill] sm:$0xff] %v15156_v52  ;;  %v15164_v44 = vsel %vm2423_vm13, nan, %v2433_v41  ;;  %v15166_v9 = vsel %vm2423_vm13, nan, %v7380_v62  ;;  %v2097_v0 = vsel %vm14934_vm12, 0, %v2095_v5  ;;  %v2102_v36 = vadd.f32 -0.4999988, %v2101_v40 }
 0x2c4   :  { %v2247_v63 = vxor.u32 2147483648, %v2246_v46  ;;  %v2249_v29 = vsub.s32 4, %v20055_v28  ;;  %v15173_v49 = vmul.u32 %v19626_v13, %v2639_v15  ;;  %vm2756_vm7 = vcmp.gt.s32.totalorder %v2755_v6, 0  ;;  %v20059_v41 = vld [vmem:[#allocation11_spill] sm:$0xff] }
 0x2c5   :  { %v15178_v47 = vsel %vm20057_vm5, %v20056_v48, %v10316_v35  ;;  %v2109_v45 = vadd.f32 -0.16666654, %v2108_v43  ;;  %vm2127_vm8 = vcmp.lt.s32.totalorder %v20059_v41, 0  ;;  %v3156_v42 = vshll.u32 %v15156_v52, 30 }
 0x2c6   :  { %20058 = vst [vmem:[#allocation10_spill] sm:$0xff] %v15178_v47  ;;  %v20060_v62 = vand.u32 2147483647, %v20059_v41  ;;  %vm11311_vm9 = vcmp.lt.s32.totalorder %v11310_v57, 0  ;;  %v15188_v5 = vmul.u32 %v2642_v23, %v2639_v15  ;;  %v2663_v55 = vand.u32 65535, %v15122_v12 }
 0x2c7   :  { %v2103_v4 = vmul.f32 %v2102_v36, %v15025_v18  ;;  %v2114_v26 = vadd.s32 3, %v2097_v0  ;;  %v2757_v32 = vsel %vm2756_vm7, %v2755_v6, 0  ;;  %v2248_v43 = vsel %vm2127_vm8, %v2247_v63, %v2246_v46 }
 0x2c8   :  { %vm15184_vm12 = vcmp.le.f32.partialorder %v20060_v62, 0.7853982  ;;  %v2250_v35 = vsel %vm2127_vm8, %v2249_v29, %v20055_v28  ;;  %v2641_v48 = vand.u32 65535, %v15138_v16  ;;  %v2669_v62 = vshll.u32 %v15173_v49, 16 }
 0x2c9   :  { %v2110_v11 = vmul.f32 %v2109_v45, %v15025_v18  ;;  %v15200_v13 = vsel %vm11311_vm9, 0, %v11310_v57  ;;  %v15203_v37 = vsub.s32 %v15090_v34, %v3156_v42  ;;  %v2640_v24 = vshrl.u32 %v15129_v2, 16 }
 0x2ca   :  { %v15206_v47 = vand.u32 3, %v2097_v0  ;;  %v2647_v6 = vshll.u32 %v15188_v5, 16  ;;  %v2665_v46 = vmul.u32 %v2663_v55, %v2639_v15  ;;  %v2759_v36 = vand.u32 31, %v2757_v32 }
 0x2cb   :  { %v15209_v63 = vand.u32 3, %v2114_v26  ;;  %v15214_v16 = vsel %vm15184_vm12, %v20059_v41, %v2248_v43  ;;  %v15218_v18 = vsel %vm15184_vm12, 0, %v2250_v35  ;;  %v15220_v34 = vmul.u32 %v2663_v55, %v2640_v24 }
 0x2cc   :  { %20063 = vst [vmem:[#allocation38_spill] sm:$0xff] %v15214_v16  ;;  %v15222_v57 = vadd.f32 1.0, %v2103_v4  ;;  %v2549_v0 = vsub.s32 4294967266, %v15200_v13  ;;  %v2643_v28 = vmul.u32 %v2641_v48, %v2639_v15  ;;  %vm2673_vm10 = vc.u32 %v2665_v46, %v2669_v62 }
 0x2cd   :  { %v15225_v29 = vadd.f32 1.0, %v2110_v11  ;;  %v3159_v45 = vsub.s32 0, %v15203_v37  ;;  %v15228_v42 = vmul.u32 %v2641_v48, %v2640_v24  ;;  %v15230_v26 = vadd.s32 %v2669_v62, %v2665_v46 }
 0x2ce   :  { %v15234_v40 = vmul.f32 %v15214_v16, %v15214_v16  ;;  %vm3158_vm0 = vcmp.lt.s32.totalorder %v15203_v37, 0  ;;  %vm2651_vm14 = vc.u32 %v2643_v28, %v2647_v6  ;;  %v15237_v55 = vsub.s32 32, %v2759_v36 }
 0x2cf   :  { %v2529_v15 = vadd.s32 %v14903_v7, %v14879_v21  ;;  %v2653_v11 = vadd.s32 %v2647_v6, %v2643_v28  ;;  %v19633_v4 = vshll.u32 %v15220_v34, 16  ;;  %v2674_v43 = vsel %vm2673_vm10, 1, %v19819_v1 }
 0x2d0   :  { %v2545_v35 = vsub.s32 32, %v15200_v13  ;;  %v2550_v48 = vadd.s32 127, %v2549_v0  ;;  %v20064_v62 = vshrl.u32 %v15122_v12, 16  ;;  %v3160_v50 = vsel %vm3158_vm0, %v3159_v45, %v15203_v37 }
 0x2d1   :  { %v2649_v52 = vshll.u32 %v15228_v42, 16  ;;  %v2652_v41 = vsel %vm2651_vm14, 1, %v19819_v1  ;;  %vm2677_vm3 = vc.u32 %v15230_v26, %v19633_v4  ;;  %v2646_v21 = vmul.u32 %v2642_v23, %v2640_v24 }
 0x2d2   :  { %v2668_v46 = vmul.u32 %v20064_v62, %v2640_v24  ;;  %v2771_v6 = vshll.u32 %v19870_v59, %v2759_v36  ;;  %v2772_v12 = vshrl.u32 %v19871_v22, %v15237_v55  ;;  %v15256_v0 = vshrl.u32 %v2757_v32, 5  ;;  %v284_v24 = vpop.permute.xlu1 %283 }
 0x2d3   :  { %vm2655_vm13 = vc.u32 %v2653_v11, %v2649_v52  ;;  %v2774_v28 = vshll.u32 %v19871_v22, %v2759_v36  ;;  %v2775_v45 = vshrl.u32 %v20041_v61, %v15237_v55  ;;  %v2654_v62 = vadd.s32 %v2652_v41, %v2646_v21 }
 0x2d4   :  { %v2676_v7 = vadd.s32 %v2674_v43, %v2668_v46  ;;  %v2678_v60 = vsel %vm2677_vm3, 1, %v19819_v1  ;;  %v2762_v4 = vshll.u32 %v19809_v58, %v2759_v36  ;;  %v2765_v23 = vshll.u32 %v19807_v30, %v2759_v36 }
 0x2d5   :  { %v2763_v43 = vshrl.u32 %v19807_v30, %v15237_v55  ;;  %v2766_v52 = vshrl.u32 %v20042_v20, %v15237_v55  ;;  %v2768_v32 = vshll.u32 %v20042_v20, %v2759_v36  ;;  %v2769_v11 = vshrl.u32 %v19870_v59, %v15237_v55  ;;  %v11599_v30 = vld [vmem:[%s19470_s1 + $0x8] sm:$0xff]  ;;  %v20066_v36 = vld [vmem:[#allocation15_spill] sm:$0xff] }
 0x2d6   :  { %v2546_v41 = vshll.u32 %v15058_v8, %v15200_v13  ;;  %v2656_v46 = vsel %vm2655_vm13, 1, %v19819_v1  ;;  %v20065_v21 = vand.u32 2147483647, %v15041_v14  ;;  %v2773_v61 = vor.u32 %v2772_v12, %v2771_v6  ;;  %10494 = vmatpush.bf16.msra.mxu0 %v11599_v30  ;;  %v11598_v30 = vld [vmem:[%s19470_s1] sm:$0xff] }
 0x2d7   :  { %v3161_v22 = vclz %v3160_v50  ;;  %v2776_v16 = vor.u32 %v2775_v45, %v2774_v28  ;;  %vm2780_vm7 = vcmp.lt.s32.totalorder %v15256_v0, 4  ;;  %v15283_v20 = vsel %vm11916_vm1, %v20066_v36, %v284_v24 }
 0x2d8   :  { %v2752_v53 = vand.u32 8388607, %v20065_v21  ;;  %20067 = vst [vmem:[#allocation34_spill] sm:$0xff] %v15283_v20  ;;  %v2547_v8 = vshrl.u32 %v2529_v15, %v2545_v35  ;;  %v2551_v13 = vshll.u32 %v2550_v48, 23  ;;  %v2670_v59 = vshrl.u32 %v15173_v49, 16 }
 0x2d9   :  { %v2680_v14 = vadd.s32 %v2678_v60, %v2676_v7  ;;  %v2658_v6 = vadd.s32 %v2656_v46, %v2654_v62  ;;  %v15286_v12 = vor.u32 %v2763_v43, %v2762_v4  ;;  %v15288_v21 = vor.u32 %v2766_v52, %v2765_v23 }
 0x2da   :  { %v15290_v50 = vor.u32 %v2769_v11, %v2768_v32  ;;  %vm2777_vm5 = vcmp.lt.s32.totalorder %v15256_v0, 1  ;;  %vm2779_vm8 = vcmp.lt.s32.totalorder %v15256_v0, 3  ;;  %v2786_v28 = vsel %vm2780_vm7, %v2773_v61, 920167782  ;;  %10495 = vmatpush.bf16.msra.mxu0 %v11598_v30 }
 0x2db   :  { %v15298_v15 = vmul.f32 %v19963_v38, %v15283_v20  ;;  %v11322_v60 = vadd.s32 4294967294, %v3161_v22  ;;  %v2648_v49 = vshrl.u32 %v15188_v5, 16  ;;  %v2753_v4 = vor.u32 8388608, %v2752_v53 }
 0x2dc   :  { %v2790_v35 = vsel %vm2780_vm7, %v2776_v16, 1326507024  ;;  %v2548_v48 = vor.u32 %v2547_v8, %v2546_v41  ;;  %v2552_v7 = vor.u32 4788187, %v2551_v13  ;;  %v2606_v45 = vshrl.u32 %v19809_v58, %v14998_v56 }
 0x2dd   :  { %20068 = vst [vmem:[#allocation36_spill] sm:$0xff] %v15298_v15  ;;  %v2681_v62 = vadd.s32 %v2680_v14, %v2670_v59  ;;  %v2659_v23 = vadd.s32 %v2658_v6, %v2648_v49  ;;  %vm2778_vm12 = vcmp.lt.s32.totalorder %v15256_v0, 2  ;;  %v2785_v22 = vsel %vm2777_vm5, %v15286_v12, %v15288_v21 }
 0x2de   :  { %v2787_v53 = vsel %vm2779_vm8, %v15290_v50, %v2786_v28  ;;  %v2672_v5 = vshrl.u32 %v15220_v34, 16  ;;  %v2789_v59 = vsel %vm2777_vm5, %v15288_v21, %v15290_v50  ;;  %v2791_v56 = vsel %vm2779_vm8, %v2773_v61, %v2790_v35 }
 0x2df   :  { %v2903_v14 = vand.u32 2139095040, %v15298_v15  ;;  %v15326_v16 = vmul.f32 %v15225_v29, %v14987_v19  ;;  %vm11323_vm9 = vcmp.lt.s32.totalorder %v11322_v60, 0  ;;  %v2650_v24 = vshrl.u32 %v15228_v42, 16 }
 0x2e0   :  { %v15329_v43 = vshll.u32 %v2753_v4, 8  ;;  %vm2120_vm10 = vcmp.eq.s32.totalorder %v15209_v63, 2  ;;  %v2254_v52 = vmul.f32 -0.001358992, %v15234_v40  ;;  %v2627_v32 = vsel %vm2625_vm11, %v15077_v39, 2102212464 }
 0x2e1   :  { %v2682_v61 = vadd.s32 %v2681_v62, %v2672_v5  ;;  %v15338_v11 = vsel %vm2778_vm12, %v2785_v22, %v2787_v53  ;;  %v2261_v19 = vmul.f32 -0.00019511016, %v15234_v40  ;;  %v2553_v29 = vand.u32 2147483647, %v2552_v7  ;;  %v15376_v22 = vpop.permute.xlu2 %155 }
 0x2e2   :  { %v15341_v41 = vadd.s32 %v2659_v23, %v2650_v24  ;;  %v15345_v42 = vsel %vm2778_vm12, %v2789_v59, %v2791_v56  ;;  %v2555_v46 = vcvt.s32.f32 %v2548_v48  ;;  %v15347_v36 = vsel %vm11323_vm9, 0, %v11322_v60  ;;  %20071 = vst [vmem:[#allocation12_spill] sm:$0xff] %v15376_v22 }
 0x2e3   :  { %v2626_v39 = vsel %vm2622_vm15, %v2606_v45, %v15073_v54  ;;  %v2904_v8 = vshrl.u32 %v2903_v14, 23  ;;  %v2628_v13 = vsel %vm2624_vm4, %v15075_v33, %v2627_v32  ;;  %v20069_v6 = vshll.u32 %v15220_v34, 16  ;;  %v20070_v54 = vld [vmem:[#allocation13_spill] sm:$0xff] }
 0x2e4   :  { %v2794_v30 = vand.u32 65535, %v15329_v43  ;;  %v2819_v49 = vshrl.u32 %v15338_v11, 16  ;;  %vm2117_vm11 = vcmp.eq.s32.totalorder %v15209_v63, 0  ;;  %vm7066_vm0 = vcmp.eq.s32.totalorder %v15206_v47, 0 }
 0x2e5   :  { %v15358_v28 = vadd.s32 %v15230_v26, %v20069_v6  ;;  %v2255_v60 = vadd.f32 0.041655596, %v2254_v52  ;;  %vm19647_vm15 = vcmp.lt.s32.totalorder %v20070_v54, 0  ;;  %v2686_v4 = vadd.s32 1, %v2682_v61 }
 0x2e6   :  { %v2797_v35 = vshrl.u32 %v15345_v42, 16  ;;  %v19644_v33 = vxor.u32 2147483648, %v15222_v57  ;;  %v2262_v34 = vadd.f32 0.008332121, %v2261_v19  ;;  %v2556_v48 = vmul.f32 %v2555_v46, %v2553_v29 }
 0x2e7   :  { %vm2685_vm4 = vc.u32 %v15341_v41, %v15358_v28  ;;  %v15370_v26 = vadd.s32 3, %v15218_v18  ;;  %v3169_v7 = vsub.s32 4294967266, %v15347_v36  ;;  %v2629_v45 = vsel %vm2623_vm6, %v2626_v39, %v2628_v13 }
 0x2e8   :  { %v11318_v62 = vadd.s32 4294967169, %v2904_v8  ;;  %v2118_v23 = vxor.u32 2147483648, %v15326_v16  ;;  %v2795_v53 = vshrl.u32 %v15329_v43, 16  ;;  %v2818_v5 = vand.u32 65535, %v15338_v11 }
 0x2e9   :  { %v15382_v59 = vmul.u32 %v2819_v49, %v2794_v30  ;;  %v2256_v56 = vmul.f32 %v2255_v60, %v15234_v40  ;;  %v20072_v14 = vand.u32 2147483647, %v20070_v54  ;;  %v2687_v24 = vsel %vm2685_vm4, %v2686_v4, %v2682_v61 }
 0x2ea   :  { %v2796_v52 = vand.u32 65535, %v15345_v42  ;;  %v15392_v32 = vmul.u32 %v2797_v35, %v2794_v30  ;;  %v2122_v19 = vsel %vm2120_vm10, %v19644_v33, %v15326_v16  ;;  %v2263_v29 = vmul.f32 %v2262_v34, %v15234_v40 }
 0x2eb   :  { %vm15387_vm14 = vcmp.le.f32.partialorder %v20072_v14, 0.7853982  ;;  %v2557_v46 = vxor.u32 2147483648, %v2556_v48  ;;  %v2683_v39 = vmul.u32 %v15129_v2, %v2629_v45  ;;  %vm7069_vm6 = vcmp.eq.s32.totalorder %v15206_v47, 2 }
 0x2ec   :  { %v3149_v61 = vadd.s32 %v15009_v27, %v15004_v3  ;;  %v3165_v42 = vsub.s32 32, %v15347_v36  ;;  %v3170_v8 = vadd.s32 127, %v3169_v7  ;;  %v2910_v13 = vadd.s32 1, %v11318_v62 }
 0x2ed   :  { %vm2116_vm3 = vcmp.lt.s32.totalorder %v15209_v63, 2  ;;  %vm7065_vm13 = vcmp.lt.s32.totalorder %v15206_v47, 2  ;;  %v15407_v6 = vadd.s32 %v2687_v24, %v2683_v39  ;;  %v2820_v60 = vmul.u32 %v2818_v5, %v2794_v30  ;;  %v20078_v63 = vld [vmem:[#allocation21_spill] sm:$0xff] }
 0x2ee   :  { %v15409_v4 = vmul.u32 %v2818_v5, %v2795_v53  ;;  %v2824_v2 = vshll.u32 %v15382_v59, 16  ;;  %v2257_v34 = vadd.f32 -0.4999988, %v2256_v56  ;;  %v2798_v45 = vmul.u32 %v2796_v52, %v2794_v30 }
 0x2ef   :  { %v15412_v14 = vmul.u32 %v2796_v52, %v2795_v53  ;;  %v2802_v3 = vshll.u32 %v15392_v32, 16  ;;  %v2119_v27 = vsel %vm2117_vm11, %v15222_v57, %v2118_v23  ;;  %v7068_v7 = vsel %vm7066_vm0, %v15222_v57, %v2118_v23 }
 0x2f0   :  { %v2264_v62 = vadd.f32 -0.16666654, %v2263_v29  ;;  %v2558_v5 = vsel %vm19647_vm15, %v2557_v46, %v2556_v48  ;;  %v3166_v56 = vshll.u32 %v15203_v37, %v15347_v36  ;;  %v3167_v30 = vshrl.u32 %v3149_v61, %v3165_v42  ;;  %v161_v61 = vpop.permute.xlu2 %160 }
 0x2f1   :  { %v3171_v24 = vshll.u32 %v3170_v8, 23  ;;  %vm2911_vm9 = vcmp.gt.s32.totalorder %v2910_v13, 0  ;;  %vm2113_vm10 = vweird.f32 %v20030_v51  ;;  %v2689_v52 = vadd.s32 536870912, %v15407_v6 }
 0x2f2   :  { %v19645_v39 = vshll.u32 %v15409_v4, 16  ;;  %vm2828_vm11 = vc.u32 %v2820_v60, %v2824_v2  ;;  %v15428_v33 = vadd.s32 %v2824_v2, %v2820_v60  ;;  %v2258_v23 = vmul.f32 %v2257_v34, %v15234_v40 }
 0x2f3   :  { %v2804_v29 = vshll.u32 %v15412_v14, 16  ;;  %vm2806_vm0 = vc.u32 %v2798_v45, %v2802_v3  ;;  %v2808_v48 = vadd.s32 %v2802_v3, %v2798_v45  ;;  %v2265_v37 = vmul.f32 %v2264_v62, %v15234_v40 }
 0x2f4   :  { %v15436_v36 = vsel %vm15387_vm14, %v20070_v54, %v2558_v5  ;;  %v2823_v46 = vmul.u32 %v2819_v49, %v2795_v53  ;;  %v2912_v42 = vsel %vm2911_vm9, %v2910_v13, 0  ;;  %v3168_v8 = vor.u32 %v3167_v30, %v3166_v56 }
 0x2f5   :  { %v3172_v60 = vor.u32 4788187, %v3171_v24  ;;  %v2801_v2 = vmul.u32 %v2797_v35, %v2795_v53  ;;  %v2829_v34 = vsel %vm2828_vm11, 1, %v19819_v1  ;;  %v20075_v45 = vxor.u32 2147483648, %v15222_v57 }
 0x2f6   :  { %v15446_v3 = vshrl.u32 %v2689_v52, 30  ;;  %v2807_v62 = vsel %vm2806_vm0, 1, %v19819_v1  ;;  %vm2832_vm4 = vc.u32 %v15428_v33, %v19645_v39  ;;  %v2123_v11 = vsel %vm2116_vm3, %v2119_v27, %v2122_v19 }
 0x2f7   :  { %v7071_v40 = vsel %vm7069_vm6, %v20075_v45, %v15326_v16  ;;  %vm2810_vm9 = vc.u32 %v2808_v48, %v2804_v29  ;;  %v2914_v35 = vand.u32 31, %v2912_v42  ;;  %v15456_v57 = vadd.f32 1.0, %v2258_v23  ;;  %v20081_v48 = vld [vmem:[#allocation38_spill] sm:$0xff] }
 0x2f8   :  { %20076 = vst [vmem:[#allocation30_spill] sm:$0xff] %v15446_v3  ;;  %v7072_v49 = vsel %vm7065_vm13, %v7068_v7, %v7071_v40  ;;  %v2266_v53 = vadd.f32 1.0, %v2265_v37  ;;  %v15460_v16 = vmul.f32 %v15436_v36, %v15436_v36  ;;  %v2831_v13 = vadd.s32 %v2829_v34, %v2823_v46 }
 0x2f9   :  { %v3173_v5 = vand.u32 2147483647, %v3172_v60  ;;  %v3175_v56 = vcvt.s32.f32 %v3168_v8  ;;  %v2809_v30 = vadd.s32 %v2807_v62, %v2801_v2  ;;  %v2833_v24 = vsel %vm2832_vm4, 1, %v19819_v1  ;;  %v300_v62 = vpop.permute.xlu2 %299 }
 0x2fa   :  { %v20077_v47 = vsel %vm12700_vm2, %v15164_v44, %v15166_v9  ;;  %vm20079_vm6 = vcmp.lt.s32.totalorder %v20050_v25, 2  ;;  %v15474_v27 = vand.u32 3, %v15218_v18  ;;  %v2691_v7 = vshll.u32 %v15446_v3, 30 }
 0x2fb   :  { %v15471_v19 = vsel %vm20079_vm6, %v20078_v63, %v20077_v47  ;;  %v2811_v52 = vsel %vm2810_vm9, 1, %v19819_v1  ;;  %v15480_v23 = vsel %vm2113_vm10, nan, %v2123_v11  ;;  %v15484_v29 = vsel %vm2113_vm10, nan, %v7072_v49 }
 0x2fc   :  { %20080 = vst [vmem:[#allocation37_spill] sm:$0xff] %v15471_v19  ;;  %v15487_v44 = vand.u32 3, %v15370_v26  ;;  %v15489_v9 = vsub.s32 32, %v2914_v35  ;;  %v15492_v18 = vmul.f32 %v2266_v53, %v20081_v48  ;;  %v2825_v46 = vshrl.u32 %v15382_v59, 16 }
 0x2fd   :  { %v2835_v8 = vadd.s32 %v2833_v24, %v2831_v13  ;;  %v2571_v60 = vmul.f32 -0.00019511016, %v15460_v16  ;;  %v15497_v2 = vmul.f32 %v3175_v56, %v3173_v5  ;;  %v2803_v51 = vshrl.u32 %v15392_v32, 16 }
 0x2fe   :  { %v2813_v34 = vadd.s32 %v2811_v52, %v2809_v30  ;;  %v15501_v26 = vsub.s32 %v15407_v6, %v2691_v7  ;;  %v2761_v45 = vshrl.u32 %v19809_v58, %v15237_v55  ;;  %v2782_v40 = vsel %vm2780_vm7, %v15290_v50, 2102212464  ;;  %v20087_v52 = vld [vmem:[#allocation33_spill] sm:$0xff] }
 0x2ff   :  { %v2805_v59 = vshrl.u32 %v15412_v14, 16  ;;  %v20082_v11 = vmov 2102212464   ;;  %v20083_v53 = vmov 920167782   ;;  %v2827_v56 = vshrl.u32 %v15409_v4, 16 }
 0x300   :  { %v2926_v49 = vshll.u32 %v20082_v11, %v2914_v35  ;;  %v2927_v13 = vshrl.u32 %v20083_v53, %v15489_v9  ;;  %v2929_v32 = vshll.u32 %v20083_v53, %v2914_v35  ;;  %v20084_v6 = vmov 1326507024  }
 0x301   :  { %v2930_v5 = vshrl.u32 %v20084_v6, %v15489_v9  ;;  %v2836_v55 = vadd.s32 %v2835_v8, %v2825_v46  ;;  %v15517_v24 = vshrl.u32 %v2912_v42, 5  ;;  %v2814_v50 = vadd.s32 %v2813_v34, %v2803_v51 }
 0x302   :  { %v2917_v14 = vshll.u32 %v19809_v58, %v2914_v35  ;;  %v20085_v47 = vmov 2475754826   ;;  %v15523_v7 = vsel %vm11916_vm1, %v161_v61, %v300_v62  ;;  %vm3057_vm7 = vcmp.lt.s32.totalorder %v20087_v52, 0 }
 0x303   :  { %v2920_v63 = vshll.u32 %v20085_v47, %v2914_v35  ;;  %20086 = vst [vmem:[#allocation14_spill] sm:$0xff] %v15523_v7  ;;  %v2918_v48 = vshrl.u32 %v20085_v47, %v15489_v9  ;;  %v20088_v46 = vmov 2131351028   ;;  %v2924_v51 = vshrl.u32 %v20082_v11, %v15489_v9 }
 0x304   :  { %v2921_v8 = vshrl.u32 %v20088_v46, %v15489_v9  ;;  %v2923_v42 = vshll.u32 %v20088_v46, %v2914_v35  ;;  %v3177_v34 = vxor.u32 2147483648, %v15497_v2  ;;  %v2781_v61 = vsel %vm2777_vm5, %v2761_v45, %v15286_v12 }
 0x305   :  { %v2928_v62 = vor.u32 %v2927_v13, %v2926_v49  ;;  %v2931_v37 = vor.u32 %v2930_v5, %v2929_v32  ;;  %v2783_v39 = vsel %vm2779_vm8, %v15288_v21, %v2782_v40  ;;  %v2837_v30 = vadd.s32 %v2836_v55, %v2827_v56 }
 0x306   :  { %v20089_v19 = vand.u32 2147483647, %v15298_v15  ;;  %vm2935_vm3 = vcmp.lt.s32.totalorder %v15517_v24, 4  ;;  %vm2275_vm13 = vcmp.eq.s32.totalorder %v15487_v44, 2  ;;  %v2694_v35 = vsub.s32 0, %v15501_v26 }
 0x307   :  { %v15545_v22 = vadd.s32 %v2814_v50, %v2805_v59  ;;  %v20091_v12 = vshll.u32 %v15409_v4, 16  ;;  %v15554_v21 = vmul.f32 %v19963_v38, %v15523_v7  ;;  %vm2272_vm5 = vcmp.eq.s32.totalorder %v15487_v44, 0  ;;  %v20094_v50 = vld [vmem:[#allocation24_spill] sm:$0xff]  ;;  %v20109_v7 = vld [vmem:[#allocation19_spill] sm:$0xff] }
 0x308   :  { %v2907_v20 = vand.u32 8388607, %v20089_v19  ;;  %vm2693_vm10 = vcmp.lt.s32.totalorder %v15501_v26, 0  ;;  %v15559_v19 = vor.u32 %v2918_v48, %v2917_v14  ;;  %v15561_v40 = vor.u32 %v2921_v8, %v2920_v63 }
 0x309   :  { %20090 = vst [vmem:[#allocation15_spill] sm:$0xff] %v15545_v22  ;;  %v15550_v45 = vadd.s32 %v15428_v33, %v20091_v12  ;;  %v15563_v59 = vor.u32 %v2924_v51, %v2923_v42  ;;  %vm2932_vm11 = vcmp.lt.s32.totalorder %v15517_v24, 1  ;;  %vm2934_vm0 = vcmp.lt.s32.totalorder %v15517_v24, 3  ;;  %v20098_v42 = vld [vmem:[#allocation11_spill] sm:$0xff] }
 0x30a   :  { %20093 = vst [vmem:[#allocation38_spill] sm:$0xff] %v15554_v21  ;;  %v2941_v33 = vsel %vm2935_vm3, %v2928_v62, 920167782  ;;  %v2945_v4 = vsel %vm2935_vm3, %v2931_v37, 1326507024  ;;  %vm7223_vm4 = vcmp.eq.s32.totalorder %v15474_v27, 2  ;;  %v2784_v13 = vsel %vm2778_vm12, %v2781_v61, %v2783_v39 }
 0x30b   :  { %20092 = vst [vmem:[#allocation21_spill] sm:$0xff] %v15550_v45  ;;  %v2572_v49 = vadd.f32 0.008332121, %v2571_v60  ;;  %v2841_v32 = vadd.s32 1, %v2837_v30  ;;  %v2908_v5 = vor.u32 8388608, %v2907_v20  ;;  %vm2271_vm9 = vcmp.lt.s32.totalorder %v15487_v44, 2 }
 0x30c   :  { %vm7219_vm6 = vcmp.lt.s32.totalorder %v15474_v27, 2  ;;  %v2695_v56 = vsel %vm2693_vm10, %v2694_v35, %v15501_v26  ;;  %vm2840_vm15 = vc.u32 %v15545_v22, %v15550_v45  ;;  %vm19648_vm8 = vcmp.lt.s32.totalorder %v15517_v24, 2 }
 0x30d   :  { %v3523_v37 = vand.u32 2139095040, %v15554_v21  ;;  %v2940_v0 = vsel %vm2932_vm11, %v15559_v19, %v15561_v40  ;;  %v2942_v20 = vsel %vm2934_vm0, %v15563_v59, %v2941_v33  ;;  %v2944_v39 = vsel %vm2932_vm11, %v15561_v40, %v15563_v59 }
 0x30e   :  { %v2946_v60 = vsel %vm2934_vm0, %v2928_v62, %v2945_v4  ;;  %v2273_v55 = vxor.u32 2147483648, %v15492_v18  ;;  %v2559_v14 = vsub.s32 4, %v20094_v50  ;;  %v20095_v63 = vand.u32 2147483647, %v20087_v52 }
 0x30f   :  { %v3178_v8 = vsel %vm3057_vm7, %v3177_v34, %v15497_v2  ;;  %vm2268_vm10 = vweird.f32 %v20098_v42  ;;  %v2564_v51 = vmul.f32 -0.001358992, %v15460_v16  ;;  %v2696_v61 = vclz %v2695_v56 }
 0x310   :  { %vm15598_vm12 = vcmp.le.f32.partialorder %v20095_v63, 0.7853982  ;;  %v2842_v62 = vsel %vm2840_vm15, %v2841_v32, %v2837_v30  ;;  %v15607_v35 = vshll.u32 %v2908_v5, 8  ;;  %v2573_v12 = vmul.f32 %v2572_v49, %v15460_v16 }
 0x311   :  { %v2838_v33 = vmul.u32 %v15329_v43, %v2784_v13  ;;  %v15613_v4 = vsel %vm19648_vm8, %v2940_v0, %v2942_v20  ;;  %v15617_v63 = vsel %vm19648_vm8, %v2944_v39, %v2946_v60  ;;  %v10318_v2 = vsel %vm12700_vm2, %v15480_v23, %v15484_v29 }
 0x312   :  { %20099 = vst [vmem:[#allocation33_spill] sm:$0xff] %v15607_v35  ;;  %v20100_v30 = vxor.u32 2147483648, %v15456_v57  ;;  %v15631_v43 = vsel %vm15598_vm12, %v20087_v52, %v3178_v8  ;;  %v3524_v49 = vshrl.u32 %v3523_v37, 23  ;;  %v2274_v13 = vsel %vm2272_vm5, %v15456_v57, %v2273_v55 }
 0x313   :  { %20101 = vst [vmem:[#allocation24_spill] sm:$0xff] %v15631_v43  ;;  %vm20102_vm15 = vcmp.eq.s32.totalorder %v15474_v27, 0  ;;  %vm20103_vm8 = vcmp.lt.s32.totalorder %v20070_v54, 0  ;;  %v15642_v32 = vadd.s32 %v2842_v62, %v2838_v33  ;;  %v11313_v5 = vadd.s32 4294967294, %v2696_v61  ;;  %v20105_v33 = vld [vmem:[#allocation27_spill] sm:$0xff] }
 0x314   :  { %v2277_v34 = vsel %vm2275_vm13, %v20100_v30, %v15492_v18  ;;  %v7222_v23 = vsel %vm20102_vm15, %v15456_v57, %v2273_v55  ;;  %v2560_v29 = vsel %vm20103_vm8, %v2559_v14, %v20094_v50  ;;  %v2949_v56 = vand.u32 65535, %v15607_v35 }
 0x315   :  { %v2952_v0 = vshrl.u32 %v15617_v63, 16  ;;  %v2974_v37 = vshrl.u32 %v15613_v4, 16  ;;  %v20104_v20 = vmov %v20100_v30  ;;  %v2565_v60 = vadd.f32 0.041655596, %v2564_v51 }
 0x316   :  { %v7225_v39 = vsel %vm7223_vm4, %v20104_v20, %v15492_v18  ;;  %v2574_v55 = vadd.f32 -0.16666654, %v2573_v12  ;;  %v15654_v50 = vmul.f32 %v15631_v43, %v15631_v43  ;;  %vm19662_vm13 = vcmp.lt.s32.totalorder %v20050_v25, 26 }
 0x317   :  { %v2278_v14 = vsel %vm2271_vm9, %v2274_v13, %v2277_v34  ;;  %v7226_v8 = vsel %vm7219_vm6, %v7222_v23, %v7225_v39  ;;  %v15663_v57 = vsel %vm15387_vm14, 0, %v2560_v29  ;;  %v11330_v61 = vadd.s32 4294967169, %v3524_v49 }
 0x318   :  { %v2844_v18 = vadd.s32 536870912, %v15642_v32  ;;  %v2950_v51 = vshrl.u32 %v15607_v35, 16  ;;  %v2951_v62 = vand.u32 65535, %v15617_v63  ;;  %v2973_v12 = vand.u32 65535, %v15613_v4 }
 0x319   :  { %vm20106_vm5 = vcmp.lt.s32.totalorder %v20050_v25, 2  ;;  %vm11314_vm8 = vcmp.lt.s32.totalorder %v11313_v5, 0  ;;  %v15674_v27 = vmul.u32 %v2952_v0, %v2949_v56  ;;  %v15676_v10 = vmul.u32 %v2974_v37, %v2949_v56 }
 0x31a   :  { %v15672_v44 = vsel %vm20106_vm5, %v20105_v33, %v10318_v2  ;;  %v15680_v30 = vsel %vm2268_vm10, nan, %v2278_v14  ;;  %v2566_v34 = vmul.f32 %v2565_v60, %v15460_v16  ;;  %v2575_v63 = vmul.f32 %v2574_v55, %v15460_v16 }
 0x31b   :  { %20107 = vst [vmem:[#allocation11_spill] sm:$0xff] %v15672_v44  ;;  %v3184_v4 = vmul.f32 -0.001358992, %v15654_v50  ;;  %v15687_v49 = vsel %vm2268_vm10, nan, %v7226_v8  ;;  %v2579_v2 = vadd.s32 3, %v15663_v57  ;;  %v3530_v23 = vadd.s32 1, %v11330_v61 }
 0x31c   :  { %v3191_v13 = vmul.f32 -0.00019511016, %v15654_v50  ;;  %v2699_v29 = vsel %vm11314_vm8, 0, %v11313_v5  ;;  %v15691_v20 = vshrl.u32 %v2844_v18, 30  ;;  %v15693_v39 = vmul.u32 %v2951_v62, %v2950_v51 }
 0x31d   :  { %v15695_v14 = vmul.u32 %v2973_v12, %v2950_v51  ;;  %v2953_v60 = vmul.u32 %v2951_v62, %v2949_v56  ;;  %v2957_v55 = vshll.u32 %v15674_v27, 16  ;;  %v2975_v33 = vmul.u32 %v2973_v12, %v2949_v56 }
 0x31e   :  { %20108 = vst [vmem:[#allocation27_spill] sm:$0xff] %v15691_v20  ;;  %v2979_v42 = vshll.u32 %v15676_v10, 16  ;;  %v2567_v8 = vadd.f32 -0.4999988, %v2566_v34  ;;  %v2576_v44 = vadd.f32 1.0, %v2575_v63  ;;  %v3179_v15 = vsub.s32 4, %v20109_v7 }
 0x31f   :  { %v3185_v45 = vadd.f32 0.041655596, %v3184_v4  ;;  %v3192_v22 = vadd.f32 0.008332121, %v3191_v13  ;;  %v2684_v5 = vadd.s32 %v15358_v28, %v15341_v41  ;;  %v2700_v61 = vsub.s32 32, %v2699_v29  ;;  %v20110_v4 = vld [vmem:[#allocation25_spill] sm:$0xff] }
 0x320   :  { %vm3531_vm14 = vcmp.gt.s32.totalorder %v3530_v23, 0  ;;  %v2704_v18 = vsub.s32 4294967266, %v2699_v29  ;;  %v2846_v3 = vshll.u32 %v15691_v20, 30  ;;  %v2959_v62 = vshll.u32 %v15693_v39, 16  ;;  %v20111_v41 = vld [vmem:[#allocation16_spill] sm:$0xff] }
 0x321   :  { %vm2961_vm4 = vc.u32 %v2953_v60, %v2957_v55  ;;  %v2963_v12 = vadd.s32 %v2957_v55, %v2953_v60  ;;  %vm2983_vm9 = vc.u32 %v2975_v33, %v2979_v42  ;;  %v15705_v34 = vadd.s32 %v2979_v42, %v2975_v33 }
 0x322   :  { %v3532_v63 = vsel %vm3531_vm14, %v3530_v23, 0  ;;  %v10373_v13 = vsel %vm19662_vm13, %v20110_v4, 0.0  ;;  %v10374_v28 = vsel %vm19662_vm13, %v20111_v41, 0.0  ;;  %vm19661_vm6 = vcmask 261120  }
 0x323   :  { %v2702_v20 = vshrl.u32 %v2684_v5, %v2700_v61  ;;  %v2956_v43 = vmul.u32 %v2952_v0, %v2950_v51  ;;  %v2978_v35 = vmul.u32 %v2974_v37, %v2950_v51  ;;  %v10405_v54 = vpack.c.bf16 %v10374_v28, %v10373_v13 }
 0x324   :  { %v2568_v56 = vmul.f32 %v2567_v8, %v15460_v16  ;;  %v2705_v60 = vadd.s32 127, %v2704_v18  ;;  %v2962_v55 = vsel %vm2961_vm4, 1, %v19819_v1  ;;  %v2984_v23 = vsel %vm2983_vm9, 1, %v19819_v1 }
 0x325   :  { %v2701_v33 = vshll.u32 %v15501_v26, %v2699_v29  ;;  %vm2965_vm10 = vc.u32 %v2963_v12, %v2959_v62  ;;  %v20112_v42 = vshll.u32 %v15695_v14, 16  ;;  %v3534_v4 = vand.u32 31, %v3532_v63  ;;  %11470 = vmatmul.msk.bf16.vlgmr.msra.gmra.mxu0 %vm19661_vm6, %v10405_v54 }
 0x326   :  { %v15722_v0 = vmul.f32 %v2576_v44, %v15436_v36  ;;  %v3180_v16 = vsel %vm3057_vm7, %v3179_v15, %v20109_v7  ;;  %v3186_v37 = vmul.f32 %v3185_v45, %v15654_v50  ;;  %v15729_v51 = vsub.s32 %v15642_v32, %v2846_v3 }
 0x327   :  { %vm2987_vm15 = vc.u32 %v15705_v34, %v20112_v42  ;;  %v3193_v26 = vmul.f32 %v3192_v22, %v15654_v50  ;;  %v15732_v29 = vor.u32 %v2702_v20, %v2701_v33  ;;  %v2964_v8 = vadd.s32 %v2962_v55, %v2956_v43 }
 0x328   :  { %v2986_v5 = vadd.s32 %v2984_v23, %v2978_v35  ;;  %v2706_v61 = vshll.u32 %v2705_v60, 23  ;;  %v2966_v54 = vsel %vm2965_vm10, 1, %v19819_v1  ;;  %v2988_v36 = vsel %vm2987_vm15, 1, %v19819_v1 }
 0x329   :  { %v19663_v44 = vand.u32 2147483647, %v15554_v21  ;;  %v15741_v3 = vand.u32 3, %v2579_v2  ;;  %v15744_v22 = vand.u32 3, %v15663_v57  ;;  %v15746_v7 = vsub.s32 32, %v3534_v4 }
 0x32a   :  { %v15748_v45 = vadd.f32 1.0, %v2568_v56  ;;  %v2583_v35 = vxor.u32 2147483648, %v15722_v0  ;;  %v15753_v43 = vsel %vm15598_vm12, 0, %v3180_v16  ;;  %v2849_v32 = vsub.s32 0, %v15729_v51 }
 0x32b   :  { %v15756_v20 = vadd.f32 -0.4999988, %v3186_v37  ;;  %vm2848_vm7 = vcmp.lt.s32.totalorder %v15729_v51, 0  ;;  %v2968_v2 = vadd.s32 %v2966_v54, %v2964_v8  ;;  %v2990_v18 = vadd.s32 %v2988_v36, %v2986_v5  ;;  %v151_v37 = vpop.permute.xlu1 %150 }
 0x32c   :  { %v3194_v57 = vadd.f32 -0.16666654, %v3193_v26  ;;  %v2707_v62 = vor.u32 4788187, %v2706_v61  ;;  %v2710_v12 = vcvt.s32.f32 %v15732_v29  ;;  %v3527_v56 = vand.u32 8388607, %v19663_v44 }
 0x32d   :  { %v2958_v13 = vshrl.u32 %v15674_v27, 16  ;;  %v2980_v48 = vshrl.u32 %v15676_v10, 16  ;;  %v3546_v41 = vshll.u32 %v20082_v11, %v3534_v4  ;;  %v3547_v28 = vshrl.u32 %v20083_v53, %v15746_v7 }
 0x32e   :  { %v2850_v60 = vsel %vm2848_vm7, %v2849_v32, %v15729_v51  ;;  %v15768_v55 = vshrl.u32 %v3532_v63, 5  ;;  %v3549_v23 = vshll.u32 %v20083_v53, %v3534_v4  ;;  %v3550_v33 = vshrl.u32 %v20084_v6, %v15746_v7  ;;  %v292_v32 = vpop.permute.xlu0 %291 }
 0x32f   :  { %v2969_v42 = vadd.s32 %v2968_v2, %v2958_v13  ;;  %v2991_v16 = vadd.s32 %v2990_v18, %v2980_v48  ;;  %v3537_v27 = vshll.u32 %v19809_v58, %v3534_v4  ;;  %v3540_v10 = vshll.u32 %v20085_v47, %v3534_v4 }
 0x330   :  { %v3538_v26 = vshrl.u32 %v20085_v47, %v15746_v7  ;;  %v3541_v29 = vshrl.u32 %v20088_v46, %v15746_v7  ;;  %v3543_v63 = vshll.u32 %v20088_v46, %v3534_v4  ;;  %v3544_v8 = vshrl.u32 %v20082_v11, %v15746_v7 }
 0x331   :  { %v2708_v5 = vand.u32 2147483647, %v2707_v62  ;;  %v2916_v61 = vshrl.u32 %v19809_v58, %v15489_v9  ;;  %v2982_v54 = vshrl.u32 %v15695_v14, 16  ;;  %v3548_v36 = vor.u32 %v3547_v28, %v3546_v41 }
 0x332   :  { %v2960_v2 = vshrl.u32 %v15693_v39, 16  ;;  %v3551_v18 = vor.u32 %v3550_v33, %v3549_v23  ;;  %vm3555_vm12 = vcmp.lt.s32.totalorder %v15768_v55, 4  ;;  %v15789_v13 = vsel %vm11916_vm1, %v151_v37, %v292_v32 }
 0x333   :  { %20113 = vst [vmem:[#allocation19_spill] sm:$0xff] %v15789_v13  ;;  %v2851_v4 = vclz %v2850_v60  ;;  %v2937_v62 = vsel %vm2935_vm3, %v15563_v59, 2102212464  ;;  %v2992_v48 = vadd.s32 %v2991_v16, %v2982_v54  ;;  %v3528_v9 = vor.u32 8388608, %v3527_v56 }
 0x334   :  { %vm2582_vm5 = vcmp.eq.s32.totalorder %v15741_v3, 0  ;;  %v15795_v41 = vadd.s32 %v2969_v42, %v2960_v2  ;;  %v15797_v28 = vor.u32 %v3538_v26, %v3537_v27  ;;  %v15799_v39 = vor.u32 %v3541_v29, %v3540_v10 }
 0x335   :  { %v15801_v23 = vor.u32 %v3544_v8, %v3543_v63  ;;  %vm3552_vm8 = vcmp.lt.s32.totalorder %v15768_v55, 1  ;;  %vm3554_vm14 = vcmp.lt.s32.totalorder %v15768_v55, 3  ;;  %v3561_v60 = vsel %vm3555_vm12, %v3548_v36, 920167782  ;;  %v20119_v8 = vld [vmem:[#allocation40_spill] sm:$0xff] }
 0x336   :  { %20114 = vst [vmem:[#allocation25_spill] sm:$0xff] %v15795_v41  ;;  %v15809_v59 = vmul.f32 %v19963_v38, %v15789_v13  ;;  %v2936_v56 = vsel %vm2932_vm11, %v2916_v61, %v15559_v19  ;;  %v2938_v33 = vsel %vm2934_vm0, %v15561_v40, %v2937_v62  ;;  %v20116_v42 = vshll.u32 %v15695_v14, 16 }
 0x337   :  { %v3565_v27 = vsel %vm3555_vm12, %v3551_v18, 1326507024  ;;  %vm2581_vm3 = vcmp.lt.s32.totalorder %v15741_v3, 2  ;;  %vm7528_vm4 = vcmp.eq.s32.totalorder %v15744_v22, 0  ;;  %vm7531_vm9 = vcmp.eq.s32.totalorder %v15744_v22, 2  ;;  %v20121_v18 = vld [vmem:[#allocation33_spill] sm:$0xff] }
 0x338   :  { %20115 = vst [vmem:[#allocation16_spill] sm:$0xff] %v15809_v59  ;;  %v15820_v16 = vadd.s32 %v15705_v34, %v20116_v42  ;;  %v3195_v19 = vmul.f32 %v3194_v57, %v15654_v50  ;;  %v2711_v10 = vmul.f32 %v2710_v12, %v2708_v5  ;;  %v11316_v37 = vadd.s32 4294967294, %v2851_v4 }
 0x339   :  { %v2996_v26 = vadd.s32 1, %v2992_v48  ;;  %vm3553_vm0 = vcmp.lt.s32.totalorder %v15768_v55, 2  ;;  %v3560_v40 = vsel %vm3552_vm8, %v15797_v28, %v15799_v39  ;;  %v3562_v14 = vsel %vm3554_vm14, %v15801_v23, %v3561_v60 }
 0x33a   :  { %20117 = vst [vmem:[#allocation41_spill] sm:$0xff] %v15820_v16  ;;  %vm2995_vm11 = vc.u32 %v15795_v41, %v15820_v16  ;;  %vm20118_vm10 = vcmp.lt.s32.totalorder %v15517_v24, 2  ;;  %v3564_v57 = vsel %vm3552_vm8, %v15799_v39, %v15801_v23  ;;  %v3566_v12 = vsel %vm3554_vm14, %v3548_v36, %v3565_v27  ;;  %v20120_v24 = vld [vmem:[#allocation13_spill] sm:$0xff] }
 0x33b   :  { %v2939_v34 = vsel %vm20118_vm10, %v2936_v56, %v2938_v33  ;;  %v3213_v29 = vand.u32 2139095040, %v15809_v59  ;;  %vm2585_vm15 = vcmp.eq.s32.totalorder %v15741_v3, 2  ;;  %v3199_v63 = vadd.s32 3, %v15753_v43 }
 0x33c   :  { %vm2592_vm7 = vcmp.lt.s32.totalorder %v20119_v8, 0  ;;  %v15850_v5 = vshll.u32 %v3528_v9, 8  ;;  %vm2578_vm10 = vweird.f32 %v20120_v24  ;;  %v2586_v61 = vxor.u32 2147483648, %v15748_v45 }
 0x33d   :  { %vm7527_vm6 = vcmp.lt.s32.totalorder %v15744_v22, 2  ;;  %vm11317_vm13 = vcmp.lt.s32.totalorder %v11316_v37, 0  ;;  %v2997_v54 = vsel %vm2995_vm11, %v2996_v26, %v2992_v48  ;;  %v15860_v36 = vsel %vm3553_vm0, %v3560_v40, %v3562_v14 }
 0x33e   :  { %v3188_v32 = vmul.f32 %v15756_v20, %v15654_v50  ;;  %v15865_v2 = vand.u32 3, %v15753_v43  ;;  %v2993_v4 = vmul.u32 %v20121_v18, %v2939_v34  ;;  %v15870_v62 = vsel %vm3553_vm0, %v3564_v57, %v3566_v12  ;;  %v20125_v12 = vld [vmem:[#allocation24_spill] sm:$0xff] }
 0x33f   :  { %v2584_v48 = vsel %vm2582_vm5, %v15748_v45, %v2583_v35  ;;  %v3196_v9 = vadd.f32 1.0, %v3195_v19  ;;  %v2712_v60 = vxor.u32 2147483648, %v2711_v10  ;;  %v3214_v56 = vshrl.u32 %v3213_v29, 23 }
 0x340   :  { %v15877_v33 = vsel %vm11317_vm13, 0, %v11316_v37  ;;  %v15879_v50 = vadd.s32 %v2997_v54, %v2993_v4  ;;  %v3569_v43 = vand.u32 65535, %v15850_v5  ;;  %v3594_v20 = vshrl.u32 %v15860_v36, 16 }
 0x341   :  { %v2587_v42 = vsel %vm2585_vm15, %v2586_v61, %v15722_v0  ;;  %v15886_v27 = vand.u32 3, %v3199_v63  ;;  %v20122_v26 = vand.u32 2147483647, %v20119_v8  ;;  %v3572_v37 = vshrl.u32 %v15870_v62, 16 }
 0x342   :  { %v2588_v40 = vsel %vm2581_vm3, %v2584_v48, %v2587_v42  ;;  %v7530_v14 = vsel %vm7528_vm4, %v15748_v45, %v2583_v35  ;;  %v7533_v34 = vsel %vm7531_vm9, %v2586_v61, %v15722_v0  ;;  %v15905_v57 = vadd.f32 1.0, %v3188_v32 }
 0x343   :  { %vm15890_vm5 = vcmp.le.f32.partialorder %v20122_v26, 0.7853982  ;;  %v15908_v29 = vmul.f32 %v3196_v9, %v20125_v12  ;;  %v2713_v63 = vsel %vm2592_vm7, %v2712_v60, %v2711_v10  ;;  %v2859_v3 = vsub.s32 4294967266, %v15877_v33 }
 0x344   :  { %v11324_v54 = vadd.s32 4294967169, %v3214_v56  ;;  %vm8144_vm13 = vcmp.eq.s32.totalorder %v15865_v2, 0  ;;  %v2999_v18 = vadd.s32 536870912, %v15879_v50  ;;  %v3570_v45 = vshrl.u32 %v15850_v5, 16 }
 0x345   :  { %v3593_v35 = vand.u32 65535, %v15860_v36  ;;  %v15917_v0 = vmul.u32 %v3594_v20, %v3569_v43  ;;  %vm3202_vm3 = vcmp.eq.s32.totalorder %v15886_v27, 0  ;;  %vm3205_vm4 = vcmp.eq.s32.totalorder %v15886_v27, 2  ;;  %v20126_v36 = vld [vmem:[#allocation30_spill] sm:$0xff] }
 0x346   :  { %v3571_v61 = vand.u32 65535, %v15870_v62  ;;  %v15922_v10 = vmul.u32 %v3572_v37, %v3569_v43  ;;  %v15926_v32 = vsel %vm2578_vm10, nan, %v2588_v40  ;;  %v7534_v4 = vsel %vm7527_vm6, %v7530_v14, %v7533_v34 }
 0x347   :  { %v3206_v48 = vxor.u32 2147483648, %v15905_v57  ;;  %v2714_v9 = vsub.s32 4, %v20126_v36  ;;  %v3203_v60 = vxor.u32 2147483648, %v15908_v29  ;;  %v15936_v56 = vsel %vm15890_vm5, %v20119_v8, %v2713_v63 }
 0x348   :  { %20127 = vst [vmem:[#allocation13_spill] sm:$0xff] %v15936_v56  ;;  %v2860_v62 = vadd.s32 127, %v2859_v3  ;;  %v3220_v42 = vadd.s32 1, %v11324_v54  ;;  %vm3201_vm9 = vcmp.lt.s32.totalorder %v15886_v27, 2  ;;  %vm8147_vm11 = vcmp.eq.s32.totalorder %v15865_v2, 2 }
 0x349   :  { %v15940_v26 = vshrl.u32 %v2999_v18, 30  ;;  %v3595_v22 = vmul.u32 %v3593_v35, %v3569_v43  ;;  %v15942_v40 = vmul.u32 %v3593_v35, %v3570_v45  ;;  %v3599_v14 = vshll.u32 %v15917_v0, 16 }
 0x34a   :  { %v15947_v34 = vsel %vm2578_vm10, nan, %v7534_v4  ;;  %vm8143_vm6 = vcmp.lt.s32.totalorder %v15865_v2, 2  ;;  %v3573_v12 = vmul.u32 %v3571_v61, %v3569_v43  ;;  %v15950_v63 = vmul.u32 %v3571_v61, %v3570_v45  ;;  %v20129_v61 = vld [vmem:[#allocation15_spill] sm:$0xff]  ;;  %v20130_v4 = vld [vmem:[#allocation21_spill] sm:$0xff] }
 0x34b   :  { %20128 = vst [vmem:[#allocation33_spill] sm:$0xff] %v15940_v26  ;;  %v3577_v3 = vshll.u32 %v15922_v10, 16  ;;  %v3207_v54 = vsel %vm3205_vm4, %v3206_v48, %v15908_v29  ;;  %v2715_v18 = vsel %vm2592_vm7, %v2714_v9, %v20126_v36  ;;  %v15961_v24 = vmul.f32 %v15936_v56, %v15936_v56 }
 0x34c   :  { %v2855_v35 = vsub.s32 32, %v15877_v33  ;;  %v3204_v43 = vsel %vm3202_vm3, %v15905_v57, %v3203_v60  ;;  %v2839_v44 = vadd.s32 %v20130_v4, %v20129_v61  ;;  %v2861_v15 = vshll.u32 %v2860_v62, 23 }
 0x34d   :  { %vm3221_vm15 = vcmp.gt.s32.totalorder %v3220_v42, 0  ;;  %vm3198_vm10 = vweird.f32 %v20087_v52  ;;  %v3001_v13 = vshll.u32 %v15940_v26, 30  ;;  %vm3603_vm7 = vc.u32 %v3595_v22, %v3599_v14 }
 0x34e   :  { %v15972_v9 = vadd.s32 %v3599_v14, %v3595_v22  ;;  %v8146_v21 = vsel %vm8144_vm13, %v15905_v57, %v3203_v60  ;;  %v3579_v8 = vshll.u32 %v15950_v63, 16  ;;  %vm3581_vm3 = vc.u32 %v3573_v12, %v3577_v3 }
 0x34f   :  { %v3583_v16 = vadd.s32 %v3577_v3, %v3573_v12  ;;  %v2719_v62 = vmul.f32 -0.001358992, %v15961_v24  ;;  %v2857_v61 = vshrl.u32 %v2839_v44, %v2855_v35  ;;  %v3598_v4 = vmul.u32 %v3594_v20, %v3570_v45 }
 0x350   :  { %v3222_v41 = vsel %vm3221_vm15, %v3220_v42, 0  ;;  %v2726_v26 = vmul.f32 -0.00019511016, %v15961_v24  ;;  %v2856_v36 = vshll.u32 %v15729_v51, %v15877_v33  ;;  %v3576_v22 = vmul.u32 %v3572_v37, %v3570_v45 }
 0x351   :  { %v3604_v14 = vsel %vm3603_vm7, 1, %v19819_v1  ;;  %v2862_v56 = vor.u32 4788187, %v2861_v15  ;;  %v15984_v57 = vsub.s32 %v15879_v50, %v3001_v13  ;;  %v3582_v60 = vsel %vm3581_vm3, 1, %v19819_v1 }
 0x352   :  { %v20131_v12 = vshll.u32 %v15942_v40, 16  ;;  %v3208_v44 = vsel %vm3201_vm9, %v3204_v43, %v3207_v54  ;;  %v8149_v51 = vsel %vm8147_vm11, %v3206_v48, %v15908_v29  ;;  %vm3585_vm4 = vc.u32 %v3583_v16, %v3579_v8 }
 0x353   :  { %v3224_v33 = vand.u32 31, %v3222_v41  ;;  %v8150_v15 = vsel %vm8143_vm6, %v8146_v21, %v8149_v51  ;;  %v15999_v13 = vsel %vm15890_vm5, 0, %v2715_v18  ;;  %v2858_v50 = vor.u32 %v2857_v61, %v2856_v36 }
 0x354   :  { %vm3607_vm13 = vc.u32 %v15972_v9, %v20131_v12  ;;  %v3606_v20 = vadd.s32 %v3604_v14, %v3598_v4  ;;  %v2720_v37 = vadd.f32 0.041655596, %v2719_v62  ;;  %v2727_v45 = vadd.f32 0.008332121, %v2726_v26 }
 0x355   :  { %v3584_v42 = vadd.s32 %v3582_v60, %v3576_v22  ;;  %v3608_v27 = vsel %vm3607_vm13, 1, %v19819_v1  ;;  %v10321_v16 = vsel %vm12700_vm2, %v15926_v32, %v15947_v34  ;;  %v2863_v8 = vand.u32 2147483647, %v2862_v56 }
 0x356   :  { %v3004_v2 = vsub.s32 0, %v15984_v57  ;;  %v3586_v21 = vsel %vm3585_vm4, 1, %v19819_v1  ;;  %v16010_v19 = vsel %vm3198_vm10, nan, %v3208_v44  ;;  %v16014_v29 = vsel %vm3198_vm10, nan, %v8150_v15 }
 0x357   :  { %vm3003_vm5 = vcmp.lt.s32.totalorder %v15984_v57, 0  ;;  %v16017_v48 = vsub.s32 32, %v3224_v33  ;;  %v16020_v26 = vadd.s32 3, %v15999_v13  ;;  %v2865_v56 = vcvt.s32.f32 %v2858_v50 }
 0x358   :  { %v3600_v3 = vshrl.u32 %v15917_v0, 16  ;;  %v3610_v54 = vadd.s32 %v3608_v27, %v3606_v20  ;;  %v2721_v18 = vmul.f32 %v2720_v37, %v15961_v24  ;;  %v2728_v35 = vmul.f32 %v2727_v45, %v15961_v24  ;;  %v296_v20 = vpop.permute.xlu1 %295 }
 0x359   :  { %v3578_v43 = vshrl.u32 %v15922_v10, 16  ;;  %v3588_v52 = vadd.s32 %v3586_v21, %v3584_v42  ;;  %v2866_v36 = vmul.f32 %v2865_v56, %v2863_v8  ;;  %v3005_v62 = vsel %vm3003_vm5, %v3004_v2, %v15984_v57  ;;  %v20132_v8 = vld [vmem:[#allocation8_spill] sm:$0xff] }
 0x35a   :  { %v3536_v61 = vshrl.u32 %v19809_v58, %v15746_v7  ;;  %v3557_v4 = vsel %vm3555_vm12, %v15801_v23, 2102212464  ;;  %v3602_v0 = vshrl.u32 %v15942_v40, 16  ;;  %v19673_v22 = vand.u32 2147483647, %v15809_v59 }
 0x35b   :  { %v3236_v14 = vshll.u32 %v20082_v11, %v3224_v33  ;;  %v3237_v10 = vshrl.u32 %v20083_v53, %v16017_v48  ;;  %v3611_v60 = vadd.s32 %v3610_v54, %v3600_v3  ;;  %v16037_v12 = vshrl.u32 %v3222_v41, 5  ;;  %v20133_v54 = vld [vmem:[#allocation12_spill] sm:$0xff] }
 0x35c   :  { %v3239_v44 = vshll.u32 %v20083_v53, %v3224_v33  ;;  %v3240_v7 = vshrl.u32 %v20084_v6, %v16017_v48  ;;  %v3580_v51 = vshrl.u32 %v15950_v63, 16  ;;  %v3589_v23 = vadd.s32 %v3588_v52, %v3578_v43 }
 0x35d   :  { %v3227_v15 = vshll.u32 %v19809_v58, %v3224_v33  ;;  %v3230_v50 = vshll.u32 %v20085_v47, %v3224_v33  ;;  %v3228_v37 = vshrl.u32 %v20085_v47, %v16017_v48  ;;  %v3231_v41 = vshrl.u32 %v20088_v46, %v16017_v48 }
 0x35e   :  { %v3233_v45 = vshll.u32 %v20088_v46, %v3224_v33  ;;  %v3234_v42 = vshrl.u32 %v20082_v11, %v16017_v48  ;;  %v2729_v27 = vadd.f32 -0.16666654, %v2728_v35  ;;  %vm2747_vm12 = vcmp.lt.s32.totalorder %v20132_v8, 0 }
 0x35f   :  { %v3556_v63 = vsel %vm3552_vm8, %v3536_v61, %v15797_v28  ;;  %v3217_v2 = vand.u32 8388607, %v19673_v22  ;;  %v3238_v21 = vor.u32 %v3237_v10, %v3236_v14  ;;  %v3612_v56 = vadd.s32 %v3611_v60, %v3602_v0 }
 0x360   :  { %v3241_v3 = vor.u32 %v3240_v7, %v3239_v44  ;;  %vm3245_vm9 = vcmp.lt.s32.totalorder %v16037_v12, 4  ;;  %v16062_v33 = vsel %vm11916_vm1, %v20133_v54, %v296_v20  ;;  %v3006_v35 = vclz %v3005_v62 }
 0x361   :  { %20134 = vst [vmem:[#allocation24_spill] sm:$0xff] %v16062_v33  ;;  %v3558_v43 = vsel %vm3554_vm14, %v15799_v39, %v3557_v4  ;;  %v16067_v52 = vadd.s32 %v3589_v23, %v3580_v51  ;;  %v20135_v28 = vshll.u32 %v15942_v40, 16  ;;  %v2867_v0 = vxor.u32 2147483648, %v2866_v36 }
 0x362   :  { %v16074_v14 = vor.u32 %v3228_v37, %v3227_v15  ;;  %v16076_v10 = vor.u32 %v3231_v41, %v3230_v50  ;;  %v16078_v60 = vor.u32 %v3234_v42, %v3233_v45  ;;  %vm3242_vm8 = vcmp.lt.s32.totalorder %v16037_v12, 1  ;;  %v20138_v15 = vld [vmem:[#allocation27_spill] sm:$0xff] }
 0x363   :  { %v16072_v61 = vadd.s32 %v15972_v9, %v20135_v28  ;;  %vm3244_vm11 = vcmp.lt.s32.totalorder %v16037_v12, 3  ;;  %v3251_v39 = vsel %vm3245_vm9, %v3238_v21, 920167782  ;;  %v16086_v40 = vmul.f32 %v19963_v38, %v16062_v33  ;;  %v20143_v28 = vld [vmem:[#allocation29_spill] sm:$0xff] }
 0x364   :  { %v3559_v9 = vsel %vm3553_vm0, %v3556_v63, %v3558_v43  ;;  %v3616_v62 = vadd.s32 1, %v3612_v56  ;;  %v3218_v4 = vor.u32 8388608, %v3217_v2  ;;  %v3255_v44 = vsel %vm3245_vm9, %v3241_v3, 1326507024 }
 0x365   :  { %20136 = vst [vmem:[#allocation30_spill] sm:$0xff] %v16072_v61  ;;  %v2722_v7 = vadd.f32 -0.4999988, %v2721_v18  ;;  %v2730_v51 = vmul.f32 %v2729_v27, %v15961_v24  ;;  %v11319_v23 = vadd.s32 4294967294, %v3006_v35  ;;  %vm3615_vm14 = vc.u32 %v16067_v52, %v16072_v61 }
 0x366   :  { %20137 = vst [vmem:[#allocation15_spill] sm:$0xff] %v16086_v40  ;;  %v2869_v50 = vsub.s32 4, %v20138_v15  ;;  %vm3243_vm6 = vcmp.lt.s32.totalorder %v16037_v12, 2  ;;  %v3250_v55 = vsel %vm3242_vm8, %v16074_v14, %v16076_v10  ;;  %v3252_v20 = vsel %vm3244_vm11, %v16078_v60, %v3251_v39 }
 0x367   :  { %v3613_v18 = vmul.u32 %v15850_v5, %v3559_v9  ;;  %v3254_v37 = vsel %vm3242_vm8, %v16076_v10, %v16078_v60  ;;  %v3256_v41 = vsel %vm3244_vm11, %v3238_v21, %v3255_v44  ;;  %v3368_v45 = vand.u32 2139095040, %v16086_v40 }
 0x368   :  { %v20139_v42 = vand.u32 2147483647, %v20132_v8  ;;  %v2868_v63 = vsel %vm2747_vm12, %v2867_v0, %v2866_v36  ;;  %v3617_v5 = vsel %vm3615_vm14, %v3616_v62, %v3612_v56  ;;  %v16120_v2 = vshll.u32 %v3218_v4, 8  ;;  %v20146_v4 = vld [vmem:[#allocation23_spill] sm:$0xff] }
 0x369   :  { %v10325_v3 = vsel %vm12700_vm2, %v16010_v19, %v16014_v29  ;;  %v2723_v21 = vmul.f32 %v2722_v7, %v15961_v24  ;;  %vm11320_vm15 = vcmp.lt.s32.totalorder %v11319_v23, 0  ;;  %v16129_v54 = vsel %vm3243_vm6, %v3250_v55, %v3252_v20 }
 0x36a   :  { %vm16114_vm0 = vcmp.le.f32.partialorder %v20139_v42, 0.7853982  ;;  %v2731_v35 = vadd.f32 1.0, %v2730_v51  ;;  %v16132_v43 = vand.u32 3, %v16020_v26  ;;  %v16135_v36 = vand.u32 3, %v15999_v13 }
 0x36b   :  { %v16139_v56 = vsel %vm3243_vm6, %v3254_v37, %v3256_v41  ;;  %v2870_v24 = vsel %vm2747_vm12, %v2869_v50, %v20138_v15  ;;  %v16147_v19 = vsel %vm16114_vm0, %v20132_v8, %v2868_v63  ;;  %v16149_v29 = vadd.s32 %v3617_v5, %v3613_v18 }
 0x36c   :  { %v3369_v26 = vshrl.u32 %v3368_v45, 23  ;;  %v20142_v13 = vsel %vm12700_vm2, %v15680_v30, %v15687_v49  ;;  %vm20144_vm10 = vcmp.lt.s32.totalorder %v20050_v25, 2  ;;  %v16161_v39 = vsel %vm11320_vm15, 0, %v11319_v23  ;;  %v20149_v49 = vld [vmem:[#allocation28_spill] sm:$0xff]  ;;  %v20152_v23 = vld [vmem:[#allocation13_spill] sm:$0xff] }
 0x36d   :  { %v16159_v0 = vsel %vm20144_vm10, %v20143_v28, %v20142_v13  ;;  %v3259_v9 = vand.u32 65535, %v16120_v2  ;;  %v3284_v62 = vshrl.u32 %v16129_v54, 16  ;;  %vm20147_vm7 = vmmov %vm20144_vm10  ;;  %v16180_v7 = vadd.f32 1.0, %v2723_v21 }
 0x36e   :  { %20145 = vst [vmem:[#allocation21_spill] sm:$0xff] %v16159_v0  ;;  %v16173_v30 = vsel %vm20147_vm7, %v20146_v4, %v10321_v16  ;;  %vm20150_vm3 = vmmov %vm20147_vm7  ;;  %v3262_v51 = vshrl.u32 %v16139_v56, 16  ;;  %v16184_v15 = vmul.f32 %v2731_v35, %v20152_v23  ;;  %vm7685_vm13 = vcmp.eq.s32.totalorder %v16135_v36, 2  ;;  %v20154_v23 = vld [vmem:[#allocation25_spill] sm:$0xff] }
 0x36f   :  { %20148 = vst [vmem:[#allocation8_spill] sm:$0xff] %v16173_v30  ;;  %v16178_v44 = vsel %vm20150_vm3, %v20149_v49, %v10325_v3  ;;  %v2872_v32 = vsel %vm16114_vm0, 0, %v2870_v24  ;;  %v16191_v34 = vmul.f32 %v16147_v19, %v16147_v19  ;;  %vm2737_vm4 = vcmp.eq.s32.totalorder %v16132_v43, 0 }
 0x370   :  { %20151 = vst [vmem:[#allocation12_spill] sm:$0xff] %v16178_v44  ;;  %v3014_v16 = vsub.s32 4294967266, %v16161_v39  ;;  %v3619_v50 = vadd.s32 536870912, %v16149_v29  ;;  %v11327_v55 = vadd.s32 4294967169, %v3369_v26  ;;  %v3260_v20 = vshrl.u32 %v16120_v2, 16 }
 0x371   :  { %v3261_v18 = vand.u32 65535, %v16139_v56  ;;  %v3283_v37 = vand.u32 65535, %v16129_v54  ;;  %v16199_v41 = vmul.u32 %v3284_v62, %v3259_v9  ;;  %vm2740_vm5 = vcmp.eq.s32.totalorder %v16132_v43, 2 }
 0x372   :  { %v2741_v45 = vxor.u32 2147483648, %v16180_v7  ;;  %v2889_v42 = vadd.s32 3, %v2872_v32  ;;  %v16203_v27 = vmul.u32 %v3262_v51, %v3259_v9  ;;  %v2738_v63 = vxor.u32 2147483648, %v16184_v15 }
 0x373   :  { %v2874_v5 = vmul.f32 -0.001358992, %v16191_v34  ;;  %v2881_v3 = vmul.f32 -0.00019511016, %v16191_v34  ;;  %v16208_v21 = vand.u32 3, %v2872_v32  ;;  %v3010_v35 = vsub.s32 32, %v16161_v39 }
 0x374   :  { %v3015_v54 = vadd.s32 127, %v3014_v16  ;;  %v16211_v56 = vshrl.u32 %v3619_v50, 30  ;;  %v3375_v24 = vadd.s32 1, %v11327_v55  ;;  %vm7682_vm12 = vcmp.eq.s32.totalorder %v16135_v36, 0  ;;  %v20155_v32 = vld [vmem:[#allocation41_spill] sm:$0xff] }
 0x375   :  { %v16214_v26 = vmul.u32 %v3261_v18, %v3260_v20  ;;  %v3285_v13 = vmul.u32 %v3283_v37, %v3259_v9  ;;  %v16216_v28 = vmul.u32 %v3283_v37, %v3260_v20  ;;  %v3289_v4 = vshll.u32 %v16199_v41, 16 }
 0x376   :  { %20153 = vst [vmem:[#allocation27_spill] sm:$0xff] %v16211_v56  ;;  %vm2736_vm14 = vcmp.lt.s32.totalorder %v16132_v43, 2  ;;  %v2742_v49 = vsel %vm2740_vm5, %v2741_v45, %v16184_v15  ;;  %v2994_v16 = vadd.s32 %v20155_v32, %v20154_v23  ;;  %v3263_v50 = vmul.u32 %v3261_v18, %v3259_v9  ;;  %v20156_v9 = vld [vmem:[#allocation40_spill] sm:$0xff] }
 0x377   :  { %v3267_v55 = vshll.u32 %v16203_v27, 16  ;;  %v2739_v22 = vsel %vm2737_vm4, %v16180_v7, %v2738_v63  ;;  %v7687_v37 = vsel %vm7685_vm13, %v2741_v45, %v16184_v15  ;;  %v2875_v44 = vadd.f32 0.041655596, %v2874_v5  ;;  %v20157_v45 = vld [vmem:[#allocation32_spill] sm:$0xff] }
 0x378   :  { %v2882_v30 = vadd.f32 0.008332121, %v2881_v3  ;;  %vm7681_vm0 = vcmp.lt.s32.totalorder %v16135_v36, 2  ;;  %v3012_v0 = vshrl.u32 %v2994_v16, %v3010_v35  ;;  %v3016_v33 = vshll.u32 %v3015_v54, 23  ;;  %v20159_v3 = vld [vmem:[#allocation17_spill] sm:$0xff] }
 0x379   :  { %v3621_v59 = vshll.u32 %v16211_v56, 30  ;;  %vm3376_vm15 = vcmp.gt.s32.totalorder %v3375_v24, 0  ;;  %vm2733_vm10 = vweird.f32 %v20156_v9  ;;  %v3269_v18 = vshll.u32 %v16214_v26, 16 }
 0x37a   :  { %vm3293_vm7 = vc.u32 %v3285_v13, %v3289_v4  ;;  %v16237_v32 = vadd.s32 %v3289_v4, %v3285_v13  ;;  %vm3271_vm3 = vc.u32 %v3263_v50, %v3267_v55  ;;  %v3273_v15 = vadd.s32 %v3267_v55, %v3263_v50 }
 0x37b   :  { %vm20158_vm13 = vcmp.lt.s32.totalorder %v20050_v25, 26  ;;  %v2876_v54 = vmul.f32 %v2875_v44, %v16191_v34  ;;  %v2883_v16 = vmul.f32 %v2882_v30, %v16191_v34  ;;  %v3288_v56 = vmul.u32 %v3284_v62, %v3260_v20 }
 0x37c   :  { %v10375_v5 = vsel %vm20158_vm13, %v20157_v45, 0.0  ;;  %vm20160_vm4 = vmmov %vm20158_vm13  ;;  %v3377_v61 = vsel %vm3376_vm15, %v3375_v24, 0  ;;  %v3011_v13 = vshll.u32 %v15984_v57, %v16161_v39  ;;  %v3017_v4 = vor.u32 4788187, %v3016_v33  ;;  %v166_v33 = vpop.permute.xlu1 %165 }
 0x37d   :  { %v10376_v35 = vsel %vm20160_vm4, %v20159_v3, 0.0  ;;  %v3266_v23 = vmul.u32 %v3262_v51, %v3260_v20  ;;  %v3294_v50 = vsel %vm3293_vm7, 1, %v19819_v1  ;;  %v16251_v55 = vsub.s32 %v16149_v29, %v3621_v59 }
 0x37e   :  { %v3272_v45 = vsel %vm3271_vm3, 1, %v19819_v1  ;;  %v20161_v3 = vshll.u32 %v16216_v28, 16  ;;  %v10406_v44 = vpack.c.bf16 %v10376_v35, %v10375_v5  ;;  %v7684_v62 = vsel %vm7682_vm12, %v16180_v7, %v2738_v63 }
 0x37f   :  { %v3013_v30 = vor.u32 %v3012_v0, %v3011_v13  ;;  %vm3275_vm15 = vc.u32 %v3273_v15, %v3269_v18  ;;  %v3379_v57 = vand.u32 31, %v3377_v61  ;;  %v2743_v39 = vsel %vm2736_vm14, %v2739_v22, %v2742_v49 }
 0x380   :  { %vm3297_vm5 = vc.u32 %v16237_v32, %v20161_v3  ;;  %v2877_v59 = vadd.f32 -0.4999988, %v2876_v54  ;;  %v2884_v29 = vadd.f32 -0.16666654, %v2883_v16  ;;  %v3296_v51 = vadd.s32 %v3294_v50, %v3288_v56  ;;  %v304_v3 = vpop.permute.xlu0 %303  ;;  %v20165_v50 = vld [vmem:[#allocation36_spill] sm:$0xff] }
 0x381   :  { %vm20162_vm7 = vcmask 261120   ;;  %v16263_v20 = vand.u32 3, %v2889_v42  ;;  %v3018_v24 = vand.u32 2147483647, %v3017_v4  ;;  %v3274_v5 = vadd.s32 %v3272_v45, %v3266_v23 }
 0x382   :  { %11471 = vmatmul.msk.bf16.gmra.mxu0 %vm20162_vm7, %v10406_v44  ;;  %v3298_v35 = vsel %vm3297_vm5, 1, %v19819_v1  ;;  %v7688_v0 = vsel %vm7681_vm0, %v7684_v62, %v7687_v37  ;;  %v3624_v7 = vsub.s32 0, %v16251_v55  ;;  %v3276_v43 = vsel %vm3275_vm15, 1, %v19819_v1 }
 0x383   :  { %v16272_v22 = vsel %vm11916_vm1, %v166_v33, %v304_v3  ;;  %v16276_v42 = vsel %vm2733_vm10, nan, %v2743_v39  ;;  %v3020_v63 = vcvt.s32.f32 %v3013_v30  ;;  %vm3623_vm12 = vcmp.lt.s32.totalorder %v16251_v55, 0 }
 0x384   :  { %20163 = vst [vmem:[#allocation29_spill] sm:$0xff] %v16272_v22  ;;  %v16279_v56 = vsub.s32 32, %v3379_v57  ;;  %v16282_v36 = vmul.f32 %v2877_v59, %v16191_v34  ;;  %v2885_v49 = vmul.f32 %v2884_v29, %v16191_v34  ;;  %v3290_v37 = vshrl.u32 %v16199_v41, 16 }
 0x385   :  { %v3300_v18 = vadd.s32 %v3298_v35, %v3296_v51  ;;  %v3021_v23 = vmul.f32 %v3020_v63, %v3018_v24  ;;  %v3268_v15 = vshrl.u32 %v16203_v27, 16  ;;  %v3278_v54 = vadd.s32 %v3276_v43, %v3274_v5  ;;  %v16318_v35 = vpop.permute.xlu2 %175 }
 0x386   :  { %v16289_v16 = vmul.f32 %v19963_v38, %v16272_v22  ;;  %v3625_v13 = vsel %vm3623_vm12, %v3624_v7, %v16251_v55  ;;  %v3226_v4 = vshrl.u32 %v19809_v58, %v16017_v48  ;;  %v3247_v34 = vsel %vm3245_vm9, %v16078_v60, 2102212464  ;;  %20169 = vst [vmem:[#allocation28_spill] sm:$0xff] %v16318_v35 }
 0x387   :  { %v19683_v41 = vand.u32 2147483647, %v16086_v40  ;;  %vm2902_vm14 = vcmp.lt.s32.totalorder %v20165_v50, 0  ;;  %v3391_v27 = vshll.u32 %v20082_v11, %v3379_v57  ;;  %v3392_v45 = vshrl.u32 %v20083_v53, %v16279_v56 }
 0x388   :  { %20164 = vst [vmem:[#allocation23_spill] sm:$0xff] %v16289_v16  ;;  %v3394_v44 = vshll.u32 %v20083_v53, %v3379_v57  ;;  %v3395_v62 = vshrl.u32 %v20084_v6, %v16279_v56  ;;  %v3270_v48 = vshrl.u32 %v16214_v26, 16  ;;  %v3292_v30 = vshrl.u32 %v16216_v28, 16 }
 0x389   :  { %v3301_v33 = vadd.s32 %v3300_v18, %v3290_v37  ;;  %v16307_v60 = vshrl.u32 %v3377_v61, 5  ;;  %v3279_v39 = vadd.s32 %v3278_v54, %v3268_v15  ;;  %v3382_v59 = vshll.u32 %v19809_v58, %v3379_v57 }
 0x38a   :  { %v3385_v29 = vshll.u32 %v20085_v47, %v3379_v57  ;;  %v3678_v51 = vand.u32 2139095040, %v16289_v16  ;;  %v20166_v24 = vand.u32 2147483647, %v20165_v50  ;;  %v3383_v26 = vshrl.u32 %v20085_v47, %v16279_v56 }
 0x38b   :  { %v3386_v61 = vshrl.u32 %v20088_v46, %v16279_v56  ;;  %v3388_v3 = vshll.u32 %v20088_v46, %v3379_v57  ;;  %v3389_v7 = vshrl.u32 %v20082_v11, %v16279_v56  ;;  %v2886_v43 = vadd.f32 1.0, %v2885_v49 }
 0x38c   :  { %vm16314_vm9 = vcmp.le.f32.partialorder %v20166_v24, 0.7853982  ;;  %v3022_v63 = vxor.u32 2147483648, %v3021_v23  ;;  %v3393_v37 = vor.u32 %v3392_v45, %v3391_v27  ;;  %v3396_v18 = vor.u32 %v3395_v62, %v3394_v44 }
 0x38d   :  { %v3626_v15 = vclz %v3625_v13  ;;  %v3246_v54 = vsel %vm3242_vm8, %v3226_v4, %v16074_v14  ;;  %v3372_v24 = vand.u32 8388607, %v19683_v41  ;;  %vm3400_vm0 = vcmp.lt.s32.totalorder %v16307_v60, 4 }
 0x38e   :  { %v3248_v57 = vsel %vm3244_vm11, %v16076_v10, %v3247_v34  ;;  %v16336_v22 = vadd.s32 %v3279_v39, %v3270_v48  ;;  %v20171_v49 = vshll.u32 %v16216_v28, 16  ;;  %v3302_v13 = vadd.s32 %v3301_v33, %v3292_v30 }
 0x38f   :  { %v16343_v45 = vor.u32 %v3383_v26, %v3382_v59  ;;  %v16345_v14 = vor.u32 %v3386_v61, %v3385_v29  ;;  %v16347_v4 = vor.u32 %v3389_v7, %v3388_v3  ;;  %v3679_v44 = vshrl.u32 %v3678_v51, 23  ;;  %v16394_v3 = vpop.permute.xlu2 %180  ;;  %v16396_v7 = vpop.permute.xlu0 %307 }
 0x390   :  { %20170 = vst [vmem:[#allocation13_spill] sm:$0xff] %v16336_v22  ;;  %v16341_v27 = vadd.s32 %v16237_v32, %v20171_v49  ;;  %vm3397_vm8 = vcmp.lt.s32.totalorder %v16307_v60, 1  ;;  %vm19681_vm3 = vcmp.lt.s32.totalorder %v16307_v60, 3  ;;  %v3406_v10 = vsel %vm3400_vm0, %v3393_v37, 920167782 }
 0x391   :  { %v3410_v28 = vsel %vm3400_vm0, %v3396_v18, 1326507024  ;;  %v7689_v32 = vsel %vm2733_vm10, nan, %v7688_v0  ;;  %vm7836_vm11 = vcmp.eq.s32.totalorder %v16208_v21, 0  ;;  %v3023_v34 = vsel %vm2902_vm14, %v3022_v63, %v3021_v23  ;;  %20174 = vst [vmem:[#allocation41_spill] sm:$0xff] %v16394_v3 }
 0x392   :  { %20172 = vst [vmem:[#allocation25_spill] sm:$0xff] %v16341_v27  ;;  %v11331_v62 = vadd.s32 4294967294, %v3626_v15  ;;  %v3373_v48 = vor.u32 8388608, %v3372_v24  ;;  %v2887_v30 = vmul.f32 %v2886_v43, %v16147_v19  ;;  %v3249_v33 = vsel %vm3243_vm6, %v3246_v54, %v3248_v57  ;;  %v20175_v15 = vld [vmem:[#allocation39_spill] sm:$0xff] }
 0x393   :  { %v3306_v39 = vadd.s32 1, %v3302_v13  ;;  %vm19682_vm13 = vcmp.lt.s32.totalorder %v16307_v60, 2  ;;  %v3405_v9 = vsel %vm3397_vm8, %v16343_v45, %v16345_v14  ;;  %v3407_v0 = vsel %vm19681_vm3, %v16347_v4, %v3406_v10 }
 0x394   :  { %v3409_v19 = vsel %vm3397_vm8, %v16345_v14, %v16347_v4  ;;  %v3411_v12 = vsel %vm19681_vm3, %v3393_v37, %v3410_v28  ;;  %v2879_v23 = vadd.f32 1.0, %v16282_v36  ;;  %vm7839_vm6 = vcmp.eq.s32.totalorder %v16208_v21, 2  ;;  %v20173_v36 = vld [vmem:[#allocation33_spill] sm:$0xff] }
 0x395   :  { %v16382_v59 = vsel %vm16314_vm9, %v20165_v50, %v3023_v34  ;;  %vm3305_vm10 = vc.u32 %v16336_v22, %v16341_v27  ;;  %v11333_v29 = vadd.s32 4294967169, %v3679_v44  ;;  %v10322_v51 = vsel %vm12700_vm2, %v16276_v42, %v7689_v32 }
 0x396   :  { %vm2891_vm4 = vcmp.lt.s32.totalorder %v16263_v20, 2  ;;  %vm7835_vm5 = vcmp.lt.s32.totalorder %v16208_v21, 2  ;;  %v3024_v26 = vsub.s32 4, %v20173_v36  ;;  %vm11332_vm15 = vcmp.lt.s32.totalorder %v11331_v62, 0 }
 0x397   :  { %v16392_v61 = vshll.u32 %v3373_v48, 8  ;;  %v2893_v43 = vxor.u32 2147483648, %v2887_v30  ;;  %v3303_v63 = vmul.u32 %v16120_v2, %v3249_v33  ;;  %v16401_v37 = vsel %vm19682_vm13, %v3405_v9, %v3407_v0  ;;  %v20178_v48 = vld [vmem:[#allocation30_spill] sm:$0xff]  ;;  %v186_v41 = vpop.permute.xlu0 %185 }
 0x398   :  { %v16405_v42 = vsel %vm19682_vm13, %v3409_v19, %v3411_v12  ;;  %vm2892_vm7 = vcmp.eq.s32.totalorder %v16263_v20, 0  ;;  %vm2895_vm12 = vcmp.eq.s32.totalorder %v16263_v20, 2  ;;  %v16411_v18 = vmul.f32 %v16382_v59, %v16382_v59 }
 0x399   :  { %v3307_v2 = vsel %vm3305_vm10, %v3306_v39, %v3302_v13  ;;  %vm20176_vm3 = vcmp.lt.s32.totalorder %v20050_v25, 2  ;;  %v2896_v24 = vxor.u32 2147483648, %v2879_v23  ;;  %v3629_v57 = vsel %vm11332_vm15, 0, %v11331_v62 }
 0x39a   :  { %v16419_v54 = vsel %vm20176_vm3, %v20175_v15, %v10322_v51  ;;  %v3685_v49 = vadd.s32 1, %v11333_v29  ;;  %vm2888_vm13 = vweird.f32 %v20132_v8  ;;  %v3025_v44 = vsel %vm2902_vm14, %v3024_v26, %v20173_v36 }
 0x39b   :  { %20177 = vst [vmem:[#allocation40_spill] sm:$0xff] %v16419_v54  ;;  %v3414_v10 = vand.u32 65535, %v16392_v61  ;;  %v3417_v28 = vshrl.u32 %v16405_v42, 16  ;;  %v3439_v13 = vshrl.u32 %v16401_v37, 16  ;;  %v2894_v32 = vsel %vm2892_vm7, %v2879_v23, %v2893_v43 }
 0x39c   :  { %v7838_v34 = vsel %vm7836_vm11, %v2879_v23, %v2893_v43  ;;  %v3614_v62 = vadd.s32 %v20178_v48, %v16067_v52  ;;  %v16432_v33 = vadd.s32 %v3307_v2, %v3303_v63  ;;  %v3029_v39 = vmul.f32 -0.001358992, %v16411_v18 }
 0x39d   :  { %v3036_v9 = vmul.f32 -0.00019511016, %v16411_v18  ;;  %v3630_v0 = vsub.s32 32, %v3629_v57  ;;  %v3634_v19 = vsub.s32 4294967266, %v3629_v57  ;;  %v3415_v12 = vshrl.u32 %v16392_v61, 16 }
 0x39e   :  { %v3416_v29 = vand.u32 65535, %v16405_v42  ;;  %v3438_v51 = vand.u32 65535, %v16401_v37  ;;  %vm3686_vm14 = vcmp.gt.s32.totalorder %v3685_v49, 0  ;;  %v2897_v23 = vsel %vm2895_vm12, %v2896_v24, %v2887_v30 }
 0x39f   :  { %v7841_v52 = vsel %vm7839_vm6, %v2896_v24, %v2887_v30  ;;  %v16443_v36 = vmul.u32 %v3417_v28, %v3414_v10  ;;  %v16445_v26 = vmul.u32 %v3439_v13, %v3414_v10  ;;  %v2898_v43 = vsel %vm2891_vm4, %v2894_v32, %v2897_v23  ;;  %v320_v24 = vpop.permute.xlu2 %319 }
 0x3a0   :  { %v7842_v63 = vsel %vm7835_vm5, %v7838_v34, %v7841_v52  ;;  %v3027_v37 = vsel %vm16314_vm9, 0, %v3025_v44  ;;  %v3309_v42 = vadd.s32 536870912, %v16432_v33  ;;  %v3030_v2 = vadd.f32 0.041655596, %v3029_v39 }
 0x3a1   :  { %v3037_v15 = vadd.f32 0.008332121, %v3036_v9  ;;  %v3631_v48 = vshll.u32 %v16251_v55, %v3629_v57  ;;  %v3687_v30 = vsel %vm3686_vm14, %v3685_v49, 0  ;;  %v3632_v54 = vshrl.u32 %v3614_v62, %v3630_v0 }
 0x3a2   :  { %v3635_v40 = vadd.s32 127, %v3634_v19  ;;  %v16455_v3 = vmul.u32 %v3416_v29, %v3415_v12  ;;  %v16457_v20 = vmul.u32 %v3438_v51, %v3415_v12  ;;  %v3418_v21 = vmul.u32 %v3416_v29, %v3414_v10 }
 0x3a3   :  { %v3422_v32 = vshll.u32 %v16443_v36, 16  ;;  %v3440_v5 = vmul.u32 %v3438_v51, %v3414_v10  ;;  %v3444_v44 = vshll.u32 %v16445_v26, 16  ;;  %v16463_v34 = vsel %vm2888_vm13, nan, %v2898_v43 }
 0x3a4   :  { %v16465_v55 = vshrl.u32 %v3309_v42, 30  ;;  %v3689_v57 = vand.u32 31, %v3687_v30  ;;  %v16469_v49 = vsel %vm11916_vm1, %v186_v41, %v320_v24  ;;  %v16473_v62 = vsel %vm2888_vm13, nan, %v7842_v63 }
 0x3a5   :  { %20180 = vst [vmem:[#allocation17_spill] sm:$0xff] %v16469_v49  ;;  %v3031_v39 = vmul.f32 %v3030_v2, %v16411_v18  ;;  %v3038_v10 = vmul.f32 %v3037_v15, %v16411_v18  ;;  %v16477_v9 = vadd.s32 3, %v3027_v37  ;;  %v16479_v0 = vor.u32 %v3632_v54, %v3631_v48 }
 0x3a6   :  { %20179 = vst [vmem:[#allocation32_spill] sm:$0xff] %v16465_v55  ;;  %v3636_v19 = vshll.u32 %v3635_v40, 23  ;;  %v3424_v29 = vshll.u32 %v16455_v3, 16  ;;  %v19686_v51 = vshll.u32 %v16457_v20, 16  ;;  %v3428_v23 = vadd.s32 %v3422_v32, %v3418_v21 }
 0x3a7   :  { %vm3448_vm9 = vc.u32 %v3440_v5, %v3444_v44  ;;  %v16483_v41 = vadd.s32 %v3444_v44, %v3440_v5  ;;  %v16487_v8 = vmul.f32 %v19963_v38, %v16469_v49  ;;  %v16489_v52 = vand.u32 3, %v3027_v37 }
 0x3a8   :  { %v3311_v43 = vshll.u32 %v16465_v55, 30  ;;  %vm3426_vm3 = vc.u32 %v3418_v21, %v3422_v32  ;;  %v16492_v54 = vsub.s32 32, %v3689_v57  ;;  %v16498_v63 = vadd.f32 -0.4999988, %v3031_v39 }
 0x3a9   :  { %20181 = vst [vmem:[#allocation33_spill] sm:$0xff] %v16487_v8  ;;  %v16500_v42 = vadd.f32 -0.16666654, %v3038_v10  ;;  %v3443_v2 = vmul.u32 %v3439_v13, %v3415_v12  ;;  %v3637_v15 = vor.u32 4788187, %v3636_v19  ;;  %v3640_v48 = vcvt.s32.f32 %v16479_v0  ;;  %v20183_v13 = vld [vmem:[#allocation38_spill] sm:$0xff] }
 0x3aa   :  { %20182 = vst [vmem:[#allocation39_spill] sm:$0xff] %v16492_v54  ;;  %v3421_v37 = vmul.u32 %v3417_v28, %v3415_v12  ;;  %v3449_v24 = vsel %vm3448_vm9, 1, %v19819_v1  ;;  %v3427_v21 = vsel %vm3426_vm3, 1, %v19819_v1  ;;  %vm3430_vm11 = vc.u32 %v3428_v23, %v3424_v29 }
 0x3ab   :  { %vm3452_vm13 = vc.u32 %v16483_v41, %v19686_v51  ;;  %v4298_v32 = vand.u32 2139095040, %v16487_v8  ;;  %v16510_v5 = vsub.s32 %v16432_v33, %v3311_v43  ;;  %v3704_v44 = vshll.u32 %v20083_v53, %v3689_v57 }
 0x3ac   :  { %v3705_v28 = vshrl.u32 %v20084_v6, %v16492_v54  ;;  %v3451_v12 = vadd.s32 %v3449_v24, %v3443_v2  ;;  %v16516_v39 = vshrl.u32 %v3687_v30, 5  ;;  %v3701_v10 = vshll.u32 %v20082_v11, %v3689_v57 }
 0x3ad   :  { %v3702_v0 = vshrl.u32 %v20083_v53, %v16492_v54  ;;  %v3429_v19 = vadd.s32 %v3427_v21, %v3421_v37  ;;  %v3431_v29 = vsel %vm3430_vm11, 1, %v19819_v1  ;;  %v3453_v33 = vsel %vm3452_vm13, 1, %v19819_v1 }
 0x3ae   :  { %v3695_v23 = vshll.u32 %v20085_v47, %v3689_v57  ;;  %v3696_v43 = vshrl.u32 %v20088_v46, %v16492_v54  ;;  %v3698_v40 = vshll.u32 %v20088_v46, %v3689_v57  ;;  %v3699_v30 = vshrl.u32 %v20082_v11, %v16492_v54 }
 0x3af   :  { %v4299_v2 = vshrl.u32 %v4298_v32, 23  ;;  %v3445_v24 = vshrl.u32 %v16445_v26, 16  ;;  %v3692_v51 = vshll.u32 %v19809_v58, %v3689_v57  ;;  %v3693_v37 = vshrl.u32 %v20085_v47, %v16492_v54 }
 0x3b0   :  { %v3706_v21 = vor.u32 %v3705_v28, %v3704_v44  ;;  %vm3522_vm6 = vcmp.lt.s32.totalorder %v20183_v13, 0  ;;  %v3455_v49 = vadd.s32 %v3453_v33, %v3451_v12  ;;  %v20184_v55 = vand.u32 2147483647, %v16289_v16 }
 0x3b1   :  { %v3703_v35 = vor.u32 %v3702_v0, %v3701_v10  ;;  %vm3710_vm10 = vcmp.lt.s32.totalorder %v16516_v39, 4  ;;  %v3638_v27 = vand.u32 2147483647, %v3637_v15  ;;  %v3381_v32 = vshrl.u32 %v19809_v58, %v16279_v56 }
 0x3b2   :  { %v3682_v50 = vand.u32 8388607, %v20184_v55  ;;  %v3423_v26 = vshrl.u32 %v16443_v36, 16  ;;  %v3433_v57 = vadd.s32 %v3431_v29, %v3429_v19  ;;  %v3314_v22 = vsub.s32 0, %v16510_v5 }
 0x3b3   :  { %v16541_v54 = vor.u32 %v3696_v43, %v3695_v23  ;;  %v16543_v44 = vor.u32 %v3699_v30, %v3698_v40  ;;  %v11345_v28 = vadd.s32 4294967169, %v4299_v2  ;;  %v20185_v12 = vand.u32 2147483647, %v20183_v13  ;;  %v20188_v43 = vld [vmem:[#allocation27_spill] sm:$0xff] }
 0x3b4   :  { %v16551_v15 = vor.u32 %v3693_v37, %v3692_v51  ;;  %vm3707_vm5 = vcmp.lt.s32.totalorder %v16516_v39, 1  ;;  %vm3709_vm15 = vcmp.lt.s32.totalorder %v16516_v39, 3  ;;  %v3720_v56 = vsel %vm3710_vm10, %v3706_v21, 1326507024 }
 0x3b5   :  { %vm16547_vm4 = vcmp.le.f32.partialorder %v20185_v12, 0.7853982  ;;  %v3447_v36 = vshrl.u32 %v16457_v20, 16  ;;  %v3456_v40 = vadd.s32 %v3455_v49, %v3445_v24  ;;  %v3683_v10 = vor.u32 8388608, %v3682_v50 }
 0x3b6   :  { %v3716_v0 = vsel %vm3710_vm10, %v3703_v35, 920167782  ;;  %vm3313_vm7 = vcmp.lt.s32.totalorder %v16510_v5, 0  ;;  %v3402_v51 = vsel %vm3400_vm0, %v16347_v4, 2102212464  ;;  %v3425_v19 = vshrl.u32 %v16455_v3, 16 }
 0x3b7   :  { %v3434_v29 = vadd.s32 %v3433_v57, %v3423_v26  ;;  %vm3708_vm12 = vcmp.lt.s32.totalorder %v16516_v39, 2  ;;  %v3719_v49 = vsel %vm3707_vm5, %v16541_v54, %v16543_v44  ;;  %v3721_v50 = vsel %vm3709_vm15, %v3703_v35, %v3720_v56 }
 0x3b8   :  { %v4305_v33 = vadd.s32 1, %v11345_v28  ;;  %v3641_v23 = vmul.f32 %v3640_v48, %v3638_v27  ;;  %v3644_v30 = vsub.s32 4, %v20188_v43  ;;  %v3715_v4 = vsel %vm3707_vm5, %v16551_v15, %v16541_v54 }
 0x3b9   :  { %v3717_v3 = vsel %vm3709_vm15, %v16543_v44, %v3716_v0  ;;  %v3315_v2 = vsel %vm3313_vm7, %v3314_v22, %v16510_v5  ;;  %v3401_v24 = vsel %vm3397_vm8, %v3381_v32, %v16343_v45  ;;  %v3457_v35 = vadd.s32 %v3456_v40, %v3447_v36 }
 0x3ba   :  { %v16584_v37 = vshll.u32 %v3683_v10, 8  ;;  %vm20189_vm0 = vcmp.lt.s32.totalorder %v16307_v60, 3  ;;  %v16589_v48 = vadd.s32 %v3434_v29, %v3425_v19  ;;  %v20191_v21 = vshll.u32 %v16457_v20, 16 }
 0x3bb   :  { %v3403_v27 = vsel %vm20189_vm0, %v16345_v14, %v3402_v51  ;;  %v16598_v22 = vsel %vm3708_vm12, %v3719_v49, %v3721_v50  ;;  %v3033_v45 = vmul.f32 %v16498_v63, %v16411_v18  ;;  %v3040_v32 = vmul.f32 %v16500_v42, %v16411_v18  ;;  %v171_v42 = vpop.permute.xlu1 %170 }
 0x3bc   :  { %20190 = vst [vmem:[#allocation30_spill] sm:$0xff] %v16589_v48  ;;  %v16594_v26 = vadd.s32 %v16483_v41, %v20191_v21  ;;  %v16606_v14 = vsel %vm3708_vm12, %v3715_v4, %v3717_v3  ;;  %vm4306_vm8 = vcmp.gt.s32.totalorder %v4305_v33, 0  ;;  %v20193_v20 = vsel %vm12700_vm2, %v16463_v34, %v16473_v62  ;;  %v20194_v41 = vld [vmem:[#allocation35_spill] sm:$0xff] }
 0x3bd   :  { %vm20195_vm14 = vcmp.lt.s32.totalorder %v20050_v25, 2  ;;  %v3642_v28 = vxor.u32 2147483648, %v3641_v23  ;;  %v3645_v18 = vsel %vm3522_vm6, %v3644_v30, %v20188_v43  ;;  %v3316_v63 = vclz %v3315_v2 }
 0x3be   :  { %20192 = vst [vmem:[#allocation27_spill] sm:$0xff] %v16594_v26  ;;  %v16616_v57 = vsel %vm20195_vm14, %v20194_v41, %v20193_v20  ;;  %vm20197_vm9 = vcmp.lt.s32.totalorder %v16307_v60, 2  ;;  %v3461_v56 = vadd.s32 1, %v3457_v35  ;;  %v3724_v36 = vand.u32 65535, %v16584_v37 }
 0x3bf   :  { %20196 = vst [vmem:[#allocation35_spill] sm:$0xff] %v16616_v57  ;;  %v3404_v12 = vsel %vm20197_vm9, %v3401_v24, %v3403_v27  ;;  %v19694_v34 = vshrl.u32 %v16598_v22, 16  ;;  %v16626_v62 = vand.u32 3, %v16477_v9  ;;  %vm3460_vm3 = vc.u32 %v16589_v48, %v16594_v26 }
 0x3c0   :  { %v3749_v40 = vshrl.u32 %v16606_v14, 16  ;;  %v4307_v10 = vsel %vm4306_vm8, %v4305_v33, 0  ;;  %v16631_v0 = vadd.f32 1.0, %v3033_v45  ;;  %v3041_v51 = vadd.f32 1.0, %v3040_v32 }
 0x3c1   :  { %v3647_v60 = vsel %vm16547_vm4, 0, %v3645_v18  ;;  %v16638_v19 = vsel %vm11916_vm1, %v171_v42, %v16396_v7  ;;  %v3643_v9 = vsel %vm3522_vm6, %v3642_v28, %v3641_v23  ;;  %v3458_v29 = vmul.u32 %v16392_v61, %v3404_v12 }
 0x3c2   :  { %20198 = vst [vmem:[#allocation42_spill] sm:$0xff] %v16638_v19  ;;  %v3725_v49 = vshrl.u32 %v16584_v37, 16  ;;  %v3726_v50 = vand.u32 65535, %v16598_v22  ;;  %v11325_v33 = vadd.s32 4294967294, %v3316_v63  ;;  %v3462_v43 = vsel %vm3460_vm3, %v3461_v56, %v3457_v35 }
 0x3c3   :  { %v16647_v30 = vmul.u32 %v19694_v34, %v3724_v36  ;;  %v4309_v4 = vand.u32 31, %v4307_v10  ;;  %v3664_v3 = vadd.s32 3, %v3647_v60  ;;  %v3748_v7 = vand.u32 65535, %v16606_v14 }
 0x3c4   :  { %v16650_v2 = vmul.u32 %v3749_v40, %v3724_v36  ;;  %v16654_v23 = vmul.f32 %v19963_v38, %v16638_v19  ;;  %v16657_v61 = vmul.f32 %v3041_v51, %v16382_v59  ;;  %vm3050_vm11 = vcmp.eq.s32.totalorder %v16626_v62, 2 }
 0x3c5   :  { %v3051_v24 = vxor.u32 2147483648, %v16631_v0  ;;  %vm7993_vm13 = vcmp.eq.s32.totalorder %v16489_v52, 2  ;;  %v16665_v35 = vsel %vm16547_vm4, %v20183_v13, %v3643_v9  ;;  %v16667_v27 = vand.u32 3, %v3647_v60 }
 0x3c6   :  { %20199 = vst [vmem:[#allocation43_spill] sm:$0xff] %v16654_v23  ;;  %v16669_v21 = vadd.s32 %v3462_v43, %v3458_v29  ;;  %v16671_v45 = vmul.u32 %v3726_v50, %v3725_v49  ;;  %vm11326_vm6 = vcmp.lt.s32.totalorder %v11325_v33, 0  ;;  %v3728_v59 = vmul.u32 %v3726_v50, %v3724_v36 }
 0x3c7   :  { %v3732_v32 = vshll.u32 %v16647_v30, 16  ;;  %v16674_v14 = vsub.s32 32, %v4309_v4  ;;  %v16676_v20 = vand.u32 3, %v3664_v3  ;;  %v3750_v41 = vmul.u32 %v3748_v7, %v3724_v36 }
 0x3c8   :  { %v3754_v28 = vshll.u32 %v16650_v2, 16  ;;  %v3833_v55 = vand.u32 2139095040, %v16654_v23  ;;  %v16684_v63 = vsel %vm3050_vm11, %v3051_v24, %v16657_v61  ;;  %v16687_v42 = vsel %vm7993_vm13, %v3051_v24, %v16657_v61 }
 0x3c9   :  { %v16689_v12 = vmul.u32 %v3748_v7, %v3725_v49  ;;  %v16693_v56 = vmul.f32 %v16665_v35, %v16665_v35  ;;  %v16695_v36 = vsel %vm11326_vm6, 0, %v11325_v33  ;;  %v3464_v51 = vadd.s32 536870912, %v16669_v21 }
 0x3ca   :  { %v3734_v60 = vshll.u32 %v16671_v45, 16  ;;  %vm16699_vm4 = vc.u32 %v3728_v59, %v3732_v32  ;;  %v4324_v50 = vshll.u32 %v20083_v53, %v4309_v4  ;;  %v4325_v43 = vshrl.u32 %v20084_v6, %v16674_v14 }
 0x3cb   :  { %vm3047_vm7 = vcmp.eq.s32.totalorder %v16626_v62, 0  ;;  %v3738_v3 = vadd.s32 %v3732_v32, %v3728_v59  ;;  %vm3758_vm0 = vc.u32 %v3750_v41, %v3754_v28  ;;  %v16708_v33 = vshrl.u32 %v4307_v10, 5 }
 0x3cc   :  { %v3834_v7 = vshrl.u32 %v3833_v55, 23  ;;  %v16711_v18 = vadd.s32 %v3754_v28, %v3750_v41  ;;  %v4321_v34 = vshll.u32 %v20082_v11, %v4309_v4  ;;  %v4322_v29 = vshrl.u32 %v20083_v53, %v16674_v14 }
 0x3cd   :  { %v4315_v19 = vshll.u32 %v20085_v47, %v4309_v4  ;;  %v4316_v57 = vshrl.u32 %v20088_v46, %v16674_v14  ;;  %v4318_v59 = vshll.u32 %v20088_v46, %v4309_v4  ;;  %v4319_v10 = vshrl.u32 %v20082_v11, %v16674_v14 }
 0x3ce   :  { %v3753_v32 = vmul.u32 %v3749_v40, %v3725_v49  ;;  %v3759_v55 = vsel %vm3758_vm0, 1, %v19819_v1  ;;  %v20202_v41 = vand.u32 2147483647, %v16487_v8  ;;  %v4326_v24 = vor.u32 %v4325_v43, %v4324_v50 }
 0x3cf   :  { %v4312_v16 = vshll.u32 %v19809_v58, %v4309_v4  ;;  %v4313_v13 = vshrl.u32 %v20085_v47, %v16674_v14  ;;  %vm4330_vm8 = vcmp.lt.s32.totalorder %v16708_v33, 4  ;;  %v11336_v26 = vadd.s32 4294967169, %v3834_v7 }
 0x3d0   :  { %v4302_v28 = vand.u32 8388607, %v20202_v41  ;;  %vm3046_vm14 = vcmp.lt.s32.totalorder %v16626_v62, 2  ;;  %vm7990_vm9 = vcmp.eq.s32.totalorder %v16489_v52, 0  ;;  %v16731_v48 = vshrl.u32 %v3464_v51, 30 }
 0x3d1   :  { %v20204_v40 = vshrl.u32 %v16598_v22, 16  ;;  %v20205_v41 = vshll.u32 %v16689_v12, 16  ;;  %v4323_v4 = vor.u32 %v4322_v29, %v4321_v34  ;;  %v3737_v50 = vsel %vm16699_vm4, 1, %v19819_v1 }
 0x3d2   :  { %20203 = vst [vmem:[#allocation44_spill] sm:$0xff] %v16731_v48  ;;  %vm3740_vm11 = vc.u32 %v3738_v3, %v3734_v60  ;;  %v16741_v43 = vor.u32 %v4316_v57, %v4315_v19  ;;  %v16743_v7 = vor.u32 %v4319_v10, %v4318_v59  ;;  %v3761_v8 = vadd.s32 %v3759_v55, %v3753_v32 }
 0x3d3   :  { %v3731_v31 = vmul.u32 %v20204_v40, %v3725_v49  ;;  %vm3762_vm3 = vc.u32 %v16711_v18, %v20205_v41  ;;  %vm4327_vm13 = vcmp.lt.s32.totalorder %v16708_v33, 1  ;;  %vm4329_vm6 = vcmp.lt.s32.totalorder %v16708_v33, 3 }
 0x3d4   :  { %v4340_v22 = vsel %vm4330_vm8, %v4326_v24, 1326507024  ;;  %v3763_v49 = vsel %vm3762_vm3, 1, %v19819_v1  ;;  %v4303_v34 = vor.u32 8388608, %v4302_v28  ;;  %v16750_v51 = vor.u32 %v4313_v13, %v4312_v16 }
 0x3d5   :  { %v3840_v9 = vadd.s32 1, %v11336_v26  ;;  %v20206_v60 = vxor.u32 2147483648, %v16657_v61  ;;  %v3324_v19 = vsub.s32 4294967266, %v16695_v36  ;;  %v3739_v29 = vadd.s32 %v3737_v50, %v3731_v31 }
 0x3d6   :  { %v4336_v3 = vsel %vm4330_vm8, %v4323_v4, 920167782  ;;  %v3741_v24 = vsel %vm3740_vm11, 1, %v19819_v1  ;;  %vm4328_vm4 = vcmp.lt.s32.totalorder %v16708_v33, 2  ;;  %v4339_v16 = vsel %vm4327_vm13, %v16741_v43, %v16743_v7 }
 0x3d7   :  { %v3049_v57 = vsel %vm3047_vm7, %v16631_v0, %v20206_v60  ;;  %v4341_v13 = vsel %vm4329_vm6, %v4323_v4, %v4340_v22  ;;  %v3649_v26 = vmul.f32 -0.001358992, %v16693_v56  ;;  %v3466_v59 = vshll.u32 %v16731_v48, 30 }
 0x3d8   :  { %v3755_v31 = vshrl.u32 %v16650_v2, 16  ;;  %v3765_v10 = vadd.s32 %v3763_v49, %v3761_v8  ;;  %v4335_v32 = vsel %vm4327_vm13, %v16750_v51, %v16741_v43  ;;  %v4337_v55 = vsel %vm4329_vm6, %v16743_v7, %v4336_v3 }
 0x3d9   :  { %v16778_v28 = vshll.u32 %v4303_v34, 8  ;;  %vm3841_vm7 = vcmp.gt.s32.totalorder %v3840_v9, 0  ;;  %v3656_v40 = vmul.f32 -0.00019511016, %v16693_v56  ;;  %v3733_v41 = vshrl.u32 %v16647_v30, 16  ;;  %v20208_v34 = vld [vmem:[#allocation39_spill] sm:$0xff] }
 0x3da   :  { %v3743_v4 = vadd.s32 %v3741_v24, %v3739_v29  ;;  %v16784_v8 = vsel %vm4328_vm4, %v4339_v16, %v4341_v13  ;;  %v16789_v2 = vsel %vm3046_vm14, %v3049_v57, %v16684_v63  ;;  %v20207_v50 = vmov %v20206_v60  ;;  %v20209_v13 = vld [vmem:[#allocation13_spill] sm:$0xff] }
 0x3db   :  { %v16796_v22 = vsel %vm7990_vm9, %v16631_v0, %v20207_v50  ;;  %v3325_v49 = vadd.s32 127, %v3324_v19  ;;  %v3691_v30 = vshrl.u32 %v19809_v58, %v20208_v34  ;;  %v16801_v60 = vsub.s32 %v16669_v21, %v3466_v59 }
 0x3dc   :  { %v3712_v62 = vsel %vm3710_vm10, %v16543_v44, 2102212464  ;;  %v16808_v63 = vsel %vm4328_vm4, %v4335_v32, %v4337_v55  ;;  %v3842_v61 = vsel %vm3841_vm7, %v3840_v9, 0  ;;  %v3757_v57 = vshrl.u32 %v16689_v12, 16  ;;  %v20210_v44 = vld [vmem:[#allocation25_spill] sm:$0xff] }
 0x3dd   :  { %v3766_v0 = vadd.s32 %v3765_v10, %v3755_v31  ;;  %v4344_v19 = vand.u32 65535, %v16778_v28  ;;  %v4347_v29 = vshrl.u32 %v16784_v8, 16  ;;  %v3650_v3 = vadd.f32 0.041655596, %v3649_v26 }
 0x3de   :  { %v16813_v24 = vadd.f32 0.008332121, %v3656_v40  ;;  %v3735_v21 = vshrl.u32 %v16671_v45, 16  ;;  %v3744_v16 = vadd.s32 %v3743_v4, %v3733_v41  ;;  %v3304_v59 = vadd.s32 %v20210_v44, %v20209_v13 }
 0x3df   :  { %v3320_v32 = vsub.s32 32, %v16695_v36  ;;  %v4369_v9 = vshrl.u32 %v16808_v63, 16  ;;  %v3844_v55 = vand.u32 31, %v3842_v61  ;;  %v3326_v50 = vshll.u32 %v3325_v49, 23 }
 0x3e0   :  { %vm3468_vm10 = vcmp.lt.s32.totalorder %v16801_v60, 0  ;;  %v3711_v26 = vsel %vm3707_vm5, %v3691_v30, %v16551_v15  ;;  %v3713_v45 = vsel %vm3709_vm15, %v16541_v54, %v3712_v62  ;;  %v3469_v31 = vsub.s32 0, %v16801_v60 }
 0x3e1   :  { %v3767_v10 = vadd.s32 %v3766_v0, %v3757_v57  ;;  %v4346_v40 = vand.u32 65535, %v16784_v8  ;;  %v16829_v41 = vmul.u32 %v4347_v29, %v4344_v19  ;;  %v16831_v4 = vadd.s32 %v3744_v16, %v3735_v21 }
 0x3e2   :  { %v20212_v49 = vshll.u32 %v16689_v12, 16  ;;  %v4368_v15 = vand.u32 65535, %v16808_v63  ;;  %v19704_v30 = vand.u32 2147483647, %v16654_v23  ;;  %v3714_v54 = vsel %vm3708_vm12, %v3711_v26, %v3713_v45 }
 0x3e3   :  { %20211 = vst [vmem:[#allocation39_spill] sm:$0xff] %v16831_v4  ;;  %v4345_v62 = vshrl.u32 %v16778_v28, 16  ;;  %v16843_v57 = vmul.u32 %v4369_v9, %v4344_v19  ;;  %v16845_v8 = vsub.s32 32, %v3844_v55  ;;  %v16848_v0 = vmul.f32 %v3650_v3, %v16693_v56 }
 0x3e4   :  { %v16836_v34 = vadd.s32 %v16711_v18, %v20212_v49  ;;  %v3321_v18 = vshll.u32 %v16510_v5, %v16695_v36  ;;  %v3322_v12 = vshrl.u32 %v3304_v59, %v3320_v32  ;;  %v16852_v21 = vor.u32 4788187, %v3326_v50 }
 0x3e5   :  { %v16857_v39 = vsel %vm3468_vm10, %v3469_v31, %v16801_v60  ;;  %v3771_v63 = vadd.s32 1, %v3767_v10  ;;  %v4348_v16 = vmul.u32 %v4346_v40, %v4344_v19  ;;  %v4352_v13 = vshll.u32 %v16829_v41, 16 }
 0x3e6   :  { %20213 = vst [vmem:[#allocation13_spill] sm:$0xff] %v16836_v34  ;;  %v3768_v44 = vmul.u32 %v16584_v37, %v3714_v54  ;;  %vm3770_vm5 = vc.u32 %v16831_v4, %v16836_v34  ;;  %v4370_v3 = vmul.u32 %v4368_v15, %v4344_v19  ;;  %v3837_v5 = vand.u32 8388607, %v19704_v30 }
 0x3e7   :  { %v16865_v36 = vmul.u32 %v4368_v15, %v4345_v62  ;;  %v4374_v59 = vshll.u32 %v16843_v57, 16  ;;  %v3856_v32 = vshll.u32 %v20082_v11, %v3844_v55  ;;  %v3857_v50 = vshrl.u32 %v20083_v53, %v16845_v8 }
 0x3e8   :  { %v16871_v26 = vmul.u32 %v4346_v40, %v4345_v62  ;;  %v16873_v45 = vshrl.u32 %v3842_v61, 5  ;;  %v3859_v37 = vshll.u32 %v20083_v53, %v3844_v55  ;;  %v3860_v19 = vshrl.u32 %v20084_v6, %v16845_v8 }
 0x3e9   :  { %v3772_v31 = vsel %vm3770_vm5, %v3771_v63, %v3767_v10  ;;  %vm16878_vm15 = vc.u32 %v4348_v16, %v4352_v13  ;;  %v3847_v15 = vshll.u32 %v19809_v58, %v3844_v55  ;;  %v3848_v54 = vshrl.u32 %v20085_v47, %v16845_v8 }
 0x3ea   :  { %v3850_v40 = vshll.u32 %v20085_v47, %v3844_v55  ;;  %v3851_v61 = vshrl.u32 %v20088_v46, %v16845_v8  ;;  %v3853_v30 = vshll.u32 %v20088_v46, %v3844_v55  ;;  %v3854_v23 = vshrl.u32 %v20082_v11, %v16845_v8 }
 0x3eb   :  { %v4376_v10 = vshll.u32 %v16865_v36, 16  ;;  %vm4378_vm12 = vc.u32 %v4370_v3, %v4374_v59  ;;  %v16892_v63 = vadd.s32 %v4374_v59, %v4370_v3  ;;  %v3858_v48 = vor.u32 %v3857_v50, %v3856_v32 }
 0x3ec   :  { %v4354_v34 = vshll.u32 %v16871_v26, 16  ;;  %v4358_v4 = vadd.s32 %v4352_v13, %v4348_v16  ;;  %v3861_v6 = vor.u32 %v3860_v19, %v3859_v37  ;;  %vm3865_vm0 = vcmp.lt.s32.totalorder %v16873_v45, 4 }
 0x3ed   :  { %v16896_v47 = vadd.s32 %v3772_v31, %v3768_v44  ;;  %v4351_v53 = vmul.u32 %v4347_v29, %v4345_v62  ;;  %v4357_v55 = vsel %vm16878_vm15, 1, %v19819_v1  ;;  %v4373_v46 = vmul.u32 %v4369_v9, %v4345_v62 }
 0x3ee   :  { %vm7989_vm14 = vcmp.lt.s32.totalorder %v16489_v52, 2  ;;  %v4379_v3 = vsel %vm4378_vm12, 1, %v19819_v1  ;;  %v16903_v59 = vor.u32 %v3848_v54, %v3847_v15  ;;  %v16905_v32 = vor.u32 %v3851_v61, %v3850_v40  ;;  %v20218_v54 = vld [vmem:[#allocation9_spill] sm:$0xff]  ;;  %v312_v40 = vpop.permute.xlu1 %311 }
 0x3ef   :  { %v16907_v16 = vor.u32 %v3854_v23, %v3853_v30  ;;  %vm4382_vm9 = vc.u32 %v16892_v63, %v4376_v10  ;;  %vm3862_vm3 = vcmp.lt.s32.totalorder %v16873_v45, 1  ;;  %vm3864_vm11 = vcmp.lt.s32.totalorder %v16873_v45, 3 }
 0x3f0   :  { %v3871_v29 = vsel %vm3865_vm0, %v3858_v48, 920167782  ;;  %v3323_v9 = vor.u32 %v3322_v12, %v3321_v18  ;;  %vm4360_vm7 = vc.u32 %v4358_v4, %v4354_v34  ;;  %v3838_v62 = vor.u32 8388608, %v3837_v5  ;;  %v20216_v5 = vld [vmem:[#allocation26_spill] sm:$0xff] }
 0x3f1   :  { %v3875_v13 = vsel %vm3865_vm0, %v3861_v6, 1326507024  ;;  %v3328_v23 = vand.u32 2147483647, %v16852_v21  ;;  %v3471_v30 = vclz %v16857_v39  ;;  %v4359_v44 = vadd.s32 %v4357_v55, %v4351_v53 }
 0x3f2   :  { %v4381_v50 = vadd.s32 %v4379_v3, %v4373_v46  ;;  %v4383_v37 = vsel %vm4382_vm9, 1, %v19819_v1  ;;  %vm19715_vm10 = vcmp.lt.s32.totalorder %v16873_v45, 2  ;;  %v3870_v18 = vsel %vm3862_vm3, %v16903_v59, %v16905_v32 }
 0x3f3   :  { %v3872_v4 = vsel %vm3864_vm11, %v16907_v16, %v3871_v29  ;;  %v3774_v6 = vadd.s32 536870912, %v16896_v47  ;;  %v4361_v34 = vsel %vm4360_vm7, 1, %v19819_v1  ;;  %v3874_v53 = vsel %vm3862_vm3, %v16905_v32, %v16907_v16 }
 0x3f4   :  { %v3876_v46 = vsel %vm3864_vm11, %v3858_v48, %v3875_v13  ;;  %v3658_v12 = vmul.f32 %v16813_v24, %v16693_v56  ;;  %v3330_v21 = vcvt.s32.f32 %v3323_v9  ;;  %v16939_v39 = vshll.u32 %v3838_v62, 8  ;;  %v20220_v24 = vld [vmem:[#allocation16_spill] sm:$0xff] }
 0x3f5   :  { %vm20217_vm5 = vcmp.lt.s32.totalorder %v20050_v25, 26  ;;  %v4375_v31 = vshrl.u32 %v16843_v57, 16  ;;  %v4385_v49 = vadd.s32 %v4383_v37, %v4381_v50  ;;  %v16947_v15 = vsel %vm19715_vm10, %v3870_v18, %v3872_v4  ;;  %v20222_v37 = vld [vmem:[#allocation28_spill] sm:$0xff] }
 0x3f6   :  { %v10377_v19 = vsel %vm20217_vm5, %v20216_v5, 0.0  ;;  %vm20219_vm15 = vmmov %vm20217_vm5  ;;  %vm3212_vm12 = vcmp.lt.s32.totalorder %v20220_v24, 0  ;;  %v4353_v61 = vshrl.u32 %v16829_v41, 16  ;;  %v4363_v55 = vadd.s32 %v4361_v34, %v4359_v44 }
 0x3f7   :  { %v10378_v48 = vsel %vm20219_vm15, %v20218_v54, 0.0  ;;  %v16956_v3 = vsel %vm19715_vm10, %v3874_v53, %v3876_v46  ;;  %v16962_v29 = vsel %vm7989_vm14, %v16796_v22, %v16687_v42  ;;  %v3331_v9 = vmul.f32 %v3330_v21, %v3328_v23 }
 0x3f8   :  { %v10407_v57 = vpack.c.bf16 %v10378_v48, %v10377_v19  ;;  %v11328_v62 = vadd.s32 4294967294, %v3471_v30  ;;  %v16964_v13 = vshrl.u32 %v3774_v6, 30  ;;  %v4311_v50 = vshrl.u32 %v19809_v58, %v16674_v14 }
 0x3f9   :  { %v3879_v41 = vand.u32 65535, %v16939_v39  ;;  %v3904_v44 = vshrl.u32 %v16947_v15, 16  ;;  %vm20221_vm9 = vcmask 261120   ;;  %v16974_v18 = vsel %vm11916_vm1, %v20222_v37, %v312_v40 }
 0x3fa   :  { %11472 = vmatmul.msk.bf16.gmra.mxu0 %vm20221_vm9, %v10407_v57  ;;  %20223 = vst [vmem:[#allocation25_spill] sm:$0xff] %v16974_v18  ;;  %v3652_v52 = vadd.f32 -0.4999988, %v16848_v0  ;;  %v20224_v42 = vand.u32 2147483647, %v20220_v24  ;;  %v4377_v14 = vshrl.u32 %v16865_v36, 16  ;;  %v4386_v23 = vadd.s32 %v4385_v49, %v4375_v31 }
 0x3fb   :  { %v3882_v30 = vshrl.u32 %v16956_v3, 16  ;;  %v3659_v4 = vadd.f32 -0.16666654, %v3658_v12  ;;  %v4332_v6 = vsel %vm4330_vm8, %v16743_v7, 2102212464  ;;  %v4355_v34 = vshrl.u32 %v16871_v26, 16 }
 0x3fc   :  { %vm16979_vm14 = vcmp.le.f32.partialorder %v20224_v42, 0.7853982  ;;  %v4364_v53 = vadd.s32 %v4363_v55, %v4353_v61  ;;  %v3332_v0 = vxor.u32 2147483648, %v3331_v9  ;;  %vm11329_vm7 = vcmp.lt.s32.totalorder %v11328_v62, 0  ;;  %v20228_v26 = vld [vmem:[#allocation36_spill] sm:$0xff] }
 0x3fd   :  { %v3776_v46 = vshll.u32 %v16964_v13, 30  ;;  %v16992_v21 = vmul.f32 %v19963_v38, %v16974_v18  ;;  %v4331_v5 = vsel %vm4327_vm13, %v4311_v50, %v16750_v51  ;;  %v3880_v12 = vshrl.u32 %v16939_v39, 16 }
 0x3fe   :  { %v3903_v19 = vand.u32 65535, %v16947_v15  ;;  %v17001_v7 = vmul.u32 %v3904_v44, %v3879_v41  ;;  %vm3043_vm8 = vweird.f32 %v20228_v26  ;;  %v4333_v31 = vsel %vm4329_vm6, %v16741_v43, %v4332_v6 }
 0x3ff   :  { %20227 = vst [vmem:[#allocation26_spill] sm:$0xff] %v16992_v21  ;;  %v4387_v49 = vadd.s32 %v4386_v23, %v4377_v14  ;;  %v3881_v54 = vand.u32 65535, %v16956_v3  ;;  %v17010_v51 = vmul.u32 %v3882_v30, %v3879_v41  ;;  %v3653_v48 = vmul.f32 %v3652_v52, %v16693_v56 }
 0x400   :  { %v3660_v40 = vmul.f32 %v3659_v4, %v16693_v56  ;;  %v17014_v61 = vadd.s32 %v4364_v53, %v4355_v34  ;;  %v17019_v55 = vadd.s32 %v16892_v63, %v4376_v10  ;;  %v3333_v43 = vsel %vm3212_vm12, %v3332_v0, %v3331_v9 }
 0x401   :  { %v17024_v57 = vsel %vm11329_vm7, 0, %v11328_v62  ;;  %v17027_v50 = vsub.s32 %v16896_v47, %v3776_v46  ;;  %v3988_v37 = vand.u32 2139095040, %v16992_v21  ;;  %v4334_v56 = vsel %vm4328_vm4, %v4331_v5, %v4333_v31 }
 0x402   :  { %v3905_v52 = vmul.u32 %v3903_v19, %v3879_v41  ;;  %v17032_v42 = vmul.u32 %v3903_v19, %v3880_v12  ;;  %v3909_v36 = vshll.u32 %v17001_v7, 16  ;;  %v4391_v10 = vadd.s32 1, %v4387_v49 }
 0x403   :  { %v3883_v63 = vmul.u32 %v3881_v54, %v3879_v41  ;;  %v17035_v14 = vmul.u32 %v3881_v54, %v3880_v12  ;;  %v3887_v9 = vshll.u32 %v17010_v51, 16  ;;  %v17038_v62 = vadd.f32 1.0, %v3653_v48 }
 0x404   :  { %v3661_v47 = vadd.f32 1.0, %v3660_v40  ;;  %v17043_v23 = vsel %vm16979_vm14, %v20220_v24, %v3333_v43  ;;  %vm4390_vm13 = vc.u32 %v17014_v61, %v17019_v55  ;;  %v3479_v33 = vsub.s32 4294967266, %v17024_v57 }
 0x405   :  { %vm3778_vm6 = vcmp.lt.s32.totalorder %v17027_v50, 0  ;;  %v3779_v41 = vsub.s32 0, %v17027_v50  ;;  %v3989_v4 = vshrl.u32 %v3988_v37, 23  ;;  %vm3670_vm4 = vcmp.eq.s32.totalorder %v16676_v20, 2 }
 0x406   :  { %v4388_v6 = vmul.u32 %v16778_v28, %v4334_v56  ;;  %v19716_v34 = vshll.u32 %v17032_v42, 16  ;;  %vm3913_vm5 = vc.u32 %v3905_v52, %v3909_v36  ;;  %v17053_v53 = vadd.s32 %v3909_v36, %v3905_v52 }
 0x407   :  { %v4392_v0 = vsel %vm4390_vm13, %v4391_v10, %v4387_v49  ;;  %v3889_v46 = vshll.u32 %v17035_v14, 16  ;;  %vm3891_vm15 = vc.u32 %v3883_v63, %v3887_v9  ;;  %v3893_v5 = vadd.s32 %v3887_v9, %v3883_v63 }
 0x408   :  { %v3054_v19 = vsel %vm3043_vm8, nan, %v16789_v2  ;;  %v7997_v31 = vsel %vm3043_vm8, nan, %v16962_v29  ;;  %v3662_v28 = vmul.f32 %v3661_v47, %v16665_v35  ;;  %v17065_v54 = vmul.f32 %v17043_v23, %v17043_v23 }
 0x409   :  { %v3480_v48 = vadd.s32 127, %v3479_v33  ;;  %v3780_v49 = vsel %vm3778_vm6, %v3779_v41, %v17027_v50  ;;  %v3914_v40 = vsel %vm3913_vm5, 1, %v19819_v1  ;;  %v11339_v43 = vadd.s32 4294967169, %v3989_v4  ;;  %v20230_v41 = vld [vmem:[#allocation30_spill] sm:$0xff]  ;;  %v20231_v4 = vld [vmem:[#allocation27_spill] sm:$0xff] }
 0x40a   :  { %vm8606_vm9 = vcmp.eq.s32.totalorder %v16667_v27, 0  ;;  %vm8609_vm7 = vcmp.eq.s32.totalorder %v16667_v27, 2  ;;  %v17073_v2 = vadd.s32 %v4392_v0, %v4388_v6  ;;  %v3892_v35 = vsel %vm3891_vm15, 1, %v19819_v1  ;;  %v20232_v0 = vld [vmem:[#allocation34_spill] sm:$0xff] }
 0x40b   :  { %v3908_v29 = vmul.u32 %v3904_v44, %v3880_v12  ;;  %vm3917_vm8 = vc.u32 %v17053_v53, %v19716_v34  ;;  %v10324_v37 = vsel %vm12700_vm2, %v3054_v19, %v7997_v31  ;;  %v3671_v56 = vxor.u32 2147483648, %v17038_v62  ;;  %v20235_v19 = vld [vmem:[#allocation32_spill] sm:$0xff] }
 0x40c   :  { %v3886_v52 = vmul.u32 %v3882_v30, %v3880_v12  ;;  %vm3895_vm13 = vc.u32 %v3893_v5, %v3889_v46  ;;  %vm3666_vm6 = vcmp.lt.s32.totalorder %v16676_v20, 2  ;;  %v3668_v36 = vxor.u32 2147483648, %v3662_v28 }
 0x40d   :  { %v3475_v10 = vsub.s32 32, %v17024_v57  ;;  %v3781_v15 = vclz %v3780_v49  ;;  %v3916_v44 = vadd.s32 %v3914_v40, %v3908_v29  ;;  %vm8605_vm5 = vcmp.lt.s32.totalorder %v16667_v27, 2  ;;  %v20236_v49 = vld [vmem:[#allocation38_spill] sm:$0xff] }
 0x40e   :  { %v3346_v63 = vmul.f32 -0.00019511016, %v17065_v54  ;;  %v3894_v9 = vadd.s32 %v3892_v35, %v3886_v52  ;;  %v3918_v47 = vsel %vm3917_vm8, 1, %v19819_v1  ;;  %v3995_v33 = vadd.s32 1, %v11339_v43 }
 0x40f   :  { %v3459_v3 = vadd.s32 %v20231_v4, %v20230_v41  ;;  %v3481_v30 = vshll.u32 %v3480_v48, 23  ;;  %v4394_v12 = vadd.s32 536870912, %v17073_v2  ;;  %v3896_v6 = vsel %vm3895_vm13, 1, %v19819_v1 }
 0x410   :  { %vm20233_vm15 = vcmp.lt.s32.totalorder %v20050_v25, 2  ;;  %vm3667_vm10 = vcmp.eq.s32.totalorder %v16676_v20, 0  ;;  %v3672_v5 = vsel %vm3670_vm4, %v3671_v56, %v3662_v28  ;;  %v3334_v31 = vsub.s32 4, %v20235_v19 }
 0x411   :  { %v17098_v46 = vsel %vm20233_vm15, %v20232_v0, %v10324_v37  ;;  %vm3663_vm8 = vweird.f32 %v20236_v49  ;;  %v3669_v48 = vsel %vm3667_vm10, %v17038_v62, %v3668_v36  ;;  %v3477_v40 = vshrl.u32 %v3459_v3, %v3475_v10 }
 0x412   :  { %20234 = vst [vmem:[#allocation9_spill] sm:$0xff] %v17098_v46  ;;  %v11334_v43 = vadd.s32 4294967294, %v3781_v15  ;;  %v3920_v35 = vadd.s32 %v3918_v47, %v3916_v44  ;;  %v3339_v29 = vmul.f32 -0.001358992, %v17065_v54  ;;  %v3347_v52 = vadd.f32 0.008332121, %v3346_v63 }
 0x413   :  { %v3898_v41 = vadd.s32 %v3896_v6, %v3894_v9  ;;  %vm3996_vm13 = vcmp.gt.s32.totalorder %v3995_v33, 0  ;;  %v3476_v37 = vshll.u32 %v16801_v60, %v17024_v57  ;;  %v3482_v4 = vor.u32 4788187, %v3481_v30  ;;  %v316_v30 = vpop.permute.xlu1 %315 }
 0x414   :  { %v17109_v0 = vshrl.u32 %v4394_v12, 30  ;;  %v3910_v34 = vshrl.u32 %v17001_v7, 16  ;;  %v8608_v18 = vsel %vm8606_vm9, %v17038_v62, %v3668_v36  ;;  %v8611_v10 = vsel %vm8609_vm7, %v3671_v56, %v3662_v28 }
 0x415   :  { %v3335_v15 = vsel %vm3212_vm12, %v3334_v31, %v20235_v19  ;;  %v3888_v44 = vshrl.u32 %v17010_v51, 16  ;;  %v3478_v63 = vor.u32 %v3477_v40, %v3476_v37  ;;  %vm11335_vm10 = vcmp.lt.s32.totalorder %v11334_v43, 0  ;;  %v20239_v40 = vld [vmem:[#allocation41_spill] sm:$0xff] }
 0x416   :  { %20237 = vst [vmem:[#allocation16_spill] sm:$0xff] %v17109_v0  ;;  %v3921_v60 = vadd.s32 %v3920_v35, %v3910_v34  ;;  %v3997_v57 = vsel %vm3996_vm13, %v3995_v33, 0  ;;  %v3673_v7 = vsel %vm3666_vm6, %v3669_v48, %v3672_v5  ;;  %v3340_v9 = vadd.f32 0.041655596, %v3339_v29 }
 0x417   :  { %v3348_v47 = vmul.f32 %v3347_v52, %v17065_v54  ;;  %v3899_v62 = vadd.s32 %v3898_v41, %v3888_v44  ;;  %v8612_v28 = vsel %vm8605_vm5, %v8608_v18, %v8611_v10  ;;  %v3483_v56 = vand.u32 2147483647, %v3482_v4 }
 0x418   :  { %v4396_v36 = vshll.u32 %v17109_v0, 30  ;;  %v3912_v3 = vshrl.u32 %v17032_v42, 16  ;;  %v17128_v51 = vsel %vm11335_vm10, 0, %v11334_v43  ;;  %v3846_v34 = vshrl.u32 %v19809_v58, %v16845_v8 }
 0x419   :  { %v3890_v20 = vshrl.u32 %v17035_v14, 16  ;;  %v3999_v33 = vand.u32 31, %v3997_v57  ;;  %v3337_v12 = vsel %vm16979_vm14, 0, %v3335_v15  ;;  %v3485_v6 = vcvt.s32.f32 %v3478_v63 }
 0x41a   :  { %v3867_v27 = vsel %vm3865_vm0, %v16907_v16, 2102212464  ;;  %v3922_v18 = vadd.s32 %v3921_v60, %v3912_v3  ;;  %v17140_v5 = vsel %vm3663_vm8, nan, %v3673_v7  ;;  %v3341_v19 = vmul.f32 %v3340_v9, %v17065_v54 }
 0x41b   :  { %20238 = vst [vmem:[#allocation28_spill] sm:$0xff] %v17140_v5  ;;  %v3349_v8 = vadd.f32 -0.16666654, %v3348_v47  ;;  %v17143_v31 = vadd.s32 %v3899_v62, %v3890_v20  ;;  %v3486_v14 = vmul.f32 %v3485_v6, %v3483_v56  ;;  %v3789_v48 = vsub.s32 4294967266, %v17128_v51 }
 0x41c   :  { %v17147_v22 = vsub.s32 %v17073_v2, %v4396_v36  ;;  %v17152_v16 = vsel %vm11916_vm1, %v20239_v40, %v316_v30  ;;  %v3866_v43 = vsel %vm3862_vm3, %v3846_v34, %v16903_v59  ;;  %v3868_v35 = vsel %vm3864_vm11, %v16905_v32, %v3867_v27  ;;  %v20243_v59 = vld [vmem:[#allocation15_spill] sm:$0xff] }
 0x41d   :  { %20240 = vst [vmem:[#allocation36_spill] sm:$0xff] %v17152_v16  ;;  %v20241_v29 = vshll.u32 %v17032_v42, 16  ;;  %v17165_v2 = vsub.s32 32, %v3999_v33  ;;  %v17169_v41 = vsel %vm3663_vm8, nan, %v8612_v28  ;;  %v17171_v37 = vadd.s32 3, %v3337_v12 }
 0x41e   :  { %20242 = vst [vmem:[#allocation30_spill] sm:$0xff] %v17169_v41  ;;  %v17173_v4 = vand.u32 3, %v3337_v12  ;;  %vm3367_vm0 = vcmp.lt.s32.totalorder %v20243_v59, 0  ;;  %v3926_v10 = vadd.s32 1, %v3922_v18  ;;  %v3342_v15 = vadd.f32 -0.4999988, %v3341_v19 }
 0x41f   :  { %v17163_v52 = vadd.s32 %v17053_v53, %v20241_v29  ;;  %v3350_v32 = vmul.f32 %v3349_v8, %v17065_v54  ;;  %v17181_v42 = vmul.f32 %v19963_v38, %v17152_v16  ;;  %v3487_v53 = vxor.u32 2147483648, %v3486_v14  ;;  %v20254_v16 = vld [vmem:[#allocation13_spill] sm:$0xff] }
 0x420   :  { %v3790_v49 = vadd.s32 127, %v3789_v48  ;;  %vm4398_vm11 = vcmp.lt.s32.totalorder %v17147_v22, 0  ;;  %vm20245_vm12 = vcmp.lt.s32.totalorder %v16873_v45, 2  ;;  %v4399_v63 = vsub.s32 0, %v17147_v22 }
 0x421   :  { %vm3925_vm3 = vc.u32 %v17143_v31, %v17163_v52  ;;  %20244 = vst [vmem:[#allocation27_spill] sm:$0xff] %v17181_v42  ;;  %v3869_v44 = vsel %vm20245_vm12, %v3866_v43, %v3868_v35  ;;  %v19720_v60 = vand.u32 2147483647, %v16992_v21  ;;  %v4011_v7 = vshll.u32 %v20082_v11, %v3999_v33 }
 0x422   :  { %v20246_v9 = vmov 920167782   ;;  %v3927_v62 = vsel %vm3925_vm3, %v3926_v10, %v3922_v18  ;;  %v17191_v28 = vshrl.u32 %v3997_v57, 5  ;;  %v20247_v36 = vmov 1326507024  }
 0x423   :  { %v4012_v47 = vshrl.u32 %v20246_v9, %v17165_v2  ;;  %v4014_v56 = vshll.u32 %v20246_v9, %v3999_v33  ;;  %v4015_v3 = vshrl.u32 %v20247_v36, %v17165_v2  ;;  %v3923_v45 = vmul.u32 %v16939_v39, %v3869_v44 }
 0x424   :  { %v4002_v34 = vshll.u32 %v19809_v58, %v3999_v33  ;;  %v20248_v20 = vmov 2475754826   ;;  %v4143_v12 = vand.u32 2139095040, %v17181_v42  ;;  %v20249_v6 = vand.u32 2147483647, %v20243_v59 }
 0x425   :  { %v4005_v30 = vshll.u32 %v20248_v20, %v3999_v33  ;;  %v4003_v57 = vshrl.u32 %v20248_v20, %v17165_v2  ;;  %v20252_v18 = vmov 2131351028   ;;  %v4009_v8 = vshrl.u32 %v20082_v11, %v17165_v2 }
 0x426   :  { %vm17202_vm14 = vcmp.le.f32.partialorder %v20249_v6, 0.7853982  ;;  %v4006_v19 = vshrl.u32 %v20252_v18, %v17165_v2  ;;  %v4008_v39 = vshll.u32 %v20252_v18, %v3999_v33  ;;  %v3343_v48 = vmul.f32 %v3342_v15, %v17065_v54  ;;  %v20253_v6 = vld [vmem:[#allocation39_spill] sm:$0xff] }
 0x427   :  { %v3351_v40 = vadd.f32 1.0, %v3350_v32  ;;  %v17214_v43 = vadd.s32 %v3927_v62, %v3923_v45  ;;  %v4013_v35 = vor.u32 %v4012_v47, %v4011_v7  ;;  %v3785_v29 = vsub.s32 32, %v17128_v51 }
 0x428   :  { %v3992_v10 = vand.u32 8388607, %v19720_v60  ;;  %v4016_v44 = vor.u32 %v4015_v3, %v4014_v56  ;;  %vm4020_vm4 = vcmp.lt.s32.totalorder %v17191_v28, 4  ;;  %v3488_v33 = vsel %vm3367_vm0, %v3487_v53, %v3486_v14 }
 0x429   :  { %v3769_v46 = vadd.s32 %v20254_v16, %v20253_v6  ;;  %v4400_v54 = vsel %vm4398_vm11, %v4399_v63, %v17147_v22  ;;  %v4144_v15 = vshrl.u32 %v4143_v12, 23  ;;  %v3791_v32 = vshll.u32 %v3790_v49, 23  ;;  %v20256_v6 = vld [vmem:[#allocation44_spill] sm:$0xff] }
 0x42a   :  { %v17227_v7 = vor.u32 %v4003_v57, %v4002_v34  ;;  %v17229_v47 = vor.u32 %v4006_v19, %v4005_v30  ;;  %v17231_v62 = vor.u32 %v4009_v8, %v4008_v39  ;;  %v3929_v56 = vadd.s32 536870912, %v17214_v43 }
 0x42b   :  { %vm4017_vm9 = vcmp.lt.s32.totalorder %v17191_v28, 1  ;;  %vm4019_vm7 = vcmp.lt.s32.totalorder %v17191_v28, 3  ;;  %v4026_v14 = vsel %vm4020_vm4, %v4013_v35, 920167782  ;;  %v3787_v16 = vshrl.u32 %v3769_v46, %v3785_v29 }
 0x42c   :  { %v4401_v53 = vclz %v4400_v54  ;;  %v3993_v63 = vor.u32 8388608, %v3992_v10  ;;  %v4030_v49 = vsel %vm4020_vm4, %v4016_v44, 1326507024  ;;  %v3344_v3 = vadd.f32 1.0, %v3343_v48 }
 0x42d   :  { %v3352_v45 = vmul.f32 %v3351_v40, %v17043_v23  ;;  %v3786_v34 = vshll.u32 %v17027_v50, %v17128_v51  ;;  %v11342_v30 = vadd.s32 4294967169, %v4144_v15  ;;  %v3792_v12 = vor.u32 4788187, %v3791_v32 }
 0x42e   :  { %vm19719_vm6 = vcmp.lt.s32.totalorder %v17191_v28, 2  ;;  %v4025_v46 = vsel %vm4017_vm9, %v17227_v7, %v17229_v47  ;;  %v4027_v57 = vsel %vm4019_vm7, %v17231_v62, %v4026_v14  ;;  %v17254_v23 = vsel %vm17202_vm14, %v20243_v59, %v3488_v33 }
 0x42f   :  { %v17256_v19 = vshrl.u32 %v3929_v56, 30  ;;  %v4029_v50 = vsel %vm4017_vm9, %v17229_v47, %v17231_v62  ;;  %v4031_v51 = vsel %vm4019_vm7, %v4013_v35, %v4030_v49  ;;  %v3355_v39 = vand.u32 3, %v17171_v37 }
 0x430   :  { %v3788_v8 = vor.u32 %v3787_v16, %v3786_v34  ;;  %v11346_v48 = vadd.s32 4294967294, %v4401_v53  ;;  %v17265_v40 = vshll.u32 %v3993_v63, 8  ;;  %v3361_v10 = vxor.u32 2147483648, %v3344_v3 }
 0x431   :  { %20255 = vst [vmem:[#allocation34_spill] sm:$0xff] %v17256_v19  ;;  %v17273_v44 = vsel %vm19719_vm6, %v4025_v46, %v4027_v57  ;;  %v4150_v33 = vadd.s32 1, %v11342_v30  ;;  %v3489_v54 = vsub.s32 4, %v20256_v6  ;;  %v17278_v37 = vmul.f32 %v17254_v23, %v17254_v23 }
 0x432   :  { %v3793_v35 = vand.u32 2147483647, %v3792_v12  ;;  %v17282_v15 = vsel %vm19719_vm6, %v4029_v50, %v4031_v51  ;;  %v3358_v32 = vxor.u32 2147483648, %v3352_v45  ;;  %vm8298_vm5 = vcmp.eq.s32.totalorder %v17173_v4, 0  ;;  %v20257_v12 = vld [vmem:[#allocation23_spill] sm:$0xff] }
 0x433   :  { %vm8301_vm15 = vcmp.eq.s32.totalorder %v17173_v4, 2  ;;  %v3931_v56 = vshll.u32 %v17256_v19, 30  ;;  %vm3356_vm8 = vcmp.lt.s32.totalorder %v3355_v39, 2  ;;  %v3795_v14 = vcvt.s32.f32 %v3788_v8 }
 0x434   :  { %vm11347_vm13 = vcmp.lt.s32.totalorder %v11346_v48, 0  ;;  %v4034_v16 = vand.u32 65535, %v17265_v40  ;;  %v4059_v53 = vshrl.u32 %v17273_v44, 16  ;;  %vm3357_vm10 = vcmp.eq.s32.totalorder %v3355_v39, 0 }
 0x435   :  { %vm3360_vm3 = vcmp.eq.s32.totalorder %v3355_v39, 2  ;;  %vm8297_vm11 = vcmp.lt.s32.totalorder %v17173_v4, 2  ;;  %v4037_v63 = vshrl.u32 %v17282_v15, 16  ;;  %vm4151_vm12 = vcmp.gt.s32.totalorder %v4150_v33, 0 }
 0x436   :  { %v3362_v49 = vsel %vm3360_vm3, %v3361_v10, %v3352_v45  ;;  %v3490_v34 = vsel %vm3367_vm0, %v3489_v54, %v20256_v6  ;;  %v3494_v30 = vmul.f32 -0.001358992, %v17278_v37  ;;  %vm3677_vm6 = vcmp.lt.s32.totalorder %v20257_v12, 0 }
 0x437   :  { %v3796_v46 = vmul.f32 %v3795_v14, %v3793_v35  ;;  %v3359_v57 = vsel %vm3357_vm10, %v3344_v3, %v3358_v32  ;;  %v8303_v50 = vsel %vm8301_vm15, %v3361_v10, %v3352_v45  ;;  %v17298_v51 = vsel %vm11347_vm13, 0, %v11346_v48 }
 0x438   :  { %v17301_v8 = vsub.s32 %v17214_v43, %v3931_v56  ;;  %v4035_v60 = vshrl.u32 %v17265_v40, 16  ;;  %v4058_v29 = vand.u32 65535, %v17273_v44  ;;  %v17305_v21 = vmul.u32 %v4059_v53, %v4034_v16 }
 0x439   :  { %v4152_v6 = vsel %vm4151_vm12, %v4150_v33, 0  ;;  %v8300_v54 = vsel %vm8298_vm5, %v3344_v3, %v3358_v32  ;;  %v17311_v35 = vsel %vm17202_vm14, 0, %v3490_v34  ;;  %v4036_v45 = vand.u32 65535, %v17282_v15 }
 0x43a   :  { %v17314_v48 = vmul.u32 %v4037_v63, %v4034_v16  ;;  %v3495_v43 = vadd.f32 0.041655596, %v3494_v30  ;;  %v3501_v10 = vmul.f32 -0.00019511016, %v17278_v37  ;;  %v3797_v56 = vxor.u32 2147483648, %v3796_v46 }
 0x43b   :  { %v4409_v44 = vsub.s32 4294967266, %v17298_v51  ;;  %v4389_v33 = vadd.s32 %v17019_v55, %v17014_v61  ;;  %v4405_v14 = vsub.s32 32, %v17298_v51  ;;  %v3934_v3 = vsub.s32 0, %v17301_v8 }
 0x43c   :  { %v4154_v27 = vand.u32 31, %v4152_v6  ;;  %vm3933_vm0 = vcmp.lt.s32.totalorder %v17301_v8, 0  ;;  %v4060_v32 = vmul.u32 %v4058_v29, %v4034_v16  ;;  %v17323_v15 = vmul.u32 %v4058_v29, %v4035_v60 }
 0x43d   :  { %v4064_v34 = vshll.u32 %v17305_v21, 16  ;;  %v17327_v30 = vsel %vm3356_vm8, %v3359_v57, %v3362_v49  ;;  %v4038_v41 = vmul.u32 %v4036_v45, %v4034_v16  ;;  %v17329_v5 = vmul.u32 %v4036_v45, %v4035_v60 }
 0x43e   :  { %v4042_v61 = vshll.u32 %v17314_v48, 16  ;;  %v17334_v55 = vsel %vm8297_vm11, %v8300_v54, %v8303_v50  ;;  %v17336_v26 = vadd.f32 0.008332121, %v3501_v10  ;;  %v17339_v19 = vadd.s32 3, %v17311_v35 }
 0x43f   :  { %20258 = vst [vmem:[#allocation32_spill] sm:$0xff] %v17334_v55  ;;  %v20259_v29 = vand.u32 2147483647, %v20257_v12  ;;  %v4410_v16 = vadd.s32 127, %v4409_v44  ;;  %v17348_v49 = vmul.f32 %v3495_v43, %v17278_v37  ;;  %v3798_v4 = vsel %vm3677_vm6, %v3797_v56, %v3796_v46 }
 0x440   :  { %v3935_v57 = vsel %vm3933_vm0, %v3934_v3, %v17301_v8  ;;  %v17353_v50 = vsub.s32 32, %v4154_v27  ;;  %v4406_v54 = vshll.u32 %v17147_v22, %v17298_v51  ;;  %v4407_v45 = vshrl.u32 %v4389_v33, %v4405_v14 }
 0x441   :  { %vm17343_vm14 = vcmp.le.f32.partialorder %v20259_v29, 0.7853982  ;;  %v19731_v10 = vshll.u32 %v17323_v15, 16  ;;  %vm4068_vm5 = vc.u32 %v4060_v32, %v4064_v34  ;;  %v4044_v29 = vshll.u32 %v17329_v5, 16 }
 0x442   :  { %vm4046_vm15 = vc.u32 %v4038_v41, %v4042_v61  ;;  %v4048_v44 = vadd.s32 %v4042_v61, %v4038_v41  ;;  %v17359_v43 = vadd.s32 %v4064_v34, %v4060_v32  ;;  %v4411_v55 = vshll.u32 %v4410_v16, 23 }
 0x443   :  { %v3936_v59 = vclz %v3935_v57  ;;  %v4063_v46 = vmul.u32 %v4059_v53, %v4035_v60  ;;  %v19739_v56 = vand.u32 2147483647, %v17181_v42  ;;  %v4041_v3 = vmul.u32 %v4037_v63, %v4035_v60 }
 0x444   :  { %v4069_v0 = vsel %vm4068_vm5, 1, %v19819_v1  ;;  %v4166_v22 = vshll.u32 %v20082_v11, %v4154_v27  ;;  %v4167_v51 = vshrl.u32 %v20246_v9, %v17353_v50  ;;  %v4047_v33 = vsel %vm4046_vm15, 1, %v19819_v1 }
 0x445   :  { %v17367_v14 = vshrl.u32 %v4152_v6, 5  ;;  %v4169_v41 = vshll.u32 %v20246_v9, %v4154_v27  ;;  %v4170_v32 = vshrl.u32 %v20247_v36, %v17353_v50  ;;  %vm17372_vm8 = vc.u32 %v4048_v44, %v4044_v29 }
 0x446   :  { %vm4072_vm13 = vc.u32 %v17359_v43, %v19731_v10  ;;  %v4157_v60 = vshll.u32 %v19809_v58, %v4154_v27  ;;  %v4160_v63 = vshll.u32 %v20248_v20, %v4154_v27  ;;  %v4158_v6 = vshrl.u32 %v20248_v20, %v17353_v50 }
 0x447   :  { %v4161_v34 = vshrl.u32 %v20252_v18, %v17353_v50  ;;  %v4163_v61 = vshll.u32 %v20252_v18, %v4154_v27  ;;  %v4164_v16 = vshrl.u32 %v20082_v11, %v17353_v50  ;;  %v17391_v57 = vsel %vm17343_vm14, %v20257_v12, %v3798_v4 }
 0x448   :  { %v4071_v29 = vadd.s32 %v4069_v0, %v4063_v46  ;;  %v4147_v44 = vand.u32 8388607, %v19739_v56  ;;  %v4168_v10 = vor.u32 %v4167_v51, %v4166_v22  ;;  %v4049_v36 = vadd.s32 %v4047_v33, %v4041_v3 }
 0x449   :  { %v4073_v20 = vsel %vm4072_vm13, 1, %v19819_v1  ;;  %v4171_v9 = vor.u32 %v4170_v32, %v4169_v41  ;;  %vm4175_vm10 = vcmp.lt.s32.totalorder %v17367_v14, 4  ;;  %v4408_v27 = vor.u32 %v4407_v45, %v4406_v54  ;;  %v17421_v32 = vpop.permute.xlu2 %195 }
 0x44a   :  { %v4412_v18 = vor.u32 4788187, %v4411_v55  ;;  %v11337_v38 = vadd.s32 4294967294, %v3936_v59  ;;  %v4051_v11 = vsel %vm17372_vm8, 1, %v19819_v1  ;;  %v4065_v4 = vshrl.u32 %v17305_v21, 16 }
 0x44b   :  { %v17401_v0 = vor.u32 %v4158_v6, %v4157_v60  ;;  %v17403_v46 = vor.u32 %v4161_v34, %v4160_v63  ;;  %v17405_v22 = vor.u32 %v4164_v16, %v4163_v61  ;;  %v4075_v3 = vadd.s32 %v4073_v20, %v4071_v29 }
 0x44c   :  { %vm4172_vm3 = vcmp.lt.s32.totalorder %v17367_v14, 1  ;;  %vm4174_vm11 = vcmp.lt.s32.totalorder %v17367_v14, 3  ;;  %v4181_v59 = vsel %vm4175_vm10, %v4168_v10, 920167782  ;;  %vm3353_vm12 = vweird.f32 %v20220_v24 }
 0x44d   :  { %v4043_v55 = vshrl.u32 %v17314_v48, 16  ;;  %v4053_v54 = vadd.s32 %v4051_v11, %v4049_v36  ;;  %v4148_v21 = vor.u32 8388608, %v4147_v44  ;;  %v4185_v45 = vsel %vm4175_vm10, %v4171_v9, 1326507024 }
 0x44e   :  { %v17417_v51 = vmul.f32 %v17391_v57, %v17391_v57  ;;  %v4413_v20 = vand.u32 2147483647, %v4412_v18  ;;  %v4415_v33 = vcvt.s32.f32 %v4408_v27  ;;  %v4001_v41 = vshrl.u32 %v19809_v58, %v17165_v2  ;;  %v20266_v27 = vld [vmem:[#allocation18_spill] sm:$0xff] }
 0x44f   :  { %vm11338_vm0 = vcmp.lt.s32.totalorder %v11337_v38, 0  ;;  %vm4173_vm5 = vcmp.lt.s32.totalorder %v17367_v14, 2  ;;  %v4180_v11 = vsel %vm4172_vm3, %v17401_v0, %v17403_v46  ;;  %v4182_v9 = vsel %vm4174_vm11, %v17405_v22, %v4181_v59 }
 0x450   :  { %v4067_v36 = vshrl.u32 %v17323_v15, 16  ;;  %v4076_v18 = vadd.s32 %v4075_v3, %v4065_v4  ;;  %v4184_v2 = vsel %vm4172_vm3, %v17403_v46, %v17405_v22  ;;  %v4186_v48 = vsel %vm4174_vm11, %v4168_v10, %v4185_v45 }
 0x451   :  { %v4022_v53 = vsel %vm4020_vm4, %v17231_v62, 2102212464  ;;  %v4045_v60 = vshrl.u32 %v17329_v5, 16  ;;  %v4054_v63 = vadd.s32 %v4053_v54, %v4043_v55  ;;  %v17442_v6 = vshll.u32 %v4148_v21, 8  ;;  %v20264_v5 = vld [vmem:[#allocation20_spill] sm:$0xff] }
 0x452   :  { %v3503_v34 = vmul.f32 %v17336_v26, %v17278_v37  ;;  %v3811_v61 = vmul.f32 -0.00019511016, %v17417_v51  ;;  %v4416_v16 = vmul.f32 %v4415_v33, %v4413_v20  ;;  %v17449_v29 = vsel %vm4173_vm5, %v4180_v11, %v4182_v9 }
 0x453   :  { %v17452_v10 = vsel %vm11338_vm0, 0, %v11337_v38  ;;  %v17456_v62 = vsel %vm4173_vm5, %v4184_v2, %v4186_v48  ;;  %vm20265_vm4 = vcmp.lt.s32.totalorder %v20050_v25, 26  ;;  %v4021_v4 = vsel %vm4017_vm9, %v4001_v41, %v17227_v7  ;;  %v201_v48 = vpop.permute.xlu2 %200 }
 0x454   :  { %v10379_v44 = vsel %vm20265_vm4, %v20264_v5, 0.0  ;;  %vm20267_vm15 = vmmov %vm20265_vm4  ;;  %v4023_v38 = vsel %vm4019_vm7, %v17229_v47, %v4022_v53  ;;  %v4077_v3 = vadd.s32 %v4076_v18, %v4067_v36  ;;  %v17470_v55 = vadd.s32 %v4054_v63, %v4045_v60  ;;  %v20270_v18 = vld [vmem:[#allocation33_spill] sm:$0xff] }
 0x455   :  { %v10380_v26 = vsel %vm20267_vm15, %v20266_v27, 0.0  ;;  %v20268_v54 = vshll.u32 %v17323_v15, 16  ;;  %v4189_v45 = vand.u32 65535, %v17442_v6  ;;  %v4214_v20 = vshrl.u32 %v17449_v29, 16 }
 0x456   :  { %v10408_v59 = vpack.c.bf16 %v10380_v26, %v10379_v44  ;;  %v17482_v7 = vsel %vm3353_vm12, nan, %v17327_v30  ;;  %v4417_v33 = vxor.u32 2147483648, %v4416_v16  ;;  %v3944_v47 = vsub.s32 4294967266, %v17452_v10 }
 0x457   :  { %v17475_v21 = vadd.s32 %v17359_v43, %v20268_v54  ;;  %v4192_v41 = vshrl.u32 %v17456_v62, 16  ;;  %vm20269_vm9 = vcmask 261120   ;;  %v3497_v15 = vadd.f32 -0.4999988, %v17348_v49 }
 0x458   :  { %11473 = vmatmul.msk.bf16.gmra.mxu0 %vm20269_vm9, %v10408_v59  ;;  %v3504_v43 = vadd.f32 -0.16666654, %v3503_v34  ;;  %v17489_v11 = vand.u32 3, %v17339_v19  ;;  %v17492_v9 = vand.u32 3, %v17311_v35  ;;  %v3812_v36 = vadd.f32 0.008332121, %v3811_v61 }
 0x459   :  { %vm4297_vm7 = vcmp.lt.s32.totalorder %v20270_v18, 0  ;;  %vm20271_vm8 = vcmp.lt.s32.totalorder %v17191_v28, 2  ;;  %v4081_v2 = vadd.s32 1, %v4077_v3  ;;  %vm4080_vm13 = vc.u32 %v17470_v55, %v17475_v21 }
 0x45a   :  { %v4024_v30 = vsel %vm20271_vm8, %v4021_v4, %v4023_v38  ;;  %v4190_v49 = vshrl.u32 %v17442_v6, 16  ;;  %v4213_v53 = vand.u32 65535, %v17449_v29  ;;  %v17501_v19 = vmul.u32 %v4214_v20, %v4189_v45 }
 0x45b   :  { %v4418_v35 = vsel %vm4297_vm7, %v4417_v33, %v4416_v16  ;;  %v3945_v60 = vadd.s32 127, %v3944_v47  ;;  %v4191_v63 = vand.u32 65535, %v17456_v62  ;;  %v17506_v34 = vmul.u32 %v4192_v41, %v4189_v45 }
 0x45c   :  { %v3799_v28 = vsub.s32 4, %v16964_v13  ;;  %v3804_v61 = vmul.f32 -0.001358992, %v17417_v51  ;;  %v20272_v5 = vand.u32 2147483647, %v20270_v18  ;;  %v4078_v29 = vmul.u32 %v17265_v40, %v4024_v30 }
 0x45d   :  { %v3813_v27 = vmul.f32 %v3812_v36, %v17417_v51  ;;  %v3924_v16 = vadd.s32 %v17163_v52, %v17143_v31  ;;  %v3940_v62 = vsub.s32 32, %v17452_v10  ;;  %v4082_v26 = vsel %vm4080_vm13, %v4081_v2, %v4077_v3 }
 0x45e   :  { %vm17512_vm0 = vcmp.le.f32.partialorder %v20272_v5, 0.7853982  ;;  %v4215_v38 = vmul.u32 %v4213_v53, %v4189_v45  ;;  %v17529_v59 = vmul.u32 %v4213_v53, %v4190_v49  ;;  %v4219_v40 = vshll.u32 %v17501_v19, 16 }
 0x45f   :  { %v17527_v4 = vsel %vm17512_vm0, %v20270_v18, %v4418_v35  ;;  %v3946_v54 = vshll.u32 %v3945_v60, 23  ;;  %v4193_v33 = vmul.u32 %v4191_v63, %v4189_v45  ;;  %v17532_v47 = vmul.u32 %v4191_v63, %v4190_v49 }
 0x460   :  { %v4197_v31 = vshll.u32 %v17506_v34, 16  ;;  %v3498_v52 = vmul.f32 %v3497_v15, %v17278_v37  ;;  %v3505_v3 = vmul.f32 %v3504_v43, %v17278_v37  ;;  %v3800_v36 = vsel %vm3677_vm6, %v3799_v28, %v16964_v13 }
 0x461   :  { %v17540_v30 = vadd.s32 %v4082_v26, %v4078_v29  ;;  %v3805_v2 = vadd.f32 0.041655596, %v3804_v61  ;;  %v3814_v53 = vadd.f32 -0.16666654, %v3813_v27  ;;  %v17544_v35 = vmul.f32 %v17527_v4, %v17527_v4  ;;  %v332_v27 = vpop.permute.xlu2 %331 }
 0x462   :  { %v3942_v45 = vshrl.u32 %v3924_v16, %v3940_v62  ;;  %v3941_v60 = vshll.u32 %v17301_v8, %v17452_v10  ;;  %v4221_v15 = vshll.u32 %v17529_v59, 16  ;;  %vm4223_vm4 = vc.u32 %v4215_v38, %v4219_v40 }
 0x463   :  { %v17549_v37 = vadd.s32 %v4219_v40, %v4215_v38  ;;  %v3947_v43 = vor.u32 4788187, %v3946_v54  ;;  %v4199_v13 = vshll.u32 %v17532_v47, 16  ;;  %vm4201_vm6 = vc.u32 %v4193_v33, %v4197_v31 }
 0x464   :  { %v4203_v63 = vadd.s32 %v4197_v31, %v4193_v33  ;;  %v17552_v28 = vadd.f32 1.0, %v3498_v52  ;;  %v3506_v61 = vadd.f32 1.0, %v3505_v3  ;;  %v4084_v5 = vadd.s32 536870912, %v17540_v30 }
 0x465   :  { %v4218_v29 = vmul.u32 %v4214_v20, %v4190_v49  ;;  %vm8455_vm15 = vcmp.eq.s32.totalorder %v17492_v9, 2  ;;  %v3802_v8 = vsel %vm17343_vm14, 0, %v3800_v36  ;;  %v3943_v10 = vor.u32 %v3942_v45, %v3941_v60 }
 0x466   :  { %v4196_v16 = vmul.u32 %v4192_v41, %v4190_v49  ;;  %v4224_v62 = vsel %vm4223_vm4, 1, %v19819_v1  ;;  %v3806_v26 = vmul.f32 %v3805_v2, %v17417_v51  ;;  %v4431_v38 = vmul.f32 -0.00019511016, %v17544_v35 }
 0x467   :  { %v4202_v40 = vsel %vm4201_vm6, 1, %v19819_v1  ;;  %vm4227_vm9 = vc.u32 %v17549_v37, %v4221_v15  ;;  %v3815_v20 = vmul.f32 %v3814_v53, %v17417_v51  ;;  %v3948_v54 = vand.u32 2147483647, %v3947_v43 }
 0x468   :  { %vm4205_vm8 = vc.u32 %v4203_v63, %v4199_v13  ;;  %v17568_v39 = vsel %vm11916_vm1, %v201_v48, %v332_v27  ;;  %v3507_v41 = vmul.f32 %v3506_v61, %v17254_v23  ;;  %vm3512_vm14 = vcmp.eq.s32.totalorder %v17489_v11, 0  ;;  %v20276_v23 = vld [vmem:[#allocation7_spill] sm:$0xff] }
 0x469   :  { %20275 = vst [vmem:[#allocation38_spill] sm:$0xff] %v17568_v39  ;;  %vm3515_vm13 = vcmp.eq.s32.totalorder %v17489_v11, 2  ;;  %v17573_v49 = vshrl.u32 %v4084_v5, 30  ;;  %v4226_v33 = vadd.s32 %v4224_v62, %v4218_v29  ;;  %v3516_v31 = vxor.u32 2147483648, %v17552_v28  ;;  %v20278_v63 = vld [vmem:[#allocation43_spill] sm:$0xff] }
 0x46a   :  { %vm8452_vm4 = vcmp.eq.s32.totalorder %v17492_v9, 0  ;;  %v3950_v52 = vcvt.s32.f32 %v3943_v10  ;;  %v4204_v3 = vadd.s32 %v4202_v40, %v4196_v16  ;;  %v4228_v36 = vsel %vm4227_vm9, 1, %v19819_v1 }
 0x46b   :  { %v3819_v2 = vadd.s32 3, %v3802_v8  ;;  %v4432_v48 = vadd.f32 0.008332121, %v4431_v38  ;;  %v4206_v53 = vsel %vm4205_vm8, 1, %v19819_v1  ;;  %v17581_v45 = vmul.f32 %v20276_v23, %v17568_v39 }
 0x46c   :  { %v3807_v60 = vadd.f32 -0.4999988, %v3806_v26  ;;  %v3816_v43 = vadd.f32 1.0, %v3815_v20  ;;  %v4424_v13 = vmul.f32 -0.001358992, %v17544_v35  ;;  %vm19738_vm6 = vcmp.lt.s32.totalorder %v20278_v63, 0 }
 0x46d   :  { %20277 = vst [vmem:[#allocation41_spill] sm:$0xff] %v17581_v45  ;;  %v3951_v61 = vmul.f32 %v3950_v52, %v3948_v54  ;;  %v17585_v5 = vand.u32 3, %v3802_v8  ;;  %v4086_v29 = vshll.u32 %v17573_v49, 30  ;;  %v4220_v27 = vshrl.u32 %v17501_v19, 16 }
 0x46e   :  { %v4230_v10 = vadd.s32 %v4228_v36, %v4226_v33  ;;  %vm3511_vm9 = vcmp.lt.s32.totalorder %v17489_v11, 2  ;;  %v3513_v16 = vxor.u32 2147483648, %v3507_v41  ;;  %v3517_v62 = vsel %vm3515_vm13, %v3516_v31, %v3507_v41 }
 0x46f   :  { %v4198_v26 = vshrl.u32 %v17506_v34, 16  ;;  %v4208_v38 = vadd.s32 %v4206_v53, %v4204_v3  ;;  %vm8451_vm8 = vcmp.lt.s32.totalorder %v17492_v9, 2  ;;  %v8457_v8 = vsel %vm8455_vm15, %v3516_v31, %v3507_v41 }
 0x470   :  { %v17596_v40 = vand.u32 3, %v3819_v2  ;;  %v4433_v20 = vmul.f32 %v4432_v48, %v17544_v35  ;;  %v4763_v19 = vand.u32 2139095040, %v17581_v45  ;;  %v3808_v54 = vmul.f32 %v3807_v60, %v17417_v51 }
 0x471   :  { %v3817_v33 = vmul.f32 %v3816_v43, %v17391_v57  ;;  %v4425_v52 = vadd.f32 0.041655596, %v4424_v13  ;;  %v20279_v36 = vand.u32 2147483647, %v20278_v63  ;;  %v3952_v3 = vxor.u32 2147483648, %v3951_v61 }
 0x472   :  { %v17609_v41 = vsub.s32 %v17540_v30, %v4086_v29  ;;  %v4156_v31 = vshrl.u32 %v19809_v58, %v17353_v50  ;;  %v4222_v2 = vshrl.u32 %v17529_v59, 16  ;;  %v4231_v48 = vadd.s32 %v4230_v10, %v4220_v27  ;;  %v20282_v27 = vld [vmem:[#allocation16_spill] sm:$0xff] }
 0x473   :  { %vm17604_vm13 = vcmp.le.f32.partialorder %v20279_v36, 0.7853982  ;;  %v3514_v57 = vsel %vm3512_vm14, %v17552_v28, %v3513_v16  ;;  %vm8760_vm15 = vcmp.eq.s32.totalorder %v17585_v5, 0  ;;  %v4200_v51 = vshrl.u32 %v17532_v47, 16 }
 0x474   :  { %v4209_v53 = vadd.s32 %v4208_v38, %v4198_v26  ;;  %v8454_v30 = vsel %vm8452_vm4, %v17552_v28, %v3513_v16  ;;  %v4434_v60 = vadd.f32 -0.16666654, %v4433_v20  ;;  %v4177_v50 = vsel %vm4175_vm10, %v17405_v22, 2102212464 }
 0x475   :  { %v4764_v43 = vshrl.u32 %v4763_v19, 23  ;;  %v3809_v13 = vadd.f32 1.0, %v3808_v54  ;;  %v3823_v29 = vxor.u32 2147483648, %v3817_v33  ;;  %v4419_v10 = vsub.s32 4, %v20282_v27  ;;  %v20283_v54 = vld [vmem:[#allocation15_spill] sm:$0xff] }
 0x476   :  { %v4426_v36 = vmul.f32 %v4425_v52, %v17544_v35  ;;  %vm8759_vm14 = vcmp.lt.s32.totalorder %v17585_v5, 2  ;;  %v3953_v47 = vsel %vm19738_vm6, %v3952_v3, %v3951_v61  ;;  %v4089_v26 = vsub.s32 0, %v17609_v41  ;;  %v324_v52 = vpop.permute.xlu0 %323 }
 0x477   :  { %v4176_v28 = vsel %vm4172_vm3, %v4156_v31, %v17401_v0  ;;  %v4232_v16 = vadd.s32 %v4231_v48, %v4222_v2  ;;  %vm4088_vm10 = vcmp.lt.s32.totalorder %v17609_v41, 0  ;;  %v4178_v22 = vsel %vm4174_vm11, %v17403_v46, %v4177_v50 }
 0x478   :  { %v17638_v38 = vadd.s32 %v4209_v53, %v4200_v51  ;;  %v17643_v20 = vadd.s32 %v17549_v37, %v4221_v15  ;;  %v3518_v61 = vsel %vm3511_vm9, %v3514_v57, %v3517_v62  ;;  %vm8763_vm4 = vcmp.eq.s32.totalorder %v17585_v5, 2  ;;  %v20287_v5 = vld [vmem:[#allocation32_spill] sm:$0xff] }
 0x479   :  { %v4435_v0 = vmul.f32 %v4434_v60, %v17544_v35  ;;  %v11354_v19 = vadd.s32 4294967169, %v4764_v43  ;;  %vm3508_vm3 = vweird.f32 %v20283_v54  ;;  %v8458_v46 = vsel %vm8451_vm8, %v8454_v30, %v8457_v8  ;;  %v191_v8 = vpop.permute.xlu1 %190 }
 0x47a   :  { %vm3818_vm11 = vweird.f32 %v20257_v12  ;;  %vm3822_vm6 = vcmp.eq.s32.totalorder %v17596_v40, 0  ;;  %v3826_v59 = vxor.u32 2147483648, %v3809_v13  ;;  %v4420_v11 = vsel %vm4297_vm7, %v4419_v10, %v20282_v27  ;;  %v20290_v12 = vld [vmem:[#allocation28_spill] sm:$0xff] }
 0x47b   :  { %v17660_v15 = vsel %vm17604_vm13, %v20278_v63, %v3953_v47  ;;  %v4090_v37 = vsel %vm4088_vm10, %v4089_v26, %v17609_v41  ;;  %v4179_v9 = vsel %vm4173_vm5, %v4176_v28, %v4178_v22  ;;  %v4236_v62 = vadd.s32 1, %v4232_v16 }
 0x47c   :  { %v3824_v3 = vsel %vm3822_vm6, %v3809_v13, %v3823_v29  ;;  %vm3825_vm9 = vcmp.eq.s32.totalorder %v17596_v40, 2  ;;  %v4427_v31 = vadd.f32 -0.4999988, %v4426_v36  ;;  %vm4235_vm7 = vc.u32 %v17638_v38, %v17643_v20  ;;  %v20285_v36 = vld [vmem:[#allocation34_spill] sm:$0xff] }
 0x47d   :  { %v8762_v2 = vsel %vm8760_vm15, %v3809_v13, %v3823_v29  ;;  %v4422_v48 = vsel %vm17512_vm0, 0, %v4420_v11  ;;  %v4436_v57 = vadd.f32 1.0, %v4435_v0  ;;  %v4770_v51 = vadd.s32 1, %v11354_v19 }
 0x47e   :  { %v17674_v14 = vmul.f32 %v17660_v15, %v17660_v15  ;;  %v4091_v53 = vclz %v4090_v37  ;;  %v4233_v30 = vmul.u32 %v17442_v6, %v4179_v9  ;;  %v17679_v60 = vsel %vm11916_vm1, %v191_v8, %v324_v52 }
 0x47f   :  { %20284 = vst [vmem:[#allocation39_spill] sm:$0xff] %v17679_v60  ;;  %vm3821_vm5 = vcmp.lt.s32.totalorder %v17596_v40, 2  ;;  %v3827_v50 = vsel %vm3825_vm9, %v3826_v59, %v3817_v33  ;;  %v8765_v44 = vsel %vm8763_vm4, %v3826_v59, %v3817_v33  ;;  %v4237_v43 = vsel %vm4235_vm7, %v4236_v62, %v4232_v16 }
 0x480   :  { %v3828_v13 = vsel %vm3821_vm5, %v3824_v3, %v3827_v50  ;;  %v8766_v29 = vsel %vm8759_vm14, %v8762_v2, %v8765_v44  ;;  %v4428_v27 = vmul.f32 %v4427_v31, %v17544_v35  ;;  %v4439_v10 = vadd.s32 3, %v4422_v48  ;;  %v20291_v3 = vld [vmem:[#allocation30_spill] sm:$0xff] }
 0x481   :  { %v4437_v6 = vmul.f32 %v4436_v57, %v17527_v4  ;;  %v3954_v47 = vsub.s32 4, %v20285_v36  ;;  %vm4771_vm0 = vcmp.gt.s32.totalorder %v4770_v51, 0  ;;  %v17691_v40 = vmul.f32 %v20276_v23, %v17679_v60  ;;  %v20293_v2 = vld [vmem:[#allocation14_spill] sm:$0xff] }
 0x482   :  { %v3959_v26 = vmul.f32 -0.001358992, %v17674_v14  ;;  %v3966_v33 = vmul.f32 -0.00019511016, %v17674_v14  ;;  %v11340_v28 = vadd.s32 4294967294, %v4091_v53  ;;  %v4238_v16 = vadd.s32 %v4237_v43, %v4233_v30 }
 0x483   :  { %20286 = vst [vmem:[#allocation13_spill] sm:$0xff] %v17691_v40  ;;  %v17698_v35 = vsel %vm3353_vm12, nan, %v20287_v5  ;;  %v17702_v4 = vsel %vm3508_vm3, nan, %v3518_v61  ;;  %v17706_v22 = vsel %vm3508_vm3, nan, %v8458_v46  ;;  %v17710_v0 = vsel %vm3818_vm11, nan, %v3828_v13 }
 0x484   :  { %v17714_v19 = vsel %vm3818_vm11, nan, %v8766_v29  ;;  %v4429_v59 = vadd.f32 1.0, %v4428_v27  ;;  %v9374_v24 = vand.u32 3, %v4422_v48  ;;  %v4772_v11 = vsel %vm4771_vm0, %v4770_v51, 0 }
 0x485   :  { %v4440_v37 = vand.u32 3, %v4439_v10  ;;  %v4443_v9 = vxor.u32 2147483648, %v4437_v6  ;;  %vm20288_vm12 = vcmp.lt.s32.totalorder %v20278_v63, 0  ;;  %v4453_v54 = vand.u32 2139095040, %v17691_v40 }
 0x486   :  { %v3955_v61 = vsel %vm20288_vm12, %v3954_v47, %v20285_v36  ;;  %v3960_v46 = vadd.f32 0.041655596, %v3959_v26  ;;  %v3967_v62 = vadd.f32 0.008332121, %v3966_v33  ;;  %vm11341_vm6 = vcmp.lt.s32.totalorder %v11340_v28, 0 }
 0x487   :  { %v4239_v8 = vadd.s32 536870912, %v4238_v16  ;;  %v20292_v31 = vsel %vm12700_vm2, %v20290_v12, %v20291_v3  ;;  %vm20294_vm8 = vcmp.lt.s32.totalorder %v20050_v25, 2  ;;  %v4774_v53 = vand.u32 31, %v4772_v11 }
 0x488   :  { %v17728_v48 = vsel %vm20294_vm8, %v20293_v2, %v20292_v31  ;;  %v4446_v50 = vxor.u32 2147483648, %v4429_v59  ;;  %vm9375_vm15 = vcmp.lt.s32.totalorder %v9374_v24, 2  ;;  %vm9376_vm14 = vcmp.eq.s32.totalorder %v9374_v24, 0 }
 0x489   :  { %20295 = vst [vmem:[#allocation44_spill] sm:$0xff] %v17728_v48  ;;  %vm4442_vm10 = vcmp.eq.s32.totalorder %v4440_v37, 0  ;;  %v3957_v44 = vsel %vm17604_vm13, 0, %v3955_v61  ;;  %v17744_v43 = vsel %vm11341_vm6, 0, %v11340_v28  ;;  %v4454_v13 = vshrl.u32 %v4453_v54, 23 }
 0x48a   :  { %vm4438_vm4 = vweird.f32 %v20270_v18  ;;  %v4444_v29 = vsel %vm4442_vm10, %v4429_v59, %v4443_v9  ;;  %v3961_v27 = vmul.f32 %v3960_v46, %v17674_v14  ;;  %v3968_v10 = vmul.f32 %v3967_v62, %v17674_v14 }
 0x48b   :  { %v17749_v36 = vshrl.u32 %v4239_v8, 30  ;;  %vm4445_vm3 = vcmp.eq.s32.totalorder %v4440_v37, 2  ;;  %v9378_v47 = vsel %vm9376_vm14, %v4429_v59, %v4443_v9  ;;  %vm9379_vm11 = vcmp.eq.s32.totalorder %v9374_v24, 2  ;;  %vm20312_vm14 = vmmov %vm20294_vm8 }
 0x48c   :  { %v17751_v26 = vsub.s32 32, %v4774_v53  ;;  %vm4441_vm9 = vcmp.lt.s32.totalorder %v4440_v37, 2  ;;  %v4447_v34 = vsel %vm4445_vm3, %v4446_v50, %v4437_v6  ;;  %v3974_v33 = vadd.s32 3, %v3957_v44 }
 0x48d   :  { %20296 = vst [vmem:[#allocation23_spill] sm:$0xff] %v17749_v36  ;;  %v4099_v28 = vsub.s32 4294967266, %v17744_v43  ;;  %v4448_v5 = vsel %vm4441_vm9, %v4444_v29, %v4447_v34  ;;  %v9381_v61 = vsel %vm9379_vm11, %v4446_v50, %v4437_v6  ;;  %v17754_v54 = vand.u32 3, %v3957_v44 }
 0x48e   :  { %v11348_v12 = vadd.s32 4294967169, %v4454_v13  ;;  %v9382_v46 = vsel %vm9375_vm15, %v9378_v47, %v9381_v61  ;;  %v3962_v62 = vadd.f32 -0.4999988, %v3961_v27  ;;  %v3969_v8 = vadd.f32 -0.16666654, %v3968_v10  ;;  %vm20308_vm15 = vmmov %vm20294_vm8 }
 0x48f   :  { %v4241_v3 = vshll.u32 %v17749_v36, 30  ;;  %v20297_v59 = vmov 2102212464   ;;  %v20298_v31 = vmov 920167782   ;;  %v4095_v6 = vsub.s32 32, %v17744_v43 }
 0x490   :  { %v4786_v9 = vshll.u32 %v20297_v59, %v4774_v53  ;;  %v4787_v37 = vshrl.u32 %v20298_v31, %v17751_v26  ;;  %v4789_v2 = vshll.u32 %v20298_v31, %v4774_v53  ;;  %v20299_v56 = vmov 1326507024  }
 0x491   :  { %v4790_v29 = vshrl.u32 %v20299_v56, %v17751_v26  ;;  %v4100_v50 = vadd.s32 127, %v4099_v28  ;;  %v17766_v44 = vshrl.u32 %v4772_v11, 5  ;;  %v4777_v13 = vshll.u32 %v19809_v58, %v4774_v53 }
 0x492   :  { %v20300_v27 = vmov 2475754826   ;;  %v20301_v47 = vmov 2131351028   ;;  %v4460_v61 = vadd.s32 1, %v11348_v12  ;;  %v17771_v30 = vsub.s32 %v4238_v16, %v4241_v3 }
 0x493   :  { %v4780_v10 = vshll.u32 %v20300_v27, %v4774_v53  ;;  %v4783_v34 = vshll.u32 %v20301_v47, %v4774_v53  ;;  %v4778_v51 = vshrl.u32 %v20300_v27, %v17751_v26  ;;  %v4781_v57 = vshrl.u32 %v20301_v47, %v17751_v26 }
 0x494   :  { %v4784_v28 = vshrl.u32 %v20297_v59, %v17751_v26  ;;  %v4449_v11 = vsel %vm4438_vm4, nan, %v4448_v5  ;;  %v4079_v24 = vadd.s32 %v17475_v21, %v17470_v55  ;;  %v4788_v39 = vor.u32 %v4787_v37, %v4786_v9 }
 0x495   :  { %v4791_v53 = vor.u32 %v4790_v29, %v4789_v2  ;;  %v9383_v16 = vsel %vm4438_vm4, nan, %v9382_v46  ;;  %v3970_v12 = vmul.f32 %v3969_v8, %v17674_v14  ;;  %v20302_v3 = vand.u32 2147483647, %v17581_v45  ;;  %vm20315_vm4 = vmmov %vm20294_vm8 }
 0x496   :  { %vm4795_vm13 = vcmp.lt.s32.totalorder %v17766_v44, 4  ;;  %v3963_v48 = vmul.f32 %v3962_v62, %v17674_v14  ;;  %v4097_v36 = vshrl.u32 %v4079_v24, %v4095_v6  ;;  %v4101_v42 = vshll.u32 %v4100_v50, 23  ;;  %v20304_v24 = vld [vmem:[#allocation19_spill] sm:$0xff] }
 0x497   :  { %v4767_v60 = vand.u32 8388607, %v20302_v3  ;;  %vm4461_vm7 = vcmp.gt.s32.totalorder %v4460_v61, 0  ;;  %v4244_v5 = vsub.s32 0, %v17771_v30  ;;  %v17791_v55 = vor.u32 %v4778_v51, %v4777_v13  ;;  %v20314_v3 = vld [vmem:[#allocation17_spill] sm:$0xff] }
 0x498   :  { %v17793_v21 = vor.u32 %v4781_v57, %v4780_v10  ;;  %v17795_v18 = vor.u32 %v4784_v28, %v4783_v34  ;;  %vm4792_vm5 = vcmp.lt.s32.totalorder %v17766_v44, 1  ;;  %vm4794_vm0 = vcmp.lt.s32.totalorder %v17766_v44, 3 }
 0x499   :  { %v4801_v46 = vsel %vm4795_vm13, %v4788_v39, 920167782  ;;  %v4805_v14 = vsel %vm4795_vm13, %v4791_v53, 1326507024  ;;  %v3971_v62 = vadd.f32 1.0, %v3970_v12  ;;  %vm4243_vm12 = vcmp.lt.s32.totalorder %v17771_v30, 0 }
 0x49a   :  { %v4768_v8 = vor.u32 8388608, %v4767_v60  ;;  %v4462_v51 = vsel %vm4461_vm7, %v4460_v61, 0  ;;  %v17804_v9 = vadd.f32 1.0, %v3963_v48  ;;  %v4096_v57 = vshll.u32 %v17609_v41, %v17744_v43  ;;  %v20311_v53 = vld [vmem:[#allocation29_spill] sm:$0xff] }
 0x49b   :  { %v4102_v37 = vor.u32 4788187, %v4101_v42  ;;  %vm4793_vm6 = vcmp.lt.s32.totalorder %v17766_v44, 2  ;;  %v4800_v2 = vsel %vm4792_vm5, %v17791_v55, %v17793_v21  ;;  %v4802_v29 = vsel %vm4794_vm0, %v17795_v18, %v4801_v46 }
 0x49c   :  { %v4804_v60 = vsel %vm4792_vm5, %v17793_v21, %v17795_v18  ;;  %v4806_v41 = vsel %vm4794_vm0, %v4788_v39, %v4805_v14  ;;  %v17822_v42 = vand.u32 3, %v3974_v33  ;;  %v4098_v48 = vor.u32 %v4097_v36, %v4096_v57 }
 0x49d   :  { %v4245_v43 = vsel %vm4243_vm12, %v4244_v5, %v17771_v30  ;;  %v4464_v6 = vand.u32 31, %v4462_v51  ;;  %v20303_v50 = vsel %vm12700_vm2, %v17482_v7, %v17698_v35  ;;  %v10333_v10 = vsel %vm12700_vm2, %v4449_v11, %v9383_v16 }
 0x49e   :  { %v17833_v13 = vsel %vm20294_vm8, %v20304_v24, %v20303_v50  ;;  %v17838_v39 = vmul.f32 %v3971_v62, %v17660_v15  ;;  %v17840_v36 = vshll.u32 %v4768_v8, 8  ;;  %v3981_v33 = vxor.u32 2147483648, %v17804_v9  ;;  %v20307_v15 = vld [vmem:[#allocation24_spill] sm:$0xff] }
 0x49f   :  { %20305 = vst [vmem:[#allocation20_spill] sm:$0xff] %v17833_v13  ;;  %v4103_v34 = vand.u32 2147483647, %v4102_v37  ;;  %v17845_v61 = vsel %vm4793_vm6, %v4800_v2, %v4802_v29  ;;  %v17849_v7 = vsel %vm4793_vm6, %v4804_v60, %v4806_v41  ;;  %v20306_v35 = vsel %vm12700_vm2, %v17702_v4, %v17706_v22 }
 0x4a0   :  { %v17859_v28 = vsel %vm20308_vm15, %v20307_v15, %v20306_v35  ;;  %v20310_v11 = vsel %vm12700_vm2, %v17710_v0, %v17714_v19  ;;  %vm8917_vm10 = vcmp.eq.s32.totalorder %v17754_v54, 2  ;;  %v4246_v12 = vclz %v4245_v43 }
 0x4a1   :  { %20309 = vst [vmem:[#allocation18_spill] sm:$0xff] %v17859_v28  ;;  %v17869_v16 = vsel %vm20312_vm14, %v20311_v53, %v20310_v11  ;;  %v17875_v4 = vsel %vm20315_vm4, %v20314_v3, %v10333_v10  ;;  %vm3980_vm3 = vcmp.eq.s32.totalorder %v17822_v42, 2  ;;  %v4105_v22 = vcvt.s32.f32 %v4098_v48  ;;  %v328_v3 = vpop.permute.xlu1 %327 }
 0x4a2   :  { %20313 = vst [vmem:[#allocation33_spill] sm:$0xff] %v17869_v16  ;;  %v17878_v5 = vsub.s32 32, %v4464_v6  ;;  %v4809_v19 = vand.u32 65535, %v17840_v36  ;;  %v19747_v46 = vshrl.u32 %v17849_v7, 16  ;;  %v19746_v14 = vshrl.u32 %v17845_v61, 16 }
 0x4a3   :  { %20316 = vst [vmem:[#allocation7_spill] sm:$0xff] %v17875_v4  ;;  %v17885_v62 = vsel %vm3980_vm3, %v3981_v33, %v17838_v39  ;;  %v17888_v8 = vsel %vm8917_vm10, %v3981_v33, %v17838_v39  ;;  %v17890_v57 = vmul.f32 %v4105_v22, %v4103_v34  ;;  %v11343_v2 = vadd.s32 4294967294, %v4246_v12  ;;  %v20317_v4 = vld [vmem:[#allocation26_spill] sm:$0xff] }
 0x4a4   :  { %v17894_v29 = vshrl.u32 %v17840_v36, 16  ;;  %v4833_v60 = vand.u32 65535, %v17845_v61  ;;  %v19748_v41 = vand.u32 2147483647, %v17691_v40  ;;  %vm3977_vm11 = vcmp.eq.s32.totalorder %v17822_v42, 0 }
 0x4a5   :  { %v4476_v48 = vshll.u32 %v20297_v59, %v4464_v6  ;;  %v4477_v43 = vshrl.u32 %v20298_v31, %v17878_v5  ;;  %v4479_v50 = vshll.u32 %v20298_v31, %v4464_v6  ;;  %v4480_v24 = vshrl.u32 %v20299_v56, %v17878_v5 }
 0x4a6   :  { %v4811_v10 = vand.u32 65535, %v17849_v7  ;;  %v17908_v33 = vmul.u32 %v19747_v46, %v4809_v19  ;;  %v17912_v34 = vmul.u32 %v19746_v14, %v4809_v19  ;;  %v17914_v35 = vshrl.u32 %v4462_v51, 5 }
 0x4a7   :  { %v4467_v15 = vshll.u32 %v19809_v58, %v4464_v6  ;;  %v4468_v11 = vshrl.u32 %v20300_v27, %v17878_v5  ;;  %v4470_v53 = vshll.u32 %v20300_v27, %v4464_v6  ;;  %v4471_v12 = vshrl.u32 %v20301_v47, %v17878_v5 }
 0x4a8   :  { %vm11344_vm9 = vcmp.lt.s32.totalorder %v11343_v2, 0  ;;  %v4457_v22 = vand.u32 8388607, %v19748_v41  ;;  %v4473_v37 = vshll.u32 %v20301_v47, %v4464_v6  ;;  %v4474_v51 = vshrl.u32 %v20297_v59, %v17878_v5 }
 0x4a9   :  { %v4835_v14 = vmul.u32 %v4833_v60, %v4809_v19  ;;  %v17928_v46 = vmul.u32 %v4833_v60, %v17894_v29  ;;  %v4478_v0 = vor.u32 %v4477_v43, %v4476_v48  ;;  %v4481_v16 = vor.u32 %v4480_v24, %v4479_v50  ;;  %v20323_v50 = vld [vmem:[#allocation10_spill] sm:$0xff] }
 0x4aa   :  { %vm3987_vm7 = vcmp.lt.s32.totalorder %v20317_v4, 0  ;;  %v4813_v28 = vmul.u32 %v4811_v10, %v4809_v19  ;;  %v17932_v13 = vmul.u32 %v4811_v10, %v17894_v29  ;;  %vm19756_vm12 = vcmp.lt.s32.totalorder %v17914_v35, 4 }
 0x4ab   :  { %v17938_v6 = vsel %vm11916_vm1, %v17421_v32, %v328_v3  ;;  %v4817_v41 = vshll.u32 %v17908_v33, 16  ;;  %v4839_v60 = vshll.u32 %v17912_v34, 16  ;;  %v17942_v52 = vor.u32 %v4468_v11, %v4467_v15 }
 0x4ac   :  { %20318 = vst [vmem:[#allocation43_spill] sm:$0xff] %v17938_v6  ;;  %v17944_v48 = vor.u32 %v4471_v12, %v4470_v53  ;;  %v17946_v43 = vor.u32 %v4474_v51, %v4473_v37  ;;  %vm4482_vm8 = vcmp.lt.s32.totalorder %v17914_v35, 1  ;;  %v17951_v19 = vmul.f32 %v20276_v23, %v17938_v6  ;;  %v20325_v37 = vld [vmem:[#allocation31_spill] sm:$0xff] }
 0x4ad   :  { %20319 = vst [vmem:[#allocation16_spill] sm:$0xff] %v17942_v52  ;;  %vm20324_vm15 = vcmp.lt.s32.totalorder %v20050_v25, 26  ;;  %vm19760_vm14 = vcmp.lt.s32.totalorder %v17914_v35, 3  ;;  %v4491_v24 = vsel %vm19756_vm12, %v4478_v0, 920167782  ;;  %vm3976_vm4 = vcmp.lt.s32.totalorder %v17822_v42, 2 }
 0x4ae   :  { %20320 = vst [vmem:[#allocation15_spill] sm:$0xff] %v17944_v48  ;;  %v10381_v32 = vsel %vm20324_vm15, %v20323_v50, 0.0  ;;  %v4495_v10 = vsel %vm19756_vm12, %v4481_v16, 1326507024  ;;  %vm20326_vm10 = vmmov %vm20324_vm15  ;;  %v20327_v11 = vxor.u32 2147483648, %v17838_v39  ;;  %vm8914_vm3 = vcmp.eq.s32.totalorder %v17754_v54, 0 }
 0x4af   :  { %20321 = vst [vmem:[#allocation34_spill] sm:$0xff] %v17946_v43  ;;  %v10382_v15 = vsel %vm20326_vm10, %v20325_v37, 0.0  ;;  %v4458_v12 = vor.u32 8388608, %v4457_v22  ;;  %v4608_v3 = vand.u32 2139095040, %v17951_v19  ;;  %v20328_v16 = vand.u32 2147483647, %v20317_v4 }
 0x4b0   :  { %20322 = vst [vmem:[#allocation32_spill] sm:$0xff] %v17951_v19  ;;  %v3979_v53 = vsel %vm3977_vm11, %v17804_v9, %v20327_v11  ;;  %v10409_v51 = vpack.c.bf16 %v10382_v15, %v10381_v32  ;;  %v4107_v37 = vxor.u32 2147483648, %v17890_v57  ;;  %v4249_v6 = vsel %vm11344_vm9, 0, %v11343_v2 }
 0x4b1   :  { %vm17974_vm15 = vcmp.le.f32.partialorder %v20328_v16, 0.7853982  ;;  %vm19761_vm10 = vcmp.lt.s32.totalorder %v17914_v35, 2  ;;  %v4490_v22 = vsel %vm4482_vm8, %v17942_v52, %v17944_v48  ;;  %v4492_v32 = vsel %vm19760_vm14, %v17946_v43, %v4491_v24 }
 0x4b2   :  { %v4494_v15 = vsel %vm4482_vm8, %v17944_v48, %v17946_v43  ;;  %v4496_v11 = vsel %vm19760_vm14, %v4478_v0, %v4495_v10  ;;  %v4609_v2 = vshrl.u32 %v4608_v3, 23  ;;  %vm20331_vm11 = vcmask 261120  }
 0x4b3   :  { %11474 = vmatmul.msk.bf16.gmra.mxu0 %vm20331_vm11, %v10409_v51  ;;  %v4819_v16 = vshll.u32 %v17932_v13, 16  ;;  %v4823_v40 = vadd.s32 %v4817_v41, %v4813_v28  ;;  %v4841_v45 = vshll.u32 %v17928_v46, 16  ;;  %v4845_v25 = vadd.s32 %v4839_v60, %v4835_v14 }
 0x4b4   :  { %vm4821_vm9 = vc.u32 %v4813_v28, %v4817_v41  ;;  %vm4843_vm12 = vc.u32 %v4835_v14, %v4839_v60  ;;  %v17997_v24 = vshll.u32 %v4458_v12, 8  ;;  %v11351_v52 = vadd.s32 4294967169, %v4609_v2 }
 0x4b5   :  { %v4108_v48 = vsel %vm3987_vm7, %v4107_v37, %v17890_v57  ;;  %v4254_v43 = vsub.s32 4294967266, %v4249_v6  ;;  %v18004_v0 = vsel %vm19761_vm10, %v4490_v22, %v4492_v32  ;;  %v4497_v10 = vsel %vm19761_vm10, %v4494_v15, %v4496_v11 }
 0x4b6   :  { %20332 = vst [vmem:[#allocation28_spill] sm:$0xff] %v17997_v24  ;;  %v4250_v3 = vsub.s32 32, %v4249_v6  ;;  %v20333_v28 = vshrl.u32 %v17849_v7, 16  ;;  %v20334_v41 = vshrl.u32 %v17845_v61, 16  ;;  %v4615_v12 = vadd.s32 1, %v11351_v52 }
 0x4b7   :  { %v4822_v57 = vsel %vm4821_vm9, 1, %v19819_v1  ;;  %vm18015_vm11 = vc.u32 %v4823_v40, %v4819_v16  ;;  %v4844_v37 = vsel %vm4843_vm12, 1, %v19819_v1  ;;  %vm18020_vm14 = vc.u32 %v4845_v25, %v4841_v45 }
 0x4b8   :  { %v4816_v14 = vmul.u32 %v20333_v28, %v17894_v29  ;;  %v4838_v60 = vmul.u32 %v20334_v41, %v17894_v29  ;;  %v4499_v7 = vand.u32 65535, %v17997_v24  ;;  %v4502_v32 = vshrl.u32 %v4497_v10, 16 }
 0x4b9   :  { %v4524_v15 = vshrl.u32 %v18004_v0, 16  ;;  %vm4616_vm10 = vcmp.gt.s32.totalorder %v4615_v12, 0  ;;  %v18029_v52 = vsel %vm3976_vm4, %v3979_v53, %v17885_v62  ;;  %v20339_v40 = vxor.u32 2147483648, %v17838_v39 }
 0x4ba   :  { %v4234_v29 = vadd.s32 %v17643_v20, %v17638_v38  ;;  %v4255_v11 = vadd.s32 127, %v4254_v43  ;;  %v18043_v2 = vsel %vm17974_vm15, %v20317_v4, %v4108_v48  ;;  %v4824_v16 = vadd.s32 %v4822_v57, %v4816_v14 }
 0x4bb   :  { %v18036_v61 = vsel %vm8914_vm3, %v17804_v9, %v20339_v40  ;;  %20340 = vst [vmem:[#allocation30_spill] sm:$0xff] %v18043_v2  ;;  %v4846_v42 = vadd.s32 %v4844_v37, %v4838_v60  ;;  %v4617_v62 = vsel %vm4616_vm10, %v4615_v12, 0  ;;  %v4776_v39 = vshrl.u32 %v19809_v58, %v17751_v26 }
 0x4bc   :  { %v4252_v53 = vshrl.u32 %v4234_v29, %v4250_v3  ;;  %v4826_v9 = vsel %vm18015_vm11, 1, %v19819_v1  ;;  %v4848_v38 = vsel %vm18020_vm14, 1, %v19819_v1  ;;  %v4501_v20 = vand.u32 65535, %v4497_v10 }
 0x4bd   :  { %v18053_v43 = vmul.u32 %v4502_v32, %v4499_v7  ;;  %v4523_v48 = vand.u32 65535, %v18004_v0  ;;  %v18056_v28 = vmul.u32 %v4524_v15, %v4499_v7  ;;  %v4251_v3 = vshll.u32 %v17771_v30, %v4249_v6 }
 0x4be   :  { %v4256_v14 = vshll.u32 %v4255_v11, 23  ;;  %v4797_v26 = vsel %vm4795_vm13, %v17795_v18, 2102212464  ;;  %v4619_v41 = vand.u32 31, %v4617_v62  ;;  %v4818_v60 = vshrl.u32 %v17908_v33, 16 }
 0x4bf   :  { %v4828_v12 = vadd.s32 %v4826_v9, %v4824_v16  ;;  %v4840_v57 = vshrl.u32 %v17912_v34, 16  ;;  %v4850_v10 = vadd.s32 %v4848_v38, %v4846_v42  ;;  %v18066_v51 = vmul.f32 %v18043_v2, %v18043_v2  ;;  %v336_v16 = vpop.permute.xlu0 %335 }
 0x4c0   :  { %v18068_v0 = vor.u32 %v4252_v53, %v4251_v3  ;;  %v18073_v30 = vsel %vm4792_vm5, %v4776_v39, %v17791_v55  ;;  %v4500_v18 = vshrl.u32 %v17997_v24, 16  ;;  %v4503_v6 = vmul.u32 %v4501_v20, %v4499_v7  ;;  %v206_v55 = vpop.permute.xlu1 %205 }
 0x4c1   :  { %v4507_v33 = vshll.u32 %v18053_v43, 16  ;;  %v4525_v37 = vmul.u32 %v4523_v48, %v4499_v7  ;;  %v4529_v34 = vshll.u32 %v18056_v28, 16  ;;  %v18078_v22 = vor.u32 4788187, %v4256_v14 }
 0x4c2   :  { %v18083_v40 = vsel %vm4794_vm0, %v17793_v21, %v4797_v26  ;;  %v4820_v29 = vshrl.u32 %v17932_v13, 16  ;;  %v18086_v11 = vsub.s32 32, %v4619_v41  ;;  %v4829_v42 = vadd.s32 %v4828_v12, %v4818_v60 }
 0x4c3   :  { %v4842_v53 = vshrl.u32 %v17928_v46, 16  ;;  %v18089_v39 = vadd.s32 %v4845_v25, %v4841_v45  ;;  %v4851_v7 = vadd.s32 %v4850_v10, %v4840_v57  ;;  %v18091_v9 = vmul.u32 %v4501_v20, %v4500_v18 }
 0x4c4   :  { %v4506_v38 = vmul.u32 %v4502_v32, %v4500_v18  ;;  %v18093_v3 = vmul.u32 %v4523_v48, %v4500_v18  ;;  %v19768_v21 = vand.u32 2147483647, %v17951_v19  ;;  %vm18096_vm13 = vc.u32 %v4503_v6, %v4507_v33  ;;  %v20374_v19 = vld [vmem:[#allocation5_spill] sm:$0xff] }
 0x4c5   :  { %vm18100_vm5 = vc.u32 %v4525_v37, %v4529_v34  ;;  %v18104_v26 = vshrl.u32 %v4617_v62, 5  ;;  %v18108_v25 = vsel %vm11916_vm1, %v206_v55, %v336_v16  ;;  %v4622_v45 = vshll.u32 %v19809_v58, %v4619_v41 }
 0x4c6   :  { %20345 = vst [vmem:[#allocation14_spill] sm:$0xff] %v18108_v25  ;;  %v4623_v46 = vshrl.u32 %v20300_v27, %v18086_v11  ;;  %v4625_v32 = vshll.u32 %v20300_v27, %v4619_v41  ;;  %v4626_v20 = vshrl.u32 %v20301_v47, %v18086_v11  ;;  %v4628_v48 = vshll.u32 %v20301_v47, %v4619_v41 }
 0x4c7   :  { %v4629_v62 = vshrl.u32 %v20297_v59, %v18086_v11  ;;  %v4631_v60 = vshll.u32 %v20297_v59, %v4619_v41  ;;  %v4632_v12 = vshrl.u32 %v20298_v31, %v18086_v11  ;;  %v4509_v57 = vshll.u32 %v18091_v9, 16 }
 0x4c8   :  { %v4513_v10 = vadd.s32 %v4507_v33, %v4503_v6  ;;  %v4528_v55 = vmul.u32 %v4524_v15, %v4500_v18  ;;  %v4612_v16 = vand.u32 8388607, %v19768_v21  ;;  %v4512_v2 = vsel %vm18096_vm13, 1, %v19819_v1 }
 0x4c9   :  { %v4531_v17 = vshll.u32 %v18093_v3, 16  ;;  %v4534_v47 = vsel %vm18100_vm5, 1, %v19819_v1  ;;  %v18132_v27 = vadd.s32 %v4529_v34, %v4525_v37  ;;  %v18134_v59 = vor.u32 %v4623_v46, %v4622_v45 }
 0x4ca   :  { %v18136_v24 = vor.u32 %v4626_v20, %v4625_v32  ;;  %v4634_v15 = vshll.u32 %v20298_v31, %v4619_v41  ;;  %v18141_v18 = vmul.f32 %v20276_v23, %v18108_v25  ;;  %vm8913_vm0 = vcmp.lt.s32.totalorder %v17754_v54, 2 }
 0x4cb   :  { %v18144_v6 = vor.u32 %v4629_v62, %v4628_v48  ;;  %v4633_v33 = vor.u32 %v4632_v12, %v4631_v60  ;;  %v4635_v14 = vshrl.u32 %v20299_v56, %v18086_v11  ;;  %vm4637_vm12 = vcmp.lt.s32.totalorder %v18104_v26, 1 }
 0x4cc   :  { %20346 = vst [vmem:[#allocation19_spill] sm:$0xff] %v18141_v18  ;;  %v18149_v37 = vadd.s32 %v4829_v42, %v4820_v29  ;;  %v4852_v34 = vadd.s32 %v4851_v7, %v4842_v53  ;;  %vm4515_vm14 = vc.u32 %v4513_v10, %v4509_v57  ;;  %v4613_v13 = vor.u32 8388608, %v4612_v16 }
 0x4cd   :  { %vm4537_vm4 = vc.u32 %v18132_v27, %v4531_v17  ;;  %v4636_v41 = vor.u32 %v4635_v14, %v4634_v15  ;;  %vm4639_vm3 = vcmp.lt.s32.totalorder %v18104_v26, 3  ;;  %vm4640_vm10 = vcmp.lt.s32.totalorder %v18104_v26, 4 }
 0x4ce   :  { %v4514_v45 = vadd.s32 %v4512_v2, %v4506_v38  ;;  %v4536_v46 = vadd.s32 %v4534_v47, %v4528_v55  ;;  %vm4638_vm9 = vcmp.lt.s32.totalorder %v18104_v26, 2  ;;  %v4645_v29 = vsel %vm4637_vm12, %v18134_v59, %v18136_v24 }
 0x4cf   :  { %v4646_v42 = vsel %vm4640_vm10, %v4633_v33, 920167782  ;;  %v4649_v53 = vsel %vm4637_vm12, %v18136_v24, %v18144_v6  ;;  %v4650_v7 = vsel %vm4640_vm10, %v4636_v41, 1326507024  ;;  %v4918_v47 = vand.u32 2139095040, %v18141_v18 }
 0x4d0   :  { %v4516_v2 = vsel %vm4515_vm14, 1, %v19819_v1  ;;  %v4538_v38 = vsel %vm4537_vm4, 1, %v19819_v1  ;;  %v4647_v32 = vsel %vm4639_vm3, %v18144_v6, %v4646_v42  ;;  %v18175_v20 = vshll.u32 %v4613_v13, 8 }
 0x4d1   :  { %v4258_v48 = vand.u32 2147483647, %v18078_v22  ;;  %v4799_v62 = vsel %vm4793_vm6, %v18073_v30, %v18083_v40  ;;  %v18184_v60 = vsel %vm4638_vm9, %v4645_v29, %v4647_v32  ;;  %v4651_v12 = vsel %vm4639_vm3, %v4633_v33, %v4650_v7 }
 0x4d2   :  { %vm4855_vm11 = vc.u32 %v18149_v37, %v18089_v39  ;;  %v4856_v57 = vadd.s32 1, %v4852_v34  ;;  %v4508_v10 = vshrl.u32 %v18053_v43, 16  ;;  %v18193_v22 = vsel %vm4638_vm9, %v4649_v53, %v4651_v12 }
 0x4d3   :  { %v4518_v55 = vadd.s32 %v4516_v2, %v4514_v45  ;;  %v4530_v44 = vshrl.u32 %v18056_v28, 16  ;;  %v4540_v30 = vadd.s32 %v4538_v38, %v4536_v46  ;;  %v4919_v40 = vshrl.u32 %v4918_v47, 23  ;;  %v20347_v28 = vld [vmem:[#allocation27_spill] sm:$0xff]  ;;  %v20349_v38 = vld [vmem:[#allocation34_spill] sm:$0xff] }
 0x4d4   :  { %vm3973_vm6 = vweird.f32 %v20278_v63  ;;  %v8920_v16 = vsel %vm8913_vm0, %v18036_v61, %v17888_v8  ;;  %v4260_v15 = vcvt.s32.f32 %v18068_v0  ;;  %v4654_v43 = vand.u32 65535, %v18175_v20 }
 0x4d5   :  { %v4679_v33 = vshrl.u32 %v18184_v60, 16  ;;  %v4114_v14 = vmul.f32 -0.001358992, %v18066_v51  ;;  %v4121_v13 = vmul.f32 -0.00019511016, %v18066_v51  ;;  %vm4142_vm13 = vcmp.lt.s32.totalorder %v20347_v28, 0 }
 0x4d6   :  { %v4853_v41 = vmul.u32 %v17840_v36, %v4799_v62  ;;  %v4657_v45 = vshrl.u32 %v18193_v22, 16  ;;  %v4261_v46 = vmul.f32 %v4260_v15, %v4258_v48  ;;  %v4857_v54 = vsel %vm4855_vm11, %v4856_v57, %v4852_v34  ;;  %v20355_v15 = vld [vmem:[#allocation15_spill] sm:$0xff] }
 0x4d7   :  { %v4466_v8 = vshrl.u32 %v19809_v58, %v17878_v5  ;;  %v4510_v61 = vshrl.u32 %v18091_v9, 16  ;;  %v4519_v0 = vadd.s32 %v4518_v55, %v4508_v10  ;;  %v4532_v29 = vshrl.u32 %v18093_v3, 16  ;;  %v20354_v10 = vld [vmem:[#allocation16_spill] sm:$0xff] }
 0x4d8   :  { %v4541_v42 = vadd.s32 %v4540_v30, %v4530_v44  ;;  %v11357_v53 = vadd.s32 4294967169, %v4919_v40  ;;  %v20348_v36 = vsub.s32 4, %v17573_v49  ;;  %v4655_v47 = vshrl.u32 %v18175_v20, 16 }
 0x4d9   :  { %v4678_v34 = vand.u32 65535, %v18184_v60  ;;  %v18223_v2 = vmul.u32 %v4679_v33, %v4654_v43  ;;  %v4115_v5 = vadd.f32 0.041655596, %v4114_v14  ;;  %vm20350_vm5 = vcmp.lt.s32.totalorder %v17914_v35, 4 }
 0x4da   :  { %v4110_v7 = vsel %vm3987_vm7, %v20348_v36, %v17573_v49  ;;  %v4487_v9 = vsel %vm20350_vm5, %v20349_v38, 2102212464  ;;  %v4656_v32 = vand.u32 65535, %v18193_v22  ;;  %v18229_v48 = vmul.u32 %v4657_v45, %v4654_v43 }
 0x4db   :  { %v4122_v62 = vadd.f32 0.008332121, %v4121_v13  ;;  %v20351_v12 = vand.u32 2147483647, %v20347_v28  ;;  %v4262_v57 = vxor.u32 2147483648, %v4261_v46  ;;  %v18237_v60 = vadd.s32 %v4857_v54, %v4853_v41 }
 0x4dc   :  { %v4486_v55 = vsel %vm4482_vm8, %v4466_v8, %v20354_v10  ;;  %v18242_v44 = vadd.s32 %v4519_v0, %v4510_v61  ;;  %v18247_v22 = vadd.s32 %v18132_v27, %v4531_v17  ;;  %v4542_v30 = vadd.s32 %v4541_v42, %v4532_v29 }
 0x4dd   :  { %vm18233_vm0 = vcmp.le.f32.partialorder %v20351_v12, 0.7853982  ;;  %v4925_v40 = vadd.s32 1, %v11357_v53  ;;  %vm20356_vm7 = vcmp.lt.s32.totalorder %v17914_v35, 3  ;;  %v4680_v13 = vmul.u32 %v4678_v34, %v4654_v43 }
 0x4de   :  { %v4488_v14 = vsel %vm20356_vm7, %v20355_v15, %v4487_v9  ;;  %v18252_v41 = vmul.u32 %v4678_v34, %v4655_v47  ;;  %v4684_v54 = vshll.u32 %v18223_v2, 16  ;;  %v18258_v8 = vsel %vm3973_vm6, nan, %v18029_v52 }
 0x4df   :  { %20357 = vst [vmem:[#allocation24_spill] sm:$0xff] %v18258_v8  ;;  %v4658_v3 = vmul.u32 %v4656_v32, %v4654_v43  ;;  %v18260_v61 = vmul.u32 %v4656_v32, %v4655_v47  ;;  %v4662_v17 = vshll.u32 %v18229_v48, 16  ;;  %v4116_v27 = vmul.f32 %v4115_v5, %v18066_v51 }
 0x4e0   :  { %v4123_v0 = vmul.f32 %v4122_v62, %v18066_v51  ;;  %v4263_v29 = vsel %vm4142_vm13, %v4262_v57, %v4261_v46  ;;  %v4859_v42 = vadd.s32 536870912, %v18237_v60  ;;  %vm20358_vm8 = vcmp.lt.s32.totalorder %v17914_v35, 2  ;;  %v20361_v57 = vld [vmem:[#allocation28_spill] sm:$0xff] }
 0x4e1   :  { %v4489_v53 = vsel %vm20358_vm8, %v4486_v55, %v4488_v14  ;;  %vm4545_vm14 = vc.u32 %v18242_v44, %v18247_v22  ;;  %v4546_v52 = vadd.s32 1, %v4542_v30  ;;  %vm4926_vm4 = vcmp.gt.s32.totalorder %v4925_v40, 0 }
 0x4e2   :  { %v19769_v43 = vshll.u32 %v18252_v41, 16  ;;  %vm4688_vm11 = vc.u32 %v4680_v13, %v4684_v54  ;;  %v18273_v36 = vadd.s32 %v4684_v54, %v4680_v13  ;;  %v4927_v34 = vsel %vm4926_vm4, %v4925_v40, 0 }
 0x4e3   :  { %v4664_v5 = vshll.u32 %v18260_v61, 16  ;;  %vm4666_vm5 = vc.u32 %v4658_v3, %v4662_v17  ;;  %v4668_v46 = vadd.s32 %v4662_v17, %v4658_v3  ;;  %v4929_v38 = vand.u32 31, %v4927_v34 }
 0x4e4   :  { %v18278_v35 = vsel %vm3973_vm6, nan, %v8920_v16  ;;  %v18282_v9 = vsel %vm17974_vm15, 0, %v4110_v7  ;;  %v18284_v32 = vshrl.u32 %v4859_v42, 30  ;;  %v4683_v62 = vmul.u32 %v4679_v33, %v4655_v47 }
 0x4e5   :  { %20359 = vst [vmem:[#allocation29_spill] sm:$0xff] %v18278_v35  ;;  %v18289_v12 = vsel %vm18233_vm0, %v20347_v28, %v4263_v29  ;;  %v4543_v10 = vmul.u32 %v20361_v57, %v4489_v53  ;;  %v4661_v55 = vmul.u32 %v4657_v45, %v4655_v47  ;;  %v4689_v40 = vsel %vm4688_vm11, 1, %v19819_v1  ;;  %v20373_v35 = vld [vmem:[#allocation21_spill] sm:$0xff] }
 0x4e6   :  { %20360 = vst [vmem:[#allocation17_spill] sm:$0xff] %v18284_v32  ;;  %v4547_v63 = vsel %vm4545_vm14, %v4546_v52, %v4542_v30  ;;  %v4667_v50 = vsel %vm4666_vm5, 1, %v19819_v1  ;;  %vm4692_vm15 = vc.u32 %v18273_v36, %v19769_v43  ;;  %v18300_v16 = vsub.s32 32, %v4929_v38 }
 0x4e7   :  { %v4117_v33 = vadd.f32 -0.4999988, %v4116_v27  ;;  %v18302_v7 = vadd.f32 -0.16666654, %v4123_v0  ;;  %v18305_v15 = vadd.s32 3, %v18282_v9  ;;  %vm4670_vm6 = vc.u32 %v4668_v46, %v4664_v5 }
 0x4e8   :  { %v18309_v45 = vmul.f32 %v18289_v12, %v18289_v12  ;;  %v4861_v47 = vshll.u32 %v18284_v32, 30  ;;  %v4691_v30 = vadd.s32 %v4689_v40, %v4683_v62  ;;  %v19771_v14 = vand.u32 2147483647, %v18141_v18 }
 0x4e9   :  { %v18313_v13 = vadd.s32 %v4547_v63, %v4543_v10  ;;  %v4669_v54 = vadd.s32 %v4667_v50, %v4661_v55  ;;  %v4693_v3 = vsel %vm4692_vm15, 1, %v19819_v1  ;;  %v20362_v17 = vmov 2102212464  }
 0x4ea   :  { %v4941_v27 = vshll.u32 %v20362_v17, %v4929_v38  ;;  %v4671_v0 = vsel %vm4670_vm6, 1, %v19819_v1  ;;  %v4685_v29 = vshrl.u32 %v18223_v2, 16  ;;  %v18319_v42 = vshrl.u32 %v4927_v34, 5 }
 0x4eb   :  { %v4942_v53 = vshrl.u32 %v20298_v31, %v18300_v16  ;;  %v4932_v52 = vshll.u32 %v19809_v58, %v4929_v38  ;;  %v20363_v5 = vmov 2475754826   ;;  %v20364_v57 = vmov 2131351028  }
 0x4ec   :  { %v4933_v46 = vshrl.u32 %v20363_v5, %v18300_v16  ;;  %v4935_v62 = vshll.u32 %v20363_v5, %v4929_v38  ;;  %v4936_v10 = vshrl.u32 %v20364_v57, %v18300_v16  ;;  %v4695_v55 = vadd.s32 %v4693_v3, %v4691_v30 }
 0x4ed   :  { %v4922_v40 = vand.u32 8388607, %v19771_v14  ;;  %v4938_v2 = vshll.u32 %v20364_v57, %v4929_v38  ;;  %v4939_v34 = vshrl.u32 %v20362_v17, %v18300_v16  ;;  %v18335_v63 = vsub.s32 %v18237_v60, %v4861_v47 }
 0x4ee   :  { %v4663_v50 = vshrl.u32 %v18229_v48, 16  ;;  %v4673_v21 = vadd.s32 %v4671_v0, %v4669_v54  ;;  %v4943_v43 = vor.u32 %v4942_v53, %v4941_v27  ;;  %v4549_v25 = vadd.s32 536870912, %v18313_v13 }
 0x4ef   :  { %v4621_v30 = vshrl.u32 %v19809_v58, %v18086_v11  ;;  %v4687_v3 = vshrl.u32 %v18252_v41, 16  ;;  %vm4950_vm7 = vcmp.lt.s32.totalorder %v18319_v42, 4  ;;  %v18343_v14 = vor.u32 %v4933_v46, %v4932_v52  ;;  %v20365_v52 = vld [vmem:[#allocation23_spill] sm:$0xff] }
 0x4f0   :  { %v18345_v18 = vor.u32 %v4936_v10, %v4935_v62  ;;  %v4944_v60 = vshll.u32 %v20298_v31, %v4929_v38  ;;  %v4945_v48 = vshrl.u32 %v20299_v56, %v18300_v16  ;;  %v4696_v47 = vadd.s32 %v4695_v55, %v4685_v29 }
 0x4f1   :  { %v4923_v54 = vor.u32 8388608, %v4922_v40  ;;  %v18350_v27 = vor.u32 %v4939_v34, %v4938_v2  ;;  %vm4947_vm8 = vcmp.lt.s32.totalorder %v18319_v42, 1  ;;  %v4665_v11 = vshrl.u32 %v18260_v61, 16 }
 0x4f2   :  { %v4674_v0 = vadd.s32 %v4673_v21, %v4663_v50  ;;  %vm4949_vm14 = vcmp.lt.s32.totalorder %v18319_v42, 3  ;;  %v4956_v53 = vsel %vm4950_vm7, %v4943_v43, 920167782  ;;  %v4264_v46 = vsub.s32 4, %v20365_v52 }
 0x4f3   :  { %v4276_v38 = vmul.f32 -0.00019511016, %v18309_v45  ;;  %v4864_v62 = vsub.s32 0, %v18335_v63  ;;  %v4642_v29 = vsel %vm4640_vm10, %v18144_v6, 2102212464  ;;  %v18363_v10 = vshrl.u32 %v4549_v25, 30 }
 0x4f4   :  { %v4946_v55 = vor.u32 %v4945_v48, %v4944_v60  ;;  %vm4948_vm4 = vcmp.lt.s32.totalorder %v18319_v42, 2  ;;  %v4955_v21 = vsel %vm4947_vm8, %v18343_v14, %v18345_v18  ;;  %vm4863_vm11 = vcmp.lt.s32.totalorder %v18335_v63, 0 }
 0x4f5   :  { %20366 = vst [vmem:[#allocation10_spill] sm:$0xff] %v18363_v10  ;;  %v4697_v61 = vadd.s32 %v4696_v47, %v4687_v3  ;;  %v4957_v40 = vsel %vm4949_vm14, %v18350_v27, %v4956_v53  ;;  %v18374_v2 = vshll.u32 %v4923_v54, 8  ;;  %v4641_v25 = vsel %vm4637_vm12, %v4621_v30, %v18134_v59 }
 0x4f6   :  { %v4643_v6 = vsel %vm4639_vm3, %v18136_v24, %v4642_v29  ;;  %v18382_v34 = vadd.s32 %v4674_v0, %v4665_v11  ;;  %v20368_v50 = vshll.u32 %v18252_v41, 16  ;;  %v4118_v60 = vmul.f32 %v4117_v33, %v18066_v51 }
 0x4f7   :  { %v4269_v48 = vmul.f32 -0.001358992, %v18309_v45  ;;  %v18393_v47 = vsel %vm4948_vm4, %v4955_v21, %v4957_v40  ;;  %v4959_v59 = vsel %vm4947_vm8, %v18345_v18, %v18350_v27  ;;  %v4277_v24 = vadd.f32 0.008332121, %v4276_v38 }
 0x4f8   :  { %20367 = vst [vmem:[#allocation31_spill] sm:$0xff] %v18382_v34  ;;  %v18387_v3 = vadd.s32 %v18273_v36, %v20368_v50  ;;  %v4865_v30 = vsel %vm4863_vm11, %v4864_v62, %v18335_v63  ;;  %v4551_v41 = vshll.u32 %v18363_v10, 30  ;;  %v4960_v36 = vsel %vm4950_vm7, %v4946_v55, 1326507024 }
 0x4f9   :  { %v4644_v33 = vsel %vm4638_vm9, %v4641_v25, %v4643_v6  ;;  %v4701_v54 = vadd.s32 1, %v4697_v61  ;;  %v4961_v11 = vsel %vm4949_vm14, %v4943_v43, %v4960_v36  ;;  %v4964_v0 = vand.u32 65535, %v18374_v2 }
 0x4fa   :  { %20369 = vst [vmem:[#allocation27_spill] sm:$0xff] %v18387_v3  ;;  %v4125_v53 = vmul.f32 %v18302_v7, %v18066_v51  ;;  %vm4700_vm12 = vc.u32 %v18382_v34, %v18387_v3  ;;  %v4962_v38 = vsel %vm4948_vm4, %v4959_v59, %v4961_v11  ;;  %v4989_v62 = vshrl.u32 %v18393_v47, 16 }
 0x4fb   :  { %v4265_v26 = vsel %vm4142_vm13, %v4264_v46, %v20365_v52  ;;  %v4270_v29 = vadd.f32 0.041655596, %v4269_v48  ;;  %v4866_v55 = vclz %v4865_v30  ;;  %v4967_v43 = vshrl.u32 %v4962_v38, 16  ;;  %v211_v52 = vpop.permute.xlu1 %210  ;;  %v340_v46 = vpop.permute.xlu0 %339 }
 0x4fc   :  { %v18419_v21 = vand.u32 3, %v18282_v9  ;;  %v4278_v51 = vmul.f32 %v4277_v24, %v18309_v45  ;;  %v18423_v7 = vsub.s32 %v18313_v13, %v4551_v41  ;;  %v4698_v40 = vmul.u32 %v18175_v20, %v4644_v33 }
 0x4fd   :  { %v4702_v25 = vsel %vm4700_vm12, %v4701_v54, %v4697_v61  ;;  %v4965_v6 = vshrl.u32 %v18374_v2, 16  ;;  %v4988_v50 = vand.u32 65535, %v18393_v47  ;;  %v18428_v59 = vmul.u32 %v4989_v62, %v4964_v0 }
 0x4fe   :  { %v18431_v48 = vand.u32 3, %v18305_v15  ;;  %v4267_v9 = vsel %vm18233_vm0, 0, %v4265_v26  ;;  %v4966_v24 = vand.u32 65535, %v4962_v38  ;;  %v18435_v13 = vmul.u32 %v4967_v43, %v4964_v0 }
 0x4ff   :  { %v18437_v30 = vadd.f32 1.0, %v4118_v60  ;;  %v4126_v20 = vadd.f32 1.0, %v4125_v53  ;;  %v4271_v61 = vmul.f32 %v4270_v29, %v18309_v45  ;;  %v11355_v41 = vadd.s32 4294967294, %v4866_v55  ;;  %v20372_v55 = vld [vmem:[#allocation30_spill] sm:$0xff] }
 0x500   :  { %v4279_v47 = vadd.f32 -0.16666654, %v4278_v51  ;;  %v4554_v36 = vsub.s32 0, %v18423_v7  ;;  %v18441_v33 = vadd.s32 %v4702_v25, %v4698_v40  ;;  %v18445_v15 = vsel %vm11916_vm1, %v211_v52, %v340_v46 }
 0x501   :  { %20371 = vst [vmem:[#allocation34_spill] sm:$0xff] %v18445_v15  ;;  %vm4553_vm3 = vcmp.lt.s32.totalorder %v18423_v7, 0  ;;  %v4990_v49 = vmul.u32 %v4988_v50, %v4964_v0  ;;  %v18448_v11 = vmul.u32 %v4988_v50, %v4965_v6  ;;  %v4994_v60 = vshll.u32 %v18428_v59, 16 }
 0x502   :  { %v4284_v53 = vadd.s32 3, %v4267_v9  ;;  %v4968_v38 = vmul.u32 %v4966_v24, %v4964_v0  ;;  %v18451_v26 = vmul.u32 %v4966_v24, %v4965_v6  ;;  %v4972_v29 = vshll.u32 %v18435_v13, 16 }
 0x503   :  { %v18455_v51 = vmul.f32 %v4126_v20, %v20372_v55  ;;  %v18457_v40 = vand.u32 3, %v4267_v9  ;;  %vm11356_vm10 = vcmp.lt.s32.totalorder %v11355_v41, 0  ;;  %v18461_v25 = vmul.f32 %v20276_v23, %v18445_v15 }
 0x504   :  { %v4136_v50 = vxor.u32 2147483648, %v18437_v30  ;;  %v4272_v52 = vadd.f32 -0.4999988, %v4271_v61  ;;  %v4555_v46 = vsel %vm4553_vm3, %v4554_v36, %v18423_v7  ;;  %v4704_v0 = vadd.s32 536870912, %v18441_v33 }
 0x505   :  { %vm4135_vm9 = vcmp.eq.s32.totalorder %v18431_v48, 2  ;;  %vm9071_vm13 = vcmp.eq.s32.totalorder %v18419_v21, 2  ;;  %v4280_v24 = vmul.f32 %v4279_v47, %v18309_v45  ;;  %vm4998_vm0 = vc.u32 %v4990_v49, %v4994_v60 }
 0x506   :  { %v18470_v20 = vadd.s32 %v4994_v60, %v4990_v49  ;;  %v18472_v55 = vsel %vm11356_vm10, 0, %v11355_v41  ;;  %v4974_v15 = vshll.u32 %v18451_v26, 16  ;;  %vm4976_vm5 = vc.u32 %v4968_v38, %v4972_v29  ;;  %v20376_v60 = vld [vmem:[#allocation11_spill] sm:$0xff] }
 0x507   :  { %v4978_v61 = vadd.s32 %v4972_v29, %v4968_v38  ;;  %vm4132_vm15 = vcmp.eq.s32.totalorder %v18431_v48, 0  ;;  %v4556_v36 = vclz %v4555_v46  ;;  %v4993_v10 = vmul.u32 %v4989_v62, %v4965_v6 }
 0x508   :  { %v5073_v8 = vand.u32 2139095040, %v18461_v25  ;;  %vm20375_vm6 = vcmp.lt.s32.totalorder %v20374_v19, 26  ;;  %v18480_v9 = vshrl.u32 %v4704_v0, 30  ;;  %v4971_v49 = vmul.u32 %v4967_v43, %v4965_v6 }
 0x509   :  { %v10384_v47 = vsel %vm20375_vm6, %v20373_v35, 0.0  ;;  %v4999_v41 = vsel %vm4998_vm0, 1, %v19819_v1  ;;  %vm20377_vm11 = vmmov %vm20375_vm6  ;;  %vm9068_vm12 = vcmp.eq.s32.totalorder %v18419_v21, 0  ;;  %v4977_v38 = vsel %vm4976_vm5, 1, %v19819_v1 }
 0x50a   :  { %v10383_v32 = vsel %vm20377_vm11, %v20376_v60, 0.0  ;;  %v20378_v62 = vshll.u32 %v18448_v11, 16  ;;  %v5074_v29 = vshrl.u32 %v5073_v8, 23  ;;  %v4133_v35 = vxor.u32 2147483648, %v18455_v51 }
 0x50b   :  { %v10410_v46 = vpack.c.bf16 %v10384_v47, %v10383_v32  ;;  %v4273_v43 = vmul.f32 %v4272_v52, %v18309_v45  ;;  %v18493_v6 = vand.u32 3, %v4284_v53  ;;  %vm4980_vm10 = vc.u32 %v4978_v61, %v4974_v15 }
 0x50c   :  { %vm5002_vm3 = vc.u32 %v18470_v20, %v20378_v62  ;;  %v4854_v0 = vadd.s32 %v18089_v39, %v18149_v37  ;;  %v4874_v60 = vsub.s32 4294967266, %v18472_v55  ;;  %v5001_v3 = vadd.s32 %v4999_v41, %v4993_v10 }
 0x50d   :  { %v11360_v34 = vadd.s32 4294967169, %v5074_v29  ;;  %vm20379_vm0 = vcmask 261120   ;;  %v4281_v4 = vadd.f32 1.0, %v4280_v24  ;;  %v4706_v8 = vshll.u32 %v18480_v9, 30 }
 0x50e   :  { %11475 = vmatmul.msk.bf16.gmra.mxu0 %vm20379_vm0, %v10410_v46  ;;  %v4979_v32 = vadd.s32 %v4977_v38, %v4971_v49  ;;  %v5003_v47 = vsel %vm5002_vm3, 1, %v19819_v1  ;;  %v4870_v45 = vsub.s32 32, %v18472_v55  ;;  %v11349_v53 = vadd.s32 4294967294, %v4556_v36 }
 0x50f   :  { %v4981_v15 = vsel %vm4980_vm10, 1, %v19819_v1  ;;  %v5080_v52 = vadd.s32 1, %v11360_v34  ;;  %v18506_v39 = vsel %vm4135_vm9, %v4136_v50, %v18455_v51  ;;  %v18511_v37 = vsel %vm9071_vm13, %v4136_v50, %v18455_v51 }
 0x510   :  { %v4274_v10 = vadd.f32 1.0, %v4273_v43  ;;  %vm4290_vm5 = vcmp.eq.s32.totalorder %v18493_v6, 2  ;;  %v4875_v24 = vadd.s32 127, %v4874_v60  ;;  %v4995_v61 = vshrl.u32 %v18428_v59, 16 }
 0x511   :  { %v5005_v36 = vadd.s32 %v5003_v47, %v5001_v3  ;;  %vm5081_vm6 = vcmp.gt.s32.totalorder %v5080_v52, 0  ;;  %v18518_v34 = vsel %vm4132_vm15, %v18437_v30, %v4133_v35  ;;  %vm9225_vm9 = vcmp.eq.s32.totalorder %v18457_v40, 2 }
 0x512   :  { %v18522_v49 = vsub.s32 %v18441_v33, %v4706_v8  ;;  %v4973_v51 = vshrl.u32 %v18435_v13, 16  ;;  %v4983_v50 = vadd.s32 %v4981_v15, %v4979_v32  ;;  %v4282_v41 = vmul.f32 %v4281_v4, %v18289_v12  ;;  %v20380_v32 = vld [vmem:[#allocation8_spill] sm:$0xff] }
 0x513   :  { %vm4287_vm13 = vcmp.eq.s32.totalorder %v18493_v6, 0  ;;  %vm9222_vm11 = vcmp.eq.s32.totalorder %v18457_v40, 0  ;;  %v4871_v3 = vshll.u32 %v18335_v63, %v18472_v55  ;;  %v4872_v59 = vshrl.u32 %v4854_v0, %v4870_v45 }
 0x514   :  { %vm11350_vm15 = vcmp.lt.s32.totalorder %v11349_v53, 0  ;;  %v18533_v38 = vsel %vm9068_vm12, %v18437_v30, %v4133_v35  ;;  %v4291_v33 = vxor.u32 2147483648, %v4274_v10  ;;  %v4931_v13 = vshrl.u32 %v19809_v58, %v18300_v16 }
 0x515   :  { %v5082_v62 = vsel %vm5081_vm6, %v5080_v52, 0  ;;  %v4876_v4 = vshll.u32 %v4875_v24, 23  ;;  %v4952_v12 = vsel %vm4950_vm7, %v18350_v27, 2102212464  ;;  %v4997_v29 = vshrl.u32 %v18448_v11, 16 }
 0x516   :  { %v5006_v63 = vadd.s32 %v5005_v36, %v4995_v61  ;;  %v18541_v55 = vsel %vm11350_vm15, 0, %v11349_v53  ;;  %v4709_v46 = vsub.s32 0, %v18522_v49  ;;  %v4975_v30 = vshrl.u32 %v18451_v26, 16  ;;  %v20383_v61 = vld [vmem:[#allocation37_spill] sm:$0xff] }
 0x517   :  { %v4984_v35 = vadd.s32 %v4983_v50, %v4973_v51  ;;  %v4288_v43 = vxor.u32 2147483648, %v4282_v41  ;;  %v4873_v0 = vor.u32 %v4872_v59, %v4871_v3  ;;  %vm4708_vm12 = vcmp.lt.s32.totalorder %v18522_v49, 0 }
 0x518   :  { %v5084_v16 = vand.u32 31, %v5082_v62  ;;  %v4951_v60 = vsel %vm4947_vm8, %v4931_v13, %v18343_v14  ;;  %v4953_v27 = vsel %vm4949_vm14, %v18345_v18, %v4952_v12  ;;  %v19784_v8 = vand.u32 2147483647, %v18461_v25 }
 0x519   :  { %vm20381_vm7 = vcmp.lt.s32.totalorder %v20374_v19, 26  ;;  %v4292_v47 = vsel %vm4290_vm5, %v4291_v33, %v4282_v41  ;;  %v4877_v45 = vor.u32 4788187, %v4876_v4  ;;  %v4564_v53 = vsub.s32 4294967266, %v18541_v55 }
 0x51a   :  { %v10386_v26 = vsel %vm20381_vm7, %v20380_v32, 0.0  ;;  %v5007_v15 = vadd.s32 %v5006_v63, %v4997_v29  ;;  %v4710_v52 = vsel %vm4708_vm12, %v4709_v46, %v18522_v49  ;;  %v18560_v14 = vadd.s32 %v4984_v35, %v4975_v30  ;;  %vm20384_vm8 = vmmov %vm20381_vm7  ;;  %v216_v32 = vpop.permute.xlu2 %215 }
 0x51b   :  { %v20382_v24 = vshll.u32 %v18448_v11, 16  ;;  %v10385_v36 = vsel %vm20384_vm8, %v20383_v61, 0.0  ;;  %v18572_v51 = vsel %vm9225_vm9, %v4291_v33, %v4282_v41  ;;  %v4954_v50 = vsel %vm4948_vm4, %v4951_v60, %v4953_v27  ;;  %vm20385_vm4 = vmmov %vm20379_vm0  ;;  %v20386_v61 = vld [vmem:[#allocation41_spill] sm:$0xff] }
 0x51c   :  { %v18576_v3 = vsub.s32 32, %v5084_v16  ;;  %v10411_v59 = vpack.c.bf16 %v10386_v26, %v10385_v36  ;;  %vm4286_vm14 = vcmp.lt.s32.totalorder %v18493_v6, 2  ;;  %v4289_v11 = vsel %vm4287_vm13, %v4274_v10, %v4288_v43  ;;  %v344_v26 = vpop.permute.xlu1 %343 }
 0x51d   :  { %v18565_v18 = vadd.s32 %v18470_v20, %v20382_v24  ;;  %v9224_v20 = vsel %vm9222_vm11, %v4274_v10, %v4288_v43  ;;  %v4880_v13 = vcvt.s32.f32 %v4873_v0  ;;  %v5077_v4 = vand.u32 8388607, %v19784_v8 }
 0x51e   :  { %v4878_v41 = vand.u32 2147483647, %v4877_v45  ;;  %v4565_v33 = vadd.s32 127, %v4564_v53  ;;  %v4711_v12 = vclz %v4710_v52  ;;  %v5011_v42 = vadd.s32 1, %v5007_v15  ;;  %11476 = vmatmul.msk.bf16.gmra.mxu0 %vm20385_vm4, %v10411_v59 }
 0x51f   :  { %v5008_v29 = vmul.u32 %v18374_v2, %v4954_v50  ;;  %vm5010_vm3 = vc.u32 %v18560_v14, %v18565_v18  ;;  %v5087_v63 = vshll.u32 %v19809_v58, %v5084_v16  ;;  %v5090_v46 = vshll.u32 %v20363_v5, %v5084_v16 }
 0x520   :  { %v5088_v10 = vshrl.u32 %v20363_v5, %v18576_v3  ;;  %v5091_v30 = vshrl.u32 %v20364_v57, %v18576_v3  ;;  %v5096_v35 = vshll.u32 %v20362_v17, %v5084_v16  ;;  %v5097_v43 = vshrl.u32 %v20298_v31, %v18576_v3 }
 0x521   :  { %v5078_v0 = vor.u32 8388608, %v5077_v4  ;;  %v18598_v2 = vshrl.u32 %v5082_v62, 5  ;;  %v5093_v60 = vshll.u32 %v20364_v57, %v5084_v16  ;;  %v5094_v27 = vshrl.u32 %v20362_v17, %v18576_v3 }
 0x522   :  { %vm9221_vm10 = vcmp.lt.s32.totalorder %v18457_v40, 2  ;;  %v4881_v45 = vmul.f32 %v4880_v13, %v4878_v41  ;;  %v5012_v53 = vsel %vm5010_vm3, %v5011_v42, %v5007_v15  ;;  %v5099_v52 = vshll.u32 %v20298_v31, %v5084_v16 }
 0x523   :  { %v5100_v24 = vshrl.u32 %v20299_v56, %v18576_v3  ;;  %vm4762_vm0 = vcmp.lt.s32.totalorder %v20386_v61, 0  ;;  %v4544_v62 = vadd.s32 %v18247_v22, %v18242_v44  ;;  %v4560_v36 = vsub.s32 32, %v18541_v55 }
 0x524   :  { %v4566_v50 = vshll.u32 %v4565_v33, 23  ;;  %v11352_v59 = vadd.s32 4294967294, %v4711_v12  ;;  %v18611_v4 = vor.u32 %v5088_v10, %v5087_v63  ;;  %v18613_v8 = vor.u32 %v5091_v30, %v5090_v46 }
 0x525   :  { %v5098_v13 = vor.u32 %v5097_v43, %v5096_v35  ;;  %v18617_v16 = vsel %vm11916_vm1, %v216_v32, %v344_v26  ;;  %v18619_v15 = vadd.s32 %v5012_v53, %v5008_v29  ;;  %v5095_v41 = vor.u32 %v5094_v27, %v5093_v60 }
 0x526   :  { %20387 = vst [vmem:[#allocation16_spill] sm:$0xff] %v18617_v16  ;;  %vm5102_vm5 = vcmp.lt.s32.totalorder %v18598_v2, 1  ;;  %v18622_v42 = vshll.u32 %v5078_v0, 8  ;;  %v18626_v44 = vsel %vm4286_vm14, %v4289_v11, %v4292_v47  ;;  %v5101_v22 = vor.u32 %v5100_v24, %v5099_v52 }
 0x527   :  { %vm5104_vm6 = vcmp.lt.s32.totalorder %v18598_v2, 3  ;;  %vm5105_vm9 = vcmp.lt.s32.totalorder %v18598_v2, 4  ;;  %v4882_v33 = vxor.u32 2147483648, %v4881_v45  ;;  %v4561_v54 = vshll.u32 %v18423_v7, %v18541_v55 }
 0x528   :  { %vm5103_vm1 = vcmp.lt.s32.totalorder %v18598_v2, 2  ;;  %v18635_v12 = vmul.f32 %v20276_v23, %v18617_v16  ;;  %v4562_v29 = vshrl.u32 %v4544_v62, %v4560_v36  ;;  %v18637_v63 = vor.u32 4788187, %v4566_v50 }
 0x529   :  { %v5110_v6 = vsel %vm5102_vm5, %v18611_v4, %v18613_v8  ;;  %v5111_v47 = vsel %vm5105_vm9, %v5098_v13, 920167782  ;;  %vm11353_vm13 = vcmp.lt.s32.totalorder %v11352_v59, 0  ;;  %v5014_v7 = vadd.s32 536870912, %v18619_v15 }
 0x52a   :  { %v5112_v55 = vsel %vm5104_vm6, %v5095_v41, %v5111_v47  ;;  %v5119_v23 = vand.u32 65535, %v18622_v42  ;;  %v5114_v46 = vsel %vm5102_vm5, %v18613_v8, %v5095_v41  ;;  %v5115_v10 = vsel %vm5105_vm9, %v5101_v22, 1326507024 }
 0x52b   :  { %v5113_v11 = vsel %vm5103_vm1, %v5110_v6, %v5112_v55  ;;  %v5120_v30 = vshrl.u32 %v18622_v42, 16  ;;  %v18660_v35 = vsel %vm9221_vm10, %v9224_v20, %v18572_v51  ;;  %v5116_v43 = vsel %vm5104_vm6, %v5098_v13, %v5115_v10 }
 0x52c   :  { %v5143_v0 = vand.u32 65535, %v5113_v11  ;;  %v5228_v60 = vand.u32 2139095040, %v18635_v12  ;;  %v4883_v27 = vsel %vm4762_vm0, %v4882_v33, %v4881_v45  ;;  %v18667_v32 = vor.u32 %v4562_v29, %v4561_v54 }
 0x52d   :  { %v5117_v26 = vsel %vm5103_vm1, %v5114_v46, %v5116_v43  ;;  %v5144_v53 = vshrl.u32 %v5113_v11, 16  ;;  %v18672_v52 = vsel %vm11353_vm13, 0, %v11352_v59  ;;  %v18674_v40 = vshrl.u32 %v5014_v7, 30 }
 0x52e   :  { %v5121_v51 = vand.u32 65535, %v5117_v26  ;;  %v5122_v20 = vshrl.u32 %v5117_v26, 16  ;;  %v4568_v24 = vand.u32 2147483647, %v18637_v63  ;;  %v5145_v62 = vmul.u32 %v5143_v0, %v5119_v23  ;;  %v11607_v63 = vld [vmem:[%s19471_s2 + $0x38] sm:$0xff] }
 0x52f   :  { %v5146_v36 = vmul.u32 %v5144_v53, %v5119_v23  ;;  %v5147_v50 = vmul.u32 %v5143_v0, %v5120_v30  ;;  %v20388_v45 = vand.u32 2147483647, %v20386_v61  ;;  %v5229_v59 = vshrl.u32 %v5228_v60, 23  ;;  %10691 = vmatpush.bf16.msra.mxu1 %v11607_v63 }
 0x530   :  { %v5123_v22 = vmul.u32 %v5121_v51, %v5119_v23  ;;  %v5124_v33 = vmul.u32 %v5122_v20, %v5119_v23  ;;  %v5125_v54 = vmul.u32 %v5121_v51, %v5120_v30  ;;  %v4719_v29 = vsub.s32 4294967266, %v18672_v52 }
 0x531   :  { %vm18679_vm11 = vcmp.le.f32.partialorder %v20388_v45, 0.7853982  ;;  %v5148_v6 = vmul.u32 %v5144_v53, %v5120_v30  ;;  %v5149_v47 = vshll.u32 %v5146_v36, 16  ;;  %v5151_v7 = vshll.u32 %v5147_v50, 16 }
 0x532   :  { %v5016_v55 = vshll.u32 %v18674_v40, 30  ;;  %v5126_v11 = vmul.u32 %v5122_v20, %v5120_v30  ;;  %v5127_v46 = vshll.u32 %v5124_v33, 16  ;;  %v5129_v10 = vshll.u32 %v5125_v54, 16 }
 0x533   :  { %v5086_v43 = vshrl.u32 %v19809_v58, %v18576_v3  ;;  %v5107_v23 = vsel %vm5105_vm9, %v5095_v41, 2102212464  ;;  %vm5153_vm15 = vc.u32 %v5145_v62, %v5149_v47  ;;  %v5155_v0 = vadd.s32 %v5149_v47, %v5145_v62 }
 0x534   :  { %vm5131_vm12 = vc.u32 %v5123_v22, %v5127_v46  ;;  %v5133_v60 = vadd.s32 %v5127_v46, %v5123_v22  ;;  %v5154_v26 = vsel %vm5153_vm15, 1, %v19819_v1  ;;  %v11363_v53 = vadd.s32 4294967169, %v5229_v59  ;;  %v20391_v46 = vld [vmem:[#allocation26_spill] sm:$0xff] }
 0x535   :  { %v5132_v51 = vsel %vm5131_vm12, 1, %v19819_v1  ;;  %v5150_v45 = vshrl.u32 %v5146_v36, 16  ;;  %v5156_v30 = vadd.s32 %v5154_v26, %v5148_v6  ;;  %vm5157_vm7 = vc.u32 %v5155_v0, %v5151_v7 }
 0x536   :  { %vm4131_vm8 = vcmp.lt.s32.totalorder %v18431_v48, 2  ;;  %v5128_v20 = vshrl.u32 %v5124_v33, 16  ;;  %v5134_v3 = vadd.s32 %v5132_v51, %v5126_v11  ;;  %vm5135_vm14 = vc.u32 %v5133_v60, %v5129_v10  ;;  %v11606_v11 = vld [vmem:[%s19471_s2 + $0x30] sm:$0xff] }
 0x537   :  { %v5158_v41 = vsel %vm5157_vm7, 1, %v19819_v1  ;;  %vm4283_vm4 = vweird.f32 %v20347_v28  ;;  %v5106_v62 = vsel %vm5102_vm5, %v5086_v43, %v18611_v4  ;;  %v5136_v22 = vsel %vm5135_vm14, 1, %v19819_v1  ;;  %10692 = vmatpush.bf16.msra.mxu1 %v11606_v11 }
 0x538   :  { %v5152_v59 = vshrl.u32 %v5147_v50, 16  ;;  %v5160_v47 = vadd.s32 %v5158_v41, %v5156_v30  ;;  %v5108_v36 = vsel %vm5104_vm6, %v18613_v8, %v5107_v23  ;;  %v5130_v6 = vshrl.u32 %v5125_v54, 16  ;;  %v20392_v23 = vld [vmem:[#allocation35_spill] sm:$0xff] }
 0x539   :  { %v5138_v33 = vadd.s32 %v5136_v22, %v5134_v3  ;;  %v5235_v63 = vadd.s32 1, %v11363_v53  ;;  %vm4128_vm3 = vweird.f32 %v20391_v46  ;;  %vm9067_vm10 = vcmp.lt.s32.totalorder %v18419_v21, 2  ;;  %v20394_v30 = vld [vmem:[#allocation31_spill] sm:$0xff]  ;;  %v11613_v21 = vld [vmem:[%s19471_s2 + $0x68] sm:$0xff] }
 0x53a   :  { %v18712_v4 = vsel %vm18679_vm11, %v20386_v61, %v4883_v27  ;;  %v4570_v50 = vcvt.s32.f32 %v18667_v32  ;;  %v18716_v8 = vsub.s32 %v18619_v15, %v5016_v55  ;;  %v5161_v54 = vadd.s32 %v5160_v47, %v5150_v45  ;;  %v20395_v15 = vld [vmem:[#allocation27_spill] sm:$0xff] }
 0x53b   :  { %v5139_v10 = vadd.s32 %v5138_v33, %v5128_v20  ;;  %v18718_v43 = vadd.s32 %v5155_v0, %v5151_v7  ;;  %vm5236_vm5 = vcmp.gt.s32.totalorder %v5235_v63, 0  ;;  %vm20393_vm6 = vcmp.lt.s32.totalorder %v20374_v19, 26  ;;  %v20396_v7 = vld [vmem:[#allocation40_spill] sm:$0xff]  ;;  %v11605_v20 = vld [vmem:[%s19471_s2 + $0x28] sm:$0xff] }
 0x53c   :  { %v10388_v60 = vsel %vm20393_vm6, %v20392_v23, 0.0  ;;  %v4720_v26 = vadd.s32 127, %v4719_v29  ;;  %v5109_v27 = vsel %vm5103_vm1, %v5106_v62, %v5108_v36  ;;  %v5162_v53 = vadd.s32 %v5161_v54, %v5152_v59  ;;  %vm20397_vm9 = vmmov %vm20393_vm6  ;;  %10693 = vmatpush.bf16.msra.mxu1 %v11605_v20  ;;  %v20398_v59 = vld [vmem:[#allocation17_spill] sm:$0xff] }
 0x53d   :  { %v5237_v51 = vsel %vm5236_vm5, %v5235_v63, 0  ;;  %v4571_v32 = vmul.f32 %v4570_v50, %v4568_v24  ;;  %v4699_v55 = vadd.s32 %v20395_v15, %v20394_v30  ;;  %v18727_v45 = vadd.s32 %v5139_v10, %v5130_v6  ;;  %v20400_v23 = vld [vmem:[#allocation13_spill] sm:$0xff] }
 0x53e   :  { %v10387_v0 = vsel %vm20397_vm9, %v20396_v7, 0.0  ;;  %v4715_v29 = vsub.s32 32, %v18672_v52  ;;  %v5019_v2 = vsub.s32 0, %v18716_v8  ;;  %v5166_v3 = vadd.s32 1, %v5162_v53 }
 0x53f   :  { %v10412_v41 = vpack.c.bf16 %v10388_v60, %v10387_v0  ;;  %vm5018_vm1 = vcmp.lt.s32.totalorder %v18716_v8, 0  ;;  %v5163_v24 = vmul.u32 %v18622_v42, %v5109_v27  ;;  %vm5165_vm13 = vc.u32 %v18727_v45, %v18718_v43 }
 0x540   :  { %v5239_v62 = vand.u32 31, %v5237_v51  ;;  %v4138_v22 = vsel %vm4131_vm8, %v18518_v34, %v18506_v39  ;;  %v4884_v47 = vsub.s32 4, %v20398_v59  ;;  %v4721_v36 = vshll.u32 %v4720_v26, 23  ;;  %v11604_v39 = vld [vmem:[%s19471_s2 + $0x20] sm:$0xff] }
 0x541   :  { %v5167_v6 = vsel %vm5165_vm13, %v5166_v3, %v5162_v53  ;;  %vm20399_vm15 = vcmask 261120   ;;  %v18750_v42 = vsel %vm4283_vm4, nan, %v18626_v44  ;;  %v18755_v33 = vsel %vm4283_vm4, nan, %v18660_v35  ;;  %10694 = vmatpush.bf16.msra.mxu1 %v11604_v39 }
 0x542   :  { %11477 = vmatmul.msk.bf16.gmra.mxu0 %vm20399_vm15, %v10412_v41  ;;  %v5168_v63 = vadd.s32 %v5167_v6, %v5163_v24  ;;  %v19785_v48 = vand.u32 2147483647, %v18635_v12  ;;  %v18763_v34 = vmul.f32 %v18712_v4, %v18712_v4  ;;  %v4572_v11 = vxor.u32 2147483648, %v4571_v32 }
 0x543   :  { %v4717_v50 = vshrl.u32 %v4699_v55, %v4715_v29  ;;  %v5020_v44 = vsel %vm5018_vm1, %v5019_v2, %v18716_v8  ;;  %v18770_v28 = vsel %vm4128_vm3, nan, %v4138_v22  ;;  %v18776_v35 = vsel %vm9067_vm10, %v18533_v38, %v18511_v37  ;;  %v11603_v55 = vld [vmem:[%s19471_s2 + $0x18] sm:$0xff]  ;;  %vm20411_vm1 = vmmov %vm20399_vm15 }
 0x544   :  { %v5169_v54 = vadd.s32 536870912, %v5168_v63  ;;  %v18778_v10 = vsub.s32 32, %v5239_v62  ;;  %v20401_v60 = vand.u32 2147483647, %v20400_v23  ;;  %vm4452_vm7 = vcmp.lt.s32.totalorder %v20400_v23, 0 }
 0x545   :  { %v4716_v27 = vshll.u32 %v18522_v49, %v18672_v52  ;;  %v4722_v53 = vor.u32 4788187, %v4721_v36  ;;  %v18796_v38 = vsel %vm4762_vm0, %v4884_v47, %v20398_v59  ;;  %v5021_v30 = vclz %v5020_v44  ;;  %10695 = vmatpush.bf16.msra.mxu1 %v11603_v55  ;;  %vm20407_vm0 = vmmov %vm20393_vm6 }
 0x546   :  { %vm18782_vm12 = vcmp.le.f32.partialorder %v20401_v60, 0.7853982  ;;  %v5232_v15 = vand.u32 8388607, %v19785_v48  ;;  %v4889_v49 = vmul.f32 -0.001358992, %v18763_v34  ;;  %v4573_v52 = vsel %vm4452_vm7, %v4572_v11, %v4571_v32  ;;  %vm20409_vm14 = vmmov %vm20407_vm0 }
 0x547   :  { %v4718_v7 = vor.u32 %v4717_v50, %v4716_v27  ;;  %v18806_v0 = vshrl.u32 %v5169_v54, 30  ;;  %v5242_v20 = vshll.u32 %v19809_v58, %v5239_v62  ;;  %v5243_v29 = vshrl.u32 %v20363_v5, %v18778_v10  ;;  %v20406_v54 = vld [vmem:[#allocation9_spill] sm:$0xff] }
 0x548   :  { %v5245_v2 = vshll.u32 %v20363_v5, %v5239_v62  ;;  %v5246_v3 = vshrl.u32 %v20364_v57, %v18778_v10  ;;  %v4723_v41 = vand.u32 2147483647, %v4722_v53  ;;  %v18814_v24 = vshrl.u32 %v5237_v51, 5  ;;  %v11602_v5 = vld [vmem:[%s19471_s2 + $0x10] sm:$0xff] }
 0x549   :  { %20405 = vst [vmem:[#allocation15_spill] sm:$0xff] %v18806_v0  ;;  %v5251_v22 = vshll.u32 %v20362_v17, %v5239_v62  ;;  %v5252_v32 = vshrl.u32 %v20298_v31, %v18778_v10  ;;  %v11358_v59 = vadd.s32 4294967294, %v5021_v30  ;;  %v5233_v47 = vor.u32 8388608, %v5232_v15  ;;  %10696 = vmatpush.bf16.msra.mxu1 %v11602_v5  ;;  %v11601_v15 = vld [vmem:[%s19471_s2 + $0x8] sm:$0xff] }
 0x54a   :  { %v5248_v36 = vshll.u32 %v20364_v57, %v5239_v62  ;;  %v5249_v6 = vshrl.u32 %v20362_v17, %v18778_v10  ;;  %v4725_v39 = vcvt.s32.f32 %v4718_v7  ;;  %v5171_v51 = vshll.u32 %v18806_v0, 30 }
 0x54b   :  { %v5254_v11 = vshll.u32 %v20298_v31, %v5239_v62  ;;  %v5255_v50 = vshrl.u32 %v20299_v56, %v18778_v10  ;;  %v18832_v44 = vsel %vm18782_vm12, %v20400_v23, %v4573_v52  ;;  %v18834_v57 = vor.u32 %v5243_v29, %v5242_v20  ;;  %v20408_v31 = vld [vmem:[#allocation12_spill] sm:$0xff] }
 0x54c   :  { %v18836_v17 = vor.u32 %v5246_v3, %v5245_v2  ;;  %v10389_v60 = vsel %vm20407_vm0, %v20406_v54, 0.0  ;;  %v4726_v27 = vmul.f32 %v4725_v39, %v4723_v41  ;;  %v5253_v53 = vor.u32 %v5252_v32, %v5251_v22  ;;  %v20410_v3 = vld [vmem:[#allocation32_spill] sm:$0xff] }
 0x54d   :  { %vm5257_vm8 = vcmp.lt.s32.totalorder %v18814_v24, 1  ;;  %v10390_v56 = vsel %vm20409_vm14, %v20408_v31, 0.0  ;;  %vm11359_vm4 = vcmp.lt.s32.totalorder %v11358_v59, 0  ;;  %v5250_v62 = vor.u32 %v5249_v6, %v5248_v36  ;;  %10697 = vmatpush.bf16.msra.mxu1 %v11601_v15  ;;  %v11600_v6 = vld [vmem:[%s19471_s2] sm:$0xff] }
 0x54e   :  { %vm5260_vm10 = vcmp.lt.s32.totalorder %v18814_v24, 4  ;;  %v18846_v30 = vshll.u32 %v5233_v47, 8  ;;  %v18851_v55 = vsub.s32 %v5168_v63, %v5171_v51  ;;  %v5256_v52 = vor.u32 %v5255_v50, %v5254_v11 }
 0x54f   :  { %vm5259_vm5 = vcmp.lt.s32.totalorder %v18814_v24, 3  ;;  %v10413_v7 = vpack.c.bf16 %v10390_v56, %v10389_v60  ;;  %v18854_v20 = vadd.f32 0.041655596, %v4889_v49  ;;  %v18857_v29 = vmul.f32 -0.00019511016, %v18763_v34  ;;  %v10497_v60 = vpop.f32.mrf.mxu0 }
 0x550   :  { %vm5258_vm6 = vcmp.lt.s32.totalorder %v18814_v24, 2  ;;  %v5265_v2 = vsel %vm5257_vm8, %v18834_v57, %v18836_v17  ;;  %v18866_v63 = vmul.f32 %v18832_v44, %v18832_v44  ;;  %vm4607_vm9 = vcmp.lt.s32.totalorder %v20410_v3, 0 }
 0x551   :  { %v4727_v41 = vxor.u32 2147483648, %v4726_v27  ;;  %v5266_v49 = vsel %vm5260_vm10, %v5253_v53, 920167782  ;;  %v18873_v22 = vsel %vm11359_vm4, 0, %v11358_v59  ;;  %v5274_v47 = vand.u32 65535, %v18846_v30  ;;  %10698 = vmatpush.bf16.msra.mxu1 %v11600_v6 }
 0x552   :  { %11478 = vmatmul.msk.bf16.gmra.mxu0 %vm20411_vm1, %v10413_v7  ;;  %v5267_v32 = vsel %vm5259_vm5, %v5250_v62, %v5266_v49  ;;  %v5275_v36 = vshrl.u32 %v18846_v30, 16  ;;  %v5174_v5 = vsub.s32 0, %v18851_v55  ;;  %v5269_v59 = vsel %vm5257_vm8, %v18836_v17, %v5250_v62 }
 0x553   :  { %v5268_v39 = vsel %vm5258_vm6, %v5265_v2, %v5267_v32  ;;  %v5270_v51 = vsel %vm5260_vm10, %v5256_v52, 1326507024  ;;  %vm5173_vm13 = vcmp.lt.s32.totalorder %v18851_v55, 0  ;;  %v18895_v31 = vsel %vm4607_vm9, %v4727_v41, %v4726_v27 }
 0x554   :  { %v5271_v11 = vsel %vm5259_vm5, %v5253_v53, %v5270_v51  ;;  %v5298_v50 = vand.u32 65535, %v5268_v39  ;;  %v5299_v54 = vshrl.u32 %v5268_v39, 16  ;;  %v5025_v56 = vsub.s32 32, %v18873_v22 }
 0x555   :  { %v5029_v15 = vsub.s32 4294967266, %v18873_v22  ;;  %v5272_v52 = vsel %vm5258_vm6, %v5269_v59, %v5271_v11  ;;  %v5009_v7 = vadd.s32 %v18565_v18, %v18560_v14  ;;  %v5175_v32 = vsel %vm5173_vm13, %v5174_v5, %v18851_v55 }
 0x556   :  { %v5276_v2 = vand.u32 65535, %v5272_v52  ;;  %v5277_v53 = vshrl.u32 %v5272_v52, 16  ;;  %v5301_v49 = vmul.u32 %v5299_v54, %v5274_v47  ;;  %v5241_v6 = vshrl.u32 %v19809_v58, %v18778_v10 }
 0x557   :  { %v5262_v27 = vsel %vm5260_vm10, %v5250_v62, 2102212464  ;;  %v5302_v41 = vmul.u32 %v5298_v50, %v5275_v36  ;;  %v5300_v37 = vmul.u32 %v5298_v50, %v5274_v47  ;;  %v5026_v59 = vshll.u32 %v18716_v8, %v18873_v22  ;;  %v18919_v22 = vld [vmem:[%s19472_s3] ss:$0 sm:$0xff] }
 0x558   :  { %v5278_v39 = vmul.u32 %v5276_v2, %v5274_v47  ;;  %v5279_v51 = vmul.u32 %v5277_v53, %v5274_v47  ;;  %v5280_v48 = vmul.u32 %v5276_v2, %v5275_v36  ;;  %v5027_v14 = vshrl.u32 %v5009_v7, %v5025_v56 }
 0x559   :  { %v5030_v18 = vadd.s32 127, %v5029_v15  ;;  %v5304_v11 = vshll.u32 %v5301_v49, 16  ;;  %v5281_v52 = vmul.u32 %v5277_v53, %v5275_v36  ;;  %v5303_v0 = vmul.u32 %v5299_v54, %v5275_v36 }
 0x55a   :  { %v5282_v16 = vshll.u32 %v5279_v51, 16  ;;  %v5284_v5 = vshll.u32 %v5280_v48, 16  ;;  %v5176_v61 = vclz %v5175_v32  ;;  %v5261_v58 = vsel %vm5257_vm8, %v5241_v6, %v18834_v57 }
 0x55b   :  { %v5263_v10 = vsel %vm5259_vm5, %v18836_v17, %v5262_v27  ;;  %v5306_v62 = vshll.u32 %v5302_v41, 16  ;;  %vm5308_vm0 = vc.u32 %v5300_v37, %v5304_v11  ;;  %v5310_v8 = vadd.s32 %v5304_v11, %v5300_v37  ;;  %v10499_v17 = vpop.f32.mrf.mxu0 }
 0x55c   :  { %vm5286_vm15 = vc.u32 %v5278_v39, %v5282_v16  ;;  %v5288_v47 = vadd.s32 %v5282_v16, %v5278_v39  ;;  %v5283_v36 = vshrl.u32 %v5279_v51, 16  ;;  %v5305_v54 = vshrl.u32 %v5301_v49, 16 }
 0x55d   :  { %v5287_v50 = vsel %vm5286_vm15, 1, %v19819_v1  ;;  %v5309_v57 = vsel %vm5308_vm0, 1, %v19819_v1  ;;  %vm5312_vm14 = vc.u32 %v5310_v8, %v5306_v62  ;;  %v5031_v7 = vshll.u32 %v5030_v18, 23 }
 0x55e   :  { %v5289_v56 = vadd.s32 %v5287_v50, %v5281_v52  ;;  %vm5290_vm8 = vc.u32 %v5288_v47, %v5284_v5  ;;  %v5311_v15 = vadd.s32 %v5309_v57, %v5303_v0  ;;  %v5285_v16 = vshrl.u32 %v5280_v48, 16  ;;  %v20412_v48 = vld [vmem:[#allocation20_spill] sm:$0xff] }
 0x55f   :  { %v5291_v37 = vsel %vm5290_vm8, 1, %v19819_v1  ;;  %v5313_v2 = vsel %vm5312_vm14, 1, %v19819_v1  ;;  %v5307_v32 = vshrl.u32 %v5302_v41, 16  ;;  %v10498_v27 = vadd.f32 %v18919_v22, %v10497_v60  ;;  %v20414_v1 = vld [vmem:[#allocation18_spill] sm:$0xff] }
 0x560   :  { %v5293_v53 = vadd.s32 %v5291_v37, %v5289_v56  ;;  %v5315_v6 = vadd.s32 %v5313_v2, %v5311_v15  ;;  %v11361_v39 = vadd.s32 4294967294, %v5176_v61  ;;  %v5264_v49 = vsel %vm5258_vm6, %v5261_v58, %v5263_v10  ;;  %vm20419_vm6 = vmmov %vm20411_vm1 }
 0x561   :  { %v18928_v51 = vadd.s32 %v5310_v8, %v5306_v62  ;;  %v10500_v0 = vadd.f32 %v18919_v22, %v10499_v17  ;;  %vm20413_vm4 = vcmp.lt.s32.totalorder %v20374_v19, 26  ;;  %v5032_v5 = vor.u32 4788187, %v5031_v7  ;;  %v20421_v7 = vld [vmem:[#allocation36_spill] sm:$0xff] }
 0x562   :  { %v5294_v11 = vadd.s32 %v5293_v53, %v5283_v36  ;;  %v5316_v18 = vadd.s32 %v5315_v6, %v5305_v54  ;;  %v10391_v52 = vsel %vm20413_vm4, %v20412_v48, 0.0  ;;  %vm20415_vm10 = vmmov %vm20413_vm4  ;;  %v10577_v60 = vmax.f32 %v10498_v27, 0.0 }
 0x563   :  { %v10392_v41 = vsel %vm20415_vm10, %v20414_v1, 0.0  ;;  %v10578_v61 = vmax.f32 %v10500_v0, 0.0  ;;  %v4586_v24 = vmul.f32 -0.00019511016, %v18866_v63  ;;  %v20416_v58 = vand.u32 2147483647, %v20410_v3  ;;  %v10502_v13 = vpop.f32.mrf.mxu0 }
 0x564   :  { %v10414_v47 = vpack.c.bf16 %v10392_v41, %v10391_v52  ;;  %v18944_v62 = vadd.s32 %v5294_v11, %v5285_v16  ;;  %v5317_v8 = vadd.s32 %v5316_v18, %v5307_v32  ;;  %v4579_v36 = vmul.f32 -0.001358992, %v18866_v63  ;;  %v20423_v32 = vld [vmem:[#allocation29_spill] sm:$0xff]  ;;  %v20426_v18 = vld [vmem:[#allocation7_spill] sm:$0xff]  ;;  %v20428_v1 = vld [vmem:[#allocation10_spill] sm:$0xff] }
 0x565   :  { %vm18940_vm5 = vcmp.le.f32.partialorder %v20416_v58, 0.7853982  ;;  %v5028_v50 = vor.u32 %v5027_v14, %v5026_v59  ;;  %v5318_v54 = vmul.u32 %v18846_v30, %v5264_v49  ;;  %v10609_v57 = vpack.c.bf16 %v10578_v61, %v10577_v60  ;;  %v20431_v58 = vld [vmem:[#allocation25_spill] sm:$0xff] }
 0x566   :  { %11479 = vmatmul.msk.bf16.gmra.mxu0 %vm20419_vm6, %v10414_v47  ;;  %v18953_v56 = vsel %vm18940_vm5, %v20410_v3, %v18895_v31  ;;  %vm11362_vm1 = vcmp.lt.s32.totalorder %v11361_v39, 0  ;;  %vm5320_vm13 = vc.u32 %v18944_v62, %v18928_v51  ;;  %v5321_v15 = vadd.s32 1, %v5317_v8 }
 0x567   :  { %v9075_v59 = vsel %vm4128_vm3, nan, %v18776_v35  ;;  %v4887_v30 = vsel %vm18679_vm11, 0, %v18796_v38  ;;  %v4897_v14 = vadd.f32 0.008332121, %v18857_v29  ;;  %v5033_v17 = vand.u32 2147483647, %v5032_v5  ;;  %10699 = vmatmul.bf16.vlgmr.msra.gmra.mxu1 %v10609_v57  ;;  %vm20425_vm11 = vmmov %vm20413_vm4 }
 0x568   :  { %v20420_v31 = vsel %vm12700_vm2, %v18750_v42, %v18755_v33  ;;  %vm20422_vm15 = vcmp.lt.s32.totalorder %v20374_v19, 2  ;;  %v4891_v46 = vmul.f32 %v18854_v20, %v18763_v34  ;;  %v4587_v35 = vadd.f32 0.008332121, %v4586_v24  ;;  %v20424_v42 = vld [vmem:[#allocation24_spill] sm:$0xff]  ;;  %vm20427_vm3 = vmmov %vm20413_vm4  ;;  %v20429_v5 = vld [vmem:[#allocation42_spill] sm:$0xff] }
 0x569   :  { %v10364_v16 = vsel %vm20422_vm15, %v20421_v7, %v20420_v31  ;;  %v5322_v37 = vsel %vm5320_vm13, %v5321_v15, %v5317_v8  ;;  %v18976_v38 = vmul.f32 %v18953_v56, %v18953_v56  ;;  %v5035_v29 = vcvt.s32.f32 %v5028_v50  ;;  %vm20430_vm0 = vmmov %vm20422_vm15 }
 0x56a   :  { %v18978_v2 = vsel %vm11362_vm1, 0, %v11361_v39  ;;  %v5323_v53 = vadd.s32 %v5322_v37, %v5318_v54  ;;  %v10330_v33 = vsel %vm12700_vm2, %v20424_v42, %v20423_v32  ;;  %v10331_v20 = vsel %vm12700_vm2, %v18770_v28, %v9075_v59  ;;  %vm20432_vm8 = vmmov %vm20430_vm0  ;;  %v20435_v37 = vld [vmem:[#allocation19_spill] sm:$0xff] }
 0x56b   :  { %v4904_v6 = vadd.s32 3, %v4887_v30  ;;  %v4580_v27 = vadd.f32 0.041655596, %v4579_v36  ;;  %v18989_v49 = vsel %vm20425_vm11, %v10364_v16, 0.0  ;;  %v4898_v0 = vmul.f32 %v4897_v14, %v18763_v34  ;;  %v20433_v16 = vld [vmem:[#allocation33_spill] sm:$0xff]  ;;  %vm20434_vm14 = vmmov %vm20427_vm3 }
 0x56c   :  { %v5036_v39 = vmul.f32 %v5035_v29, %v5033_v17  ;;  %v5324_v11 = vadd.s32 536870912, %v5323_v53  ;;  %v18995_v48 = vsel %vm20427_vm3, %v20426_v18, 0.0  ;;  %v4892_v52 = vadd.f32 -0.4999988, %v4891_v46  ;;  %vm20443_vm15 = vmmov %vm20427_vm3 }
 0x56d   :  { %v4574_v41 = vsub.s32 4, %v20428_v1  ;;  %v5184_v28 = vsub.s32 4294967266, %v18978_v2  ;;  %v19002_v60 = vsel %vm20430_vm0, %v20429_v5, %v10330_v33  ;;  %v4588_v61 = vmul.f32 %v4587_v35, %v18866_v63 }
 0x56e   :  { %v4741_v47 = vmul.f32 -0.00019511016, %v18976_v38  ;;  %v19006_v24 = vshrl.u32 %v5324_v11, 30  ;;  %v19011_v8 = vsel %vm20432_vm8, %v20431_v58, %v10331_v20  ;;  %v10417_v36 = vpack.c.bf16 %v18995_v48, %v18989_v49  ;;  %v10504_v20 = vpop.f32.mrf.mxu0 }
 0x56f   :  { %v19015_v50 = vand.u32 3, %v4887_v30  ;;  %v4581_v54 = vmul.f32 %v4580_v27, %v18866_v63  ;;  %v4899_v57 = vadd.f32 -0.16666654, %v4898_v0  ;;  %v19018_v15 = vand.u32 3, %v4904_v6  ;;  %v20436_v6 = vld [vmem:[#allocation44_spill] sm:$0xff] }
 0x570   :  { %v5037_v59 = vxor.u32 2147483648, %v5036_v39  ;;  %v5326_v14 = vshll.u32 %v19006_v24, 30  ;;  %v19022_v17 = vmul.f32 %v4892_v52, %v18763_v34  ;;  %v4575_v31 = vsel %vm4452_vm7, %v4574_v41, %v20428_v1  ;;  %vm20437_vm7 = vmmov %vm20427_vm3 }
 0x571   :  { %v5185_v7 = vadd.s32 127, %v5184_v28  ;;  %v10394_v30 = vsel %vm20434_vm14, %v20433_v16, 0.0  ;;  %v4589_v46 = vadd.f32 -0.16666654, %v4588_v61  ;;  %v4742_v35 = vadd.f32 0.008332121, %v4741_v47 }
 0x572   :  { %vm4917_vm4 = vcmp.lt.s32.totalorder %v20435_v37, 0  ;;  %v19031_v29 = vsub.s32 %v5323_v53, %v5326_v14  ;;  %v4582_v32 = vadd.f32 -0.4999988, %v4581_v54  ;;  %v4734_v42 = vmul.f32 -0.001358992, %v18976_v38 }
 0x573   :  { %v5180_v33 = vsub.s32 32, %v18978_v2  ;;  %v10393_v27 = vsel %vm20437_vm7, %v20436_v6, 0.0  ;;  %v5038_v0 = vsel %vm4917_vm4, %v5037_v59, %v5036_v39  ;;  %v5164_v53 = vadd.s32 %v18718_v43, %v18727_v45 }
 0x574   :  { %vm5328_vm10 = vcmp.lt.s32.totalorder %v19031_v29, 0  ;;  %v5329_v11 = vsub.s32 0, %v19031_v29  ;;  %v10415_v18 = vpack.c.bf16 %v10394_v30, %v10393_v27  ;;  %v5186_v52 = vshll.u32 %v5185_v7, 23 }
 0x575   :  { %v10503_v1 = vadd.f32 %v18919_v22, %v10502_v13  ;;  %v10505_v41 = vadd.f32 %v18919_v22, %v10504_v20  ;;  %v4590_v28 = vmul.f32 %v4589_v46, %v18866_v63  ;;  %v4743_v5 = vmul.f32 %v4742_v35, %v18976_v38 }
 0x576   :  { %v20438_v61 = vand.u32 2147483647, %v20435_v37  ;;  %v5330_v47 = vsel %vm5328_vm10, %v5329_v11, %v19031_v29  ;;  %vm20441_vm1 = vcmask 261120   ;;  %v4900_v43 = vmul.f32 %v4899_v57, %v18763_v34 }
 0x577   :  { %11480 = vmatmul.msk.bf16.gmra.mxu0 %vm20441_vm1, %v10415_v18  ;;  %v5182_v13 = vshrl.u32 %v5164_v53, %v5180_v33  ;;  %v5331_v58 = vclz %v5330_v47  ;;  %v4577_v54 = vsel %vm18782_vm12, 0, %v4575_v31  ;;  %v4583_v59 = vmul.f32 %v4582_v32, %v18866_v63  ;;  %v10507_v32 = vpop.f32.mrf.mxu0  ;;  %vm20444_vm8 = vmmov %vm20441_vm1 }
 0x578   :  { %vm19050_vm6 = vcmp.le.f32.partialorder %v20438_v61, 0.7853982  ;;  %v4735_v14 = vadd.f32 0.041655596, %v4734_v42  ;;  %v10580_v7 = vmax.f32 %v10505_v41, 0.0  ;;  %v5181_v16 = vshll.u32 %v18851_v55, %v18978_v2 }
 0x579   :  { %v19060_v45 = vsel %vm19050_vm6, %v20435_v37, %v5038_v0  ;;  %v5187_v30 = vor.u32 4788187, %v5186_v52  ;;  %v11364_v46 = vadd.s32 4294967294, %v5331_v58  ;;  %v10579_v34 = vmax.f32 %v10503_v1, 0.0 }
 0x57a   :  { %v4591_v57 = vadd.f32 1.0, %v4590_v28  ;;  %v4729_v35 = vsub.s32 4, %v18480_v9  ;;  %v4744_v20 = vadd.f32 -0.16666654, %v4743_v5  ;;  %v19070_v33 = vmul.f32 %v19060_v45, %v19060_v45 }
 0x57b   :  { %v5183_v26 = vor.u32 %v5182_v13, %v5181_v16  ;;  %v5319_v63 = vadd.s32 %v18928_v51, %v18944_v62  ;;  %vm11365_vm12 = vcmp.lt.s32.totalorder %v11364_v46, 0  ;;  %v10610_v31 = vpack.c.bf16 %v10580_v7, %v10579_v34 }
 0x57c   :  { %v4594_v42 = vadd.s32 3, %v4577_v54  ;;  %v19074_v55 = vand.u32 3, %v4577_v54  ;;  %v4736_v2 = vmul.f32 %v4735_v14, %v18976_v38  ;;  %v5334_v6 = vsel %vm11365_vm12, 0, %v11364_v46 }
 0x57d   :  { %v5188_v27 = vand.u32 2147483647, %v5187_v30  ;;  %v5335_v0 = vsub.s32 32, %v5334_v6  ;;  %v5336_v11 = vshll.u32 %v19031_v29, %v5334_v6  ;;  %v5339_v18 = vsub.s32 4294967266, %v5334_v6  ;;  %10704 = vmatmul.bf16.gmra.mxu1 %v10610_v31 }
 0x57e   :  { %v19078_v53 = vadd.f32 1.0, %v4583_v59  ;;  %v19081_v52 = vmul.f32 %v4591_v57, %v18832_v44  ;;  %v4730_v51 = vsel %vm4607_vm9, %v4729_v35, %v18480_v9  ;;  %v5051_v62 = vmul.f32 -0.00019511016, %v19070_v33  ;;  %vm20442_vm9 = vmmov %vm20427_vm3 }
 0x57f   :  { %v4745_v1 = vmul.f32 %v4744_v20, %v18976_v38  ;;  %v5190_v41 = vcvt.s32.f32 %v5183_v26  ;;  %v5337_v28 = vshrl.u32 %v5319_v63, %v5335_v0  ;;  %v5340_v5 = vadd.s32 127, %v5339_v18  ;;  %v10509_v63 = vpop.f32.mrf.mxu0 }
 0x580   :  { %v19089_v29 = vadd.f32 1.0, %v19022_v17  ;;  %v19091_v61 = vadd.f32 1.0, %v4900_v43  ;;  %v4595_v47 = vand.u32 3, %v4594_v42  ;;  %v4737_v13 = vadd.f32 -0.4999988, %v4736_v2 }
 0x581   :  { %v5191_v44 = vmul.f32 %v5190_v41, %v5188_v27  ;;  %v5338_v58 = vor.u32 %v5337_v28, %v5336_v11  ;;  %v5341_v54 = vshll.u32 %v5340_v5, 23  ;;  %v10396_v9 = vsel %vm20442_vm9, %v19011_v8, 0.0 }
 0x582   :  { %v4598_v59 = vxor.u32 2147483648, %v19081_v52  ;;  %v4601_v14 = vxor.u32 2147483648, %v19078_v53  ;;  %v4732_v7 = vsel %vm18940_vm5, 0, %v4730_v51  ;;  %v5052_v17 = vadd.f32 0.008332121, %v5051_v62 }
 0x583   :  { %vm9530_vm13 = vcmp.eq.s32.totalorder %v19074_v55, 0  ;;  %v4746_v43 = vadd.f32 1.0, %v4745_v1  ;;  %v5342_v16 = vor.u32 4788187, %v5341_v54  ;;  %v5345_v30 = vcvt.s32.f32 %v5338_v58 }
 0x584   :  { %v10395_v46 = vsel %vm20443_vm15, %v19002_v60, 0.0  ;;  %vm4596_vm11 = vcmp.lt.s32.totalorder %v4595_v47, 2  ;;  %vm4600_vm3 = vcmp.eq.s32.totalorder %v4595_v47, 2  ;;  %vm9533_vm0 = vcmp.eq.s32.totalorder %v19074_v55, 2 }
 0x585   :  { %v5044_v8 = vmul.f32 -0.001358992, %v19070_v33  ;;  %v10508_v34 = vadd.f32 %v18919_v22, %v10507_v32  ;;  %v10416_v10 = vpack.c.bf16 %v10396_v9, %v10395_v46  ;;  %v4738_v57 = vmul.f32 %v4737_v13, %v18976_v38 }
 0x586   :  { %v4749_v35 = vadd.s32 3, %v4732_v7  ;;  %v5192_v20 = vxor.u32 2147483648, %v5191_v44  ;;  %v5343_v26 = vand.u32 2147483647, %v5342_v16  ;;  %vm4597_vm5 = vcmp.eq.s32.totalorder %v4595_v47, 0 }
 0x587   :  { %v4602_v31 = vsel %vm4600_vm3, %v4601_v14, %v19081_v52  ;;  %v5053_v60 = vmul.f32 %v5052_v17, %v19070_v33  ;;  %v10510_v42 = vadd.f32 %v18919_v22, %v10509_v63  ;;  %11481 = vmatmul.msk.bf16.gmra.mxu0 %vm20444_vm8, %v10416_v10  ;;  %v4599_v2 = vsel %vm4597_vm5, %v19078_v53, %v4598_v59  ;;  %v10512_v46 = vpop.f32.mrf.mxu0 }
 0x588   :  { %v4747_v32 = vmul.f32 %v4746_v43, %v18953_v56  ;;  %v9682_v6 = vand.u32 3, %v4732_v7  ;;  %v5346_v27 = vmul.f32 %v5345_v30, %v5343_v26  ;;  %v5045_v38 = vadd.f32 0.041655596, %v5044_v8 }
 0x589   :  { %vm5072_vm14 = vcmp.lt.s32.totalorder %v18461_v25, 0  ;;  %v10581_v0 = vmax.f32 %v10508_v34, 0.0  ;;  %v10582_v11 = vmax.f32 %v10510_v42, 0.0  ;;  %v4739_v18 = vadd.f32 1.0, %v4738_v57 }
 0x58a   :  { %v4750_v51 = vand.u32 3, %v4749_v35  ;;  %v5193_v62 = vsel %vm5072_vm14, %v5192_v20, %v5191_v44  ;;  %v5347_v1 = vxor.u32 2147483648, %v5346_v27  ;;  %v5039_v41 = vsub.s32 4, %v18674_v40  ;;  %v20461_v44 = vld [vmem:[#allocation14_spill] sm:$0xff] }
 0x58b   :  { %v5054_v28 = vadd.f32 -0.16666654, %v5053_v60  ;;  %vm5227_vm7 = vcmp.lt.s32.totalorder %v18635_v12, 0  ;;  %v10611_v5 = vpack.c.bf16 %v10582_v11, %v10581_v0  ;;  %vm4593_vm10 = vweird.f32 %v20400_v23 }
 0x58c   :  { %v4753_v56 = vxor.u32 2147483648, %v4747_v32  ;;  %v20445_v13 = vand.u32 2147483647, %v18461_v25  ;;  %v20448_v54 = vand.u32 2147483647, %v18635_v12  ;;  %v5348_v9 = vsel %vm5227_vm7, %v5347_v1, %v5346_v27 }
 0x58d   :  { %v9532_v7 = vsel %vm9530_vm13, %v19078_v53, %v4598_v59  ;;  %v5046_v17 = vmul.f32 %v5045_v38, %v19070_v33  ;;  %v4603_v30 = vsel %vm4596_vm11, %v4599_v2, %v4602_v31  ;;  %vm9529_vm9 = vcmp.lt.s32.totalorder %v19074_v55, 2  ;;  %10709 = vmatmul.bf16.gmra.mxu1 %v10611_v5 }
 0x58e   :  { %vm19122_vm1 = vcmp.le.f32.partialorder %v20445_v13, 0.7853982  ;;  %vm19128_vm12 = vcmp.le.f32.partialorder %v20448_v54, 0.7853982  ;;  %v9535_v53 = vsel %vm9533_vm0, %v4601_v14, %v19081_v52  ;;  %v4756_v59 = vxor.u32 2147483648, %v4739_v18 }
 0x58f   :  { %v19141_v43 = vsel %vm19122_vm1, %v18461_v25, %v5193_v62  ;;  %v19146_v16 = vsel %vm19128_vm12, %v18635_v12, %v5348_v9  ;;  %vm4752_vm13 = vcmp.eq.s32.totalorder %v4750_v51, 0  ;;  %v5040_v8 = vsel %vm4917_vm4, %v5039_v41, %v18674_v40 }
 0x590   :  { %v5055_v34 = vmul.f32 %v5054_v28, %v19070_v33  ;;  %v19159_v47 = vmul.f32 %v19146_v16, %v19146_v16  ;;  %v9536_v10 = vsel %vm9529_vm9, %v9532_v7, %v9535_v53  ;;  %v4754_v57 = vsel %vm4752_vm13, %v4739_v18, %v4753_v56  ;;  %v20452_v53 = vld [vmem:[#allocation39_spill] sm:$0xff] }
 0x591   :  { %vm9684_vm15 = vcmp.eq.s32.totalorder %v9682_v6, 0  ;;  %v19163_v55 = vmul.f32 %v19141_v43, %v19141_v43  ;;  %vm9841_vm11 = vcmp.eq.s32.totalorder %v19015_v50, 2  ;;  %vm4755_vm3 = vcmp.eq.s32.totalorder %v4750_v51, 2 }
 0x592   :  { %vm9683_vm0 = vcmp.lt.s32.totalorder %v9682_v6, 2  ;;  %v9686_v52 = vsel %vm9684_vm15, %v4739_v18, %v4753_v56  ;;  %v5047_v14 = vadd.f32 -0.4999988, %v5046_v17  ;;  %vm4751_vm4 = vcmp.lt.s32.totalorder %v4750_v51, 2 }
 0x593   :  { %v4757_v40 = vsel %vm4755_vm3, %v4756_v59, %v4747_v32  ;;  %vm9687_vm5 = vcmp.eq.s32.totalorder %v9682_v6, 2  ;;  %v5042_v35 = vsel %vm19050_vm6, 0, %v5040_v8  ;;  %vm4907_vm8 = vcmp.eq.s32.totalorder %v19018_v15, 0  ;;  %v20454_v8 = vld [vmem:[#allocation41_spill] sm:$0xff] }
 0x594   :  { %vm9838_vm9 = vcmp.eq.s32.totalorder %v19015_v50, 0  ;;  %v4758_v20 = vsel %vm4751_vm4, %v4754_v57, %v4757_v40  ;;  %v9689_v26 = vsel %vm9687_vm5, %v4756_v59, %v4747_v32  ;;  %v5056_v63 = vadd.f32 1.0, %v5055_v34  ;;  %v20455_v57 = vld [vmem:[#allocation43_spill] sm:$0xff] }
 0x595   :  { %v5361_v31 = vmul.f32 -0.00019511016, %v19159_v47  ;;  %v4902_v60 = vmul.f32 %v19091_v61, %v18712_v4  ;;  %vm4748_vm13 = vweird.f32 %v20410_v3  ;;  %v9690_v42 = vsel %vm9683_vm0, %v9686_v52, %v9689_v26  ;;  %v10514_v3 = vpop.f32.mrf.mxu0 }
 0x596   :  { %v5206_v2 = vmul.f32 -0.00019511016, %v19163_v55  ;;  %v4604_v39 = vsel %vm4593_vm10, nan, %v4603_v30  ;;  %v9537_v6 = vsel %vm4593_vm10, nan, %v9536_v10  ;;  %v5048_v27 = vmul.f32 %v5047_v14, %v19070_v33  ;;  %v20457_v14 = vld [vmem:[#allocation15_spill] sm:$0xff] }
 0x597   :  { %v10513_v32 = vadd.f32 %v18919_v22, %v10512_v46  ;;  %vm4910_vm6 = vcmp.eq.s32.totalorder %v19018_v15, 2  ;;  %v4911_v38 = vxor.u32 2147483648, %v19089_v29  ;;  %v4759_v4 = vsel %vm4748_vm13, nan, %v4758_v20 }
 0x598   :  { %v5059_v61 = vadd.s32 3, %v5042_v35  ;;  %v9691_v0 = vsel %vm4748_vm13, nan, %v9690_v42  ;;  %v5057_v11 = vmul.f32 %v5056_v63, %v19060_v45  ;;  %v5362_v18 = vadd.f32 0.008332121, %v5361_v31 }
 0x599   :  { %v10515_v51 = vadd.f32 %v18919_v22, %v10514_v3  ;;  %vm20451_vm10 = vcmask 261120   ;;  %v4908_v23 = vxor.u32 2147483648, %v4902_v60  ;;  %v10334_v33 = vsel %vm12700_vm2, %v4604_v39, %v9537_v6 }
 0x59a   :  { %11482 = vmatmul.msk.bf16.gmra.mxu0 %vm20451_vm10, %v10417_v36  ;;  %v9990_v62 = vand.u32 3, %v5042_v35  ;;  %v5207_v1 = vadd.f32 0.008332121, %v5206_v2  ;;  %vm4906_vm15 = vcmp.lt.s32.totalorder %v19018_v15, 2  ;;  %vm9837_vm3 = vcmp.lt.s32.totalorder %v19015_v50, 2 }
 0x59b   :  { %v5049_v41 = vadd.f32 1.0, %v5048_v27  ;;  %v5354_v45 = vmul.f32 -0.001358992, %v19159_v47  ;;  %v10583_v28 = vmax.f32 %v10513_v32, 0.0  ;;  %v10584_v5 = vmax.f32 %v10515_v51, 0.0 }
 0x59c   :  { %v4912_v49 = vsel %vm4910_vm6, %v4911_v38, %v4902_v60  ;;  %v9843_v48 = vsel %vm9841_vm11, %v4911_v38, %v4902_v60  ;;  %v10335_v36 = vsel %vm12700_vm2, %v4759_v4, %v9691_v0  ;;  %v5060_v56 = vand.u32 3, %v5059_v61 }
 0x59d   :  { %v5063_v13 = vxor.u32 2147483648, %v5057_v11  ;;  %v5199_v54 = vmul.f32 -0.001358992, %v19163_v55  ;;  %v5363_v9 = vmul.f32 %v5362_v18, %v19159_v47  ;;  %v10612_v7 = vpack.c.bf16 %v10584_v5, %v10583_v28  ;;  %v10517_v40 = vpop.f32.mrf.mxu0 }
 0x59e   :  { %v4909_v17 = vsel %vm4907_vm8, %v19089_v29, %v4908_v23  ;;  %v9840_v30 = vsel %vm9838_vm9, %v19089_v29, %v4908_v23  ;;  %vm20453_vm11 = vcmp.lt.s32.totalorder %v20374_v19, 2  ;;  %v5208_v46 = vmul.f32 %v5207_v1, %v19163_v55 }
 0x59f   :  { %v10366_v59 = vsel %vm20453_vm11, %v20452_v53, %v10334_v33  ;;  %vm4903_vm0 = vweird.f32 %v20454_v8  ;;  %v5066_v34 = vxor.u32 2147483648, %v5049_v41  ;;  %vm9991_vm4 = vcmp.lt.s32.totalorder %v9990_v62, 2  ;;  %vm20456_vm13 = vmmov %vm20453_vm11  ;;  %10714 = vmatmul.bf16.gmra.mxu1 %v10612_v7  ;;  %v20463_v8 = vld [vmem:[#allocation38_spill] sm:$0xff] }
 0x5a0   :  { %vm9992_vm5 = vcmp.eq.s32.totalorder %v9990_v62, 0  ;;  %v5355_v10 = vadd.f32 0.041655596, %v5354_v45  ;;  %v10367_v52 = vsel %vm20456_vm13, %v20455_v57, %v10335_v36  ;;  %vm5062_vm8 = vcmp.eq.s32.totalorder %v5060_v56, 0 }
 0x5a1   :  { %vm9995_vm6 = vcmp.eq.s32.totalorder %v9990_v62, 2  ;;  %v5194_v29 = vsub.s32 4, %v20457_v14  ;;  %v5064_v35 = vsel %vm5062_vm8, %v5049_v41, %v5063_v13  ;;  %v9994_v20 = vsel %vm9992_vm5, %v5049_v41, %v5063_v13 }
 0x5a2   :  { %v5200_v26 = vadd.f32 0.041655596, %v5199_v54  ;;  %v5364_v63 = vadd.f32 -0.16666654, %v5363_v9  ;;  %vm5061_vm9 = vcmp.lt.s32.totalorder %v5060_v56, 2  ;;  %vm5065_vm10 = vcmp.eq.s32.totalorder %v5060_v56, 2 }
 0x5a3   :  { %v5209_v31 = vadd.f32 -0.16666654, %v5208_v46  ;;  %v5349_v60 = vsub.s32 4, %v19006_v24  ;;  %vm20458_vm11 = vcmp.lt.s32.totalorder %v20374_v19, 26  ;;  %v5067_v2 = vsel %vm5065_vm10, %v5066_v34, %v5057_v11 }
 0x5a4   :  { %v10400_v42 = vsel %vm20458_vm11, %v10367_v52, 0.0  ;;  %v9997_v39 = vsel %vm9995_vm6, %v5066_v34, %v5057_v11  ;;  %v5356_v6 = vmul.f32 %v5355_v10, %v19159_v47  ;;  %v4913_v27 = vsel %vm4906_vm15, %v4909_v17, %v4912_v49  ;;  %vm20459_vm5 = vmmov %vm20458_vm11 }
 0x5a5   :  { %v9844_v32 = vsel %vm9837_vm3, %v9840_v30, %v9843_v48  ;;  %v5068_v38 = vsel %vm5061_vm9, %v5064_v35, %v5067_v2  ;;  %v9998_v4 = vsel %vm9991_vm4, %v9994_v20, %v9997_v39  ;;  %v10399_v61 = vsel %vm20459_vm5, %v10366_v59, 0.0  ;;  %v10519_v45 = vpop.f32.mrf.mxu0  ;;  %vm20466_vm3 = vmmov %vm20459_vm5 }
 0x5a6   :  { %v5195_v3 = vsel %vm5072_vm14, %v5194_v29, %v20457_v14  ;;  %v5201_v0 = vmul.f32 %v5200_v26, %v19163_v55  ;;  %v5365_v11 = vmul.f32 %v5364_v63, %v19159_v47  ;;  %v10418_v18 = vpack.c.bf16 %v10400_v42, %v10399_v61 }
 0x5a7   :  { %vm5058_vm15 = vweird.f32 %v20435_v37  ;;  %v5210_v50 = vmul.f32 %v5209_v31, %v19163_v55  ;;  %v5350_v15 = vsel %vm5227_vm7, %v5349_v60, %v19006_v24  ;;  %v5357_v33 = vadd.f32 -0.4999988, %v5356_v6  ;;  %vm20462_vm7 = vmmov %vm20456_vm13 }
 0x5a8   :  { %v5069_v51 = vsel %vm5058_vm15, nan, %v5068_v38  ;;  %v9999_v23 = vsel %vm5058_vm15, nan, %v9998_v4  ;;  %v10518_v62 = vadd.f32 %v18919_v22, %v10517_v40  ;;  %v4914_v1 = vsel %vm4903_vm0, nan, %v4913_v27 }
 0x5a9   :  { %v9845_v41 = vsel %vm4903_vm0, nan, %v9844_v32  ;;  %v5197_v37 = vsel %vm19122_vm1, 0, %v5195_v3  ;;  %v5202_v28 = vadd.f32 -0.4999988, %v5201_v0  ;;  %v5352_v5 = vsel %vm19128_vm12, 0, %v5350_v15  ;;  %vm20464_vm1 = vmmov %vm20462_vm7 }
 0x5aa   :  { %v5366_v24 = vadd.f32 1.0, %v5365_v11  ;;  %v10520_v49 = vadd.f32 %v18919_v22, %v10519_v45  ;;  %vm20460_vm14 = vcmask 261120   ;;  %v10337_v48 = vsel %vm12700_vm2, %v5069_v51, %v9999_v23  ;;  %vm20465_vm12 = vmmov %vm20459_vm5 }
 0x5ab   :  { %11483 = vmatmul.msk.bf16.gmra.mxu0 %vm20460_vm14, %v10418_v18  ;;  %v5211_v36 = vadd.f32 1.0, %v5210_v50  ;;  %v5358_v56 = vmul.f32 %v5357_v33, %v19159_v47  ;;  %v10585_v13 = vmax.f32 %v10518_v62, 0.0  ;;  %v10336_v58 = vsel %vm12700_vm2, %v4914_v1, %v9845_v41  ;;  %v11615_v33 = vld [vmem:[%s19471_s2 + $0x78] sm:$0xff] }
 0x5ac   :  { %v10586_v54 = vmax.f32 %v10520_v49, 0.0  ;;  %v5214_v9 = vadd.s32 3, %v5197_v37  ;;  %v5369_v7 = vadd.s32 3, %v5352_v5  ;;  %v10369_v17 = vsel %vm20462_vm7, %v20461_v44, %v10337_v48  ;;  %10895 = vmatpush.bf16.msra.mxu2 %v11615_v33  ;;  %v11614_v49 = vld [vmem:[%s19471_s2 + $0x70] sm:$0xff]  ;;  %v11612_v44 = vld [vmem:[%s19471_s2 + $0x60] sm:$0xff] }
 0x5ad   :  { %v5203_v30 = vmul.f32 %v5202_v28, %v19163_v55  ;;  %v5367_v53 = vmul.f32 %v5366_v24, %v19146_v16  ;;  %v5212_v46 = vmul.f32 %v5211_v36, %v19141_v43  ;;  %v10368_v47 = vsel %vm20464_vm1, %v20463_v8, %v10336_v58  ;;  %v10522_v40 = vpop.f32.mrf.mxu0  ;;  %v20468_v28 = vld [vmem:[#allocation16_spill] sm:$0xff]  ;;  %v20470_v24 = vld [vmem:[#allocation34_spill] sm:$0xff] }
 0x5ae   :  { %v10613_v59 = vpack.c.bf16 %v10586_v54, %v10585_v13  ;;  %v10144_v34 = vand.u32 3, %v5197_v37  ;;  %v5359_v10 = vadd.f32 1.0, %v5358_v56  ;;  %v10402_v57 = vsel %vm20465_vm12, %v10369_v17, 0.0 }
 0x5af   :  { %v5215_v52 = vand.u32 3, %v5214_v9  ;;  %v5370_v14 = vand.u32 3, %v5369_v7  ;;  %v10298_v29 = vand.u32 3, %v5352_v5  ;;  %v5204_v55 = vadd.f32 1.0, %v5203_v30 }
 0x5b0   :  { %10719 = vmatmul.bf16.gmra.mxu1 %v10613_v59  ;;  %v5373_v35 = vxor.u32 2147483648, %v5367_v53  ;;  %v10401_v16 = vsel %vm20466_vm3, %v10368_v47, 0.0  ;;  %v5218_v43 = vxor.u32 2147483648, %v5212_v46  ;;  %vm10145_vm0 = vcmp.lt.s32.totalorder %v10144_v34, 2  ;;  %10896 = vmatpush.bf16.msra.mxu2 %v11614_v49  ;;  %v11609_v59 = vld [vmem:[%s19471_s2 + $0x48] sm:$0xff] }
 0x5b1   :  { %v10419_v20 = vpack.c.bf16 %v10402_v57, %v10401_v16  ;;  %v5376_v26 = vxor.u32 2147483648, %v5359_v10  ;;  %vm5217_vm4 = vcmp.eq.s32.totalorder %v5215_v52, 0  ;;  %vm10146_vm13 = vcmp.eq.s32.totalorder %v10144_v34, 0  ;;  %v11608_v57 = vld [vmem:[%s19471_s2 + $0x40] sm:$0xff] }
 0x5b2   :  { %vm5372_vm8 = vcmp.eq.s32.totalorder %v5370_v14, 0  ;;  %vm10300_vm6 = vcmp.eq.s32.totalorder %v10298_v29, 0  ;;  %v5221_v63 = vxor.u32 2147483648, %v5204_v55  ;;  %vm10299_vm9 = vcmp.lt.s32.totalorder %v10298_v29, 2 }
 0x5b3   :  { %v5374_v31 = vsel %vm5372_vm8, %v5359_v10, %v5373_v35  ;;  %v10302_v60 = vsel %vm10300_vm6, %v5359_v10, %v5373_v35  ;;  %v5219_v42 = vsel %vm5217_vm4, %v5204_v55, %v5218_v43  ;;  %v10148_v2 = vsel %vm10146_vm13, %v5204_v55, %v5218_v43 }
 0x5b4   :  { %vm5375_vm10 = vcmp.eq.s32.totalorder %v5370_v14, 2  ;;  %vm10303_vm11 = vcmp.eq.s32.totalorder %v10298_v29, 2  ;;  %vm5371_vm5 = vcmp.lt.s32.totalorder %v5370_v14, 2  ;;  %v10523_v27 = vadd.f32 %v18919_v22, %v10522_v40  ;;  %10897 = vmatpush.bf16.msra.mxu2 %v11613_v21 }
 0x5b5   :  { %v5377_v39 = vsel %vm5375_vm10, %v5376_v26, %v5367_v53  ;;  %v10305_v6 = vsel %vm10303_vm11, %v5376_v26, %v5367_v53  ;;  %vm5220_vm15 = vcmp.eq.s32.totalorder %v5215_v52, 2  ;;  %vm10149_vm14 = vcmp.eq.s32.totalorder %v10144_v34, 2  ;;  %v10524_v4 = vpop.f32.mrf.mxu0  ;;  %v11610_v53 = vld [vmem:[%s19471_s2 + $0x50] sm:$0xff] }
 0x5b6   :  { %v5378_v32 = vsel %vm5371_vm5, %v5374_v31, %v5377_v39  ;;  %v10306_v38 = vsel %vm10299_vm9, %v10302_v60, %v10305_v6  ;;  %vm5216_vm7 = vcmp.lt.s32.totalorder %v5215_v52, 2  ;;  %v5222_v61 = vsel %vm5220_vm15, %v5221_v63, %v5212_v46 }
 0x5b7   :  { %v10151_v3 = vsel %vm10149_vm14, %v5221_v63, %v5212_v46  ;;  %v10525_v0 = vadd.f32 %v18919_v22, %v10524_v4  ;;  %vm20467_vm1 = vcmask 261120   ;;  %v5223_v11 = vsel %vm5216_vm7, %v5219_v42, %v5222_v61 }
 0x5b8   :  { %v10152_v18 = vsel %vm10145_vm0, %v10148_v2, %v10151_v3  ;;  %vm5368_vm12 = vweird.f32 %v18635_v12  ;;  %v10587_v51 = vmax.f32 %v10523_v27, 0.0  ;;  %vm5213_vm3 = vweird.f32 %v18461_v25  ;;  %vm20474_vm8 = vmmov %vm20467_vm1  ;;  %10898 = vmatpush.bf16.msra.mxu2 %v11612_v44 }
 0x5b9   :  { %v5379_v50 = vsel %vm5368_vm12, nan, %v5378_v32  ;;  %v10307_v15 = vsel %vm5368_vm12, nan, %v10306_v38  ;;  %v10588_v23 = vmax.f32 %v10525_v0, 0.0  ;;  %v5224_v62 = vsel %vm5213_vm3, nan, %v5223_v11 }
 0x5ba   :  { %v10153_v1 = vsel %vm5213_vm3, nan, %v10152_v18  ;;  %v10339_v37 = vsel %vm12700_vm2, %v5379_v50, %v10307_v15  ;;  %vm20469_vm0 = vcmp.lt.s32.totalorder %v20374_v19, 2  ;;  %vm20472_vm13 = vcmp.lt.s32.totalorder %v20374_v19, 26  ;;  %v11611_v19 = vld [vmem:[%s19471_s2 + $0x58] sm:$0xff] }
 0x5bb   :  { %11484 = vmatmul.msk.bf16.gmra.mxu0 %vm20467_vm1, %v10419_v20  ;;  %v10614_v41 = vpack.c.bf16 %v10588_v23, %v10587_v51  ;;  %v10338_v12 = vsel %vm12700_vm2, %v5224_v62, %v10153_v1  ;;  %v10371_v5 = vsel %vm20469_vm0, %v20468_v28, %v10339_v37  ;;  %vm20471_vm4 = vmmov %vm20469_vm0  ;;  %v19321_v20 = vld [vmem:[%s19472_s3 + $0x1] ss:$0 sm:$0xff] }
 0x5bc   :  { %v10370_v25 = vsel %vm20471_vm4, %v20470_v24, %v10338_v12  ;;  %v10404_v48 = vsel %vm20472_vm13, %v10371_v5, 0.0  ;;  %vm20473_vm2 = vmmov %vm20472_vm13  ;;  %10899 = vmatpush.bf16.msra.mxu2 %v11611_v19 }
 0x5bd   :  { %v10527_v45 = vpop.f32.mrf.mxu0  ;;  %v10403_v36 = vsel %vm20473_vm2, %v10370_v25, 0.0 }
 0x5be   :  { %v10420_v56 = vpack.c.bf16 %v10404_v48, %v10403_v36  ;;  %v10528_v13 = vadd.f32 %v18919_v22, %v10527_v45 }
 0x5c0   :  { %10724 = vmatmul.bf16.gmra.mxu1 %v10614_v41  ;;  %v10589_v9 = vmax.f32 %v10528_v13, 0.0  ;;  %10900 = vmatpush.bf16.msra.mxu2 %v11610_v53 }
 0x5c4   :  { %10901 = vmatpush.bf16.msra.mxu2 %v11609_v59 }
 0x5c5   :  { %v10529_v54 = vpop.f32.mrf.mxu0 }
 0x5c6   :  { %v10530_v58 = vadd.f32 %v18919_v22, %v10529_v54 }
 0x5c8   :  { %v10590_v7 = vmax.f32 %v10530_v58, 0.0  ;;  %10902 = vmatpush.bf16.msra.mxu2 %v11608_v57 }
 0x5ca   :  { %v10615_v17 = vpack.c.bf16 %v10590_v7, %v10589_v9 }
 0x5cb   :  { %11485 = vmatmul.msk.bf16.gmra.mxu0 %vm20474_vm8, %v10420_v56 }
 0x5cd   :  { %v10532_v30 = vpop.f32.mrf.mxu0 }
 0x5ce   :  { %v10533_v46 = vadd.f32 %v18919_v22, %v10532_v30 }
 0x5d0   :  { %10729 = vmatmul.bf16.gmra.mxu1 %v10615_v17  ;;  %v10591_v34 = vmax.f32 %v10533_v46, 0.0 }
 0x5d5   :  { %v10534_v8 = vpop.f32.mrf.mxu0 }
 0x5d6   :  { %v10535_v47 = vadd.f32 %v18919_v22, %v10534_v8 }
 0x5d8   :  { %v10592_v10 = vmax.f32 %v10535_v47, 0.0 }
 0x5da   :  { %v10616_v52 = vpack.c.bf16 %v10592_v10, %v10591_v34 }
 0x5dd   :  { %v10537_v14 = vpop.f32.mrf.mxu0 }
 0x5de   :  { %v10538_v29 = vadd.f32 %v18919_v22, %v10537_v14 }
 0x5e0   :  { %10734 = vmatmul.bf16.gmra.mxu1 %v10616_v52  ;;  %v10593_v16 = vmax.f32 %v10538_v29, 0.0 }
 0x5e4   :  { %v10700_v55 = vpop.f32.mrf.mxu1 }
 0x5e5   :  { %v10539_v40 = vpop.f32.mrf.mxu0  ;;  %v10701_v63 = vadd.f32 %v19321_v20, %v10700_v55 }
 0x5e6   :  { %v10540_v35 = vadd.f32 %v18919_v22, %v10539_v40 }
 0x5e7   :  { %v10780_v2 = vmax.f32 %v10701_v63, 0.0 }
 0x5e8   :  { %v10594_v43 = vmax.f32 %v10540_v35, 0.0 }
 0x5ea   :  { %v10617_v26 = vpack.c.bf16 %v10594_v43, %v10593_v16 }
 0x5ec   :  { %v10702_v60 = vpop.f32.mrf.mxu1 }
 0x5ed   :  { %v10542_v31 = vpop.f32.mrf.mxu0  ;;  %v10703_v42 = vadd.f32 %v19321_v20, %v10702_v60 }
 0x5ee   :  { %v10543_v27 = vadd.f32 %v18919_v22, %v10542_v31 }
 0x5ef   :  { %v10781_v39 = vmax.f32 %v10703_v42, 0.0 }
 0x5f0   :  { %10739 = vmatmul.bf16.gmra.mxu1 %v10617_v26  ;;  %v10595_v4 = vmax.f32 %v10543_v27, 0.0 }
 0x5f1   :  { %v10812_v6 = vpack.c.bf16 %v10781_v39, %v10780_v2 }
 0x5f3   :  { %10903 = vmatmul.bf16.vlgmr.msra.gmra.mxu2 %v10812_v6 }
 0x5f5   :  { %v10544_v32 = vpop.f32.mrf.mxu0 }
 0x5f6   :  { %v10545_v38 = vadd.f32 %v18919_v22, %v10544_v32 }
 0x5f8   :  { %v10596_v61 = vmax.f32 %v10545_v38, 0.0 }
 0x5fa   :  { %v10705_v3 = vpop.f32.mrf.mxu1  ;;  %v10618_v0 = vpack.c.bf16 %v10596_v61, %v10595_v4 }
 0x5fb   :  { %v10706_v18 = vadd.f32 %v19321_v20, %v10705_v3  ;;  %v11741_v3 = vld [vmem:[%s19472_s3] ss:$0 sm:$0xff] }
 0x5fd   :  { %v10547_v11 = vpop.f32.mrf.mxu0  ;;  %v10782_v23 = vmax.f32 %v10706_v18, 0.0 }
 0x5fe   :  { %v10548_v51 = vadd.f32 %v18919_v22, %v10547_v11 }
 0x600   :  { %10744 = vmatmul.bf16.gmra.mxu1 %v10618_v0  ;;  %v10597_v37 = vmax.f32 %v10548_v51, 0.0 }
 0x602   :  { %v10707_v50 = vpop.f32.mrf.mxu1 }
 0x603   :  { %v10708_v15 = vadd.f32 %v19321_v20, %v10707_v50 }
 0x605   :  { %v10783_v33 = vmax.f32 %v10708_v15, 0.0  ;;  %v10549_v62 = vpop.f32.mrf.mxu0 }
 0x606   :  { %v10550_v1 = vadd.f32 %v18919_v22, %v10549_v62 }
 0x607   :  { %v10813_v41 = vpack.c.bf16 %v10783_v33, %v10782_v23 }
 0x608   :  { %v10598_v12 = vmax.f32 %v10550_v1, 0.0 }
 0x609   :  { %10908 = vmatmul.bf16.gmra.mxu2 %v10813_v41  ;;  %v11623_v41 = vld [vmem:[%s19473_s4 + $0x38] sm:$0xff] }
 0x60a   :  { %v10710_v45 = vpop.f32.mrf.mxu1  ;;  %v10619_v28 = vpack.c.bf16 %v10598_v12, %v10597_v37  ;;  %11098 = vmatpush.bf16.msra.mxu3 %v11623_v41  ;;  %v11622_v37 = vld [vmem:[%s19473_s4 + $0x30] sm:$0xff] }
 0x60b   :  { %v10711_v24 = vadd.f32 %v19321_v20, %v10710_v45 }
 0x60d   :  { %v10552_v5 = vpop.f32.mrf.mxu0  ;;  %v10784_v21 = vmax.f32 %v10711_v24, 0.0 }
 0x60e   :  { %v10553_v48 = vadd.f32 %v18919_v22, %v10552_v5  ;;  %11099 = vmatpush.bf16.msra.mxu3 %v11622_v37 }
 0x610   :  { %10749 = vmatmul.bf16.gmra.mxu1 %v10619_v28  ;;  %v10599_v58 = vmax.f32 %v10553_v48, 0.0  ;;  %v11621_v48 = vld [vmem:[%s19473_s4 + $0x28] sm:$0xff] }
 0x612   :  { %v10712_v25 = vpop.f32.mrf.mxu1  ;;  %11100 = vmatpush.bf16.msra.mxu3 %v11621_v48 }
 0x613   :  { %v10713_v49 = vadd.f32 %v19321_v20, %v10712_v25 }
 0x615   :  { %v10785_v36 = vmax.f32 %v10713_v49, 0.0  ;;  %v10554_v56 = vpop.f32.mrf.mxu0 }
 0x616   :  { %v10555_v13 = vadd.f32 %v18919_v22, %v10554_v56  ;;  %v11620_v56 = vld [vmem:[%s19473_s4 + $0x20] sm:$0xff] }
 0x617   :  { %v10814_v54 = vpack.c.bf16 %v10785_v36, %v10784_v21  ;;  %11101 = vmatpush.bf16.msra.mxu3 %v11620_v56 }
 0x618   :  { %v10600_v9 = vmax.f32 %v10555_v13, 0.0 }
 0x619   :  { %10913 = vmatmul.bf16.gmra.mxu2 %v10814_v54 }
 0x61a   :  { %v10620_v44 = vpack.c.bf16 %v10600_v9, %v10599_v58 }
 0x61c   :  { %v10715_v7 = vpop.f32.mrf.mxu1 }
 0x61d   :  { %v10557_v17 = vpop.f32.mrf.mxu0  ;;  %v10716_v19 = vadd.f32 %v19321_v20, %v10715_v7  ;;  %v11619_v7 = vld [vmem:[%s19473_s4 + $0x18] sm:$0xff] }
 0x61e   :  { %v10558_v59 = vadd.f32 %v18919_v22, %v10557_v17  ;;  %11102 = vmatpush.bf16.msra.mxu3 %v11619_v7 }
 0x61f   :  { %v10786_v46 = vmax.f32 %v10716_v19, 0.0 }
 0x620   :  { %10754 = vmatmul.bf16.gmra.mxu1 %v10620_v44  ;;  %v10601_v57 = vmax.f32 %v10558_v59, 0.0  ;;  %v11618_v44 = vld [vmem:[%s19473_s4 + $0x10] sm:$0xff] }
 0x622   :  { %11103 = vmatpush.bf16.msra.mxu3 %v11618_v44 }
 0x624   :  { %v10717_v30 = vpop.f32.mrf.mxu1 }
 0x625   :  { %v10718_v53 = vadd.f32 %v19321_v20, %v10717_v30  ;;  %v10559_v47 = vpop.f32.mrf.mxu0 }
 0x626   :  { %v10560_v34 = vadd.f32 %v18919_v22, %v10559_v47  ;;  %v11616_v47 = vld [vmem:[%s19473_s4] sm:$0xff] }
 0x627   :  { %v10787_v8 = vmax.f32 %v10718_v53, 0.0 }
 0x628   :  { %v10602_v52 = vmax.f32 %v10560_v34, 0.0 }
 0x629   :  { %v10815_v10 = vpack.c.bf16 %v10787_v8, %v10786_v46  ;;  %v11617_v46 = vld [vmem:[%s19473_s4 + $0x8] sm:$0xff] }
 0x62a   :  { %v10621_v14 = vpack.c.bf16 %v10602_v52, %v10601_v57  ;;  %11104 = vmatpush.bf16.msra.mxu3 %v11617_v46 }
 0x62b   :  { %10918 = vmatmul.bf16.gmra.mxu2 %v10815_v10 }
 0x62d   :  { %v10720_v29 = vpop.f32.mrf.mxu1  ;;  %v10562_v40 = vpop.f32.mrf.mxu0 }
 0x62e   :  { %v10721_v55 = vadd.f32 %v19321_v20, %v10720_v29  ;;  %v10563_v43 = vadd.f32 %v18919_v22, %v10562_v40  ;;  %11105 = vmatpush.bf16.msra.mxu3 %v11616_v47 }
 0x630   :  { %10759 = vmatmul.bf16.gmra.mxu1 %v10621_v14  ;;  %v10788_v26 = vmax.f32 %v10721_v55, 0.0  ;;  %v10603_v2 = vmax.f32 %v10563_v43, 0.0 }
 0x635   :  { %v10722_v35 = vpop.f32.mrf.mxu1  ;;  %v10564_v31 = vpop.f32.mrf.mxu0 }
 0x636   :  { %v10723_v16 = vadd.f32 %v19321_v20, %v10722_v35  ;;  %v10565_v60 = vadd.f32 %v18919_v22, %v10564_v31 }
 0x638   :  { %v10789_v63 = vmax.f32 %v10723_v16, 0.0  ;;  %v10604_v39 = vmax.f32 %v10565_v60, 0.0  ;;  %v19381_v16 = vld [vmem:[%s19472_s3 + $0x2] ss:$0 sm:$0xff] }
 0x63a   :  { %v10816_v42 = vpack.c.bf16 %v10789_v63, %v10788_v26  ;;  %v10622_v6 = vpack.c.bf16 %v10604_v39, %v10603_v2 }
 0x63c   :  { %10923 = vmatmul.bf16.gmra.mxu2 %v10816_v42 }
 0x63d   :  { %v10725_v27 = vpop.f32.mrf.mxu1  ;;  %v10567_v32 = vpop.f32.mrf.mxu0 }
 0x63e   :  { %v10726_v38 = vadd.f32 %v19321_v20, %v10725_v27  ;;  %v10568_v0 = vadd.f32 %v11741_v3, %v10567_v32 }
 0x640   :  { %10764 = vmatmul.bf16.gmra.mxu1 %v10622_v6  ;;  %v10790_v11 = vmax.f32 %v10726_v38, 0.0  ;;  %v10605_v51 = vmax.f32 %v10568_v0, 0.0 }
 0x645   :  { %v10727_v4 = vpop.f32.mrf.mxu1  ;;  %v10569_v18 = vpop.f32.mrf.mxu0 }
 0x646   :  { %v10728_v61 = vadd.f32 %v19321_v20, %v10727_v4  ;;  %v10570_v50 = vadd.f32 %v11741_v3, %v10569_v18 }
 0x648   :  { %v10791_v22 = vmax.f32 %v10728_v61, 0.0  ;;  %v10606_v23 = vmax.f32 %v10570_v50, 0.0 }
 0x64a   :  { %v10817_v15 = vpack.c.bf16 %v10791_v22, %v10790_v11  ;;  %v10623_v33 = vpack.c.bf16 %v10606_v23, %v10605_v51 }
 0x64c   :  { %10928 = vmatmul.bf16.gmra.mxu2 %v10817_v15 }
 0x64d   :  { %v10730_v62 = vpop.f32.mrf.mxu1  ;;  %v10572_v1 = vpop.f32.mrf.mxu0 }
 0x64e   :  { %v10731_v12 = vadd.f32 %v19321_v20, %v10730_v62  ;;  %v10573_v5 = vadd.f32 %v11741_v3, %v10572_v1 }
 0x650   :  { %10769 = vmatmul.bf16.gmra.mxu1 %v10623_v33  ;;  %v10792_v24 = vmax.f32 %v10731_v12, 0.0  ;;  %v10607_v13 = vmax.f32 %v10573_v5, 0.0 }
 0x655   :  { %v10732_v45 = vpop.f32.mrf.mxu1  ;;  %v10574_v49 = vpop.f32.mrf.mxu0 }
 0x656   :  { %v10733_v28 = vadd.f32 %v19321_v20, %v10732_v45  ;;  %v10575_v21 = vadd.f32 %v11741_v3, %v10574_v49 }
 0x658   :  { %v10793_v25 = vmax.f32 %v10733_v28, 0.0  ;;  %v10608_v54 = vmax.f32 %v10575_v21, 0.0 }
 0x65a   :  { %v10818_v36 = vpack.c.bf16 %v10793_v25, %v10792_v24  ;;  %v10624_v58 = vpack.c.bf16 %v10608_v54, %v10607_v13 }
 0x65c   :  { %10933 = vmatmul.bf16.gmra.mxu2 %v10818_v36 }
 0x65d   :  { %v10735_v9 = vpop.f32.mrf.mxu1 }
 0x65e   :  { %v10736_v17 = vadd.f32 %v19321_v20, %v10735_v9 }
 0x660   :  { %10774 = vmatmul.bf16.gmra.mxu1 %v10624_v58  ;;  %v10794_v53 = vmax.f32 %v10736_v17, 0.0 }
 0x665   :  { %v10737_v19 = vpop.f32.mrf.mxu1 }
 0x666   :  { %v10738_v30 = vadd.f32 %v19321_v20, %v10737_v19 }
 0x668   :  { %v10795_v59 = vmax.f32 %v10738_v30, 0.0 }
 0x66a   :  { %v10819_v8 = vpack.c.bf16 %v10795_v59, %v10794_v53 }
 0x66c   :  { %10938 = vmatmul.bf16.gmra.mxu2 %v10819_v8 }
 0x66d   :  { %v10740_v34 = vpop.f32.mrf.mxu1 }
 0x66e   :  { %v10741_v10 = vadd.f32 %v19321_v20, %v10740_v34 }
 0x670   :  { %v10796_v14 = vmax.f32 %v10741_v10, 0.0 }
 0x675   :  { %v10742_v57 = vpop.f32.mrf.mxu1 }
 0x676   :  { %v10743_v52 = vadd.f32 %v19321_v20, %v10742_v57  ;;  %v10904_v55 = vpop.f32.mrf.mxu2 }
 0x677   :  { %v10905_v43 = vadd.f32 %v19381_v16, %v10904_v55 }
 0x678   :  { %v10797_v29 = vmax.f32 %v10743_v52, 0.0 }
 0x679   :  { %v10984_v60 = vmax.f32 %v10905_v43, 0.0 }
 0x67a   :  { %v10820_v40 = vpack.c.bf16 %v10797_v29, %v10796_v14 }
 0x67c   :  { %10943 = vmatmul.bf16.gmra.mxu2 %v10820_v40 }
 0x67d   :  { %v10745_v35 = vpop.f32.mrf.mxu1 }
 0x67e   :  { %v10906_v26 = vpop.f32.mrf.mxu2  ;;  %v10746_v31 = vadd.f32 %v19321_v20, %v10745_v35 }
 0x67f   :  { %v10907_v63 = vadd.f32 %v19381_v16, %v10906_v26 }
 0x680   :  { %v10798_v27 = vmax.f32 %v10746_v31, 0.0 }
 0x681   :  { %v10985_v2 = vmax.f32 %v10907_v63, 0.0 }
 0x683   :  { %v11016_v6 = vpack.c.bf16 %v10985_v2, %v10984_v60 }
 0x685   :  { %v10747_v42 = vpop.f32.mrf.mxu1  ;;  %11106 = vmatmul.bf16.vlgmr.msra.gmra.mxu3 %v11016_v6 }
 0x686   :  { %v10748_v39 = vadd.f32 %v19321_v20, %v10747_v42 }
 0x688   :  { %v10799_v32 = vmax.f32 %v10748_v39, 0.0 }
 0x68a   :  { %v10821_v38 = vpack.c.bf16 %v10799_v32, %v10798_v27 }
 0x68c   :  { %10948 = vmatmul.bf16.gmra.mxu2 %v10821_v38  ;;  %v10909_v61 = vpop.f32.mrf.mxu2 }
 0x68d   :  { %v10750_v4 = vpop.f32.mrf.mxu1  ;;  %v10910_v11 = vadd.f32 %v19381_v16, %v10909_v61 }
 0x68e   :  { %v10751_v3 = vadd.f32 %v19321_v20, %v10750_v4 }
 0x68f   :  { %v10986_v23 = vmax.f32 %v10910_v11, 0.0 }
 0x690   :  { %v10800_v50 = vmax.f32 %v10751_v3, 0.0 }
 0x694   :  { %v10911_v18 = vpop.f32.mrf.mxu2 }
 0x695   :  { %v10752_v0 = vpop.f32.mrf.mxu1  ;;  %v10912_v51 = vadd.f32 %v19381_v16, %v10911_v18 }
 0x696   :  { %v10753_v22 = vadd.f32 %v19321_v20, %v10752_v0 }
 0x697   :  { %v10987_v33 = vmax.f32 %v10912_v51, 0.0 }
 0x698   :  { %v10801_v15 = vmax.f32 %v10753_v22, 0.0 }
 0x699   :  { %v11017_v1 = vpack.c.bf16 %v10987_v33, %v10986_v23 }
 0x69a   :  { %v10822_v62 = vpack.c.bf16 %v10801_v15, %v10800_v50 }
 0x69b   :  { %11111 = vmatmul.bf16.gmra.mxu3 %v11017_v1 }
 0x69c   :  { %10953 = vmatmul.bf16.gmra.mxu2 %v10822_v62  ;;  %v10914_v37 = vpop.f32.mrf.mxu2 }
 0x69d   :  { %v10755_v41 = vpop.f32.mrf.mxu1  ;;  %v10915_v28 = vadd.f32 %v19381_v16, %v10914_v37 }
 0x69e   :  { %v10756_v12 = vadd.f32 %v19321_v20, %v10755_v41 }
 0x69f   :  { %v10988_v21 = vmax.f32 %v10915_v28, 0.0 }
 0x6a0   :  { %v10802_v25 = vmax.f32 %v10756_v12, 0.0 }
 0x6a4   :  { %v10916_v24 = vpop.f32.mrf.mxu2 }
 0x6a5   :  { %v10757_v45 = vpop.f32.mrf.mxu1  ;;  %v10917_v48 = vadd.f32 %v19381_v16, %v10916_v24 }
 0x6a6   :  { %v10758_v5 = vadd.f32 %v19321_v20, %v10757_v45 }
 0x6a7   :  { %v10989_v36 = vmax.f32 %v10917_v48, 0.0 }
 0x6a8   :  { %v10803_v49 = vmax.f32 %v10758_v5, 0.0 }
 0x6a9   :  { %v11018_v13 = vpack.c.bf16 %v10989_v36, %v10988_v21 }
 0x6aa   :  { %v10823_v56 = vpack.c.bf16 %v10803_v49, %v10802_v25 }
 0x6ab   :  { %11116 = vmatmul.bf16.gmra.mxu3 %v11018_v13 }
 0x6ac   :  { %10958 = vmatmul.bf16.gmra.mxu2 %v10823_v56 }
 0x6ad   :  { %v10760_v54 = vpop.f32.mrf.mxu1 }
 0x6ae   :  { %v10919_v58 = vpop.f32.mrf.mxu2  ;;  %v10761_v9 = vadd.f32 %v19321_v20, %v10760_v54 }
 0x6af   :  { %v10920_v44 = vadd.f32 %v19381_v16, %v10919_v58 }
 0x6b0   :  { %v10804_v30 = vmax.f32 %v10761_v9, 0.0 }
 0x6b1   :  { %v10990_v46 = vmax.f32 %v10920_v44, 0.0  ;;  %v19418_v44 = vld [vmem:[%s19472_s3 + $0x3] ss:$0 sm:$0xff]  ;;  %s11776_s3 = smov [#allocation2]  }
 0x6b2   :  { %s11255_s11 = sshll.u32 %s11776_s3, 4  ;;  %s11256_s11 = int_to_ptr.vmem [resolvable:$true] %s11255_s11 }
 0x6b5   :  { %v10762_v7 = vpop.f32.mrf.mxu1 }
 0x6b6   :  { %v10763_v17 = vadd.f32 %v19321_v20, %v10762_v7  ;;  %v10921_v19 = vpop.f32.mrf.mxu2 }
 0x6b7   :  { %v10922_v59 = vadd.f32 %v19381_v16, %v10921_v19 }
 0x6b8   :  { %v10805_v53 = vmax.f32 %v10763_v17, 0.0 }
 0x6b9   :  { %v10991_v47 = vmax.f32 %v10922_v59, 0.0 }
 0x6ba   :  { %v10824_v8 = vpack.c.bf16 %v10805_v53, %v10804_v30 }
 0x6bb   :  { %v11019_v34 = vpack.c.bf16 %v10991_v47, %v10990_v46 }
 0x6bc   :  { %10963 = vmatmul.bf16.gmra.mxu2 %v10824_v8 }
 0x6bd   :  { %v10765_v10 = vpop.f32.mrf.mxu1  ;;  %11121 = vmatmul.bf16.gmra.mxu3 %v11019_v34 }
 0x6be   :  { %v10766_v52 = vadd.f32 %v19321_v20, %v10765_v10 }
 0x6bf   :  { %v10924_v57 = vpop.f32.mrf.mxu2 }
 0x6c0   :  { %v10925_v29 = vadd.f32 %v19381_v16, %v10924_v57  ;;  %v10806_v35 = vmax.f32 %v10766_v52, 0.0 }
 0x6c2   :  { %v10992_v63 = vmax.f32 %v10925_v29, 0.0 }
 0x6c5   :  { %v10767_v14 = vpop.f32.mrf.mxu1 }
 0x6c6   :  { %v10768_v40 = vadd.f32 %v19321_v20, %v10767_v14 }
 0x6c7   :  { %v10926_v55 = vpop.f32.mrf.mxu2 }
 0x6c8   :  { %v10807_v43 = vmax.f32 %v10768_v40, 0.0  ;;  %v10927_v26 = vadd.f32 %v19381_v16, %v10926_v55 }
 0x6ca   :  { %v10825_v31 = vpack.c.bf16 %v10807_v43, %v10806_v35  ;;  %v10993_v60 = vmax.f32 %v10927_v26, 0.0 }
 0x6cc   :  { %10968 = vmatmul.bf16.gmra.mxu2 %v10825_v31  ;;  %v11020_v42 = vpack.c.bf16 %v10993_v60, %v10992_v63 }
 0x6cd   :  { %v10770_v2 = vpop.f32.mrf.mxu1 }
 0x6ce   :  { %11126 = vmatmul.bf16.gmra.mxu3 %v11020_v42  ;;  %v10771_v6 = vadd.f32 %v19321_v20, %v10770_v2 }
 0x6cf   :  { %v10929_v39 = vpop.f32.mrf.mxu2 }
 0x6d0   :  { %v10930_v32 = vadd.f32 %v19381_v16, %v10929_v39  ;;  %v10808_v61 = vmax.f32 %v10771_v6, 0.0 }
 0x6d2   :  { %v10994_v11 = vmax.f32 %v10930_v32, 0.0 }
 0x6d5   :  { %v10772_v27 = vpop.f32.mrf.mxu1 }
 0x6d6   :  { %v10773_v38 = vadd.f32 %v19321_v20, %v10772_v27 }
 0x6d7   :  { %v10931_v4 = vpop.f32.mrf.mxu2 }
 0x6d8   :  { %v10809_v3 = vmax.f32 %v10773_v38, 0.0  ;;  %v10932_v0 = vadd.f32 %v19381_v16, %v10931_v4 }
 0x6da   :  { %v10826_v22 = vpack.c.bf16 %v10809_v3, %v10808_v61  ;;  %v10995_v18 = vmax.f32 %v10932_v0, 0.0 }
 0x6dc   :  { %10973 = vmatmul.bf16.gmra.mxu2 %v10826_v22  ;;  %v11021_v50 = vpack.c.bf16 %v10995_v18, %v10994_v11 }
 0x6dd   :  { %v10775_v15 = vpop.f32.mrf.mxu1 }
 0x6de   :  { %11131 = vmatmul.bf16.gmra.mxu3 %v11021_v50  ;;  %v10776_v23 = vadd.f32 %v19321_v20, %v10775_v15 }
 0x6df   :  { %v10934_v51 = vpop.f32.mrf.mxu2 }
 0x6e0   :  { %v10935_v62 = vadd.f32 %v19381_v16, %v10934_v51  ;;  %v10810_v37 = vmax.f32 %v10776_v23, 0.0 }
 0x6e2   :  { %v10996_v28 = vmax.f32 %v10935_v62, 0.0 }
 0x6e5   :  { %v10777_v33 = vpop.f32.mrf.mxu1 }
 0x6e6   :  { %v10778_v1 = vadd.f32 %v19321_v20, %v10777_v33 }
 0x6e7   :  { %v10936_v41 = vpop.f32.mrf.mxu2 }
 0x6e8   :  { %v10811_v12 = vmax.f32 %v10778_v1, 0.0  ;;  %v10937_v45 = vadd.f32 %v19381_v16, %v10936_v41 }
 0x6ea   :  { %v10827_v5 = vpack.c.bf16 %v10811_v12, %v10810_v37  ;;  %v10997_v24 = vmax.f32 %v10937_v45, 0.0 }
 0x6ec   :  { %10978 = vmatmul.bf16.gmra.mxu2 %v10827_v5  ;;  %v11022_v25 = vpack.c.bf16 %v10997_v24, %v10996_v28 }
 0x6ee   :  { %11136 = vmatmul.bf16.gmra.mxu3 %v11022_v25 }
 0x6ef   :  { %v10939_v49 = vpop.f32.mrf.mxu2 }
 0x6f0   :  { %v10940_v48 = vadd.f32 %v19381_v16, %v10939_v49 }
 0x6f2   :  { %v10998_v56 = vmax.f32 %v10940_v48, 0.0 }
 0x6f7   :  { %v10941_v21 = vpop.f32.mrf.mxu2 }
 0x6f8   :  { %v10942_v36 = vadd.f32 %v19381_v16, %v10941_v21 }
 0x6fa   :  { %v10999_v13 = vmax.f32 %v10942_v36, 0.0 }
 0x6fc   :  { %v11023_v20 = vpack.c.bf16 %v10999_v13, %v10998_v56 }
 0x6fe   :  { %11141 = vmatmul.bf16.gmra.mxu3 %v11023_v20 }
 0x6ff   :  { %v10944_v54 = vpop.f32.mrf.mxu2 }
 0x700   :  { %v10945_v58 = vadd.f32 %v19381_v16, %v10944_v54 }
 0x702   :  { %v11000_v17 = vmax.f32 %v10945_v58, 0.0 }
 0x707   :  { %v10946_v9 = vpop.f32.mrf.mxu2 }
 0x708   :  { %v10947_v7 = vadd.f32 %v19381_v16, %v10946_v9  ;;  %v11107_v53 = vpop.f32.mrf.mxu3 }
 0x709   :  { %v11108_v59 = vadd.f32 %v19418_v44, %v11107_v53 }
 0x70a   :  { %v11001_v19 = vmax.f32 %v10947_v7, 0.0 }
 0x70b   :  { %11677 = vtanh.f32 %v11108_v59 }
 0x70c   :  { %v11024_v30 = vpack.c.bf16 %v11001_v19, %v11000_v17 }
 0x70e   :  { %11146 = vmatmul.bf16.gmra.mxu3 %v11024_v30 }
 0x70f   :  { %v10949_v46 = vpop.f32.mrf.mxu2 }
 0x710   :  { %v11109_v8 = vpop.f32.mrf.mxu3  ;;  %v10950_v10 = vadd.f32 %v19381_v16, %v10949_v46 }
 0x711   :  { %v11678_v47 = vpop.eup %11677  ;;  %v11110_v34 = vadd.f32 %v19418_v44, %v11109_v8 }
 0x712   :  { %11219 = vst [vmem:[#allocation2] sm:$0xff] %v11678_v47  ;;  %v11002_v14 = vmax.f32 %v10950_v10, 0.0 }
 0x713   :  { %11679 = vtanh.f32 %v11110_v34 }
 0x717   :  { %v10951_v57 = vpop.f32.mrf.mxu2 }
 0x718   :  { %v10952_v52 = vadd.f32 %v19381_v16, %v10951_v57 }
 0x719   :  { %v11680_v55 = vpop.eup %11679 }
 0x71a   :  { %v11003_v29 = vmax.f32 %v10952_v52, 0.0  ;;  %11220 = vst [vmem:[#allocation2 + $0x8] sm:$0xff] %v11680_v55 }
 0x71c   :  { %v11025_v40 = vpack.c.bf16 %v11003_v29, %v11002_v14 }
 0x71e   :  { %11151 = vmatmul.bf16.gmra.mxu3 %v11025_v40  ;;  %v11112_v43 = vpop.f32.mrf.mxu3 }
 0x71f   :  { %v10954_v35 = vpop.f32.mrf.mxu2  ;;  %v11113_v26 = vadd.f32 %v19418_v44, %v11112_v43 }
 0x720   :  { %v10955_v63 = vadd.f32 %v19381_v16, %v10954_v35 }
 0x721   :  { %11681 = vtanh.f32 %v11113_v26 }
 0x722   :  { %v11004_v39 = vmax.f32 %v10955_v63, 0.0 }
 0x726   :  { %v11114_v42 = vpop.f32.mrf.mxu3 }
 0x727   :  { %v10956_v31 = vpop.f32.mrf.mxu2  ;;  %v11682_v2 = vpop.eup %11681  ;;  %v11115_v27 = vadd.f32 %v19418_v44, %v11114_v42 }
 0x728   :  { %v10957_v60 = vadd.f32 %v19381_v16, %v10956_v31  ;;  %11221 = vst [vmem:[#allocation2 + $0x10] sm:$0xff] %v11682_v2 }
 0x729   :  { %11683 = vtanh.f32 %v11115_v27 }
 0x72a   :  { %v11005_v6 = vmax.f32 %v10957_v60, 0.0 }
 0x72c   :  { %v11026_v32 = vpack.c.bf16 %v11005_v6, %v11004_v39 }
 0x72e   :  { %11156 = vmatmul.bf16.gmra.mxu3 %v11026_v32  ;;  %v11117_v4 = vpop.f32.mrf.mxu3 }
 0x72f   :  { %v10959_v38 = vpop.f32.mrf.mxu2  ;;  %v11684_v61 = vpop.eup %11683  ;;  %v11118_v3 = vadd.f32 %v19418_v44, %v11117_v4 }
 0x730   :  { %11222 = vst [vmem:[#allocation2 + $0x18] sm:$0xff] %v11684_v61  ;;  %v10960_v0 = vadd.f32 %v19381_v16, %v10959_v38 }
 0x731   :  { %11685 = vtanh.f32 %v11118_v3 }
 0x732   :  { %v11006_v15 = vmax.f32 %v10960_v0, 0.0 }
 0x736   :  { %v11119_v18 = vpop.f32.mrf.mxu3 }
 0x737   :  { %v10961_v11 = vpop.f32.mrf.mxu2  ;;  %v11686_v50 = vpop.eup %11685  ;;  %v11120_v23 = vadd.f32 %v19418_v44, %v11119_v18 }
 0x738   :  { %v10962_v22 = vadd.f32 %v19381_v16, %v10961_v11  ;;  %11223 = vst [vmem:[#allocation2 + $0x20] sm:$0xff] %v11686_v50 }
 0x739   :  { %11687 = vtanh.f32 %v11120_v23 }
 0x73a   :  { %v11007_v51 = vmax.f32 %v10962_v22, 0.0 }
 0x73c   :  { %v11027_v33 = vpack.c.bf16 %v11007_v51, %v11006_v15 }
 0x73e   :  { %11161 = vmatmul.bf16.gmra.mxu3 %v11027_v33 }
 0x73f   :  { %v10964_v62 = vpop.f32.mrf.mxu2  ;;  %v11688_v41 = vpop.eup %11687 }
 0x740   :  { %v11122_v1 = vpop.f32.mrf.mxu3  ;;  %11224 = vst [vmem:[#allocation2 + $0x28] sm:$0xff] %v11688_v41  ;;  %v10965_v12 = vadd.f32 %v19381_v16, %v10964_v62 }
 0x741   :  { %v11123_v37 = vadd.f32 %v19418_v44, %v11122_v1 }
 0x742   :  { %v11008_v25 = vmax.f32 %v10965_v12, 0.0 }
 0x743   :  { %11689 = vtanh.f32 %v11123_v37 }
 0x747   :  { %v10966_v45 = vpop.f32.mrf.mxu2 }
 0x748   :  { %v10967_v28 = vadd.f32 %v19381_v16, %v10966_v45  ;;  %v11124_v5 = vpop.f32.mrf.mxu3 }
 0x749   :  { %v11690_v24 = vpop.eup %11689  ;;  %v11125_v48 = vadd.f32 %v19418_v44, %v11124_v5 }
 0x74a   :  { %v11009_v49 = vmax.f32 %v10967_v28, 0.0  ;;  %11225 = vst [vmem:[#allocation2 + $0x30] sm:$0xff] %v11690_v24 }
 0x74b   :  { %11691 = vtanh.f32 %v11125_v48 }
 0x74c   :  { %v11028_v21 = vpack.c.bf16 %v11009_v49, %v11008_v25 }
 0x74e   :  { %11166 = vmatmul.bf16.gmra.mxu3 %v11028_v21 }
 0x74f   :  { %v10969_v36 = vpop.f32.mrf.mxu2 }
 0x750   :  { %v10970_v54 = vadd.f32 %v19381_v16, %v10969_v36 }
 0x751   :  { %v11127_v56 = vpop.f32.mrf.mxu3  ;;  %v11692_v13 = vpop.eup %11691 }
 0x752   :  { %v11128_v20 = vadd.f32 %v19418_v44, %v11127_v56  ;;  %11226 = vst [vmem:[#allocation2 + $0x38] sm:$0xff] %v11692_v13  ;;  %v11010_v19 = vmax.f32 %v10970_v54, 0.0 }
 0x754   :  { %11693 = vtanh.f32 %v11128_v20 }
 0x757   :  { %v10971_v58 = vpop.f32.mrf.mxu2 }
 0x758   :  { %v10972_v9 = vadd.f32 %v19381_v16, %v10971_v58 }
 0x759   :  { %v11129_v7 = vpop.f32.mrf.mxu3 }
 0x75a   :  { %v11694_v17 = vpop.eup %11693  ;;  %v11011_v30 = vmax.f32 %v10972_v9, 0.0  ;;  %v11130_v53 = vadd.f32 %v19418_v44, %v11129_v7 }
 0x75b   :  { %11227 = vst [vmem:[#allocation2 + $0x40] sm:$0xff] %v11694_v17 }
 0x75c   :  { %v11029_v59 = vpack.c.bf16 %v11011_v30, %v11010_v19  ;;  %11695 = vtanh.f32 %v11130_v53 }
 0x75e   :  { %11171 = vmatmul.bf16.gmra.mxu3 %v11029_v59 }
 0x75f   :  { %v10974_v46 = vpop.f32.mrf.mxu2 }
 0x760   :  { %v10975_v10 = vadd.f32 %v19381_v16, %v10974_v46 }
 0x761   :  { %v11132_v8 = vpop.f32.mrf.mxu3 }
 0x762   :  { %v11696_v47 = vpop.eup %11695  ;;  %v11133_v34 = vadd.f32 %v19418_v44, %v11132_v8  ;;  %v11012_v40 = vmax.f32 %v10975_v10, 0.0 }
 0x763   :  { %11228 = vst [vmem:[#allocation2 + $0x48] sm:$0xff] %v11696_v47 }
 0x764   :  { %11697 = vtanh.f32 %v11133_v34 }
 0x767   :  { %v10976_v57 = vpop.f32.mrf.mxu2 }
 0x768   :  { %v10977_v52 = vadd.f32 %v19381_v16, %v10976_v57 }
 0x769   :  { %v11134_v14 = vpop.f32.mrf.mxu3 }
 0x76a   :  { %v11698_v29 = vpop.eup %11697  ;;  %v11013_v55 = vmax.f32 %v10977_v52, 0.0  ;;  %v11135_v35 = vadd.f32 %v19418_v44, %v11134_v14 }
 0x76b   :  { %11229 = vst [vmem:[#allocation2 + $0x50] sm:$0xff] %v11698_v29 }
 0x76c   :  { %v11030_v43 = vpack.c.bf16 %v11013_v55, %v11012_v40  ;;  %11699 = vtanh.f32 %v11135_v35 }
 0x76e   :  { %11176 = vmatmul.bf16.gmra.mxu3 %v11030_v43 }
 0x76f   :  { %v10979_v26 = vpop.f32.mrf.mxu2 }
 0x770   :  { %v10980_v42 = vadd.f32 %v19381_v16, %v10979_v26 }
 0x771   :  { %v11137_v63 = vpop.f32.mrf.mxu3 }
 0x772   :  { %v11700_v31 = vpop.eup %11699  ;;  %v11138_v60 = vadd.f32 %v19418_v44, %v11137_v63  ;;  %v11014_v32 = vmax.f32 %v10980_v42, 0.0 }
 0x773   :  { %11230 = vst [vmem:[#allocation2 + $0x58] sm:$0xff] %v11700_v31 }
 0x774   :  { %11701 = vtanh.f32 %v11138_v60 }
 0x777   :  { %v10981_v2 = vpop.f32.mrf.mxu2 }
 0x778   :  { %v10982_v39 = vadd.f32 %v19381_v16, %v10981_v2 }
 0x779   :  { %v11139_v6 = vpop.f32.mrf.mxu3 }
 0x77a   :  { %v11702_v27 = vpop.eup %11701  ;;  %v11015_v38 = vmax.f32 %v10982_v39, 0.0  ;;  %v11140_v4 = vadd.f32 %v19418_v44, %v11139_v6 }
 0x77b   :  { %11231 = vst [vmem:[#allocation2 + $0x60] sm:$0xff] %v11702_v27 }
 0x77c   :  { %v11031_v61 = vpack.c.bf16 %v11015_v38, %v11014_v32  ;;  %11703 = vtanh.f32 %v11140_v4 }
 0x77e   :  { %11181 = vmatmul.bf16.gmra.mxu3 %v11031_v61 }
 0x781   :  { %v11142_v3 = vpop.f32.mrf.mxu3 }
 0x782   :  { %v11704_v0 = vpop.eup %11703  ;;  %v11143_v11 = vadd.f32 %v19418_v44, %v11142_v3 }
 0x783   :  { %11232 = vst [vmem:[#allocation2 + $0x68] sm:$0xff] %v11704_v0 }
 0x784   :  { %11705 = vtanh.f32 %v11143_v11 }
 0x789   :  { %v11144_v22 = vpop.f32.mrf.mxu3 }
 0x78a   :  { %v11706_v18 = vpop.eup %11705  ;;  %v11145_v16 = vadd.f32 %v19418_v44, %v11144_v22 }
 0x78b   :  { %11233 = vst [vmem:[#allocation2 + $0x70] sm:$0xff] %v11706_v18 }
 0x78c   :  { %11707 = vtanh.f32 %v11145_v16 }
 0x791   :  { %v11147_v50 = vpop.f32.mrf.mxu3 }
 0x792   :  { %v11708_v15 = vpop.eup %11707  ;;  %v11148_v51 = vadd.f32 %v19418_v44, %v11147_v50 }
 0x793   :  { %11234 = vst [vmem:[#allocation2 + $0x78] sm:$0xff] %v11708_v15 }
 0x794   :  { %11709 = vtanh.f32 %v11148_v51 }
 0x799   :  { %v11149_v23 = vpop.f32.mrf.mxu3 }
 0x79a   :  { %v11710_v33 = vpop.eup %11709  ;;  %v11150_v62 = vadd.f32 %v19418_v44, %v11149_v23 }
 0x79b   :  { %11235 = vst [vmem:[#allocation2 + $0x80] sm:$0xff] %v11710_v33 }
 0x79c   :  { %11711 = vtanh.f32 %v11150_v62 }
 0x7a1   :  { %v11152_v1 = vpop.f32.mrf.mxu3 }
 0x7a2   :  { %v11712_v41 = vpop.eup %11711  ;;  %v11153_v37 = vadd.f32 %v19418_v44, %v11152_v1 }
 0x7a3   :  { %11236 = vst [vmem:[#allocation2 + $0x88] sm:$0xff] %v11712_v41 }
 0x7a4   :  { %11713 = vtanh.f32 %v11153_v37 }
 0x7a9   :  { %v11154_v12 = vpop.f32.mrf.mxu3 }
 0x7aa   :  { %v11714_v45 = vpop.eup %11713  ;;  %v11155_v28 = vadd.f32 %v19418_v44, %v11154_v12 }
 0x7ab   :  { %11237 = vst [vmem:[#allocation2 + $0x90] sm:$0xff] %v11714_v45 }
 0x7ac   :  { %11715 = vtanh.f32 %v11155_v28 }
 0x7b1   :  { %v11157_v5 = vpop.f32.mrf.mxu3 }
 0x7b2   :  { %v11716_v24 = vpop.eup %11715  ;;  %v11158_v25 = vadd.f32 %v19418_v44, %v11157_v5 }
 0x7b3   :  { %11238 = vst [vmem:[#allocation2 + $0x98] sm:$0xff] %v11716_v24 }
 0x7b4   :  { %11717 = vtanh.f32 %v11158_v25 }
 0x7b9   :  { %v11159_v49 = vpop.f32.mrf.mxu3 }
 0x7ba   :  { %v11718_v48 = vpop.eup %11717  ;;  %v11160_v21 = vadd.f32 %v19418_v44, %v11159_v49 }
 0x7bb   :  { %11239 = vst [vmem:[#allocation2 + $0xa0] sm:$0xff] %v11718_v48 }
 0x7bc   :  { %11719 = vtanh.f32 %v11160_v21 }
 0x7c1   :  { %v11162_v36 = vpop.f32.mrf.mxu3 }
 0x7c2   :  { %v11720_v56 = vpop.eup %11719  ;;  %v11163_v13 = vadd.f32 %v19418_v44, %v11162_v36 }
 0x7c3   :  { %11240 = vst [vmem:[#allocation2 + $0xa8] sm:$0xff] %v11720_v56 }
 0x7c4   :  { %11721 = vtanh.f32 %v11163_v13 }
 0x7c9   :  { %v11164_v20 = vpop.f32.mrf.mxu3 }
 0x7ca   :  { %v11722_v54 = vpop.eup %11721  ;;  %v11165_v58 = vadd.f32 %v19418_v44, %v11164_v20 }
 0x7cb   :  { %11241 = vst [vmem:[#allocation2 + $0xb0] sm:$0xff] %v11722_v54 }
 0x7cc   :  { %11723 = vtanh.f32 %v11165_v58 }
 0x7d1   :  { %v11167_v9 = vpop.f32.mrf.mxu3 }
 0x7d2   :  { %v11724_v7 = vpop.eup %11723  ;;  %v11168_v17 = vadd.f32 %v19418_v44, %v11167_v9 }
 0x7d3   :  { %11242 = vst [vmem:[#allocation2 + $0xb8] sm:$0xff] %v11724_v7 }
 0x7d4   :  { %11725 = vtanh.f32 %v11168_v17 }
 0x7d9   :  { %v11169_v19 = vpop.f32.mrf.mxu3 }
 0x7da   :  { %v11726_v30 = vpop.eup %11725  ;;  %v11170_v53 = vadd.f32 %v19418_v44, %v11169_v19 }
 0x7db   :  { %11243 = vst [vmem:[#allocation2 + $0xc0] sm:$0xff] %v11726_v30 }
 0x7dc   :  { %11727 = vtanh.f32 %v11170_v53 }
 0x7e1   :  { %v11172_v59 = vpop.f32.mrf.mxu3 }
 0x7e2   :  { %v11728_v46 = vpop.eup %11727  ;;  %v11173_v8 = vadd.f32 %v19418_v44, %v11172_v59 }
 0x7e3   :  { %11244 = vst [vmem:[#allocation2 + $0xc8] sm:$0xff] %v11728_v46 }
 0x7e4   :  { %11729 = vtanh.f32 %v11173_v8 }
 0x7e9   :  { %v11174_v47 = vpop.f32.mrf.mxu3 }
 0x7ea   :  { %v11730_v34 = vpop.eup %11729  ;;  %v11175_v10 = vadd.f32 %v19418_v44, %v11174_v47 }
 0x7eb   :  { %11245 = vst [vmem:[#allocation2 + $0xd0] sm:$0xff] %v11730_v34 }
 0x7ec   :  { %11731 = vtanh.f32 %v11175_v10 }
 0x7f1   :  { %v11177_v57 = vpop.f32.mrf.mxu3 }
 0x7f2   :  { %v11732_v52 = vpop.eup %11731  ;;  %v11178_v14 = vadd.f32 %v19418_v44, %v11177_v57 }
 0x7f3   :  { %11246 = vst [vmem:[#allocation2 + $0xd8] sm:$0xff] %v11732_v52 }
 0x7f4   :  { %11733 = vtanh.f32 %v11178_v14 }
 0x7f9   :  { %v11179_v29 = vpop.f32.mrf.mxu3 }
 0x7fa   :  { %v11734_v40 = vpop.eup %11733  ;;  %v11180_v55 = vadd.f32 %v19418_v44, %v11179_v29 }
 0x7fb   :  { %11247 = vst [vmem:[#allocation2 + $0xe0] sm:$0xff] %v11734_v40 }
 0x7fc   :  { %11735 = vtanh.f32 %v11180_v55 }
 0x801   :  { %v11182_v35 = vpop.f32.mrf.mxu3 }
 0x802   :  { %v11736_v43 = vpop.eup %11735  ;;  %v11183_v26 = vadd.f32 %v19418_v44, %v11182_v35 }
 0x803   :  { %11248 = vst [vmem:[#allocation2 + $0xe8] sm:$0xff] %v11736_v43 }
 0x804   :  { %11737 = vtanh.f32 %v11183_v26 }
 0x809   :  { %v11184_v63 = vpop.f32.mrf.mxu3 }
 0x80a   :  { %v11738_v31 = vpop.eup %11737  ;;  %v11185_v60 = vadd.f32 %v19418_v44, %v11184_v63 }
 0x80b   :  { %11249 = vst [vmem:[#allocation2 + $0xf0] sm:$0xff] %v11738_v31 }
 0x80c   :  { %11739 = vtanh.f32 %v11185_v60 }
 0x812   :  { %v11740_v42 = vpop.eup %11739 }
 0x813   :  { %11250 = vst [vmem:[#allocation2 + $0xf8] sm:$0xff] %v11740_v42 }
 0x814   :  { %11263 = dma.vmem_to_hbm [thread:$0]  %s11256_s11, 4096, %s11258_s14, [#allocation3], %s11777_s15, %s11777_s15, %s11778_s16  }
 0x815   :  { %11766 = dma.done.wait [#allocation3], 4096  }
 0x816   :  { %11767 = vsyncadd [#allocation3], 4294963200 }
 0x817   :  { %11268 = vsyncpa [#allocation3], 1 }

</bundles_post_ra>
